<compile_context>
chip_gen: v5e
topology: v5e:2x2
jax: 0.10.0
libtpu: 0.0.40
codegen_flags: <defaults>
</compile_context>

<pallas_src>
import math
import functools

import jax
import jax.numpy as jnp
from jax import lax
from jax.experimental import pallas as pl
from jax.experimental.pallas import tpu as pltpu


_NEG_FILL = -1e20  # matches scores.masked_fill(mask == 0, -1e+20)


def _vmem_limit_bytes():
    """Generation-aware scoped-VMEM budget (75% of capacity, capped)."""
    cap = None
    try:
        cap = int(pltpu.get_tpu_info().vmem_capacity_bytes)
    except Exception:
        cap = None
    if not cap or cap <= 0:
        cap = 64 * 1024 * 1024  # conservative fallback (v7x per-TC physical)
    return max(32 * 1024 * 1024, min(cap * 3 // 4, 100 * 1024 * 1024))


def _tile_candidates(n, preferred):
    cands = [t for t in preferred if t <= n and n % t == 0]
    return cands if cands else [n]  # full extent is always legal


# ---------------------------------------------------------------------------
# Flash path (no p_attn): grid = (BH, Sq/tq, Sk/tk); Sk is the reduction axis.
# ---------------------------------------------------------------------------
def _flash_prologue(q_ref, q_sc, m_sc, l_sc, acc_sc, scale):
    @pl.when(pl.program_id(2) == 0)
    def _():
        # Hoist the 1/sqrt(d_k) scaling out of the ki loop (scratch, not wrapper).
        q_sc[...] = (q_ref[0] * scale).astype(q_sc.dtype)
        m_sc[...] = jnp.full_like(m_sc, -jnp.inf)
        l_sc[...] = jnp.zeros_like(l_sc)
        acc_sc[...] = jnp.zeros_like(acc_sc)


def _flash_scores(q_sc, k_ref):
    # Contract over D directly (no in-kernel K transpose), f32 accumulation.
    return lax.dot_general(q_sc[...], k_ref[0],
                           dimension_numbers=(((1,), (1,)), ((), ())),
                           preferred_element_type=jnp.float32)


def _flash_update(s, v, m_sc, l_sc, acc_sc, bf16_exp):
    m_prev = m_sc[...]
    m_new = jnp.maximum(m_prev, jnp.max(s, axis=-1, keepdims=True))
    alpha = jnp.exp(m_prev - m_new)
    x = s - m_new
    if bf16_exp:
        # bf16 EUP exp (v6e/v7x ~2x); m/l stats and the accumulator stay f32.
        p = jnp.exp(x.astype(jnp.bfloat16))
        p_sum = jnp.sum(p.astype(jnp.float32), axis=-1, keepdims=True)
    else:
        p = jnp.exp(x)
        p_sum = jnp.sum(p, axis=-1, keepdims=True)
    l_sc[...] = alpha * l_sc[...] + p_sum
    acc_sc[...] = alpha * acc_sc[...] + lax.dot_general(
        p.astype(v.dtype), v,
        dimension_numbers=(((1,), (0,)), ((), ())),
        preferred_element_type=jnp.float32)
    m_sc[...] = m_new


def _flash_kernel(q_ref, k_ref, v_ref, o_ref, q_sc, m_sc, l_sc, acc_sc,
                  *, scale, bf16_exp):
    _flash_prologue(q_ref, q_sc, m_sc, l_sc, acc_sc, scale)
    s = _flash_scores(q_sc, k_ref)
    _flash_update(s, v_ref[0], m_sc, l_sc, acc_sc, bf16_exp)

    @pl.when(pl.program_id(2) == pl.num_programs(2) - 1)
    def _():
        o_ref[0] = (acc_sc[...] * pl.reciprocal(l_sc[...], approx=True)
                    ).astype(o_ref.dtype)


def _flash_kernel_masked(cls_ref, mask_ref, q_ref, k_ref, v_ref, o_ref,
                         q_sc, m_sc, l_sc, acc_sc,
                         *, scale, H, Bm, Hm, nq_c, nk_c,
                         mask_q_tiled, mask_k_tiled, bf16_exp):
    i = pl.program_id(0)
    qi = pl.program_id(1)
    ki = pl.program_id(2)
    _flash_prologue(q_ref, q_sc, m_sc, l_sc, acc_sc, scale)

    # Scalar-prefetched tile classification: 0 = all-masked, 1 = partial, 2 = all-valid.
    mh = ((i // H) % Bm) * Hm + ((i % H) % Hm)
    qc = qi if mask_q_tiled else 0
    kc = ki if mask_k_tiled else 0
    cls = cls_ref[(mh * nq_c + qc) * nk_c + kc]

    @pl.when(cls == 2)  # all-valid: skip the mask select entirely
    def _():
        s = _flash_scores(q_sc, k_ref)
        _flash_update(s, v_ref[0], m_sc, l_sc, acc_sc, bf16_exp)

    @pl.when(cls == 1)  # partially masked: in-kernel broadcast of the natural-shape mask
    def _():
        s = _flash_scores(q_sc, k_ref)
        s = jnp.where(mask_ref[0] == 0, jnp.float32(_NEG_FILL), s)
        _flash_update(s, v_ref[0], m_sc, l_sc, acc_sc, bf16_exp)

    # cls == 0: QK^T / exp / PV all skipped.

    @pl.when(ki == pl.num_programs(2) - 1)
    def _():
        l = l_sc[...]
        # Rows whose every tile was fully masked never accumulated; emit 0 instead
        # of NaN (the un-tiled -1e20 reference would emit mean(V) for such rows).
        l = jnp.where(l > 0.0, l, 1.0)
        o_ref[0] = (acc_sc[...] * pl.reciprocal(l, approx=True)).astype(o_ref.dtype)


# ---------------------------------------------------------------------------
# p_attn-returning path (module semantics): grid = (BH, Sq/tq), full K/V per head.
# ---------------------------------------------------------------------------
def _attn_kernel(q_ref, k_ref, v_ref, o_ref, p_ref, *, scale):
    q = q_ref[0] * scale
    v = v_ref[0]
    s = lax.dot_general(q, k_ref[0],
                        dimension_numbers=(((1,), (1,)), ((), ())),
                        preferred_element_type=jnp.float32)        # (tq, Sk)
    m = jnp.max(s, axis=-1, keepdims=True)
    e = jnp.exp(s - m)
    # Exact divide: p_attn is an exported result; cost is amortized over the
    # O(tq*Sk) writeback, so the approx EUP reciprocal buys nothing here.
    p = e / jnp.sum(e, axis=-1, keepdims=True)
    o_ref[0] = lax.dot_general(p.astype(v.dtype), v,
                               dimension_numbers=(((1,), (0,)), ((), ())),
                               preferred_element_type=jnp.float32).astype(o_ref.dtype)
    p_ref[0] = p.astype(p_ref.dtype)


def _attn_kernel_masked(mask_ref, q_ref, k_ref, v_ref, o_ref, p_ref, *, scale):
    q = q_ref[0] * scale
    v = v_ref[0]
    s = lax.dot_general(q, k_ref[0],
                        dimension_numbers=(((1,), (1,)), ((), ())),
                        preferred_element_type=jnp.float32)
    s = jnp.where(mask_ref[0] == 0, jnp.float32(_NEG_FILL), s)
    m = jnp.max(s, axis=-1, keepdims=True)
    e = jnp.exp(s - m)
    p = e / jnp.sum(e, axis=-1, keepdims=True)
    o_ref[0] = lax.dot_general(p.astype(v.dtype), v,
                               dimension_numbers=(((1,), (0,)), ((), ())),
                               preferred_element_type=jnp.float32).astype(o_ref.dtype)
    p_ref[0] = p.astype(p_ref.dtype)


# ---------------------------------------------------------------------------
# Wrapper
# ---------------------------------------------------------------------------
@functools.partial(jax.jit,
                   static_argnames=("return_attn", "bf16_exp", "q_tile", "k_tile"))
def scaled_dot_product_attention(query, key, value, mask=None, *,
                                 return_attn=True, bf16_exp=False,
                                 q_tile=None, k_tile=None):
    """Pallas equivalent of ScaledDotProductAttention.forward.

    query: [B, H, Sq, D]; key/value: [B, H, Sk, D]
    mask (optional): broadcastable to [B, H, Sq, Sk]; entries == 0 are masked out.
    return_attn: True -> (output, p_attn) (module semantics);
                 False -> flash path, returns (output, None).
    bf16_exp:    compute the flash-path exp in bf16 (v6e/v7x EUP lever).
    q_tile/k_tile: optional static tile overrides (must divide Sq/Sk).
    """
    B, H, Sq, D = query.shape
    Sk = key.shape[2]
    BH = B * H
    scale = 1.0 / math.sqrt(D)
    in_bytes = query.dtype.itemsize

    q = query.reshape(BH, Sq, D)
    k = key.reshape(BH, Sk, D)
    v = value.reshape(BH, Sk, D)

    vmem_limit = _vmem_limit_bytes()
    budget = int(vmem_limit * 0.7)

    # ---- Mask preprocessing: keep the mask at its natural broadcast shape
    # (no O(S^2) host-side expansion; size-1 dims stay size-1).
    if mask is not None:
        m4 = jnp.asarray(mask)
        m4 = m4.reshape((1,) * (4 - m4.ndim) + m4.shape)   # promote to 4-D
        Bm, Hm, mSq, mSk = m4.shape
        assert Bm in (1, B) and Hm in (1, H), "mask not broadcastable over B/H"
        assert mSq in (1, Sq) and mSk in (1, Sk), "mask not broadcastable over S"
        Mh = Bm * Hm
        mask_i8 = (m4 != 0).astype(jnp.int8).reshape(Mh, mSq, mSk)

        def _mask_idx(i):  # flattened (b*H + h) -> mask head index
            return ((i // H) % Bm) * Hm + ((i % H) % Hm)

    if not return_attn:
        # ---------------- flash path ----------------
        tq_cands = [q_tile] if q_tile is not None else \
            _tile_candidates(Sq, (512, 256, 128, 64, 32, 16, 8))
        tk_cands = [k_tile] if k_tile is not None else \
            _tile_candidates(Sk, (2048, 1024, 512, 256, 128))
        if q_tile is not None:
            assert Sq % q_tile == 0
        if k_tile is not None:
            assert Sk % k_tile == 0

        def est(tq_, tk_):
            blocks = 2 * (2 * tq_ * D + 2 * tk_ * D) * in_bytes  # q,o,k,v double-buffered
            blocks += 2 * tq_ * tk_                               # int8 mask (worst case)
            scratch_b = tq_ * D * in_bytes + tq_ * D * 4 + 2 * tq_ * 4
            temps = 3 * tq_ * tk_ * 4                             # s / p f32 temporaries
            return blocks + scratch_b + temps

        ti, kj = 0, 0
        while est(tq_cands[ti], tk_cands[kj]) > budget:
            if kj + 1 < len(tk_cands):
                kj += 1
            elif ti + 1 < len(tq_cands):
                ti += 1
            else:
                break
        tq, tk = tq_cands[ti], tk_cands[kj]
        nq, nk = Sq // tq, Sk // tk
        grid = (BH, nq, nk)

        scratch = [pltpu.VMEM((tq, D), query.dtype),   # scaled q (resident across ki)
                   pltpu.VMEM((tq, 1), jnp.float32),   # m
                   pltpu.VMEM((tq, 1), jnp.float32),   # l
                   pltpu.VMEM((tq, D), jnp.float32)]   # acc
        cp = pltpu.CompilerParams(
            dimension_semantics=("parallel", "parallel", "arbitrary"),
            vmem_limit_bytes=vmem_limit)
        out_shape = jax.ShapeDtypeStruct((BH, Sq, D), query.dtype)

        if mask is None:
            q_spec = pl.BlockSpec((1, tq, D), lambda i, qi, ki: (i, qi, 0))
            k_spec = pl.BlockSpec((1, tk, D), lambda i, qi, ki: (i, ki, 0))
            v_spec = pl.BlockSpec((1, tk, D), lambda i, qi, ki: (i, ki, 0))
            o_spec = pl.BlockSpec((1, tq, D), lambda i, qi, ki: (i, qi, 0))
            out = pl.pallas_call(
                functools.partial(_flash_kernel, scale=scale, bf16_exp=bf16_exp),
                out_shape=out_shape,
                grid_spec=pltpu.PrefetchScalarGridSpec(
                    num_scalar_prefetch=0, grid=grid,
                    in_specs=[q_spec, k_spec, v_spec],
                    out_specs=o_spec, scratch_shapes=scratch),
                compiler_params=cp,
            )(q, k, v)
        else:
            mask_q_tiled = (mSq == Sq)
            mask_k_tiled = (mSk == Sk)
            bq = tq if mask_q_tiled else 1
            bk = tk if mask_k_tiled else 1
            nq_c = nq if mask_q_tiled else 1
            nk_c = nk if mask_k_tiled else 1

            # Per-tile classification (scalar-prefetched, SMEM, int32, flattened 1-D):
            #   0 = fully masked, 1 = partial, 2 = all valid.
            va = mask_i8 != 0                                    # (Mh, mSq, mSk)
            vn = va
            if mask_q_tiled:
                va = va.reshape(Mh, nq_c, tq, mSk).all(axis=2)
                vn = vn.reshape(Mh, nq_c, tq, mSk).any(axis=2)
            if mask_k_tiled:
                va = va.reshape(Mh, nq_c, nk_c, tk).all(axis=3)
                vn = vn.reshape(Mh, nq_c, nk_c, tk).any(axis=3)
            cls = jnp.where(va, 2, jnp.where(vn, 1, 0)).astype(jnp.int32).reshape(-1)

            def qo_map(i, qi, ki, cls_ref):
                return (i, qi, 0)

            def kv_map(i, qi, ki, cls_ref):
                return (i, ki, 0)

            def mk_map(i, qi, ki, cls_ref):
                return (_mask_idx(i),
                        qi if mask_q_tiled else 0,
                        ki if mask_k_tiled else 0)

            q_spec = pl.BlockSpec((1, tq, D), qo_map)
            k_spec = pl.BlockSpec((1, tk, D), kv_map)
            v_spec = pl.BlockSpec((1, tk, D), kv_map)
            o_spec = pl.BlockSpec((1, tq, D), qo_map)
            mask_spec = pl.BlockSpec((1, bq, bk), mk_map)

            out = pl.pallas_call(
                functools.partial(_flash_kernel_masked, scale=scale,
                                  H=H, Bm=Bm, Hm=Hm, nq_c=nq_c, nk_c=nk_c,
                                  mask_q_tiled=mask_q_tiled,
                                  mask_k_tiled=mask_k_tiled, bf16_exp=bf16_exp),
                out_shape=out_shape,
                grid_spec=pltpu.PrefetchScalarGridSpec(
                    num_scalar_prefetch=1, grid=grid,
                    in_specs=[mask_spec, q_spec, k_spec, v_spec],
                    out_specs=o_spec, scratch_shapes=scratch),
                compiler_params=cp,
            )(cls, mask_i8, q, k, v)
        return out.reshape(B, H, Sq, D), None

    # ---------------- p_attn path (module semantics) ----------------
    tq_cands = [q_tile] if q_tile is not None else \
        _tile_candidates(Sq, (512, 256, 128, 64, 32, 16, 8))
    if q_tile is not None:
        assert Sq % q_tile == 0

    def est_p(tq_):
        blocks = 2 * (2 * tq_ * D + 2 * Sk * D) * in_bytes + 2 * tq_ * Sk * in_bytes
        blocks += 2 * tq_ * Sk                    # int8 mask (worst case)
        temps = 3 * tq_ * Sk * 4
        return blocks + temps

    ti = 0
    while est_p(tq_cands[ti]) > budget and ti + 1 < len(tq_cands):
        ti += 1
    tq = tq_cands[ti]

    grid = (BH, Sq // tq)
    q_spec = pl.BlockSpec((1, tq, D), lambda i, qi: (i, qi, 0))
    kv_spec = pl.BlockSpec((1, Sk, D), lambda i, qi: (i, 0, 0))
    o_spec = pl.BlockSpec((1, tq, D), lambda i, qi: (i, qi, 0))
    p_spec = pl.BlockSpec((1, tq, Sk), lambda i, qi: (i, qi, 0))
    cp = pltpu.CompilerParams(
        dimension_semantics=("parallel", "parallel"),
        vmem_limit_bytes=vmem_limit)
    out_shapes = (jax.ShapeDtypeStruct((BH, Sq, D), query.dtype),
                  jax.ShapeDtypeStruct((BH, Sq, Sk), query.dtype))  # p_attn in input dtype

    if mask is None:
        out, p_attn = pl.pallas_call(
            functools.partial(_attn_kernel, scale=scale),
            out_shape=out_shapes,
            grid_spec=pltpu.PrefetchScalarGridSpec(
                num_scalar_prefetch=0, grid=grid,
                in_specs=[q_spec, kv_spec, kv_spec],
                out_specs=(o_spec, p_spec)),
            compiler_params=cp,
        )(q, k, v)
    else:
        bq = tq if mSq == Sq else 1
        bk = Sk if mSk == Sk else 1
        mask_spec = pl.BlockSpec(
            (1, bq, bk),
            lambda i, qi: (_mask_idx(i), qi if mSq == Sq else 0, 0))
        out, p_attn = pl.pallas_call(
            functools.partial(_attn_kernel_masked, scale=scale),
            out_shape=out_shapes,
            grid_spec=pltpu.PrefetchScalarGridSpec(
                num_scalar_prefetch=0, grid=grid,
                in_specs=[mask_spec, q_spec, kv_spec, kv_spec],
                out_specs=(o_spec, p_spec)),
            compiler_params=cp,
        )(mask_i8, q, k, v)

    return out.reshape(B, H, Sq, D), p_attn.reshape(B, H, Sq, Sk)


# ---------------------------------------------------------------------------
# Pure-JAX reference (mirrors the PyTorch module)
# ---------------------------------------------------------------------------
def _reference(query, key, value, mask=None):
    d_k = query.shape[-1]
    scores = jnp.einsum("bhqd,bhkd->bhqk", query, key) / math.sqrt(d_k)
    if mask is not None:
        scores = jnp.where(mask == 0, _NEG_FILL, scores)
    p = jax.nn.softmax(scores, axis=-1)
    return jnp.einsum("bhqk,bhkd->bhqd", p, value), p


if __name__ == "__main__":
    rng = jax.random.PRNGKey(0)
    kq, kk, kv, km = jax.random.split(rng, 4)

    # Lane-dense shapes: D = 128, Sk a multiple of 128.
    B, H, Sq, Sk, D = 2, 2, 256, 1024, 128
    query = jax.random.normal(kq, (B, H, Sq, D), dtype=jnp.float32)
    key = jax.random.normal(kk, (B, H, Sk, D), dtype=jnp.float32)
    value = jax.random.normal(kv, (B, H, Sk, D), dtype=jnp.float32)

    # 1) full module semantics: (p_attn @ v, p_attn), unmasked
    out, p_attn = scaled_dot_product_attention(query, key, value)
    jax.block_until_ready((out, p_attn))
    ref_out, ref_p = _reference(query, key, value)
    assert jnp.allclose(out, ref_out, atol=1e-4, rtol=1e-4)
    assert jnp.allclose(p_attn, ref_p, atol=1e-4, rtol=1e-4)

    # 2) module semantics with a broadcastable [1, 1, Sq, Sk] causal-style mask
    #    (shared across B and H via the index_map; never expanded host-side)
    causal = (jnp.arange(Sk)[None, :] <= (jnp.arange(Sq)[:, None] + (Sk - Sq)))
    causal = causal.astype(jnp.int32)[None, None]
    out_m, p_m = scaled_dot_product_attention(query, key, value, mask=causal)
    jax.block_until_ready((out_m, p_m))
    ref_out_m, ref_p_m = _reference(query, key, value, mask=causal)
    assert jnp.allclose(out_m, ref_out_m, atol=1e-4, rtol=1e-4)
    assert jnp.allclose(p_m, ref_p_m, atol=1e-4, rtol=1e-4)

    # 3) flash path (no p_attn writeback), unmasked
    out_f, _ = scaled_dot_product_attention(query, key, value, return_attn=False)
    jax.block_until_ready(out_f)
    assert jnp.allclose(out_f, ref_out, atol=1e-2, rtol=1e-2)

    # 4) flash path with a [B, 1, 1, Sk] padding mask kept at natural shape
    #    (no Sq broadcast), bf16 exp enabled (v6e/v7x EUP lever)
    pad = (jax.random.uniform(km, (B, 1, 1, Sk)) > 0.2).astype(jnp.int32)
    out_fm, _ = scaled_dot_product_attention(query, key, value, mask=pad,
                                             return_attn=False, bf16_exp=True)
    jax.block_until_ready(out_fm)
    ref_out_fm, _ = _reference(query, key, value, mask=pad)
    assert jnp.allclose(out_fm, ref_out_fm, atol=3e-2, rtol=3e-2)

    # 5) flash path with a square causal mask and small tiles -> exercises the
    #    all-masked / partial / all-valid tile classification and block skipping
    S2 = 512
    q2 = jax.random.normal(kq, (B, H, S2, D), dtype=jnp.float32)
    k2 = jax.random.normal(kk, (B, H, S2, D), dtype=jnp.float32)
    v2 = jax.random.normal(kv, (B, H, S2, D), dtype=jnp.float32)
    tri = (jnp.arange(S2)[None, :] <= jnp.arange(S2)[:, None]).astype(jnp.int32)
    tri = tri[None, None]
    out_c, _ = scaled_dot_product_attention(q2, k2, v2, mask=tri,
                                            return_attn=False,
                                            q_tile=128, k_tile=128)
    jax.block_until_ready(out_c)
    ref_out_c, _ = _reference(q2, k2, v2, mask=tri)
    assert jnp.allclose(out_c, ref_out_c, atol=1e-2, rtol=1e-2)

    print("KERNEL_OK")
</pallas_src>

<mosaic_0001>
module attributes {stable_mosaic.version = 11 : i64} {
  func.func @_attn_kernel(%arg0: i32, %arg1: i32, %arg2: memref<1x256x128xf32, #tpu.memory_space<vmem>>, %arg3: memref<1x1024x128xf32, #tpu.memory_space<vmem>>, %arg4: memref<1x1024x128xf32, #tpu.memory_space<vmem>>, %arg5: memref<1x256x128xf32, #tpu.memory_space<vmem>>, %arg6: memref<1x256x1024xf32, #tpu.memory_space<vmem>>) attributes {dimension_semantics = [#tpu.dimension_semantics<parallel>, #tpu.dimension_semantics<parallel>], iteration_bounds = array<i64: 4, 1>, scalar_prefetch = 0 : i64, scratch_operands = 0 : i64, tpu.core_type = #tpu.core_type<tc>, window_params = [{transform_indices = @transform_0, window_bounds = array<i64: 1, 256, 128>}, {transform_indices = @transform_1, window_bounds = array<i64: 1, 1024, 128>}, {transform_indices = @transform_2, window_bounds = array<i64: 1, 1024, 128>}, {transform_indices = @transform_3, window_bounds = array<i64: 1, 256, 128>}, {transform_indices = @transform_4, window_bounds = array<i64: 1, 256, 1024>}]} {
    %c0 = arith.constant 0 : index
    %c0_0 = arith.constant 0 : index
    %c0_1 = arith.constant 0 : index
    %0 = vector.load %arg2[%c0, %c0_0, %c0_1] : memref<1x256x128xf32, #tpu.memory_space<vmem>>, vector<1x256x128xf32>
    %1 = vector.shape_cast %0 : vector<1x256x128xf32> to vector<256x128xf32>
    %cst = arith.constant 0.0883883461 : f32
    %2 = vector.broadcast %cst : f32 to vector<256x128xf32>
    %3 = arith.mulf %1, %2 : vector<256x128xf32>
    %c0_2 = arith.constant 0 : index
    %c0_3 = arith.constant 0 : index
    %c0_4 = arith.constant 0 : index
    %4 = vector.load %arg4[%c0_2, %c0_3, %c0_4] : memref<1x1024x128xf32, #tpu.memory_space<vmem>>, vector<1x1024x128xf32>
    %5 = vector.shape_cast %4 : vector<1x1024x128xf32> to vector<1024x128xf32>
    %c0_5 = arith.constant 0 : index
    %c0_6 = arith.constant 0 : index
    %c0_7 = arith.constant 0 : index
    %6 = vector.load %arg3[%c0_5, %c0_6, %c0_7] : memref<1x1024x128xf32, #tpu.memory_space<vmem>>, vector<1x1024x128xf32>
    %7 = vector.shape_cast %6 : vector<1x1024x128xf32> to vector<1024x128xf32>
    %cst_8 = arith.constant dense<0.000000e+00> : vector<256x1024xf32>
    %8 = tpu.matmul %3, %7, %cst_8 {dimension_numbers = #tpu.dot_dimension_numbers<[1], [1], [0], [0], [0, 0, 1, 0], [], []>} : vector<256x128xf32>, vector<1024x128xf32>, vector<256x1024xf32> -> vector<256x1024xf32>
    %cst_9 = arith.constant dense<0xFF800000> : vector<256xf32>
    %9 = vector.multi_reduction <maximumf>, %8, %cst_9 [1] : vector<256x1024xf32> to vector<256xf32>
    %10 = vector.shape_cast %9 : vector<256xf32> to vector<256x1xf32>
    %11 = vector.broadcast %10 : vector<256x1xf32> to vector<256x1024xf32>
    %12 = arith.subf %8, %11 : vector<256x1024xf32>
    %13 = math.exp %12 : vector<256x1024xf32>
    %cst_10 = arith.constant dense<0.000000e+00> : vector<256xf32>
    %14 = vector.multi_reduction <add>, %13, %cst_10 [1] : vector<256x1024xf32> to vector<256xf32>
    %15 = vector.shape_cast %14 : vector<256xf32> to vector<256x1xf32>
    %16 = vector.broadcast %15 : vector<256x1xf32> to vector<256x1024xf32>
    %17 = arith.divf %13, %16 : vector<256x1024xf32>
    %cst_11 = arith.constant dense<0.000000e+00> : vector<256x128xf32>
    %18 = tpu.matmul %17, %5, %cst_11 {dimension_numbers = #tpu.dot_dimension_numbers<[1], [0], [0], [1], [0, 0, 1, 1], [], []>} : vector<256x1024xf32>, vector<1024x128xf32>, vector<256x128xf32> -> vector<256x128xf32>
    %c0_12 = arith.constant 0 : index
    %c0_13 = arith.constant 0 : index
    %c0_14 = arith.constant 0 : index
    %19 = vector.load %arg5[%c0_12, %c0_13, %c0_14] : memref<1x256x128xf32, #tpu.memory_space<vmem>>, vector<1x256x128xf32>
    %20 = vector.shape_cast %19 : vector<1x256x128xf32> to vector<256x128xf32>
    %21 = vector.shape_cast %18 : vector<256x128xf32> to vector<1x256x128xf32>
    tpu.vector_store %arg5[%c0_12, %c0_13, %c0_14], %21 {strides = array<i32>} : memref<1x256x128xf32, #tpu.memory_space<vmem>>, vector<1x256x128xf32>,
    %c0_15 = arith.constant 0 : index
    %c0_16 = arith.constant 0 : index
    %c0_17 = arith.constant 0 : index
    %22 = vector.load %arg6[%c0_15, %c0_16, %c0_17] : memref<1x256x1024xf32, #tpu.memory_space<vmem>>, vector<1x256x1024xf32>
    %23 = vector.shape_cast %22 : vector<1x256x1024xf32> to vector<256x1024xf32>
    %24 = vector.shape_cast %17 : vector<256x1024xf32> to vector<1x256x1024xf32>
    tpu.vector_store %arg6[%c0_15, %c0_16, %c0_17], %24 {strides = array<i32>} : memref<1x256x1024xf32, #tpu.memory_space<vmem>>, vector<1x256x1024xf32>,
    return
  }
  func.func @transform_0(%arg0: i32, %arg1: i32) -> (i32, i32, i32) {
    %c0_i32 = arith.constant 0 : i32
    %c0_i32_0 = arith.constant 0 : i32
    return %arg0, %arg1, %c0_i32 : i32, i32, i32
  }
  func.func @transform_1(%arg0: i32, %arg1: i32) -> (i32, i32, i32) {
    %c0_i32 = arith.constant 0 : i32
    %c0_i32_0 = arith.constant 0 : i32
    %c0_i32_1 = arith.constant 0 : i32
    return %arg0, %c0_i32, %c0_i32_0 : i32, i32, i32
  }
  func.func @transform_2(%arg0: i32, %arg1: i32) -> (i32, i32, i32) {
    %c0_i32 = arith.constant 0 : i32
    %c0_i32_0 = arith.constant 0 : i32
    %c0_i32_1 = arith.constant 0 : i32
    return %arg0, %c0_i32, %c0_i32_0 : i32, i32, i32
  }
  func.func @transform_3(%arg0: i32, %arg1: i32) -> (i32, i32, i32) {
    %c0_i32 = arith.constant 0 : i32
    %c0_i32_0 = arith.constant 0 : i32
    return %arg0, %arg1, %c0_i32 : i32, i32, i32
  }
  func.func @transform_4(%arg0: i32, %arg1: i32) -> (i32, i32, i32) {
    %c0_i32 = arith.constant 0 : i32
    %c0_i32_0 = arith.constant 0 : i32
    return %arg0, %arg1, %c0_i32 : i32, i32, i32
  }
}

</mosaic_0001>

<bundles_post_ra>
// kernel: scaled_dot_product_attention.1
= control target key start
LH: loop header
LB: loop body
LE: loop exit
PB: predicated region body
PF: predicated region fallthrough
CT: control target
= control target key end

     0   :  { %s10963_s0 = inlined_call_operand.hbm [shape: f32[4,256,128], index: 0, kind: input, shape index: {}]   ;;  %s10964_s1 = inlined_call_operand.hbm [shape: f32[4,1024,128], index: 1, kind: input, shape index: {}]   ;;  %s10965_s2 = inlined_call_operand.hbm [shape: f32[4,1024,128], index: 2, kind: input, shape index: {}]   ;;  %s10966_s3 = inlined_call_operand.hbm [shape: f32[4,256,128], index: 3, kind: output, shape index: {0}]   ;;  %s10967_s4 = inlined_call_operand.hbm [shape: f32[4,256,1024], index: 4, kind: output, shape index: {1}]  }
   0x1   :  { %11376 = sst [smem:[#allocation228_spill]] %s10964_s1 }
   0x2   :  { %10 = vsyncpa [#allocation3], 0 }
   0x3   :  { %12 = vsyncpa [#allocation3 + $0x1], 0 }
   0x4   :  { %13 = vsyncpa [#allocation6], 0 }
   0x5   :  { %15 = vsyncpa [#allocation6 + $0x1], 0 }
   0x6   :  { %16 = vsyncpa [#allocation4], 0 }
   0x7   :  { %18 = vsyncpa [#allocation4 + $0x1], 0 }
   0x8   :  { %19 = vsyncpa [#allocation10], 0 }
   0x9   :  { %21 = vsyncpa [#allocation10 + $0x1], 0  ;;  %s6022_s15 = smov 0   ;;  %s6024_s16 = smov 0  }
   0xa   :  { %s6026_s17 = smov 0   ;;  %s6028_s18 = smov 0  }
   0xb   :  { %s6030_s19 = smov 0   ;;  %s6032_s20 = smov 0  }
   0xc LB: > { %11377 = sst [smem:[#allocation15_spill]] %s5977_s17  ;;  %s6053_s21 = sadd.s32 4294967295, %s5989_s20   ;;  %s5989_s20 = sphi %s6032_s20, %s27_s20   ;;  %s5985_s19 = sphi %s6030_s19, %s12556_s19   ;;  %s5981_s18 = sphi %s6028_s18, %s12555_s18   ;;  %s5977_s17 = sphi %s6026_s17, %s12551_s17   ;;  %s5973_s16 = sphi %s6024_s16, %s12554_s16   ;;  %s5969_s15 = sphi %s6022_s15, %s12553_s15  }
   0xd   : > { %s5007_s22 = sadd.s32 4294967294, %s5989_s20   ;;  %s39_s23 = sadd.s32 1, %s5985_s19 }
   0xe   : > { %s48_s24 = sadd.s32 1, %s5977_s17  ;;  %p41_p0 = scmp.ge.s32.totalorder %s39_s23, 4 }
   0xf   : > { %p55_p1 = scmp.ne.s32.totalorder %s5977_s17, %s5973_s16  ;;  %p56_p2 = scmp.eq.s32.totalorder %s5989_s20, 0 }
  0x10   : > { %p61_p3 = scmp.ne.s32.totalorder %s5973_s16, %s5969_s15  ;;  %s12558_s23 = smov (%p41_p0, %s39_s23), 0 }
  0x11   : > { %11378 = sst [smem:[#allocation16_spill]] %s12558_s23  ;;  %p57_p4 = por %p56_p2, %p55_p1 }
  0x12   : > { %p62_p5 = scmp.eq.s32.totalorder %s6053_s21, 0  ;;  %s43_s25 = ssub.s32 %s5985_s19, %s12558_s23 }
  0x13   : > { %p139_p6 = scmp.eq.s32.totalorder %s6053_s21, 3  ;;  %p46_p7 = scmp.eq.s32.totalorder %s43_s25, 0 }
  0x14   : > { %p6069_p8 = por %p62_p5, %p61_p3  ;;  %p145_p10 = scmp.eq.s32.totalorder %s5007_s22, 3 }
  0x15   : > { %p6073_p9 = por %p139_p6, %p55_p1  ;;  %p5065_p12 = scmp.lt.s32.totalorder %s5989_s20, 4 }
  0x16   : > { %s6078_s28 = scalar_select %p46_p7, %s5977_s17, %s48_s24  }
  0x17   : > { %p6080_p11 = por %p145_p10, %p61_p3  ;;  %s6086_s30 = sand.u32 1, %s5977_s17  }
  0x18   : > { %11381 = sst [smem:[#allocation17_spill]] %s6078_s28  ;;  %p6088_p13 = pnand %p5065_p12, %p57_p4 }
  0x19   : > { %s11382_s29 = scalar_select %p6080_p11, 1, 0 }
  0x1a   : > { %s217_s6 = sand.u32 1, %s5989_s20   ;;  %s5013_s7 = sshll.u32 %s6086_s30, 10 }
  0x1b   : > { %11383 = sst [smem:[#allocation18_spill]] %s11382_s29  ;;  %s5034_s8 = sshll.u32 %s5985_s19, 10 }
  0x1c   : > { %s221_s9 = scalar_lea.vmem [#allocation5], %s5013_s7  ;;  %s11385_s1 = sld [smem:[#allocation228_spill]] }
  0x1d   : > { %s229_s10 = sshll.u32 %s221_s9, 4  ;;  %s248_s25 = scalar_lea.hbm %s10965_s2, %s5034_s8  ;;  %s230_s10 = int_to_ptr.vmem [resolvable:$true] %s229_s10 }
  0x1e   : > { %s218_s23 = scalar_lea.sflag [#allocation6], %s217_s6  ;;  %s5991_s28 = smov 128  }
  0x1f   : > { %s5992_s17 = smov 8   ;;  %s249_s9 = sshll.u32 %s248_s25, 4  ;;  %s250_s9 = int_to_ptr.hbm [resolvable:$true] %s249_s9 }
  0x20   : > { %s243_s29 = scalar_lea.vmem [#allocation7], %s5013_s7  ;;  %p5019_p0 = scmp.ge.s32.totalorder %s5989_s20, 1 }
  0x21   : > { %s251_s11 = sshll.u32 %s243_s29, 4  ;;  %p259_p1 = scmp.lt.s32.totalorder %s5989_s20, 5  ;;  %s252_s11 = int_to_ptr.vmem [resolvable:$true] %s251_s11 }
  0x22   : > { %s226_s13 = scalar_lea.hbm %s11385_s1, %s5034_s8  ;;  %s5010_s12 = sshll.u32 %s6086_s30, 8 }
  0x23   : > { %s227_s14 = sshll.u32 %s226_s13, 4  ;;  %p260_p2 = pnand %p5019_p0, %p259_p1  ;;  %s228_s14 = int_to_ptr.hbm [resolvable:$true] %s227_s14 }
  0x24   : > { %5054 = dma.hbm_to_vmem [thread:$0]  (!%p6088_p13), %s228_s14, 16384, %s230_s10, %s218_s23, %s5991_s28, %s5991_s28, %s5992_s17  }
  0x25   : > { %s5033_s13 = sshll.u32 %s5985_s19, 8  ;;  %s197_s1 = scalar_lea.vmem [#allocation2], %s5010_s12 }
  0x26   : > { %s204_s6 = scalar_lea.hbm %s10963_s0, %s5033_s13  ;;  %s207_s10 = sshll.u32 %s197_s1, 4  ;;  %s208_s10 = int_to_ptr.vmem [resolvable:$true] %s207_s10 }
  0x27   : > { %s205_s24 = sshll.u32 %s204_s6, 4  ;;  %s194_s7 = scalar_lea.sflag [#allocation3], %s6086_s30  ;;  %s206_s24 = int_to_ptr.hbm [resolvable:$true] %s205_s24 }
  0x28   : > { %5051 = dma.hbm_to_vmem [thread:$0]  (!%p6088_p13), %s206_s24, 4096, %s208_s10, %s194_s7, %s5991_s28, %s5991_s28, %s5992_s17  }
  0x29   : > { %5057 = dma.hbm_to_vmem [thread:$0]  (!%p6088_p13), %s250_s9, 16384, %s252_s11, %s218_s23, %s5991_s28, %s5991_s28, %s5992_s17  }
  0x2a   : > { %263 = sbr.rel (%p260_p2) target bundleno = 1689 (0x699), region = 32 }
  0x2f   : > { %s6116_s29 = sand.u32 1, %s5973_s16  }
  0x30   : > { %s5020_s14 = sshll.u32 %s6116_s29, 8  ;;  %s266_s25 = scalar_lea.sflag [#allocation3], %s6116_s29 }
  0x31   : > { %s6122_s12 = scalar_lea.vmem [#allocation2], %s5020_s14 }
  0x32   : > { %5952 = dma.done.wait (%p6069_p8), %s266_s25, 4096  }
  0x33   : > { %5954 = vsyncadd (%p6069_p8), %s266_s25, 4294963200  ;;  %s275_s1 = sand.u32 1, %s6053_s21   ;;  %s5021_s17 = sshll.u32 %s6116_s29, 10 }
  0x34   : > { %s276_s23 = scalar_lea.sflag [#allocation6], %s275_s1  ;;  %s6132_s28 = scalar_lea.vmem [#allocation5], %s5021_s17 }
  0x35   : > { %5956 = dma.done.wait (%p6069_p8), %s276_s23, 32768  }
  0x36   : > { %5958 = vsyncadd (%p6069_p8), %s276_s23, 4294934528  ;;  %v540_v0 = vld [vmem:[%s6132_s28 + $0x78] sm:$0xff]  ;;  %v539_v4 = vld [vmem:[%s6132_s28 + $0x70] sm:$0xff]  ;;  %s7527_s21 = scalar_lea.vmem [#allocation7], %s5021_s17  ;;  %s5024_s26 = sshll.u32 %s6116_s29, 11 }
  0x37   : > { %v572_v1 = vld [vmem:[%s6132_s28 + $0x178] sm:$0xff]  ;;  %653 = vmatpush.xpose.msra.mxu0 %v540_v0  ;;  %v571_v5 = vld [vmem:[%s6132_s28 + $0x170] sm:$0xff]  ;;  %v538_v8 = vld [vmem:[%s6132_s28 + $0x68] sm:$0xff]  ;;  %s7871_s30 = scalar_lea.vmem [#allocation9], %s5024_s26  ;;  %s10706_s5 = scalar_lea.vmem [#allocation8], %s5020_s14 }
  0x38   : > { %v556_v2 = vld [vmem:[%s6132_s28 + $0xf8] sm:$0xff]  ;;  %879 = vmatpush.xpose.msra.mxu2 %v572_v1  ;;  %v555_v6 = vld [vmem:[%s6132_s28 + $0xf0] sm:$0xff]  ;;  %v570_v9 = vld [vmem:[%s6132_s28 + $0x168] sm:$0xff]  ;;  %s5037_s9 = sshll.u32 %s5981_s18, 11  ;;  %s4837_s11 = sshll.u32 %s7871_s30, 4  ;;  %s4838_s11 = int_to_ptr.vmem [resolvable:$true] %s4837_s11 }
  0x39   : > { %v588_v3 = vld [vmem:[%s6132_s28 + $0x1f8] sm:$0xff]  ;;  %766 = vmatpush.xpose.msra.mxu1 %v556_v2  ;;  %v587_v7 = vld [vmem:[%s6132_s28 + $0x1f0] sm:$0xff]  ;;  %v554_v10 = vld [vmem:[%s6132_s28 + $0xe8] sm:$0xff]  ;;  %s4836_s8 = scalar_lea.hbm %s10967_s4, %s5037_s9  ;;  %s4803_s24 = scalar_lea.sflag [#allocation10], %s6116_s29 }
  0x3a   : > { %992 = vmatpush.xpose.msra.mxu3 %v588_v3  ;;  %v586_v11 = vld [vmem:[%s6132_s28 + $0x1e8] sm:$0xff]  ;;  %v537_v12 = vld [vmem:[%s6132_s28 + $0x60] sm:$0xff]  ;;  %v536_v16 = vld [vmem:[%s6132_s28 + $0x58] sm:$0xff]  ;;  %s4839_s6 = sshll.u32 %s4836_s8, 4  ;;  %s4840_s6 = int_to_ptr.hbm [resolvable:$true] %s4839_s6 }
  0x3b   : > { %654 = vmatpush.xpose.msra.mxu0 %v539_v4  ;;  %v569_v13 = vld [vmem:[%s6132_s28 + $0x160] sm:$0xff]  ;;  %v568_v17 = vld [vmem:[%s6132_s28 + $0x158] sm:$0xff]  ;;  %v535_v20 = vld [vmem:[%s6132_s28 + $0x50] sm:$0xff]  ;;  %s5885_s10 = sshra.s32 %s4840_s6, 4  ;;  %s5886_s10 = int_to_ptr.hbm [resolvable:$true] %s5885_s10 }
  0x3c   : > { %880 = vmatpush.xpose.msra.mxu2 %v571_v5  ;;  %v553_v14 = vld [vmem:[%s6132_s28 + $0xe0] sm:$0xff]  ;;  %v552_v18 = vld [vmem:[%s6132_s28 + $0xd8] sm:$0xff]  ;;  %v567_v21 = vld [vmem:[%s6132_s28 + $0x150] sm:$0xff]  ;;  %s5887_s7 = scalar_lea.hbm %s5886_s10, 2048  ;;  %p5892_p6 = scmp.lt.s32.totalorder %s5886_s10, %s10967_s4 }
  0x3d   : > { %767 = vmatpush.xpose.msra.mxu1 %v555_v6  ;;  %v585_v15 = vld [vmem:[%s6132_s28 + $0x1e0] sm:$0xff]  ;;  %v584_v19 = vld [vmem:[%s6132_s28 + $0x1d8] sm:$0xff]  ;;  %v551_v22 = vld [vmem:[%s6132_s28 + $0xd0] sm:$0xff]  ;;  %p5888_p3 = scmp.ne.s32.totalorder %s5886_s10, %s5887_s7 }
  0x3e   : > { %993 = vmatpush.xpose.msra.mxu3 %v587_v7  ;;  %v583_v23 = vld [vmem:[%s6132_s28 + $0x1d0] sm:$0xff]  ;;  %v534_v24 = vld [vmem:[%s6132_s28 + $0x48] sm:$0xff]  ;;  %v533_v28 = vld [vmem:[%s6132_s28 + $0x40] sm:$0xff] }
  0x3f   : > { %655 = vmatpush.xpose.msra.mxu0 %v538_v8  ;;  %v566_v25 = vld [vmem:[%s6132_s28 + $0x148] sm:$0xff]  ;;  %v565_v29 = vld [vmem:[%s6132_s28 + $0x140] sm:$0xff]  ;;  %v532_v32 = vld [vmem:[%s6132_s28 + $0x38] sm:$0xff]  ;;  %p5889_p4 = pnand %p5888_p3, %p6073_p9 }
  0x40   : > { %881 = vmatpush.xpose.msra.mxu2 %v570_v9  ;;  %v550_v26 = vld [vmem:[%s6132_s28 + $0xc8] sm:$0xff]  ;;  %v549_v30 = vld [vmem:[%s6132_s28 + $0xc0] sm:$0xff]  ;;  %v564_v33 = vld [vmem:[%s6132_s28 + $0x138] sm:$0xff] }
  0x41   : > { %768 = vmatpush.xpose.msra.mxu1 %v554_v10  ;;  %v582_v27 = vld [vmem:[%s6132_s28 + $0x1c8] sm:$0xff]  ;;  %v581_v31 = vld [vmem:[%s6132_s28 + $0x1c0] sm:$0xff]  ;;  %v548_v34 = vld [vmem:[%s6132_s28 + $0xb8] sm:$0xff]  ;;  %p5890_p5 = pneg %p5889_p4 }
  0x42   : > { %994 = vmatpush.xpose.msra.mxu3 %v586_v11  ;;  %v580_v35 = vld [vmem:[%s6132_s28 + $0x1b8] sm:$0xff]  ;;  %v531_v36 = vld [vmem:[%s6132_s28 + $0x30] sm:$0xff]  ;;  %v530_v40 = vld [vmem:[%s6132_s28 + $0x28] sm:$0xff] }
  0x43   : > { %656 = vmatpush.xpose.msra.mxu0 %v537_v12  ;;  %v563_v37 = vld [vmem:[%s6132_s28 + $0x130] sm:$0xff]  ;;  %v562_v41 = vld [vmem:[%s6132_s28 + $0x128] sm:$0xff]  ;;  %v529_v44 = vld [vmem:[%s6132_s28 + $0x20] sm:$0xff] }
  0x44   : > { %882 = vmatpush.xpose.msra.mxu2 %v569_v13  ;;  %v547_v38 = vld [vmem:[%s6132_s28 + $0xb0] sm:$0xff]  ;;  %v546_v42 = vld [vmem:[%s6132_s28 + $0xa8] sm:$0xff]  ;;  %v561_v45 = vld [vmem:[%s6132_s28 + $0x120] sm:$0xff] }
  0x45   : > { %769 = vmatpush.xpose.msra.mxu1 %v553_v14  ;;  %v579_v39 = vld [vmem:[%s6132_s28 + $0x1b0] sm:$0xff]  ;;  %v578_v43 = vld [vmem:[%s6132_s28 + $0x1a8] sm:$0xff]  ;;  %v545_v46 = vld [vmem:[%s6132_s28 + $0xa0] sm:$0xff] }
  0x46   : > { %995 = vmatpush.xpose.msra.mxu3 %v585_v15  ;;  %v577_v47 = vld [vmem:[%s6132_s28 + $0x1a0] sm:$0xff]  ;;  %v528_v48 = vld [vmem:[%s6132_s28 + $0x18] sm:$0xff]  ;;  %v527_v52 = vld [vmem:[%s6132_s28 + $0x10] sm:$0xff] }
  0x47   : > { %657 = vmatpush.xpose.msra.mxu0 %v536_v16  ;;  %v560_v49 = vld [vmem:[%s6132_s28 + $0x118] sm:$0xff]  ;;  %v559_v53 = vld [vmem:[%s6132_s28 + $0x110] sm:$0xff]  ;;  %v526_v56 = vld [vmem:[%s6132_s28 + $0x8] sm:$0xff] }
  0x48   : > { %883 = vmatpush.xpose.msra.mxu2 %v568_v17  ;;  %v544_v50 = vld [vmem:[%s6132_s28 + $0x98] sm:$0xff]  ;;  %v543_v54 = vld [vmem:[%s6132_s28 + $0x90] sm:$0xff]  ;;  %v558_v57 = vld [vmem:[%s6132_s28 + $0x108] sm:$0xff] }
  0x49   : > { %770 = vmatpush.xpose.msra.mxu1 %v552_v18  ;;  %v576_v51 = vld [vmem:[%s6132_s28 + $0x198] sm:$0xff]  ;;  %v575_v55 = vld [vmem:[%s6132_s28 + $0x190] sm:$0xff]  ;;  %v542_v58 = vld [vmem:[%s6132_s28 + $0x88] sm:$0xff] }
  0x4a   : > { %996 = vmatpush.xpose.msra.mxu3 %v584_v19  ;;  %v574_v59 = vld [vmem:[%s6132_s28 + $0x188] sm:$0xff]  ;;  %v333_v60 = vld [vmem:[%s6122_s12] sm:$0xff]  ;;  %v636_v2 = vld [vmem:[%s6132_s28 + $0x378] sm:$0xff] }
  0x4b   : > { %658 = vmatpush.xpose.msra.mxu0 %v535_v20  ;;  %v525_v61 = vld [vmem:[%s6132_s28] sm:$0xff]  ;;  %v6203_v1 = vmul.f32 0.088388346, %v333_v60  ;;  %v604_v3 = vld [vmem:[%s6132_s28 + $0x278] sm:$0xff]  ;;  %v635_v6 = vld [vmem:[%s6132_s28 + $0x370] sm:$0xff] }
  0x4c   : > { %884 = vmatpush.xpose.msra.mxu2 %v567_v21  ;;  %v557_v62 = vld [vmem:[%s6132_s28 + $0x100] sm:$0xff]  ;;  %v652_v4 = vld [vmem:[%s6132_s28 + $0x3f8] sm:$0xff]  ;;  %v603_v7 = vld [vmem:[%s6132_s28 + $0x270] sm:$0xff] }
  0x4d   : > { %771 = vmatpush.xpose.msra.mxu1 %v551_v22  ;;  %v541_v63 = vld [vmem:[%s6132_s28 + $0x80] sm:$0xff]  ;;  %v620_v5 = vld [vmem:[%s6132_s28 + $0x2f8] sm:$0xff]  ;;  %v334_v8 = vld [vmem:[%s6122_s12 + $0x8] sm:$0xff] }
  0x4e   : > { %997 = vmatpush.xpose.msra.mxu3 %v583_v23  ;;  %v573_v0 = vld [vmem:[%s6132_s28 + $0x180] sm:$0xff]  ;;  %v651_v9 = vld [vmem:[%s6132_s28 + $0x3f0] sm:$0xff]  ;;  %v6218_v11 = vmul.f32 0.088388346, %v334_v8  ;;  %v634_v12 = vld [vmem:[%s6132_s28 + $0x368] sm:$0xff] }
  0x4f   : > { %659 = vmatpush.xpose.msra.mxu0 %v534_v24  ;;  %v619_v10 = vld [vmem:[%s6132_s28 + $0x2f0] sm:$0xff]  ;;  %v602_v13 = vld [vmem:[%s6132_s28 + $0x268] sm:$0xff]  ;;  %v336_v18 = vld [vmem:[%s6122_s12 + $0x18] sm:$0xff] }
  0x50   : > { %885 = vmatpush.xpose.msra.mxu2 %v566_v25  ;;  %v650_v14 = vld [vmem:[%s6132_s28 + $0x3e8] sm:$0xff]  ;;  %v335_v16 = vld [vmem:[%s6122_s12 + $0x10] sm:$0xff]  ;;  %v633_v19 = vld [vmem:[%s6132_s28 + $0x360] sm:$0xff]  ;;  %v6240_v23 = vmul.f32 0.088388346, %v336_v18 }
  0x51   : > { %772 = vmatpush.xpose.msra.mxu1 %v550_v26  ;;  %v618_v15 = vld [vmem:[%s6132_s28 + $0x2e8] sm:$0xff]  ;;  %v6229_v17 = vmul.f32 0.088388346, %v335_v16  ;;  %v601_v20 = vld [vmem:[%s6132_s28 + $0x260] sm:$0xff]  ;;  %v596_v60 = vld [vmem:[%s6132_s28 + $0x238] sm:$0xff] }
  0x52   : > { %998 = vmatpush.xpose.msra.mxu3 %v582_v27  ;;  %v649_v21 = vld [vmem:[%s6132_s28 + $0x3e0] sm:$0xff]  ;;  %v338_v26 = vld [vmem:[%s6122_s12 + $0x28] sm:$0xff]  ;;  %v632_v27 = vld [vmem:[%s6132_s28 + $0x358] sm:$0xff] }
  0x53   : > { %660 = vmatpush.xpose.msra.mxu0 %v533_v28  ;;  %v617_v22 = vld [vmem:[%s6132_s28 + $0x2e0] sm:$0xff]  ;;  %v600_v28 = vld [vmem:[%s6132_s28 + $0x258] sm:$0xff]  ;;  %v611_v8 = vld [vmem:[%s6132_s28 + $0x2b0] sm:$0xff] }
  0x54   : > { %886 = vmatpush.xpose.msra.mxu2 %v565_v29  ;;  %v337_v24 = vld [vmem:[%s6122_s12 + $0x20] sm:$0xff]  ;;  %v648_v29 = vld [vmem:[%s6132_s28 + $0x3d8] sm:$0xff]  ;;  %v594_v16 = vld [vmem:[%s6132_s28 + $0x228] sm:$0xff] }
  0x55   : > { %773 = vmatpush.xpose.msra.mxu1 %v549_v30  ;;  %v6247_v25 = vmul.f32 0.088388346, %v337_v24  ;;  %v616_v30 = vld [vmem:[%s6132_s28 + $0x2d8] sm:$0xff]  ;;  %v642_v18 = vld [vmem:[%s6132_s28 + $0x3a8] sm:$0xff] }
  0x56   : > { %999 = vmatpush.xpose.msra.mxu3 %v581_v31  ;;  %v6258_v31 = vmul.f32 0.088388346, %v338_v26 }
  0x57   : > { %661 = vmatpush.xpose.msra.mxu0 %v532_v32  ;;  %v339_v32 = vld [vmem:[%s6122_s12 + $0x30] sm:$0xff] }
  0x58   : > { %887 = vmatpush.xpose.msra.mxu2 %v564_v33  ;;  %v6265_v33 = vmul.f32 0.088388346, %v339_v32 }
  0x59   : > { %774 = vmatpush.xpose.msra.mxu1 %v548_v34  ;;  %v340_v34 = vld [vmem:[%s6122_s12 + $0x38] sm:$0xff] }
  0x5a   : > { %1000 = vmatpush.xpose.msra.mxu3 %v580_v35  ;;  %v631_v35 = vld [vmem:[%s6132_s28 + $0x350] sm:$0xff] }
  0x5b   : > { %662 = vmatpush.xpose.msra.mxu0 %v531_v36  ;;  %v599_v36 = vld [vmem:[%s6132_s28 + $0x250] sm:$0xff] }
  0x5c   : > { %888 = vmatpush.xpose.msra.mxu2 %v563_v37  ;;  %v647_v37 = vld [vmem:[%s6132_s28 + $0x3d0] sm:$0xff] }
  0x5d   : > { %775 = vmatpush.xpose.msra.mxu1 %v547_v38  ;;  %v615_v38 = vld [vmem:[%s6132_s28 + $0x2d0] sm:$0xff] }
  0x5e   : > { %1001 = vmatpush.xpose.msra.mxu3 %v579_v39  ;;  %v6276_v39 = vmul.f32 0.088388346, %v340_v34 }
  0x5f   : > { %663 = vmatpush.xpose.msra.mxu0 %v530_v40  ;;  %v341_v40 = vld [vmem:[%s6122_s12 + $0x40] sm:$0xff] }
  0x60   : > { %889 = vmatpush.xpose.msra.mxu2 %v562_v41  ;;  %v6283_v41 = vmul.f32 0.088388346, %v341_v40 }
  0x61   : > { %776 = vmatpush.xpose.msra.mxu1 %v546_v42  ;;  %v342_v42 = vld [vmem:[%s6122_s12 + $0x48] sm:$0xff] }
  0x62   : > { %1002 = vmatpush.xpose.msra.mxu3 %v578_v43  ;;  %v630_v43 = vld [vmem:[%s6132_s28 + $0x348] sm:$0xff] }
  0x63   : > { %664 = vmatpush.xpose.msra.mxu0 %v529_v44  ;;  %v598_v44 = vld [vmem:[%s6132_s28 + $0x248] sm:$0xff] }
  0x64   : > { %890 = vmatpush.xpose.msra.mxu2 %v561_v45  ;;  %v646_v45 = vld [vmem:[%s6132_s28 + $0x3c8] sm:$0xff] }
  0x65   : > { %777 = vmatpush.xpose.msra.mxu1 %v545_v46  ;;  %v614_v46 = vld [vmem:[%s6132_s28 + $0x2c8] sm:$0xff] }
  0x66   : > { %1003 = vmatpush.xpose.msra.mxu3 %v577_v47  ;;  %v6294_v47 = vmul.f32 0.088388346, %v342_v42 }
  0x67   : > { %665 = vmatpush.xpose.msra.mxu0 %v528_v48  ;;  %v343_v48 = vld [vmem:[%s6122_s12 + $0x50] sm:$0xff] }
  0x68   : > { %891 = vmatpush.xpose.msra.mxu2 %v560_v49  ;;  %v6301_v49 = vmul.f32 0.088388346, %v343_v48  ;;  %v353_v48 = vld [vmem:[%s6122_s12 + $0xa0] sm:$0xff] }
  0x69   : > { %778 = vmatpush.xpose.msra.mxu1 %v544_v50  ;;  %v344_v50 = vld [vmem:[%s6122_s12 + $0x58] sm:$0xff] }
  0x6a   : > { %1004 = vmatpush.xpose.msra.mxu3 %v576_v51  ;;  %v629_v51 = vld [vmem:[%s6132_s28 + $0x340] sm:$0xff] }
  0x6b   : > { %666 = vmatpush.xpose.msra.mxu0 %v527_v52  ;;  %v597_v52 = vld [vmem:[%s6132_s28 + $0x240] sm:$0xff] }
  0x6c   : > { %892 = vmatpush.xpose.msra.mxu2 %v559_v53  ;;  %v645_v53 = vld [vmem:[%s6132_s28 + $0x3c0] sm:$0xff] }
  0x6d   : > { %779 = vmatpush.xpose.msra.mxu1 %v543_v54  ;;  %v613_v54 = vld [vmem:[%s6132_s28 + $0x2c0] sm:$0xff] }
  0x6e   : > { %1005 = vmatpush.xpose.msra.mxu3 %v575_v55  ;;  %v6312_v55 = vmul.f32 0.088388346, %v344_v50 }
  0x6f   : > { %667 = vmatpush.xpose.msra.mxu0 %v526_v56  ;;  %v345_v56 = vld [vmem:[%s6122_s12 + $0x60] sm:$0xff] }
  0x70   : > { %893 = vmatpush.xpose.msra.mxu2 %v558_v57  ;;  %v6319_v57 = vmul.f32 0.088388346, %v345_v56  ;;  %v624_v56 = vld [vmem:[%s6132_s28 + $0x318] sm:$0xff] }
  0x71   : > { %780 = vmatpush.xpose.msra.mxu1 %v542_v58  ;;  %v628_v58 = vld [vmem:[%s6132_s28 + $0x338] sm:$0xff] }
  0x72   : > { %1006 = vmatpush.xpose.msra.mxu3 %v574_v59  ;;  %v346_v59 = vld [vmem:[%s6122_s12 + $0x68] sm:$0xff] }
  0x73   : > { %668 = vmatpush.xpose.msra.mxu0 %v525_v61  ;;  %v644_v61 = vld [vmem:[%s6132_s28 + $0x3b8] sm:$0xff] }
  0x74   : > { %894 = vmatpush.xpose.msra.mxu2 %v557_v62  ;;  %v6329_v62 = vmul.f32 0.088388346, %v346_v59  ;;  %v592_v59 = vld [vmem:[%s6132_s28 + $0x218] sm:$0xff] }
  0x75   : > { %781 = vmatpush.xpose.msra.mxu1 %v541_v63  ;;  %v612_v63 = vld [vmem:[%s6132_s28 + $0x2b8] sm:$0xff] }
  0x76   : > { %1007 = vmatpush.xpose.msra.mxu3 %v573_v0  ;;  %669 = vmatmul.f32.vlgmr.msra.gmra.mxu0 %v6203_v1  ;;  %v347_v0 = vld [vmem:[%s6122_s12 + $0x70] sm:$0xff] }
  0x77   : > { %1105 = vmatpush.xpose.msrb.mxu0 %v604_v3  ;;  %895 = vmatmul.f32.vlgmr.msra.gmra.mxu2 %v6203_v1  ;;  %v627_v3 = vld [vmem:[%s6132_s28 + $0x330] sm:$0xff] }
  0x78   : > { %1331 = vmatpush.xpose.msrb.mxu2 %v636_v2  ;;  %782 = vmatmul.f32.vlgmr.msra.gmra.mxu1 %v6203_v1  ;;  %v6337_v2 = vmul.f32 0.088388346, %v347_v0 }
  0x79   : > { %1008 = vmatmul.f32.vlgmr.msra.gmra.mxu3 %v6203_v1  ;;  %1218 = vmatpush.xpose.msrb.mxu1 %v620_v5  ;;  %v595_v5 = vld [vmem:[%s6132_s28 + $0x230] sm:$0xff] }
  0x7a   : > { %1444 = vmatpush.xpose.msrb.mxu3 %v652_v4  ;;  %v348_v4 = vld [vmem:[%s6122_s12 + $0x78] sm:$0xff] }
  0x7b   : > { %1106 = vmatpush.xpose.msrb.mxu0 %v603_v7  ;;  %v6347_v7 = vmul.f32 0.088388346, %v348_v4 }
  0x7c   : > { %1332 = vmatpush.xpose.msrb.mxu2 %v635_v6  ;;  %v643_v6 = vld [vmem:[%s6132_s28 + $0x3b0] sm:$0xff] }
  0x7d   : > { %1219 = vmatpush.xpose.msrb.mxu1 %v619_v10 }
  0x7e   : > { %1445 = vmatpush.xpose.msrb.mxu3 %v651_v9  ;;  %672 = vmatmul.f32.gmra.mxu0 %v6218_v11  ;;  %v349_v9 = vld [vmem:[%s6122_s12 + $0x80] sm:$0xff] }
  0x7f   : > { %1107 = vmatpush.xpose.msrb.mxu0 %v602_v13  ;;  %898 = vmatmul.f32.gmra.mxu2 %v6218_v11  ;;  %v6355_v10 = vmul.f32 0.088388346, %v349_v9 }
  0x80   : > { %1333 = vmatpush.xpose.msrb.mxu2 %v634_v12  ;;  %785 = vmatmul.f32.gmra.mxu1 %v6218_v11 }
  0x81   : > { %1011 = vmatmul.f32.gmra.mxu3 %v6218_v11  ;;  %1220 = vmatpush.xpose.msrb.mxu1 %v618_v15  ;;  %v350_v15 = vld [vmem:[%s6122_s12 + $0x88] sm:$0xff] }
  0x82   : > { %1446 = vmatpush.xpose.msrb.mxu3 %v650_v14  ;;  %v626_v14 = vld [vmem:[%s6132_s28 + $0x328] sm:$0xff] }
  0x83   : > { %1108 = vmatpush.xpose.msrb.mxu0 %v601_v20 }
  0x84   : > { %1334 = vmatpush.xpose.msrb.mxu2 %v633_v19 }
  0x85   : > { %1221 = vmatpush.xpose.msrb.mxu1 %v617_v22  ;;  %v610_v22 = vld [vmem:[%s6132_s28 + $0x2a8] sm:$0xff] }
  0x86   : > { %675 = vmatmul.f32.gmra.mxu0 %v6229_v17  ;;  %1447 = vmatpush.xpose.msrb.mxu3 %v649_v21  ;;  %v6373_v21 = vmul.f32 0.088388346, %v350_v15 }
  0x87   : > { %901 = vmatmul.f32.gmra.mxu2 %v6229_v17  ;;  %1109 = vmatpush.xpose.msrb.mxu0 %v600_v28 }
  0x88   : > { %788 = vmatmul.f32.gmra.mxu1 %v6229_v17  ;;  %1335 = vmatpush.xpose.msrb.mxu2 %v632_v27  ;;  %v351_v27 = vld [vmem:[%s6122_s12 + $0x90] sm:$0xff] }
  0x89   : > { %1014 = vmatmul.f32.gmra.mxu3 %v6229_v17  ;;  %1222 = vmatpush.xpose.msrb.mxu1 %v616_v30  ;;  %v6389_v30 = vmul.f32 0.088388346, %v351_v27  ;;  %v591_v27 = vld [vmem:[%s6132_s28 + $0x210] sm:$0xff] }
  0x8a   : > { %1448 = vmatpush.xpose.msrb.mxu3 %v648_v29 }
  0x8b   : > { %1110 = vmatpush.xpose.msrb.mxu0 %v599_v36  ;;  %v352_v36 = vld [vmem:[%s6122_s12 + $0x98] sm:$0xff] }
  0x8c   : > { %1336 = vmatpush.xpose.msrb.mxu2 %v631_v35  ;;  %v625_v35 = vld [vmem:[%s6132_s28 + $0x320] sm:$0xff] }
  0x8d   : > { %1223 = vmatpush.xpose.msrb.mxu1 %v615_v38  ;;  %v641_v38 = vld [vmem:[%s6132_s28 + $0x3a0] sm:$0xff] }
  0x8e   : > { %678 = vmatmul.f32.gmra.mxu0 %v6240_v23  ;;  %1449 = vmatpush.xpose.msrb.mxu3 %v647_v37  ;;  %v593_v37 = vld [vmem:[%s6132_s28 + $0x220] sm:$0xff] }
  0x8f   : > { %904 = vmatmul.f32.gmra.mxu2 %v6240_v23  ;;  %1111 = vmatpush.xpose.msrb.mxu0 %v598_v44  ;;  %v609_v44 = vld [vmem:[%s6132_s28 + $0x2a0] sm:$0xff] }
  0x90   : > { %791 = vmatmul.f32.gmra.mxu1 %v6240_v23  ;;  %1337 = vmatpush.xpose.msrb.mxu2 %v630_v43  ;;  %v6407_v43 = vmul.f32 0.088388346, %v352_v36 }
  0x91   : > { %1017 = vmatmul.f32.gmra.mxu3 %v6240_v23  ;;  %1224 = vmatpush.xpose.msrb.mxu1 %v614_v46 }
  0x92   : > { %1450 = vmatpush.xpose.msrb.mxu3 %v646_v45 }
  0x93   : > { %1112 = vmatpush.xpose.msrb.mxu0 %v597_v52  ;;  %v6423_v52 = vmul.f32 0.088388346, %v353_v48 }
  0x94   : > { %1338 = vmatpush.xpose.msrb.mxu2 %v629_v51 }
  0x95   : > { %1225 = vmatpush.xpose.msrb.mxu1 %v613_v54 }
  0x96   : > { %681 = vmatmul.f32.gmra.mxu0 %v6247_v25  ;;  %1451 = vmatpush.xpose.msrb.mxu3 %v645_v53 }
  0x97   : > { %907 = vmatmul.f32.gmra.mxu2 %v6247_v25  ;;  %1113 = vmatpush.xpose.msrb.mxu0 %v596_v60  ;;  %v640_v60 = vld [vmem:[%s6132_s28 + $0x398] sm:$0xff] }
  0x98   : > { %794 = vmatmul.f32.gmra.mxu1 %v6247_v25  ;;  %1339 = vmatpush.xpose.msrb.mxu2 %v628_v58  ;;  %v354_v58 = vld [vmem:[%s6122_s12 + $0xa8] sm:$0xff] }
  0x99   : > { %1020 = vmatmul.f32.gmra.mxu3 %v6247_v25  ;;  %1226 = vmatpush.xpose.msrb.mxu1 %v612_v63  ;;  %v6441_v0 = vmul.f32 0.088388346, %v354_v58  ;;  %v357_v58 = vld [vmem:[%s6122_s12 + $0xc0] sm:$0xff] }
  0x9a   : > { %1452 = vmatpush.xpose.msrb.mxu3 %v644_v61 }
  0x9b   : > { %1114 = vmatpush.xpose.msrb.mxu0 %v595_v5 }
  0x9c   : > { %1340 = vmatpush.xpose.msrb.mxu2 %v627_v3  ;;  %v608_v3 = vld [vmem:[%s6132_s28 + $0x298] sm:$0xff] }
  0x9d   : > { %1227 = vmatpush.xpose.msrb.mxu1 %v611_v8 }
  0x9e   : > { %684 = vmatmul.f32.gmra.mxu0 %v6258_v31  ;;  %1453 = vmatpush.xpose.msrb.mxu3 %v643_v6  ;;  %v355_v6 = vld [vmem:[%s6122_s12 + $0xb0] sm:$0xff] }
  0x9f   : > { %910 = vmatmul.f32.gmra.mxu2 %v6258_v31  ;;  %1115 = vmatpush.xpose.msrb.mxu0 %v594_v16 }
  0xa0   : > { %797 = vmatmul.f32.gmra.mxu1 %v6258_v31  ;;  %1341 = vmatpush.xpose.msrb.mxu2 %v626_v14  ;;  %v6457_v14 = vmul.f32 0.088388346, %v355_v6 }
  0xa1   : > { %1023 = vmatmul.f32.gmra.mxu3 %v6258_v31  ;;  %1228 = vmatpush.xpose.msrb.mxu1 %v610_v22  ;;  %v356_v22 = vld [vmem:[%s6122_s12 + $0xb8] sm:$0xff] }
  0xa2   : > { %1454 = vmatpush.xpose.msrb.mxu3 %v642_v18  ;;  %11390 = vst [vmem:[#allocation23_spill] sm:$0xff] %v6457_v14  ;;  %v623_v18 = vld [vmem:[%s6132_s28 + $0x310] sm:$0xff] }
  0xa3   : > { %1116 = vmatpush.xpose.msrb.mxu0 %v593_v37 }
  0xa4   : > { %1342 = vmatpush.xpose.msrb.mxu2 %v625_v35  ;;  %v639_v35 = vld [vmem:[%s6132_s28 + $0x390] sm:$0xff] }
  0xa5   : > { %1229 = vmatpush.xpose.msrb.mxu1 %v609_v44  ;;  %v607_v44 = vld [vmem:[%s6132_s28 + $0x290] sm:$0xff] }
  0xa6   : > { %687 = vmatmul.f32.gmra.mxu0 %v6265_v33  ;;  %1455 = vmatpush.xpose.msrb.mxu3 %v641_v38  ;;  %v6475_v38 = vmul.f32 0.088388346, %v356_v22  ;;  %v622_v22 = vld [vmem:[%s6132_s28 + $0x308] sm:$0xff] }
  0xa7   : > { %913 = vmatmul.f32.gmra.mxu2 %v6265_v33  ;;  %1117 = vmatpush.xpose.msrb.mxu0 %v592_v59 }
  0xa8   : > { %800 = vmatmul.f32.gmra.mxu1 %v6265_v33  ;;  %1343 = vmatpush.xpose.msrb.mxu2 %v624_v56  ;;  %11395 = vst [vmem:[#allocation28_spill] sm:$0xff] %v6475_v38 }
  0xa9   : > { %1026 = vmatmul.f32.gmra.mxu3 %v6265_v33  ;;  %1230 = vmatpush.xpose.msrb.mxu1 %v608_v3  ;;  %v6491_v3 = vmul.f32 0.088388346, %v357_v58 }
  0xaa   : > { %1456 = vmatpush.xpose.msrb.mxu3 %v640_v60 }
  0xab   : > { %1118 = vmatpush.xpose.msrb.mxu0 %v591_v27  ;;  %11400 = vst [vmem:[#allocation33_spill] sm:$0xff] %v6491_v3  ;;  %v358_v27 = vld [vmem:[%s6122_s12 + $0xc8] sm:$0xff] }
  0xac   : > { %1344 = vmatpush.xpose.msrb.mxu2 %v623_v18 }
  0xad   : > { %1231 = vmatpush.xpose.msrb.mxu1 %v607_v44  ;;  %v638_v44 = vld [vmem:[%s6132_s28 + $0x388] sm:$0xff] }
  0xae   : > { %690 = vmatmul.f32.gmra.mxu0 %v6276_v39  ;;  %1457 = vmatpush.xpose.msrb.mxu3 %v639_v35  ;;  %v590_v35 = vld [vmem:[%s6132_s28 + $0x208] sm:$0xff] }
  0xaf   : > { %916 = vmatmul.f32.gmra.mxu2 %v6276_v39  ;;  %1119 = vmatpush.xpose.msrb.mxu0 %v590_v35 }
  0xb0   : > { %803 = vmatmul.f32.gmra.mxu1 %v6276_v39  ;;  %1345 = vmatpush.xpose.msrb.mxu2 %v622_v22  ;;  %v359_v22 = vld [vmem:[%s6122_s12 + $0xd0] sm:$0xff] }
  0xb1   : > { %1029 = vmatmul.f32.gmra.mxu3 %v6276_v39 }
  0xb2   : > { %1458 = vmatpush.xpose.msrb.mxu3 %v638_v44  ;;  %v6525_v44 = vmul.f32 0.088388346, %v359_v22 }
  0xb6   : > { %693 = vmatmul.f32.gmra.mxu0 %v6283_v41 }
  0xb7   : > { %919 = vmatmul.f32.gmra.mxu2 %v6283_v41 }
  0xb8   : > { %806 = vmatmul.f32.gmra.mxu1 %v6283_v41 }
  0xb9   : > { %1032 = vmatmul.f32.gmra.mxu3 %v6283_v41 }
  0xbe   : > { %696 = vmatmul.f32.gmra.mxu0 %v6294_v47 }
  0xbf   : > { %922 = vmatmul.f32.gmra.mxu2 %v6294_v47 }
  0xc0   : > { %809 = vmatmul.f32.gmra.mxu1 %v6294_v47 }
  0xc1   : > { %1035 = vmatmul.f32.gmra.mxu3 %v6294_v47 }
  0xc6   : > { %699 = vmatmul.f32.gmra.mxu0 %v6301_v49 }
  0xc7   : > { %925 = vmatmul.f32.gmra.mxu2 %v6301_v49 }
  0xc8   : > { %812 = vmatmul.f32.gmra.mxu1 %v6301_v49 }
  0xc9   : > { %1038 = vmatmul.f32.gmra.mxu3 %v6301_v49 }
  0xce   : > { %702 = vmatmul.f32.gmra.mxu0 %v6312_v55 }
  0xcf   : > { %928 = vmatmul.f32.gmra.mxu2 %v6312_v55 }
  0xd0   : > { %815 = vmatmul.f32.gmra.mxu1 %v6312_v55 }
  0xd1   : > { %1041 = vmatmul.f32.gmra.mxu3 %v6312_v55 }
  0xd6   : > { %705 = vmatmul.f32.gmra.mxu0 %v6319_v57 }
  0xd7   : > { %931 = vmatmul.f32.gmra.mxu2 %v6319_v57 }
  0xd8   : > { %818 = vmatmul.f32.gmra.mxu1 %v6319_v57 }
  0xd9   : > { %1044 = vmatmul.f32.gmra.mxu3 %v6319_v57 }
  0xde   : > { %708 = vmatmul.f32.gmra.mxu0 %v6329_v62 }
  0xdf   : > { %934 = vmatmul.f32.gmra.mxu2 %v6329_v62 }
  0xe0   : > { %821 = vmatmul.f32.gmra.mxu1 %v6329_v62 }
  0xe1   : > { %1047 = vmatmul.f32.gmra.mxu3 %v6329_v62 }
  0xe6   : > { %711 = vmatmul.f32.gmra.mxu0 %v6337_v2 }
  0xe7   : > { %937 = vmatmul.f32.gmra.mxu2 %v6337_v2 }
  0xe8   : > { %824 = vmatmul.f32.gmra.mxu1 %v6337_v2 }
  0xe9   : > { %1050 = vmatmul.f32.gmra.mxu3 %v6337_v2 }
  0xee   : > { %714 = vmatmul.f32.gmra.mxu0 %v6347_v7 }
  0xef   : > { %940 = vmatmul.f32.gmra.mxu2 %v6347_v7 }
  0xf0   : > { %827 = vmatmul.f32.gmra.mxu1 %v6347_v7 }
  0xf1   : > { %1053 = vmatmul.f32.gmra.mxu3 %v6347_v7 }
  0xf3   : > { %v6357_v12 = vpop.f32.mrf.mxu0 }
  0xf5   : > { %v6359_v13 = vpop.f32.mrf.mxu1 }
  0xf6   : > { %717 = vmatmul.f32.gmra.mxu0 %v6355_v10 }
  0xf7   : > { %943 = vmatmul.f32.gmra.mxu2 %v6355_v10 }
  0xf8   : > { %830 = vmatmul.f32.gmra.mxu1 %v6355_v10 }
  0xf9   : > { %1056 = vmatmul.f32.gmra.mxu3 %v6355_v10 }
  0xfa   : > { %v6369_v19 = vpop.f32.mrf.mxu2 }
  0xfb   : > { %v6376_v24 = vpop.f32.mrf.mxu0 }
  0xfc   : > { %v6371_v20 = vpop.f32.mrf.mxu3 }
  0xfd   : > { %v6378_v26 = vpop.f32.mrf.mxu1 }
  0xfe   : > { %720 = vmatmul.f32.gmra.mxu0 %v6373_v21 }
  0xff   : > { %946 = vmatmul.f32.gmra.mxu2 %v6373_v21 }
 0x100   : > { %833 = vmatmul.f32.gmra.mxu1 %v6373_v21 }
 0x101   : > { %1059 = vmatmul.f32.gmra.mxu3 %v6373_v21 }
 0x102   : > { %v6385_v28 = vpop.f32.mrf.mxu2 }
 0x103   : > { %v6391_v32 = vpop.f32.mrf.mxu0 }
 0x104   : > { %v6387_v29 = vpop.f32.mrf.mxu3 }
 0x105   : > { %v6393_v34 = vpop.f32.mrf.mxu1 }
 0x106   : > { %723 = vmatmul.f32.gmra.mxu0 %v6389_v30 }
 0x107   : > { %949 = vmatmul.f32.gmra.mxu2 %v6389_v30 }
 0x108   : > { %836 = vmatmul.f32.gmra.mxu1 %v6389_v30 }
 0x109   : > { %1062 = vmatmul.f32.gmra.mxu3 %v6389_v30 }
 0x10a   : > { %v6403_v40 = vpop.f32.mrf.mxu2 }
 0x10b   : > { %v6410_v45 = vpop.f32.mrf.mxu0 }
 0x10c   : > { %v6405_v42 = vpop.f32.mrf.mxu3 }
 0x10d   : > { %v6412_v46 = vpop.f32.mrf.mxu1 }
 0x10e   : > { %726 = vmatmul.f32.gmra.mxu0 %v6407_v43 }
 0x10f   : > { %952 = vmatmul.f32.gmra.mxu2 %v6407_v43 }
 0x110   : > { %839 = vmatmul.f32.gmra.mxu1 %v6407_v43 }
 0x111   : > { %1065 = vmatmul.f32.gmra.mxu3 %v6407_v43 }
 0x112   : > { %v6419_v50 = vpop.f32.mrf.mxu2 }
 0x113   : > { %v6425_v53 = vpop.f32.mrf.mxu0 }
 0x114   : > { %v6421_v51 = vpop.f32.mrf.mxu3 }
 0x115   : > { %v6427_v54 = vpop.f32.mrf.mxu1 }
 0x116   : > { %729 = vmatmul.f32.gmra.mxu0 %v6423_v52 }
 0x117   : > { %955 = vmatmul.f32.gmra.mxu2 %v6423_v52 }
 0x118   : > { %842 = vmatmul.f32.gmra.mxu1 %v6423_v52 }
 0x119   : > { %1068 = vmatmul.f32.gmra.mxu3 %v6423_v52 }
 0x11a   : > { %v6437_v61 = vpop.f32.mrf.mxu2 }
 0x11b   : > { %v6444_v4 = vpop.f32.mrf.mxu0 }
 0x11c   : > { %v6439_v63 = vpop.f32.mrf.mxu3  ;;  %11386 = vst [vmem:[#allocation19_spill] sm:$0xff] %v6444_v4 }
 0x11d   : > { %v6446_v5 = vpop.f32.mrf.mxu1 }
 0x11e   : > { %11387 = vst [vmem:[#allocation20_spill] sm:$0xff] %v6446_v5  ;;  %732 = vmatmul.f32.gmra.mxu0 %v6441_v0 }
 0x11f   : > { %958 = vmatmul.f32.gmra.mxu2 %v6441_v0 }
 0x120   : > { %845 = vmatmul.f32.gmra.mxu1 %v6441_v0 }
 0x121   : > { %1071 = vmatmul.f32.gmra.mxu3 %v6441_v0 }
 0x122   : > { %v6453_v8 = vpop.f32.mrf.mxu2 }
 0x123   : > { %11388 = vst [vmem:[#allocation21_spill] sm:$0xff] %v6453_v8  ;;  %v6459_v15 = vpop.f32.mrf.mxu0 }
 0x124   : > { %v6455_v9 = vpop.f32.mrf.mxu3  ;;  %11391 = vst [vmem:[#allocation24_spill] sm:$0xff] %v6459_v15 }
 0x125   : > { %11389 = vst [vmem:[#allocation22_spill] sm:$0xff] %v6455_v9  ;;  %v6461_v16 = vpop.f32.mrf.mxu1 }
 0x126   : > { %11392 = vst [vmem:[#allocation25_spill] sm:$0xff] %v6461_v16  ;;  %735 = vmatmul.f32.gmra.mxu0 %v6457_v14 }
 0x127   : > { %961 = vmatmul.f32.gmra.mxu2 %v6457_v14 }
 0x128   : > { %848 = vmatmul.f32.gmra.mxu1 %v6457_v14 }
 0x129   : > { %1074 = vmatmul.f32.gmra.mxu3 %v6457_v14 }
 0x12a   : > { %v6471_v36 = vpop.f32.mrf.mxu2 }
 0x12b   : > { %11393 = vst [vmem:[#allocation26_spill] sm:$0xff] %v6471_v36  ;;  %v6478_v48 = vpop.f32.mrf.mxu0 }
 0x12c   : > { %v6473_v37 = vpop.f32.mrf.mxu3  ;;  %11396 = vst [vmem:[#allocation29_spill] sm:$0xff] %v6478_v48 }
 0x12d   : > { %11394 = vst [vmem:[#allocation27_spill] sm:$0xff] %v6473_v37  ;;  %v6480_v56 = vpop.f32.mrf.mxu1 }
 0x12e   : > { %11397 = vst [vmem:[#allocation30_spill] sm:$0xff] %v6480_v56  ;;  %738 = vmatmul.f32.gmra.mxu0 %v6475_v38 }
 0x12f   : > { %964 = vmatmul.f32.gmra.mxu2 %v6475_v38 }
 0x130   : > { %851 = vmatmul.f32.gmra.mxu1 %v6475_v38 }
 0x131   : > { %1077 = vmatmul.f32.gmra.mxu3 %v6475_v38 }
 0x132   : > { %v6487_v59 = vpop.f32.mrf.mxu2 }
 0x133   : > { %11398 = vst [vmem:[#allocation31_spill] sm:$0xff] %v6487_v59  ;;  %v6493_v6 = vpop.f32.mrf.mxu0 }
 0x134   : > { %v6489_v60 = vpop.f32.mrf.mxu3  ;;  %11401 = vst [vmem:[#allocation34_spill] sm:$0xff] %v6493_v6  ;;  %v6509_v6 = vmul.f32 0.088388346, %v358_v27 }
 0x135   : > { %11399 = vst [vmem:[#allocation32_spill] sm:$0xff] %v6489_v60  ;;  %v6495_v18 = vpop.f32.mrf.mxu1 }
 0x136   : > { %11402 = vst [vmem:[#allocation35_spill] sm:$0xff] %v6495_v18  ;;  %741 = vmatmul.f32.gmra.mxu0 %v6491_v3  ;;  %v606_v18 = vld [vmem:[%s6132_s28 + $0x288] sm:$0xff] }
 0x137   : > { %967 = vmatmul.f32.gmra.mxu2 %v6491_v3  ;;  %11405 = vst [vmem:[#allocation38_spill] sm:$0xff] %v6509_v6  ;;  %1232 = vmatpush.xpose.msrb.mxu1 %v606_v18 }
 0x138   : > { %854 = vmatmul.f32.gmra.mxu1 %v6491_v3 }
 0x139   : > { %1080 = vmatmul.f32.gmra.mxu3 %v6491_v3 }
 0x13a   : > { %v6505_v58 = vpop.f32.mrf.mxu2 }
 0x13b   : > { %11403 = vst [vmem:[#allocation36_spill] sm:$0xff] %v6505_v58  ;;  %v6512_v60 = vpop.f32.mrf.mxu0 }
 0x13c   : > { %v6507_v38 = vpop.f32.mrf.mxu3  ;;  %11406 = vst [vmem:[#allocation39_spill] sm:$0xff] %v6512_v60  ;;  %v621_v60 = vld [vmem:[%s6132_s28 + $0x300] sm:$0xff] }
 0x13d   : > { %11404 = vst [vmem:[#allocation37_spill] sm:$0xff] %v6507_v38  ;;  %v6514_v14 = vpop.f32.mrf.mxu1  ;;  %1346 = vmatpush.xpose.msrb.mxu2 %v621_v60  ;;  %v361_v60 = vld [vmem:[%s6122_s12 + $0xe0] sm:$0xff] }
 0x13e   : > { %11407 = vst [vmem:[#allocation40_spill] sm:$0xff] %v6514_v14  ;;  %744 = vmatmul.f32.gmra.mxu0 %v6509_v6  ;;  %v605_v14 = vld [vmem:[%s6132_s28 + $0x280] sm:$0xff] }
 0x13f   : > { %970 = vmatmul.f32.gmra.mxu2 %v6509_v6  ;;  %1233 = vmatpush.xpose.msrb.mxu1 %v605_v14 }
 0x140   : > { %857 = vmatmul.f32.gmra.mxu1 %v6509_v6 }
 0x141   : > { %1083 = vmatmul.f32.gmra.mxu3 %v6509_v6  ;;  %v360_v6 = vld [vmem:[%s6122_s12 + $0xd8] sm:$0xff] }
 0x142   : > { %v6521_v27 = vpop.f32.mrf.mxu2 }
 0x143   : > { %11408 = vst [vmem:[#allocation41_spill] sm:$0xff] %v6521_v27  ;;  %v6527_v18 = vpop.f32.mrf.mxu0  ;;  %v589_v27 = vld [vmem:[%s6132_s28 + $0x200] sm:$0xff] }
 0x144   : > { %v6523_v35 = vpop.f32.mrf.mxu3  ;;  %11410 = vst [vmem:[#allocation43_spill] sm:$0xff] %v6527_v18  ;;  %1120 = vmatpush.xpose.msrb.mxu0 %v589_v27 }
 0x145   : > { %11409 = vst [vmem:[#allocation42_spill] sm:$0xff] %v6523_v35  ;;  %v6529_v3 = vpop.f32.mrf.mxu1  ;;  %v637_v35 = vld [vmem:[%s6132_s28 + $0x380] sm:$0xff] }
 0x146   : > { %11411 = vst [vmem:[#allocation44_spill] sm:$0xff] %v6529_v3  ;;  %747 = vmatmul.f32.gmra.mxu0 %v6525_v44  ;;  %1459 = vmatpush.xpose.msrb.mxu3 %v637_v35  ;;  %v6543_v3 = vmul.f32 0.088388346, %v360_v6  ;;  %v6559_v35 = vmul.f32 0.088388346, %v361_v60 }
 0x147   : > { %973 = vmatmul.f32.gmra.mxu2 %v6525_v44 }
 0x148   : > { %860 = vmatmul.f32.gmra.mxu1 %v6525_v44 }
 0x149   : > { %1086 = vmatmul.f32.gmra.mxu3 %v6525_v44 }
 0x14a   : > { %v6539_v22 = vpop.f32.mrf.mxu2 }
 0x14b   : > { %11412 = vst [vmem:[#allocation45_spill] sm:$0xff] %v6539_v22  ;;  %v6546_v38 = vpop.f32.mrf.mxu0  ;;  %v362_v22 = vld [vmem:[%s6122_s12 + $0xe8] sm:$0xff] }
 0x14c   : > { %v6541_v18 = vpop.f32.mrf.mxu3  ;;  %11414 = vst [vmem:[#allocation47_spill] sm:$0xff] %v6546_v38  ;;  %v6574_v60 = vmul.f32 0.088388346, %v362_v22 }
 0x14d   : > { %11413 = vst [vmem:[#allocation46_spill] sm:$0xff] %v6541_v18  ;;  %v6548_v58 = vpop.f32.mrf.mxu1 }
 0x14e   : > { %11415 = vst [vmem:[#allocation48_spill] sm:$0xff] %v6548_v58  ;;  %750 = vmatmul.f32.gmra.mxu0 %v6543_v3 }
 0x14f   : > { %976 = vmatmul.f32.gmra.mxu2 %v6543_v3  ;;  %11422 = vst [vmem:[#allocation55_spill] sm:$0xff] %v6574_v60 }
 0x150   : > { %863 = vmatmul.f32.gmra.mxu1 %v6543_v3 }
 0x151   : > { %1089 = vmatmul.f32.gmra.mxu3 %v6543_v3 }
 0x152   : > { %v6555_v27 = vpop.f32.mrf.mxu2 }
 0x153   : > { %11416 = vst [vmem:[#allocation49_spill] sm:$0xff] %v6555_v27  ;;  %v6561_v18 = vpop.f32.mrf.mxu0 }
 0x154   : > { %v6557_v6 = vpop.f32.mrf.mxu3  ;;  %11418 = vst [vmem:[#allocation51_spill] sm:$0xff] %v6561_v18 }
 0x155   : > { %11417 = vst [vmem:[#allocation50_spill] sm:$0xff] %v6557_v6  ;;  %v6563_v14 = vpop.f32.mrf.mxu1 }
 0x156   : > { %11419 = vst [vmem:[#allocation52_spill] sm:$0xff] %v6563_v14  ;;  %753 = vmatmul.f32.gmra.mxu0 %v6559_v35  ;;  %v363_v14 = vld [vmem:[%s6122_s12 + $0xf0] sm:$0xff] }
 0x157   : > { %979 = vmatmul.f32.gmra.mxu2 %v6559_v35  ;;  %v6589_v22 = vmul.f32 0.088388346, %v363_v14 }
 0x158   : > { %866 = vmatmul.f32.gmra.mxu1 %v6559_v35 }
 0x159   : > { %1092 = vmatmul.f32.gmra.mxu3 %v6559_v35  ;;  %11427 = vst [vmem:[#allocation60_spill] sm:$0xff] %v6589_v22 }
 0x15a   : > { %v6570_v38 = vpop.f32.mrf.mxu2 }
 0x15b   : > { %11420 = vst [vmem:[#allocation53_spill] sm:$0xff] %v6570_v38  ;;  %v6576_v6 = vpop.f32.mrf.mxu0 }
 0x15c   : > { %v6572_v27 = vpop.f32.mrf.mxu3  ;;  %11423 = vst [vmem:[#allocation56_spill] sm:$0xff] %v6576_v6 }
 0x15d   : > { %11421 = vst [vmem:[#allocation54_spill] sm:$0xff] %v6572_v27  ;;  %v6578_v18 = vpop.f32.mrf.mxu1 }
 0x15e   : > { %11424 = vst [vmem:[#allocation57_spill] sm:$0xff] %v6578_v18  ;;  %756 = vmatmul.f32.gmra.mxu0 %v6574_v60  ;;  %v364_v18 = vld [vmem:[%s6122_s12 + $0xf8] sm:$0xff]  ;;  %s5891_s12 = scalar_lea.hbm %s10967_s4, 8192 }
 0x15f   : > { %982 = vmatmul.f32.gmra.mxu2 %v6574_v60  ;;  %p5893_p7 = scmp.lt.s32.totalorder %s5891_s12, %s5887_s7 }
 0x160   : > { %869 = vmatmul.f32.gmra.mxu1 %v6574_v60 }
 0x161   : > { %1095 = vmatmul.f32.gmra.mxu3 %v6574_v60  ;;  %p5894_p8 = por %p5893_p7, %p5892_p6 }
 0x162   : > { %v6585_v58 = vpop.f32.mrf.mxu2 }
 0x163   : > { %11425 = vst [vmem:[#allocation58_spill] sm:$0xff] %v6585_v58  ;;  %v6591_v27 = vpop.f32.mrf.mxu0  ;;  %p5895_p10 = pnand %p5894_p8, %p5890_p5 }
 0x164   : > { %v6587_v38 = vpop.f32.mrf.mxu3  ;;  %11428 = vst [vmem:[#allocation61_spill] sm:$0xff] %v6591_v27 }
 0x165   : > { %11426 = vst [vmem:[#allocation59_spill] sm:$0xff] %v6587_v38  ;;  %v6593_v6 = vpop.f32.mrf.mxu1  ;;  %v6604_v38 = vmul.f32 0.088388346, %v364_v18 }
 0x166   : > { %11429 = vst [vmem:[#allocation62_spill] sm:$0xff] %v6593_v6  ;;  %759 = vmatmul.f32.gmra.mxu0 %v6589_v22 }
 0x167   : > { %985 = vmatmul.f32.gmra.mxu2 %v6589_v22 }
 0x168   : > { %872 = vmatmul.f32.gmra.mxu1 %v6589_v22 }
 0x169   : > { %1098 = vmatmul.f32.gmra.mxu3 %v6589_v22 }
 0x16a   : > { %v6600_v60 = vpop.f32.mrf.mxu2 }
 0x16b   : > { %11430 = vst [vmem:[#allocation63_spill] sm:$0xff] %v6600_v60  ;;  %v6606_v14 = vpop.f32.mrf.mxu0 }
 0x16c   : > { %v6602_v58 = vpop.f32.mrf.mxu3  ;;  %11432 = vst [vmem:[#allocation65_spill] sm:$0xff] %v6606_v14 }
 0x16d   : > { %11431 = vst [vmem:[#allocation64_spill] sm:$0xff] %v6602_v58  ;;  %v6608_v27 = vpop.f32.mrf.mxu1 }
 0x16e   : > { %11433 = vst [vmem:[#allocation66_spill] sm:$0xff] %v6608_v27  ;;  %762 = vmatmul.f32.gmra.mxu0 %v6604_v38 }
 0x16f   : > { %988 = vmatmul.f32.gmra.mxu2 %v6604_v38 }
 0x170   : > { %875 = vmatmul.f32.gmra.mxu1 %v6604_v38 }
 0x171   : > { %1101 = vmatmul.f32.gmra.mxu3 %v6604_v38 }
 0x172   : > { %v6614_v6 = vpop.f32.mrf.mxu2 }
 0x173   : > { %11434 = vst [vmem:[#allocation67_spill] sm:$0xff] %v6614_v6  ;;  %v6618_v60 = vpop.f32.mrf.mxu0 }
 0x174   : > { %v6616_v22 = vpop.f32.mrf.mxu3  ;;  %11436 = vst [vmem:[#allocation69_spill] sm:$0xff] %v6618_v60 }
 0x175   : > { %11435 = vst [vmem:[#allocation68_spill] sm:$0xff] %v6616_v22  ;;  %v6620_v18 = vpop.f32.mrf.mxu1 }
 0x176   : > { %11437 = vst [vmem:[#allocation70_spill] sm:$0xff] %v6620_v18  ;;  %1121 = vmatmul.f32.vlgmr.msrb.gmra.mxu0 %v6203_v1 }
 0x177   : > { %1347 = vmatmul.f32.vlgmr.msrb.gmra.mxu2 %v6203_v1 }
 0x178   : > { %1234 = vmatmul.f32.vlgmr.msrb.gmra.mxu1 %v6203_v1 }
 0x179   : > { %1460 = vmatmul.f32.vlgmr.msrb.gmra.mxu3 %v6203_v1 }
 0x17a   : > { %v6626_v58 = vpop.f32.mrf.mxu2 }
 0x17b   : > { %11438 = vst [vmem:[#allocation71_spill] sm:$0xff] %v6626_v58  ;;  %v6630_v27 = vpop.f32.mrf.mxu0 }
 0x17c   : > { %v6628_v14 = vpop.f32.mrf.mxu3  ;;  %11440 = vst [vmem:[#allocation73_spill] sm:$0xff] %v6630_v27 }
 0x17d   : > { %11439 = vst [vmem:[#allocation72_spill] sm:$0xff] %v6628_v14  ;;  %v6632_v6 = vpop.f32.mrf.mxu1 }
 0x17e   : > { %11441 = vst [vmem:[#allocation74_spill] sm:$0xff] %v6632_v6  ;;  %1124 = vmatmul.f32.gmra.mxu0 %v6218_v11 }
 0x17f   : > { %1350 = vmatmul.f32.gmra.mxu2 %v6218_v11 }
 0x180   : > { %1237 = vmatmul.f32.gmra.mxu1 %v6218_v11 }
 0x181   : > { %1463 = vmatmul.f32.gmra.mxu3 %v6218_v11 }
 0x182   : > { %v6638_v22 = vpop.f32.mrf.mxu2 }
 0x183   : > { %11442 = vst [vmem:[#allocation75_spill] sm:$0xff] %v6638_v22  ;;  %v6642_v1 = vpop.f32.mrf.mxu0 }
 0x184   : > { %v6640_v60 = vpop.f32.mrf.mxu3  ;;  %11444 = vst [vmem:[#allocation77_spill] sm:$0xff] %v6642_v1 }
 0x185   : > { %11443 = vst [vmem:[#allocation76_spill] sm:$0xff] %v6640_v60  ;;  %v6644_v58 = vpop.f32.mrf.mxu1  ;;  %v1602_v60 = vmax.f32 %v6444_v4, %v6446_v5 }
 0x186   : > { %11445 = vst [vmem:[#allocation78_spill] sm:$0xff] %v6644_v58  ;;  %1127 = vmatmul.f32.gmra.mxu0 %v6229_v17 }
 0x187   : > { %1353 = vmatmul.f32.gmra.mxu2 %v6229_v17 }
 0x188   : > { %1240 = vmatmul.f32.gmra.mxu1 %v6229_v17 }
 0x189   : > { %1466 = vmatmul.f32.gmra.mxu3 %v6229_v17 }
 0x18a   : > { %v6650_v14 = vpop.f32.mrf.mxu2 }
 0x18b   : > { %11446 = vst [vmem:[#allocation79_spill] sm:$0xff] %v6650_v14  ;;  %v6654_v11 = vpop.f32.mrf.mxu0 }
 0x18c   : > { %v6652_v27 = vpop.f32.mrf.mxu3  ;;  %11448 = vst [vmem:[#allocation81_spill] sm:$0xff] %v6654_v11 }
 0x18d   : > { %11447 = vst [vmem:[#allocation80_spill] sm:$0xff] %v6652_v27  ;;  %v6656_v22 = vpop.f32.mrf.mxu1 }
 0x18e   : > { %11449 = vst [vmem:[#allocation82_spill] sm:$0xff] %v6656_v22  ;;  %1130 = vmatmul.f32.gmra.mxu0 %v6240_v23 }
 0x18f   : > { %1356 = vmatmul.f32.gmra.mxu2 %v6240_v23 }
 0x190   : > { %1243 = vmatmul.f32.gmra.mxu1 %v6240_v23 }
 0x191   : > { %1469 = vmatmul.f32.gmra.mxu3 %v6240_v23 }
 0x192   : > { %v6662_v1 = vpop.f32.mrf.mxu2 }
 0x193   : > { %11450 = vst [vmem:[#allocation83_spill] sm:$0xff] %v6662_v1  ;;  %v6666_v17 = vpop.f32.mrf.mxu0 }
 0x194   : > { %v6664_v58 = vpop.f32.mrf.mxu3  ;;  %11452 = vst [vmem:[#allocation85_spill] sm:$0xff] %v6666_v17 }
 0x195   : > { %11451 = vst [vmem:[#allocation84_spill] sm:$0xff] %v6664_v58  ;;  %v6668_v14 = vpop.f32.mrf.mxu1 }
 0x196   : > { %11453 = vst [vmem:[#allocation86_spill] sm:$0xff] %v6668_v14  ;;  %1133 = vmatmul.f32.gmra.mxu0 %v6247_v25 }
 0x197   : > { %1359 = vmatmul.f32.gmra.mxu2 %v6247_v25 }
 0x198   : > { %1246 = vmatmul.f32.gmra.mxu1 %v6247_v25 }
 0x199   : > { %1472 = vmatmul.f32.gmra.mxu3 %v6247_v25 }
 0x19a   : > { %v6674_v11 = vpop.f32.mrf.mxu2 }
 0x19b   : > { %11454 = vst [vmem:[#allocation87_spill] sm:$0xff] %v6674_v11  ;;  %v6678_v23 = vpop.f32.mrf.mxu0 }
 0x19c   : > { %v6676_v22 = vpop.f32.mrf.mxu3  ;;  %11456 = vst [vmem:[#allocation89_spill] sm:$0xff] %v6678_v23 }
 0x19d   : > { %11455 = vst [vmem:[#allocation88_spill] sm:$0xff] %v6676_v22  ;;  %v6680_v1 = vpop.f32.mrf.mxu1 }
 0x19e   : > { %11457 = vst [vmem:[#allocation90_spill] sm:$0xff] %v6680_v1  ;;  %1136 = vmatmul.f32.gmra.mxu0 %v6258_v31  ;;  %v1593_v1 = vmax.f32 %v6425_v53, %v6427_v54 }
 0x19f   : > { %1362 = vmatmul.f32.gmra.mxu2 %v6258_v31 }
 0x1a0   : > { %1249 = vmatmul.f32.gmra.mxu1 %v6258_v31 }
 0x1a1   : > { %1475 = vmatmul.f32.gmra.mxu3 %v6258_v31 }
 0x1a2   : > { %v6686_v17 = vpop.f32.mrf.mxu2 }
 0x1a3   : > { %11458 = vst [vmem:[#allocation91_spill] sm:$0xff] %v6686_v17  ;;  %v6690_v25 = vpop.f32.mrf.mxu0 }
 0x1a4   : > { %v6688_v14 = vpop.f32.mrf.mxu3  ;;  %11460 = vst [vmem:[#allocation93_spill] sm:$0xff] %v6690_v25 }
 0x1a5   : > { %11459 = vst [vmem:[#allocation92_spill] sm:$0xff] %v6688_v14  ;;  %v6692_v11 = vpop.f32.mrf.mxu1 }
 0x1a6   : > { %11461 = vst [vmem:[#allocation94_spill] sm:$0xff] %v6692_v11  ;;  %1139 = vmatmul.f32.gmra.mxu0 %v6265_v33 }
 0x1a7   : > { %1365 = vmatmul.f32.gmra.mxu2 %v6265_v33 }
 0x1a8   : > { %1252 = vmatmul.f32.gmra.mxu1 %v6265_v33 }
 0x1a9   : > { %1478 = vmatmul.f32.gmra.mxu3 %v6265_v33 }
 0x1aa   : > { %v6698_v22 = vpop.f32.mrf.mxu2 }
 0x1ab   : > { %11462 = vst [vmem:[#allocation95_spill] sm:$0xff] %v6698_v22  ;;  %v6702_v31 = vpop.f32.mrf.mxu0 }
 0x1ac   : > { %v6700_v23 = vpop.f32.mrf.mxu3  ;;  %11464 = vst [vmem:[#allocation97_spill] sm:$0xff] %v6702_v31 }
 0x1ad   : > { %11463 = vst [vmem:[#allocation96_spill] sm:$0xff] %v6700_v23  ;;  %v6704_v17 = vpop.f32.mrf.mxu1 }
 0x1ae   : > { %11465 = vst [vmem:[#allocation98_spill] sm:$0xff] %v6704_v17  ;;  %1142 = vmatmul.f32.gmra.mxu0 %v6276_v39 }
 0x1af   : > { %1368 = vmatmul.f32.gmra.mxu2 %v6276_v39 }
 0x1b0   : > { %1255 = vmatmul.f32.gmra.mxu1 %v6276_v39 }
 0x1b1   : > { %1481 = vmatmul.f32.gmra.mxu3 %v6276_v39 }
 0x1b2   : > { %v6710_v14 = vpop.f32.mrf.mxu2 }
 0x1b3   : > { %11466 = vst [vmem:[#allocation99_spill] sm:$0xff] %v6710_v14  ;;  %v6714_v33 = vpop.f32.mrf.mxu0 }
 0x1b4   : > { %v6712_v25 = vpop.f32.mrf.mxu3  ;;  %11468 = vst [vmem:[#allocation101_spill] sm:$0xff] %v6714_v33 }
 0x1b5   : > { %11467 = vst [vmem:[#allocation100_spill] sm:$0xff] %v6712_v25  ;;  %v6716_v22 = vpop.f32.mrf.mxu1 }
 0x1b6   : > { %11469 = vst [vmem:[#allocation102_spill] sm:$0xff] %v6716_v22  ;;  %1145 = vmatmul.f32.gmra.mxu0 %v6283_v41  ;;  %v1584_v22 = vmax.f32 %v6410_v45, %v6412_v46 }
 0x1b7   : > { %1371 = vmatmul.f32.gmra.mxu2 %v6283_v41 }
 0x1b8   : > { %1258 = vmatmul.f32.gmra.mxu1 %v6283_v41 }
 0x1b9   : > { %1484 = vmatmul.f32.gmra.mxu3 %v6283_v41 }
 0x1ba   : > { %v6722_v23 = vpop.f32.mrf.mxu2 }
 0x1bb   : > { %11470 = vst [vmem:[#allocation103_spill] sm:$0xff] %v6722_v23  ;;  %v6726_v39 = vpop.f32.mrf.mxu0 }
 0x1bc   : > { %v6724_v31 = vpop.f32.mrf.mxu3  ;;  %11472 = vst [vmem:[#allocation105_spill] sm:$0xff] %v6726_v39 }
 0x1bd   : > { %11471 = vst [vmem:[#allocation104_spill] sm:$0xff] %v6724_v31  ;;  %v6728_v14 = vpop.f32.mrf.mxu1 }
 0x1be   : > { %11473 = vst [vmem:[#allocation106_spill] sm:$0xff] %v6728_v14  ;;  %1148 = vmatmul.f32.gmra.mxu0 %v6294_v47 }
 0x1bf   : > { %1374 = vmatmul.f32.gmra.mxu2 %v6294_v47 }
 0x1c0   : > { %1261 = vmatmul.f32.gmra.mxu1 %v6294_v47 }
 0x1c1   : > { %1487 = vmatmul.f32.gmra.mxu3 %v6294_v47 }
 0x1c2   : > { %v6734_v25 = vpop.f32.mrf.mxu2 }
 0x1c3   : > { %11474 = vst [vmem:[#allocation107_spill] sm:$0xff] %v6734_v25  ;;  %v6738_v41 = vpop.f32.mrf.mxu0 }
 0x1c4   : > { %v6736_v33 = vpop.f32.mrf.mxu3  ;;  %11476 = vst [vmem:[#allocation109_spill] sm:$0xff] %v6738_v41 }
 0x1c5   : > { %11475 = vst [vmem:[#allocation108_spill] sm:$0xff] %v6736_v33  ;;  %v6740_v23 = vpop.f32.mrf.mxu1 }
 0x1c6   : > { %11477 = vst [vmem:[#allocation110_spill] sm:$0xff] %v6740_v23  ;;  %1151 = vmatmul.f32.gmra.mxu0 %v6301_v49 }
 0x1c7   : > { %1377 = vmatmul.f32.gmra.mxu2 %v6301_v49 }
 0x1c8   : > { %1264 = vmatmul.f32.gmra.mxu1 %v6301_v49 }
 0x1c9   : > { %1490 = vmatmul.f32.gmra.mxu3 %v6301_v49 }
 0x1ca   : > { %v6746_v31 = vpop.f32.mrf.mxu2 }
 0x1cb   : > { %11478 = vst [vmem:[#allocation111_spill] sm:$0xff] %v6746_v31  ;;  %v6750_v47 = vpop.f32.mrf.mxu0 }
 0x1cc   : > { %v6748_v39 = vpop.f32.mrf.mxu3  ;;  %11480 = vst [vmem:[#allocation113_spill] sm:$0xff] %v6750_v47 }
 0x1cd   : > { %11479 = vst [vmem:[#allocation112_spill] sm:$0xff] %v6748_v39  ;;  %v6752_v25 = vpop.f32.mrf.mxu1 }
 0x1ce   : > { %11481 = vst [vmem:[#allocation114_spill] sm:$0xff] %v6752_v25  ;;  %1154 = vmatmul.f32.gmra.mxu0 %v6312_v55 }
 0x1cf   : > { %1380 = vmatmul.f32.gmra.mxu2 %v6312_v55 }
 0x1d0   : > { %1267 = vmatmul.f32.gmra.mxu1 %v6312_v55 }
 0x1d1   : > { %1493 = vmatmul.f32.gmra.mxu3 %v6312_v55 }
 0x1d2   : > { %v6758_v33 = vpop.f32.mrf.mxu2 }
 0x1d3   : > { %11482 = vst [vmem:[#allocation115_spill] sm:$0xff] %v6758_v33  ;;  %v6762_v49 = vpop.f32.mrf.mxu0 }
 0x1d4   : > { %v6760_v41 = vpop.f32.mrf.mxu3  ;;  %11484 = vst [vmem:[#allocation117_spill] sm:$0xff] %v6762_v49 }
 0x1d5   : > { %11483 = vst [vmem:[#allocation116_spill] sm:$0xff] %v6760_v41  ;;  %v6764_v31 = vpop.f32.mrf.mxu1 }
 0x1d6   : > { %11485 = vst [vmem:[#allocation118_spill] sm:$0xff] %v6764_v31  ;;  %1157 = vmatmul.f32.gmra.mxu0 %v6319_v57 }
 0x1d7   : > { %1383 = vmatmul.f32.gmra.mxu2 %v6319_v57 }
 0x1d8   : > { %1270 = vmatmul.f32.gmra.mxu1 %v6319_v57 }
 0x1d9   : > { %1496 = vmatmul.f32.gmra.mxu3 %v6319_v57 }
 0x1da   : > { %v6770_v39 = vpop.f32.mrf.mxu2 }
 0x1db   : > { %11486 = vst [vmem:[#allocation119_spill] sm:$0xff] %v6770_v39  ;;  %v6774_v55 = vpop.f32.mrf.mxu0 }
 0x1dc   : > { %v6772_v47 = vpop.f32.mrf.mxu3  ;;  %11488 = vst [vmem:[#allocation121_spill] sm:$0xff] %v6774_v55 }
 0x1dd   : > { %11487 = vst [vmem:[#allocation120_spill] sm:$0xff] %v6772_v47  ;;  %v6776_v33 = vpop.f32.mrf.mxu1 }
 0x1de   : > { %11489 = vst [vmem:[#allocation122_spill] sm:$0xff] %v6776_v33  ;;  %1160 = vmatmul.f32.gmra.mxu0 %v6329_v62 }
 0x1df   : > { %1386 = vmatmul.f32.gmra.mxu2 %v6329_v62 }
 0x1e0   : > { %1273 = vmatmul.f32.gmra.mxu1 %v6329_v62 }
 0x1e1   : > { %1499 = vmatmul.f32.gmra.mxu3 %v6329_v62 }
 0x1e2   : > { %v6782_v41 = vpop.f32.mrf.mxu2 }
 0x1e3   : > { %11490 = vst [vmem:[#allocation123_spill] sm:$0xff] %v6782_v41  ;;  %v6786_v57 = vpop.f32.mrf.mxu0 }
 0x1e4   : > { %v6784_v49 = vpop.f32.mrf.mxu3  ;;  %11492 = vst [vmem:[#allocation125_spill] sm:$0xff] %v6786_v57 }
 0x1e5   : > { %11491 = vst [vmem:[#allocation124_spill] sm:$0xff] %v6784_v49  ;;  %v6788_v39 = vpop.f32.mrf.mxu1  ;;  %v1557_v49 = vmax.f32 %v6357_v12, %v6359_v13 }
 0x1e6   : > { %11493 = vst [vmem:[#allocation126_spill] sm:$0xff] %v6788_v39  ;;  %1163 = vmatmul.f32.gmra.mxu0 %v6337_v2 }
 0x1e7   : > { %1389 = vmatmul.f32.gmra.mxu2 %v6337_v2  ;;  %v1558_v39 = vmax.f32 %v1557_v49, %v6369_v19 }
 0x1e8   : > { %1276 = vmatmul.f32.gmra.mxu1 %v6337_v2 }
 0x1e9   : > { %1502 = vmatmul.f32.gmra.mxu3 %v6337_v2 }
 0x1ea   : > { %v6794_v55 = vpop.f32.mrf.mxu2 }
 0x1eb   : > { %11494 = vst [vmem:[#allocation127_spill] sm:$0xff] %v6794_v55  ;;  %v6798_v62 = vpop.f32.mrf.mxu0 }
 0x1ec   : > { %v6796_v33 = vpop.f32.mrf.mxu3  ;;  %11496 = vst [vmem:[#allocation129_spill] sm:$0xff] %v6798_v62 }
 0x1ed   : > { %11495 = vst [vmem:[#allocation128_spill] sm:$0xff] %v6796_v33  ;;  %v6802_v57 = vpop.f32.mrf.mxu1  ;;  %v1559_v33 = vmax.f32 %v1558_v39, %v6371_v20 }
 0x1ee   : > { %11497 = vst [vmem:[#allocation130_spill] sm:$0xff] %v6802_v57  ;;  %1166 = vmatmul.f32.gmra.mxu0 %v6347_v7  ;;  %v1566_v57 = vmax.f32 %v6376_v24, %v6378_v26 }
 0x1ef   : > { %1392 = vmatmul.f32.gmra.mxu2 %v6347_v7 }
 0x1f0   : > { %1279 = vmatmul.f32.gmra.mxu1 %v6347_v7  ;;  %v1567_v47 = vmax.f32 %v1566_v57, %v6385_v28  ;;  %v1575_v57 = vmax.f32 %v6391_v32, %v6393_v34 }
 0x1f1   : > { %1505 = vmatmul.f32.gmra.mxu3 %v6347_v7 }
 0x1f2   : > { %v6809_v2 = vpop.f32.mrf.mxu2 }
 0x1f3   : > { %11498 = vst [vmem:[#allocation131_spill] sm:$0xff] %v6809_v2  ;;  %v6814_v55 = vpop.f32.mrf.mxu0 }
 0x1f4   : > { %v6812_v62 = vpop.f32.mrf.mxu3  ;;  %v1560_v49 = vmax.f32 %v1559_v33, %v6814_v55 }
 0x1f5   : > { %11499 = vst [vmem:[#allocation132_spill] sm:$0xff] %v6812_v62  ;;  %v6819_v41 = vpop.f32.mrf.mxu1  ;;  %v1568_v62 = vmax.f32 %v1567_v47, %v6387_v29 }
 0x1f6   : > { %1169 = vmatmul.f32.gmra.mxu0 %v6355_v10  ;;  %v1561_v7 = vmax.f32 %v1560_v49, %v6819_v41  ;;  %v1576_v49 = vmax.f32 %v1575_v57, %v6403_v40 }
 0x1f7   : > { %1395 = vmatmul.f32.gmra.mxu2 %v6355_v10 }
 0x1f8   : > { %1282 = vmatmul.f32.gmra.mxu1 %v6355_v10 }
 0x1f9   : > { %1508 = vmatmul.f32.gmra.mxu3 %v6355_v10 }
 0x1fa   : > { %v6827_v39 = vpop.f32.mrf.mxu2 }
 0x1fb   : > { %v1562_v33 = vmax.f32 %v1561_v7, %v6827_v39  ;;  %v6833_v31 = vpop.f32.mrf.mxu0 }
 0x1fc   : > { %v6830_v2 = vpop.f32.mrf.mxu3  ;;  %v1569_v25 = vmax.f32 %v1568_v62, %v6833_v31  ;;  %v1577_v62 = vmax.f32 %v1576_v49, %v6405_v42 }
 0x1fd   : > { %v6838_v23 = vpop.f32.mrf.mxu1  ;;  %v1563_v10 = vmax.f32 %v1562_v33, %v6830_v2 }
 0x1fe   : > { %1172 = vmatmul.f32.gmra.mxu0 %v6373_v21  ;;  %v1570_v47 = vmax.f32 %v1569_v25, %v6838_v23 }
 0x1ff   : > { %1398 = vmatmul.f32.gmra.mxu2 %v6373_v21  ;;  %1564 = vmax.xlane.f32.xlu0 %v1563_v10 }
 0x200   : > { %1285 = vmatmul.f32.gmra.mxu1 %v6373_v21 }
 0x201   : > { %1511 = vmatmul.f32.gmra.mxu3 %v6373_v21  ;;  %v1585_v21 = vmax.f32 %v1584_v22, %v6419_v50 }
 0x202   : > { %v6847_v7 = vpop.f32.mrf.mxu2 }
 0x203   : > { %v1571_v33 = vmax.f32 %v1570_v47, %v6847_v7  ;;  %v6853_v57 = vpop.f32.mrf.mxu0 }
 0x204   : > { %v6850_v14 = vpop.f32.mrf.mxu3  ;;  %v1578_v10 = vmax.f32 %v1577_v62, %v6853_v57  ;;  %v1586_v62 = vmax.f32 %v1585_v21, %v6421_v51 }
 0x205   : > { %v6858_v17 = vpop.f32.mrf.mxu1  ;;  %v1572_v25 = vmax.f32 %v1571_v33, %v6850_v14 }
 0x206   : > { %1175 = vmatmul.f32.gmra.mxu0 %v6389_v30  ;;  %v1579_v49 = vmax.f32 %v1578_v10, %v6858_v17 }
 0x207   : > { %1401 = vmatmul.f32.gmra.mxu2 %v6389_v30  ;;  %1573 = vmax.xlane.f32.xlu0 %v1572_v25 }
 0x208   : > { %1288 = vmatmul.f32.gmra.mxu1 %v6389_v30 }
 0x209   : > { %1514 = vmatmul.f32.gmra.mxu3 %v6389_v30  ;;  %v1594_v30 = vmax.f32 %v1593_v1, %v6437_v61 }
 0x20a   : > { %v6867_v47 = vpop.f32.mrf.mxu2 }
 0x20b   : > { %v1580_v33 = vmax.f32 %v1579_v49, %v6867_v47  ;;  %v6873_v22 = vpop.f32.mrf.mxu0 }
 0x20c   : > { %v6870_v11 = vpop.f32.mrf.mxu3  ;;  %v1587_v25 = vmax.f32 %v1586_v62, %v6873_v22  ;;  %v1595_v62 = vmax.f32 %v1594_v30, %v6439_v63 }
 0x20d   : > { %v6878_v58 = vpop.f32.mrf.mxu1  ;;  %v1581_v10 = vmax.f32 %v1580_v33, %v6870_v11 }
 0x20e   : > { %1178 = vmatmul.f32.gmra.mxu0 %v6407_v43  ;;  %v1588_v21 = vmax.f32 %v1587_v25, %v6878_v58 }
 0x20f   : > { %1404 = vmatmul.f32.gmra.mxu2 %v6407_v43  ;;  %1582 = vmax.xlane.f32.xlu1 %v1581_v10 }
 0x210   : > { %1291 = vmatmul.f32.gmra.mxu1 %v6407_v43 }
 0x211   : > { %1517 = vmatmul.f32.gmra.mxu3 %v6407_v43  ;;  %v1603_v43 = vmax.f32 %v1602_v60, %v6453_v8  ;;  %v1611_v8 = vmax.f32 %v6459_v15, %v6461_v16 }
 0x212   : > { %v6887_v49 = vpop.f32.mrf.mxu2 }
 0x213   : > { %v1589_v33 = vmax.f32 %v1588_v21, %v6887_v49  ;;  %v6893_v1 = vpop.f32.mrf.mxu0 }
 0x214   : > { %v6890_v27 = vpop.f32.mrf.mxu3  ;;  %v1596_v10 = vmax.f32 %v1595_v62, %v6893_v1  ;;  %v1604_v62 = vmax.f32 %v1603_v43, %v6455_v9 }
 0x215   : > { %v6898_v6 = vpop.f32.mrf.mxu1  ;;  %v1590_v25 = vmax.f32 %v1589_v33, %v6890_v27 }
 0x216   : > { %11500 = vst [vmem:[#allocation133_spill] sm:$0xff] %v6898_v6  ;;  %1181 = vmatmul.f32.gmra.mxu0 %v6423_v52  ;;  %v1597_v30 = vmax.f32 %v1596_v10, %v6898_v6  ;;  %v11548_v6 = vld [vmem:[#allocation53_spill] sm:$0xff] }
 0x217   : > { %1407 = vmatmul.f32.gmra.mxu2 %v6423_v52  ;;  %1591 = vmax.xlane.f32.xlu1 %v1590_v25 }
 0x218   : > { %1294 = vmatmul.f32.gmra.mxu1 %v6423_v52 }
 0x219   : > { %1520 = vmatmul.f32.gmra.mxu3 %v6423_v52  ;;  %v1612_v52 = vmax.f32 %v1611_v8, %v6471_v36  ;;  %v1620_v36 = vmax.f32 %v6478_v48, %v6480_v56 }
 0x21a   : > { %v6907_v21 = vpop.f32.mrf.mxu2 }
 0x21b   : > { %11501 = vst [vmem:[#allocation134_spill] sm:$0xff] %v6907_v21  ;;  %v1598_v33 = vmax.f32 %v1597_v30, %v6907_v21  ;;  %v6913_v60 = vpop.f32.mrf.mxu0  ;;  %v11547_v21 = vld [vmem:[#allocation49_spill] sm:$0xff] }
 0x21c   : > { %v6910_v18 = vpop.f32.mrf.mxu3  ;;  %11503 = vst [vmem:[#allocation136_spill] sm:$0xff] %v6913_v60  ;;  %v1605_v25 = vmax.f32 %v1604_v62, %v6913_v60  ;;  %v1613_v62 = vmax.f32 %v1612_v52, %v6473_v37  ;;  %v11543_v60 = vld [vmem:[#allocation51_spill] sm:$0xff] }
 0x21d   : > { %11502 = vst [vmem:[#allocation135_spill] sm:$0xff] %v6910_v18  ;;  %v6918_v5 = vpop.f32.mrf.mxu1  ;;  %v1599_v10 = vmax.f32 %v1598_v33, %v6910_v18 }
 0x21e   : > { %11504 = vst [vmem:[#allocation137_spill] sm:$0xff] %v6918_v5  ;;  %1184 = vmatmul.f32.gmra.mxu0 %v6441_v0  ;;  %v1606_v43 = vmax.f32 %v1605_v25, %v6918_v5  ;;  %v11509_v5 = vld [vmem:[#allocation23_spill] sm:$0xff] }
 0x21f   : > { %1410 = vmatmul.f32.gmra.mxu2 %v6441_v0  ;;  %1600 = vmax.xlane.f32.xlu2 %v1599_v10 }
 0x220   : > { %1297 = vmatmul.f32.gmra.mxu1 %v6441_v0 }
 0x221   : > { %1523 = vmatmul.f32.gmra.mxu3 %v6441_v0  ;;  %v1621_v0 = vmax.f32 %v1620_v36, %v6487_v59  ;;  %v11514_v59 = vld [vmem:[#allocation35_spill] sm:$0xff] }
 0x222   : > { %v6927_v30 = vpop.f32.mrf.mxu2 }
 0x223   : > { %11505 = vst [vmem:[#allocation138_spill] sm:$0xff] %v6927_v30  ;;  %v1607_v33 = vmax.f32 %v1606_v43, %v6927_v30  ;;  %v6933_v8 = vpop.f32.mrf.mxu0  ;;  %v11518_v30 = vld [vmem:[#allocation28_spill] sm:$0xff] }
 0x224   : > { %v6930_v16 = vpop.f32.mrf.mxu3  ;;  %11507 = vst [vmem:[#allocation140_spill] sm:$0xff] %v6933_v8  ;;  %v1614_v10 = vmax.f32 %v1613_v62, %v6933_v8  ;;  %v11511_v62 = vld [vmem:[#allocation32_spill] sm:$0xff]  ;;  %v11515_v8 = vld [vmem:[#allocation34_spill] sm:$0xff] }
 0x225   : > { %11506 = vst [vmem:[#allocation139_spill] sm:$0xff] %v6930_v16  ;;  %v6938_v15 = vpop.f32.mrf.mxu1  ;;  %v1608_v25 = vmax.f32 %v1607_v33, %v6930_v16  ;;  %v1622_v56 = vmax.f32 %v1621_v0, %v11511_v62  ;;  %v1629_v37 = vmax.f32 %v11515_v8, %v11514_v59 }
 0x226   : > { %11508 = vst [vmem:[#allocation141_spill] sm:$0xff] %v6938_v15  ;;  %1187 = vmatmul.f32.gmra.mxu0 %v11509_v5  ;;  %v1615_v52 = vmax.f32 %v1614_v10, %v6938_v15 }
 0x227   : > { %1413 = vmatmul.f32.gmra.mxu2 %v11509_v5  ;;  %1609 = vmax.xlane.f32.xlu2 %v1608_v25 }
 0x228   : > { %1300 = vmatmul.f32.gmra.mxu1 %v11509_v5 }
 0x229   : > { %1526 = vmatmul.f32.gmra.mxu3 %v11509_v5  ;;  %v11517_v5 = vld [vmem:[#allocation36_spill] sm:$0xff] }
 0x22a   : > { %v6947_v43 = vpop.f32.mrf.mxu2  ;;  %v1630_v15 = vmax.f32 %v1629_v37, %v11517_v5  ;;  %v11523_v5 = vld [vmem:[#allocation40_spill] sm:$0xff] }
 0x22b   : > { %11510 = vst [vmem:[#allocation23_spill] sm:$0xff] %v6947_v43  ;;  %v1616_v33 = vmax.f32 %v1615_v52, %v6947_v43  ;;  %v6953_v36 = vpop.f32.mrf.mxu0  ;;  %v11527_v43 = vld [vmem:[#allocation33_spill] sm:$0xff] }
 0x22c   : > { %v6950_v48 = vpop.f32.mrf.mxu3  ;;  %11513 = vst [vmem:[#allocation143_spill] sm:$0xff] %v6953_v36  ;;  %v1623_v25 = vmax.f32 %v1622_v56, %v6953_v36  ;;  %v11520_v56 = vld [vmem:[#allocation37_spill] sm:$0xff]  ;;  %v11524_v36 = vld [vmem:[#allocation39_spill] sm:$0xff] }
 0x22d   : > { %11512 = vst [vmem:[#allocation142_spill] sm:$0xff] %v6950_v48  ;;  %v6958_v16 = vpop.f32.mrf.mxu1  ;;  %v1617_v10 = vmax.f32 %v1616_v33, %v6950_v48  ;;  %v1631_v59 = vmax.f32 %v1630_v15, %v11520_v56  ;;  %v1638_v62 = vmax.f32 %v11524_v36, %v11523_v5  ;;  %v11533_v56 = vld [vmem:[#allocation38_spill] sm:$0xff] }
 0x22e   : > { %11516 = vst [vmem:[#allocation144_spill] sm:$0xff] %v6958_v16  ;;  %1190 = vmatmul.f32.gmra.mxu0 %v11518_v30  ;;  %v1624_v0 = vmax.f32 %v1623_v25, %v6958_v16 }
 0x22f   : > { %1416 = vmatmul.f32.gmra.mxu2 %v11518_v30  ;;  %1618 = vmax.xlane.f32.xlu0 %v1617_v10 }
 0x230   : > { %1303 = vmatmul.f32.gmra.mxu1 %v11518_v30 }
 0x231   : > { %1529 = vmatmul.f32.gmra.mxu3 %v11518_v30  ;;  %v11526_v30 = vld [vmem:[#allocation41_spill] sm:$0xff] }
 0x232   : > { %v6967_v52 = vpop.f32.mrf.mxu2  ;;  %v1639_v16 = vmax.f32 %v1638_v62, %v11526_v30 }
 0x233   : > { %11519 = vst [vmem:[#allocation28_spill] sm:$0xff] %v6967_v52  ;;  %v1625_v33 = vmax.f32 %v1624_v0, %v6967_v52  ;;  %v6973_v37 = vpop.f32.mrf.mxu0  ;;  %v11542_v52 = vld [vmem:[#allocation52_spill] sm:$0xff] }
 0x234   : > { %v6970_v8 = vpop.f32.mrf.mxu3  ;;  %11522 = vst [vmem:[#allocation146_spill] sm:$0xff] %v6973_v37  ;;  %v1632_v10 = vmax.f32 %v1631_v59, %v6973_v37  ;;  %v11529_v59 = vld [vmem:[#allocation42_spill] sm:$0xff] }
 0x235   : > { %11521 = vst [vmem:[#allocation145_spill] sm:$0xff] %v6970_v8  ;;  %v6978_v48 = vpop.f32.mrf.mxu1  ;;  %v1626_v25 = vmax.f32 %v1625_v33, %v6970_v8  ;;  %v1640_v5 = vmax.f32 %v1639_v16, %v11529_v59 }
 0x236   : > { %11525 = vst [vmem:[#allocation147_spill] sm:$0xff] %v6978_v48  ;;  %1193 = vmatmul.f32.gmra.mxu0 %v11527_v43  ;;  %v1633_v15 = vmax.f32 %v1632_v10, %v6978_v48  ;;  %v11540_v48 = vld [vmem:[#allocation48_spill] sm:$0xff] }
 0x237   : > { %1419 = vmatmul.f32.gmra.mxu2 %v11527_v43  ;;  %1627 = vmax.xlane.f32.xlu1 %v1626_v25 }
 0x238   : > { %1306 = vmatmul.f32.gmra.mxu1 %v11527_v43 }
 0x239   : > { %1532 = vmatmul.f32.gmra.mxu3 %v11527_v43 }
 0x23a   : > { %v6987_v0 = vpop.f32.mrf.mxu2 }
 0x23b   : > { %11528 = vst [vmem:[#allocation33_spill] sm:$0xff] %v6987_v0  ;;  %v1634_v33 = vmax.f32 %v1633_v15, %v6987_v0  ;;  %v6993_v62 = vpop.f32.mrf.mxu0 }
 0x23c   : > { %v6990_v36 = vpop.f32.mrf.mxu3  ;;  %11531 = vst [vmem:[#allocation149_spill] sm:$0xff] %v6993_v62  ;;  %v1641_v30 = vmax.f32 %v1640_v5, %v6993_v62 }
 0x23d   : > { %11530 = vst [vmem:[#allocation148_spill] sm:$0xff] %v6990_v36  ;;  %v1635_v25 = vmax.f32 %v1634_v33, %v6990_v36  ;;  %v6997_v37 = vpop.f32.mrf.mxu1  ;;  %v11539_v36 = vld [vmem:[#allocation43_spill] sm:$0xff] }
 0x23e   : > { %11532 = vst [vmem:[#allocation150_spill] sm:$0xff] %v6997_v37  ;;  %1196 = vmatmul.f32.gmra.mxu0 %v11533_v56  ;;  %v1642_v16 = vmax.f32 %v1641_v30, %v6997_v37  ;;  %v11537_v30 = vld [vmem:[#allocation60_spill] sm:$0xff] }
 0x23f   : > { %1422 = vmatmul.f32.gmra.mxu2 %v11533_v56  ;;  %1636 = vmax.xlane.f32.xlu2 %v1635_v25 }
 0x240   : > { %1309 = vmatmul.f32.gmra.mxu1 %v11533_v56 }
 0x241   : > { %1535 = vmatmul.f32.gmra.mxu3 %v11533_v56  ;;  %v11536_v56 = vld [vmem:[#allocation55_spill] sm:$0xff] }
 0x242   : > { %v7004_v43 = vpop.f32.mrf.mxu2 }
 0x243   : > { %11534 = vst [vmem:[#allocation38_spill] sm:$0xff] %v7004_v43  ;;  %v1643_v5 = vmax.f32 %v1642_v16, %v7004_v43 }
 0x244   : > { %v7006_v10 = vpop.f32.mrf.mxu3 }
 0x245   : > { %11535 = vst [vmem:[#allocation151_spill] sm:$0xff] %v7006_v10  ;;  %v1644_v15 = vmax.f32 %v1643_v5, %v7006_v10 }
 0x246   : > { %1199 = vmatmul.f32.gmra.mxu0 %v6525_v44 }
 0x247   : > { %1425 = vmatmul.f32.gmra.mxu2 %v6525_v44  ;;  %1645 = vmax.xlane.f32.xlu1 %v1644_v15 }
 0x248   : > { %1312 = vmatmul.f32.gmra.mxu1 %v6525_v44 }
 0x249   : > { %1538 = vmatmul.f32.gmra.mxu3 %v6525_v44  ;;  %v7026_v44 = vpop.f32.mrf.mxu0 }
 0x24c   : > { %v7049_v43 = vpop.f32.mrf.mxu3 }
 0x24e   : > { %1202 = vmatmul.f32.gmra.mxu0 %v6543_v3 }
 0x24f   : > { %1428 = vmatmul.f32.gmra.mxu2 %v6543_v3 }
 0x250   : > { %1315 = vmatmul.f32.gmra.mxu1 %v6543_v3 }
 0x251   : > { %1541 = vmatmul.f32.gmra.mxu3 %v6543_v3  ;;  %v7032_v3 = vpop.f32.mrf.mxu1  ;;  %v7039_v33 = vpop.f32.mrf.mxu0 }
 0x256   : > { %1205 = vmatmul.f32.gmra.mxu0 %v6559_v35 }
 0x257   : > { %1431 = vmatmul.f32.gmra.mxu2 %v6559_v35 }
 0x258   : > { %1318 = vmatmul.f32.gmra.mxu1 %v6559_v35 }
 0x259   : > { %1544 = vmatmul.f32.gmra.mxu3 %v6559_v35  ;;  %v7034_v35 = vpop.f32.mrf.mxu2 }
 0x25e   : > { %1208 = vmatmul.f32.gmra.mxu0 %v11536_v56 }
 0x25f   : > { %1434 = vmatmul.f32.gmra.mxu2 %v11536_v56 }
 0x260   : > { %1321 = vmatmul.f32.gmra.mxu1 %v11536_v56 }
 0x261   : > { %1547 = vmatmul.f32.gmra.mxu3 %v11536_v56 }
 0x266   : > { %1211 = vmatmul.f32.gmra.mxu0 %v11537_v30 }
 0x267   : > { %1437 = vmatmul.f32.gmra.mxu2 %v11537_v30 }
 0x268   : > { %1324 = vmatmul.f32.gmra.mxu1 %v11537_v30 }
 0x269   : > { %1550 = vmatmul.f32.gmra.mxu3 %v11537_v30  ;;  %v7046_v30 = vpop.f32.mrf.mxu1 }
 0x26e   : > { %1214 = vmatmul.f32.gmra.mxu0 %v6604_v38 }
 0x26f   : > { %1440 = vmatmul.f32.gmra.mxu2 %v6604_v38 }
 0x270   : > { %1327 = vmatmul.f32.gmra.mxu1 %v6604_v38 }
 0x271   : > { %1553 = vmatmul.f32.gmra.mxu3 %v6604_v38  ;;  %v11538_v38 = vld [vmem:[#allocation44_spill] sm:$0xff] }
 0x272   : > { %v1565_v25 = vpop.xlane.xlu0 %1564  ;;  %v1647_v0 = vmax.f32 %v11539_v36, %v11538_v38  ;;  %v11546_v36 = vld [vmem:[#allocation45_spill] sm:$0xff] }
 0x273   : > { %v1845_v16 = vsub.f32 %v6357_v12, %v1565_v25  ;;  %v1846_v5 = vsub.f32 %v6359_v13, %v1565_v25  ;;  %v1847_v15 = vsub.f32 %v6369_v19, %v1565_v25  ;;  %v1848_v56 = vsub.f32 %v6371_v20, %v1565_v25  ;;  %v7054_v12 = vpop.f32.mrf.mxu2  ;;  %v11541_v20 = vld [vmem:[#allocation47_spill] sm:$0xff] }
 0x274   : > { %v1849_v10 = vsub.f32 %v6814_v55, %v1565_v25  ;;  %v1850_v59 = vsub.f32 %v6819_v41, %v1565_v25  ;;  %v1851_v13 = vsub.f32 %v6827_v39, %v1565_v25  ;;  %v1656_v8 = vmax.f32 %v11541_v20, %v11540_v48  ;;  %v11549_v20 = vld [vmem:[#allocation58_spill] sm:$0xff] }
 0x275   : > { %v2101_v37 = vmul.f32 1.442695, %v1845_v16  ;;  %v2103_v62 = vmul.f32 1.442695, %v1846_v5  ;;  %v2105_v19 = vmul.f32 1.442695, %v1847_v15  ;;  %v1665_v55 = vmax.f32 %v11543_v60, %v11542_v52 }
 0x276   : > { %v2107_v9 = vmul.f32 1.442695, %v1848_v56  ;;  %v11544_v16 = vld [vmem:[#allocation57_spill] sm:$0xff]  ;;  %v11545_v5 = vld [vmem:[#allocation56_spill] sm:$0xff]  ;;  %v1852_v41 = vsub.f32 %v6830_v2, %v1565_v25  ;;  %v2109_v38 = vmul.f32 1.442695, %v1849_v10  ;;  %v1648_v4 = vmax.f32 %v1647_v0, %v11546_v36 }
 0x277   : > { %5121 = vpow2.f32 %v2101_v37  ;;  %v1674_v18 = vmax.f32 %v11545_v5, %v11544_v16  ;;  %v7066_v39 = vmax.f32 %v1656_v8, %v11547_v21  ;;  %v2111_v15 = vmul.f32 1.442695, %v1850_v59  ;;  %v7074_v37 = vpop.f32.mrf.mxu0 }
 0x278   : > { %5123 = vpow2.f32 %v2103_v62  ;;  %v7069_v48 = vmax.f32 %v1665_v55, %v11548_v6  ;;  %11550 = vst [vmem:[#allocation55_spill] sm:$0xff] %v7074_v37  ;;  %v2113_v16 = vmul.f32 1.442695, %v1851_v13  ;;  %v2115_v0 = vmul.f32 1.442695, %v1852_v41 }
 0x279   : > { %v7072_v52 = vmax.f32 %v1674_v18, %v11549_v20  ;;  %5125 = vpow2.f32 %v2105_v19 }
 0x27a   : > { %v1574_v56 = vpop.xlane.xlu0 %1573  ;;  %5127 = vpow2.f32 %v2107_v9  ;;  %v7087_v9 = vpop.f32.mrf.mxu1 }
 0x27b   : > { %v1853_v2 = vsub.f32 %v6376_v24, %v1574_v56  ;;  %v1854_v62 = vsub.f32 %v6378_v26, %v1574_v56  ;;  %v1855_v8 = vsub.f32 %v6385_v28, %v1574_v56  ;;  %5129 = vpow2.f32 %v2109_v38  ;;  %v11551_v24 = vld [vmem:[#allocation46_spill] sm:$0xff]  ;;  %11552 = vst [vmem:[#allocation60_spill] sm:$0xff] %v7087_v9  ;;  %v7091_v38 = vpop.f32.mrf.mxu3  ;;  %v7101_v20 = vpop.f32.mrf.mxu2 }
 0x27c   : > { %v1856_v59 = vsub.f32 %v6387_v29, %v1574_v56  ;;  %v1857_v10 = vsub.f32 %v6833_v31, %v1574_v56  ;;  %5131 = vpow2.f32 %v2111_v15  ;;  %v1858_v13 = vsub.f32 %v6838_v23, %v1574_v56  ;;  %11556 = vst [vmem:[#allocation46_spill] sm:$0xff] %v7101_v20 }
 0x27d   : > { %v7081_v18 = vpop.eup %5121  ;;  %v2117_v25 = vmul.f32 1.442695, %v1853_v2  ;;  %v2119_v55 = vmul.f32 1.442695, %v1854_v62  ;;  %v1649_v26 = vmax.f32 %v1648_v4, %v11551_v24  ;;  %5133 = vpow2.f32 %v2113_v16  ;;  %v11554_v2 = vld [vmem:[#allocation50_spill] sm:$0xff] }
 0x27e   : > { %v7084_v19 = vpop.eup %5123  ;;  %v1859_v28 = vsub.f32 %v6847_v7, %v1574_v56  ;;  %v1860_v29 = vsub.f32 %v6850_v14, %v1574_v56  ;;  %v2121_v41 = vmul.f32 1.442695, %v1855_v8  ;;  %v2123_v15 = vmul.f32 1.442695, %v1856_v59  ;;  %v11555_v62 = vld [vmem:[#allocation54_spill] sm:$0xff]  ;;  %v11557_v56 = vld [vmem:[#allocation59_spill] sm:$0xff] }
 0x27f   : > { %v2613_v31 = vadd.f32 %v7084_v19, %v7081_v18  ;;  %5135 = vpow2.f32 %v2117_v25  ;;  %v7095_v23 = vpop.eup %5125  ;;  %v1658_v4 = vmax.f32 %v7066_v39, %v11554_v2  ;;  %v2125_v14 = vmul.f32 1.442695, %v1857_v10 }
 0x280   : > { %11553 = vst [vmem:[#allocation45_spill] sm:$0xff] %v7095_v23  ;;  %5137 = vpow2.f32 %v2119_v55  ;;  %v7103_v7 = vpop.eup %5127  ;;  %v2127_v59 = vmul.f32 1.442695, %v1858_v13  ;;  %v1650_v39 = vmax.f32 %v1649_v26, %v7026_v44  ;;  %v2129_v16 = vmul.f32 1.442695, %v1859_v28  ;;  %v11561_v13 = vld [vmem:[#allocation62_spill] sm:$0xff] }
 0x281   : > { %5139 = vpow2.f32 %v2115_v0  ;;  %v2614_v8 = vadd.f32 %v7095_v23, %v2613_v31  ;;  %v7108_v25 = vpop.eup %5129  ;;  %v2131_v60 = vmul.f32 1.442695, %v1860_v29  ;;  %v11562_v31 = vld [vmem:[#allocation61_spill] sm:$0xff]  ;;  %v7120_v23 = vpop.f32.mrf.mxu0 }
 0x282   : > { %11558 = vst [vmem:[#allocation152_spill] sm:$0xff] %v7108_v25  ;;  %v1583_v6 = vpop.xlane.xlu1 %1582  ;;  %5141 = vpow2.f32 %v2121_v41  ;;  %v7111_v2 = vpop.eup %5131  ;;  %v1683_v21 = vmax.f32 %v11562_v31, %v11561_v13 }
 0x283   : > { %11559 = vst [vmem:[#allocation153_spill] sm:$0xff] %v7111_v2  ;;  %v1861_v10 = vsub.f32 %v6391_v32, %v1583_v6  ;;  %v1862_v55 = vsub.f32 %v6393_v34, %v1583_v6  ;;  %v2615_v5 = vadd.f32 %v7103_v7, %v2614_v8  ;;  %5143 = vpow2.f32 %v2123_v15  ;;  %v7116_v0 = vpop.eup %5133 }
 0x284   : > { %11560 = vst [vmem:[#allocation154_spill] sm:$0xff] %v7116_v0  ;;  %5145 = vpow2.f32 %v2125_v14  ;;  %v1863_v26 = vsub.f32 %v6403_v40, %v1583_v6  ;;  %v1864_v28 = vsub.f32 %v6405_v42, %v1583_v6  ;;  %v1651_v8 = vmax.f32 %v1650_v39, %v7032_v3 }
 0x285   : > { %11563 = vst [vmem:[#allocation155_spill] sm:$0xff] %v7120_v23  ;;  %v7124_v29 = vpop.eup %5135  ;;  %v2133_v32 = vmul.f32 1.442695, %v1861_v10  ;;  %v2135_v41 = vmul.f32 1.442695, %v1862_v55  ;;  %v2616_v34 = vadd.f32 %v7108_v25, %v2615_v5  ;;  %5147 = vpow2.f32 %v2127_v59  ;;  %v7140_v10 = vpop.f32.mrf.mxu1 }
 0x286   : > { %v7127_v15 = vpop.eup %5137  ;;  %5149 = vpow2.f32 %v2129_v16  ;;  %v1865_v13 = vsub.f32 %v6853_v57, %v1583_v6  ;;  %v1866_v14 = vsub.f32 %v6858_v17, %v1583_v6  ;;  %v1867_v5 = vsub.f32 %v6867_v47, %v1583_v6  ;;  %11566 = vst [vmem:[#allocation158_spill] sm:$0xff] %v7140_v10  ;;  %v7145_v55 = vpop.f32.mrf.mxu3 }
 0x287   : > { %11564 = vst [vmem:[#allocation156_spill] sm:$0xff] %v7127_v15  ;;  %v7132_v31 = vpop.eup %5139  ;;  %v2617_v40 = vadd.f32 %v7111_v2, %v2616_v34  ;;  %5151 = vpow2.f32 %v2131_v60  ;;  %v2622_v42 = vadd.f32 %v7127_v15, %v7124_v29  ;;  %v1868_v16 = vsub.f32 %v6870_v11, %v1583_v6  ;;  %v7152_v15 = vpop.f32.mrf.mxu2 }
 0x288   : > { %11565 = vst [vmem:[#allocation157_spill] sm:$0xff] %v7132_v31  ;;  %v7138_v59 = vpop.eup %5141  ;;  %5153 = vpow2.f32 %v2133_v32  ;;  %v2137_v57 = vmul.f32 1.442695, %v1863_v26  ;;  %v2139_v39 = vmul.f32 1.442695, %v1864_v28  ;;  %v1659_v25 = vmax.f32 %v1658_v4, %v7039_v33 }
 0x289   : > { %v7143_v17 = vpop.eup %5143  ;;  %11567 = vst [vmem:[#allocation159_spill] sm:$0xff] %v7145_v55  ;;  %v2618_v60 = vadd.f32 %v7116_v0, %v2617_v40  ;;  %v2623_v34 = vadd.f32 %v7138_v59, %v2622_v42  ;;  %5155 = vpow2.f32 %v2135_v41  ;;  %v2141_v2 = vmul.f32 1.442695, %v1865_v13 }
 0x28a   : > { %v7149_v47 = vpop.eup %5145  ;;  %11569 = vst [vmem:[#allocation161_spill] sm:$0xff] %v7152_v15  ;;  %v7154_v6 = vpop.xlane.xlu1 %1591  ;;  %5157 = vpow2.f32 %v2137_v57  ;;  %v2143_v11 = vmul.f32 1.442695, %v1866_v14  ;;  %v2145_v26 = vmul.f32 1.442695, %v1867_v5  ;;  %v1652_v42 = vmax.f32 %v1651_v8, %v7034_v35 }
 0x28b   : > { %11568 = vst [vmem:[#allocation160_spill] sm:$0xff] %v7149_v47  ;;  %v7156_v28 = vpop.eup %5147  ;;  %v1869_v32 = vsub.f32 %v6410_v45, %v7154_v6  ;;  %v1870_v41 = vsub.f32 %v6412_v46, %v7154_v6  ;;  %v2619_v13 = vadd.f32 %v7132_v31, %v2618_v60  ;;  %v2624_v40 = vadd.f32 %v7143_v17, %v2623_v34  ;;  %v11573_v34 = vld [vmem:[#allocation63_spill] sm:$0xff]  ;;  %v7179_v8 = vpop.f32.mrf.mxu0 }
 0x28c   : > { %11570 = vst [vmem:[#allocation162_spill] sm:$0xff] %v7156_v28  ;;  %v7164_v4 = vpop.eup %5149  ;;  %5159 = vpow2.f32 %v2139_v39  ;;  %v2147_v57 = vmul.f32 1.442695, %v1868_v16  ;;  %v1871_v14 = vsub.f32 %v6419_v50, %v7154_v6  ;;  %v1872_v46 = vsub.f32 %v6421_v51, %v7154_v6 }
 0x28d   : > { %11571 = vst [vmem:[#allocation163_spill] sm:$0xff] %v7164_v4  ;;  %v7169_v5 = vpop.eup %5151  ;;  %v2149_v0 = vmul.f32 1.442695, %v1869_v32  ;;  %2620 = vadd.xlane.f32.xlu0 %v2619_v13  ;;  %v2625_v45 = vadd.f32 %v7149_v47, %v2624_v40  ;;  %5161 = vpow2.f32 %v2141_v2  ;;  %v7177_v31 = vmax.f32 %v1683_v21, %v11573_v34 }
 0x28e   : > { %11572 = vst [vmem:[#allocation164_spill] sm:$0xff] %v7169_v5  ;;  %v7174_v60 = vpop.eup %5153  ;;  %v2151_v16 = vmul.f32 1.442695, %v1870_v41  ;;  %5163 = vpow2.f32 %v2143_v11  ;;  %v1873_v50 = vsub.f32 %v6873_v22, %v7154_v6  ;;  %v1660_v32 = vmax.f32 %v1659_v25, %v7046_v30 }
 0x28f   : > { %11574 = vst [vmem:[#allocation165_spill] sm:$0xff] %v7179_v8  ;;  %v7183_v39 = vpop.eup %5155  ;;  %v2626_v2 = vadd.f32 %v7156_v28, %v2625_v45  ;;  %5165 = vpow2.f32 %v2145_v26  ;;  %v1874_v51 = vsub.f32 %v6878_v58, %v7154_v6  ;;  %v1875_v11 = vsub.f32 %v6887_v49, %v7154_v6  ;;  %v7199_v45 = vpop.f32.mrf.mxu1 }
 0x290   : > { %11575 = vst [vmem:[#allocation166_spill] sm:$0xff] %v7183_v39  ;;  %v7189_v13 = vpop.eup %5157  ;;  %5167 = vpow2.f32 %v2147_v57  ;;  %v2631_v21 = vadd.f32 %v7183_v39, %v7174_v60  ;;  %v2153_v22 = vmul.f32 1.442695, %v1871_v14  ;;  %v1653_v25 = vmax.f32 %v1652_v42, %v7049_v43  ;;  %v11762_v39 = vld [vmem:[#allocation92_spill] sm:$0xff] }
 0x291   : > { %11576 = vst [vmem:[#allocation167_spill] sm:$0xff] %v7189_v13  ;;  %v2627_v41 = vadd.f32 %v7164_v4, %v2626_v2  ;;  %5169 = vpow2.f32 %v2149_v0  ;;  %v2155_v40 = vmul.f32 1.442695, %v1872_v46  ;;  %v1661_v28 = vmax.f32 %v1660_v32, %v7054_v12  ;;  %v7214_v4 = vpop.f32.mrf.mxu3 }
 0x292   : > { %v7197_v26 = vpop.eup %5159  ;;  %11578 = vst [vmem:[#allocation169_spill] sm:$0xff] %v7199_v45  ;;  %v7201_v58 = vpop.xlane.xlu2 %1600  ;;  %v2632_v57 = vadd.f32 %v7189_v13, %v2631_v21  ;;  %5171 = vpow2.f32 %v2151_v16  ;;  %v2157_v47 = vmul.f32 1.442695, %v1873_v50  ;;  %v2159_v46 = vmul.f32 1.442695, %v1874_v51 }
 0x293   : > { %11577 = vst [vmem:[#allocation168_spill] sm:$0xff] %v7197_v26  ;;  %v7205_v49 = vpop.eup %5161  ;;  %v1877_v14 = vsub.f32 %v6425_v53, %v7201_v58  ;;  %v1878_v0 = vsub.f32 %v6427_v54, %v7201_v58  ;;  %v2628_v42 = vadd.f32 %v7169_v5, %v2627_v41  ;;  %v7216_v21 = vpop.f32.mrf.mxu2  ;;  %5173 = vpow2.f32 %v2153_v22 }
 0x294   : > { %11579 = vst [vmem:[#allocation170_spill] sm:$0xff] %v7205_v49  ;;  %v7212_v2 = vpop.eup %5163  ;;  %v2633_v16 = vadd.f32 %v7197_v26, %v2632_v57  ;;  %v2161_v50 = vmul.f32 1.442695, %v1875_v11  ;;  %v1879_v32 = vsub.f32 %v6437_v61, %v7201_v58  ;;  %v11584_v54 = vmax.f32 %v7069_v48, %v11555_v62  ;;  %v11587_v48 = vld [vmem:[#allocation66_spill] sm:$0xff]  ;;  %v447_v26 = vld [vmem:[%s7527_s21 + $0x190] sm:$0xff] }
 0x295   : > { %11580 = vst [vmem:[#allocation171_spill] sm:$0xff] %v7212_v2  ;;  %v7221_v53 = vpop.eup %5165  ;;  %v2165_v41 = vmul.f32 1.442695, %v1877_v14  ;;  %2629 = vadd.xlane.f32.xlu2 %v2628_v42  ;;  %1654 = vmax.xlane.f32.xlu0 %v1653_v25  ;;  %v1876_v5 = vsub.f32 %v6890_v27, %v7154_v6  ;;  %5175 = vpow2.f32 %v2155_v40  ;;  %v2167_v11 = vmul.f32 1.442695, %v1878_v0  ;;  %v7243_v40 = vpop.f32.mrf.mxu0 }
 0x296   : > { %11581 = vst [vmem:[#allocation172_spill] sm:$0xff] %v7214_v4  ;;  %v1668_v51 = vmax.f32 %v11584_v54, %v7074_v37  ;;  %v7229_v57 = vpop.eup %5167  ;;  %v2634_v22 = vadd.f32 %v7205_v49, %v2633_v16  ;;  %5177 = vpow2.f32 %v2157_v47  ;;  %v1880_v61 = vsub.f32 %v6439_v63, %v7201_v58  ;;  %v11588_v54 = vld [vmem:[#allocation65_spill] sm:$0xff] }
 0x297   : > { %11582 = vst [vmem:[#allocation173_spill] sm:$0xff] %v7216_v21  ;;  %v7234_v34 = vpop.eup %5169  ;;  %v1692_v14 = vmax.f32 %v11588_v54, %v11587_v48  ;;  %v1662_v25 = vmax.f32 %v1661_v28, %v7091_v38  ;;  %5179 = vpow2.f32 %v2159_v46  ;;  %v1881_v27 = vsub.f32 %v6893_v1, %v7201_v58  ;;  %v11591_v63 = vld [vmem:[#allocation133_spill] sm:$0xff]  ;;  %v7267_v37 = vpop.f32.mrf.mxu1 }
 0x298   : > { %11583 = vst [vmem:[#allocation174_spill] sm:$0xff] %v7221_v53  ;;  %v7241_v6 = vpop.eup %5171  ;;  %v2635_v47 = vadd.f32 %v7212_v2, %v2634_v22  ;;  %5181 = vpow2.f32 %v2161_v50  ;;  %v1882_v0 = vsub.f32 %v11591_v63, %v7201_v58  ;;  %v2169_v42 = vmul.f32 1.442695, %v1879_v32  ;;  %v11593_v22 = vld [vmem:[#allocation134_spill] sm:$0xff]  ;;  %v11595_v32 = vld [vmem:[#allocation19_spill] sm:$0xff] }
 0x299   : > { %11585 = vst [vmem:[#allocation175_spill] sm:$0xff] %v7229_v57  ;;  %v1669_v16 = vmax.f32 %v1668_v51, %v7087_v9  ;;  %v2163_v49 = vmul.f32 1.442695, %v1876_v5  ;;  %v2640_v28 = vadd.f32 %v7241_v6, %v7234_v34  ;;  %5183 = vpow2.f32 %v2165_v41  ;;  %v7251_v46 = vpop.eup %5173  ;;  %v11596_v51 = vld [vmem:[#allocation20_spill] sm:$0xff]  ;;  %v7279_v62 = vpop.f32.mrf.mxu3 }
 0x29a   : > { %11586 = vst [vmem:[#allocation176_spill] sm:$0xff] %v7234_v34  ;;  %v7253_v1 = vpop.xlane.xlu2 %1609  ;;  %v2636_v48 = vadd.f32 %v7221_v53, %v2635_v47  ;;  %v1883_v50 = vsub.f32 %v11593_v22, %v7201_v58  ;;  %5185 = vpow2.f32 %v2167_v11  ;;  %v2171_v2 = vmul.f32 1.442695, %v1880_v61  ;;  %v11599_v61 = vld [vmem:[#allocation21_spill] sm:$0xff] }
 0x29b   : > { %11589 = vst [vmem:[#allocation177_spill] sm:$0xff] %v7241_v6  ;;  %v7258_v63 = vpop.eup %5175  ;;  %v1885_v5 = vsub.f32 %v11595_v32, %v7253_v1  ;;  %v1886_v54 = vsub.f32 %v11596_v51, %v7253_v1  ;;  %v2641_v41 = vadd.f32 %v7251_v46, %v2640_v28  ;;  %v2173_v9 = vmul.f32 1.442695, %v1881_v27  ;;  %v11601_v27 = vld [vmem:[#allocation135_spill] sm:$0xff] }
 0x29c   : > { %11590 = vst [vmem:[#allocation178_spill] sm:$0xff] %v7243_v40  ;;  %v7265_v6 = vpop.eup %5177  ;;  %v2637_v47 = vadd.f32 %v7229_v57, %v2636_v48  ;;  %5187 = vpow2.f32 %v2169_v42  ;;  %v2175_v11 = vmul.f32 1.442695, %v1882_v0  ;;  %v1887_v22 = vsub.f32 %v11599_v61, %v7253_v1  ;;  %v7281_v48 = vpop.f32.mrf.mxu2 }
 0x29d   : > { %11592 = vst [vmem:[#allocation133_spill] sm:$0xff] %v7251_v46  ;;  %v7272_v53 = vpop.eup %5179  ;;  %v2181_v32 = vmul.f32 1.442695, %v1885_v5  ;;  %1663 = vmax.xlane.f32.xlu2 %v1662_v25  ;;  %5189 = vpow2.f32 %v2163_v49  ;;  %v2642_v51 = vadd.f32 %v7258_v63, %v2641_v41  ;;  %v1884_v28 = vsub.f32 %v11601_v27, %v7201_v58  ;;  %v11605_v5 = vld [vmem:[#allocation22_spill] sm:$0xff]  ;;  %v11607_v41 = vld [vmem:[#allocation67_spill] sm:$0xff] }
 0x29e   : > { %11594 = vst [vmem:[#allocation134_spill] sm:$0xff] %v7258_v63  ;;  %v7277_v46 = vpop.eup %5181  ;;  %v2183_v0 = vmul.f32 1.442695, %v1886_v54  ;;  %2638 = vadd.xlane.f32.xlu1 %v2637_v47  ;;  %v1670_v42 = vmax.f32 %v1669_v16, %v7101_v20  ;;  %5191 = vpow2.f32 %v2171_v2  ;;  %v1888_v25 = vsub.f32 %v11605_v5, %v7253_v1  ;;  %v11610_v2 = vld [vmem:[#allocation136_spill] sm:$0xff] }
 0x29f   : > { %11597 = vst [vmem:[#allocation19_spill] sm:$0xff] %v7265_v6  ;;  %v7286_v49 = vpop.eup %5183  ;;  %v7289_v61 = vmax.f32 %v1692_v14, %v11607_v41  ;;  %v2643_v58 = vadd.f32 %v7265_v6, %v2642_v51  ;;  %5193 = vpow2.f32 %v2173_v9  ;;  %v2177_v27 = vmul.f32 1.442695, %v1883_v50  ;;  %v7305_v50 = vpop.f32.mrf.mxu0 }
 0x2a0   : > { %11598 = vst [vmem:[#allocation20_spill] sm:$0xff] %v7267_v37  ;;  %v7292_v57 = vpop.eup %5185  ;;  %v11609_v54 = vmax.f32 %v7072_v52, %v11557_v56  ;;  %5195 = vpow2.f32 %v2175_v11  ;;  %v1889_v47 = vsub.f32 %v11610_v2, %v7253_v1  ;;  %v2185_v5 = vmul.f32 1.442695, %v1887_v22  ;;  %v11613_v11 = vld [vmem:[#allocation137_spill] sm:$0xff] }
 0x2a1   : > { %11600 = vst [vmem:[#allocation21_spill] sm:$0xff] %v7272_v53  ;;  %v2644_v20 = vadd.f32 %v7272_v53, %v2643_v58  ;;  %v2179_v14 = vmul.f32 1.442695, %v1884_v28  ;;  %v2649_v51 = vadd.f32 %v7292_v57, %v7286_v49  ;;  %5197 = vpow2.f32 %v2181_v32  ;;  %v11615_v58 = vld [vmem:[#allocation138_spill] sm:$0xff] }
 0x2a2   : > { %11602 = vst [vmem:[#allocation135_spill] sm:$0xff] %v7277_v46  ;;  %v1677_v16 = vmax.f32 %v11609_v54, %v7120_v23  ;;  %v7303_v9 = vpop.eup %5187  ;;  %v7307_v6 = vpop.xlane.xlu0 %1618  ;;  %v1671_v52 = vmax.f32 %v1670_v42, %v7145_v55  ;;  %v1890_v54 = vsub.f32 %v11613_v11, %v7253_v1  ;;  %5199 = vpow2.f32 %v2183_v0  ;;  %v11617_v42 = vld [vmem:[#allocation24_spill] sm:$0xff] }
 0x2a3   : > { %11603 = vst [vmem:[#allocation179_spill] sm:$0xff] %v7279_v62  ;;  %v2187_v22 = vmul.f32 1.442695, %v1888_v25  ;;  %v7312_v2 = vpop.eup %5189  ;;  %v2645_v28 = vadd.f32 %v7277_v46, %v2644_v20  ;;  %5201 = vpow2.f32 %v2177_v27  ;;  %v2650_v32 = vadd.f32 %v7303_v9, %v2649_v51  ;;  %v11619_v27 = vld [vmem:[#allocation139_spill] sm:$0xff]  ;;  %v11621_v46 = vld [vmem:[#allocation64_spill] sm:$0xff] }
 0x2a4   : > { %11604 = vst [vmem:[#allocation180_spill] sm:$0xff] %v7281_v48  ;;  %v1891_v53 = vsub.f32 %v11615_v58, %v7253_v1  ;;  %v7318_v41 = vpop.eup %5191  ;;  %v1678_v23 = vmax.f32 %v1677_v16, %v7140_v10  ;;  %v1893_v56 = vsub.f32 %v11617_v42, %v7307_v6  ;;  %5203 = vpow2.f32 %v2185_v5  ;;  %v7333_v10 = vpop.f32.mrf.mxu1  ;;  %v11623_v5 = vld [vmem:[#allocation25_spill] sm:$0xff] }
 0x2a5   : > { %11606 = vst [vmem:[#allocation22_spill] sm:$0xff] %v7286_v49  ;;  %v2189_v0 = vmul.f32 1.442695, %v1889_v47  ;;  %v7323_v25 = vpop.eup %5193  ;;  %v2646_v11 = vadd.f32 %v7312_v2, %v2645_v28  ;;  %5205 = vpow2.f32 %v2179_v14  ;;  %v2651_v20 = vadd.f32 %v7318_v41, %v2650_v32  ;;  %v11625_v14 = vld [vmem:[#allocation70_spill] sm:$0xff]  ;;  %v11626_v32 = vld [vmem:[#allocation69_spill] sm:$0xff] }
 0x2a6   : > { %11608 = vst [vmem:[#allocation181_spill] sm:$0xff] %v7292_v57  ;;  %v1892_v51 = vsub.f32 %v11619_v27, %v7253_v1  ;;  %v7329_v58 = vpop.eup %5195  ;;  %v1685_v16 = vmax.f32 %v7177_v31, %v11621_v46  ;;  %v1894_v47 = vsub.f32 %v11623_v5, %v7307_v6  ;;  %1672 = vmax.xlane.f32.xlu1 %v1671_v52  ;;  %5207 = vpow2.f32 %v2187_v22  ;;  %v7348_v52 = vpop.f32.mrf.mxu2  ;;  %v11630_v22 = vld [vmem:[#allocation26_spill] sm:$0xff] }
 0x2a7   : > { %11611 = vst [vmem:[#allocation136_spill] sm:$0xff] %v7303_v9  ;;  %v2191_v42 = vmul.f32 1.442695, %v1890_v54  ;;  %v7337_v28 = vpop.eup %5197  ;;  %2647 = vadd.xlane.f32.xlu0 %v2646_v11  ;;  %v2652_v1 = vadd.f32 %v7323_v25, %v2651_v20  ;;  %v1679_v27 = vmax.f32 %v1678_v23, %v7152_v15  ;;  %v7346_v9 = vpop.f32.mrf.mxu3  ;;  %v2197_v54 = vmul.f32 1.442695, %v1893_v56  ;;  %v11632_v11 = vld [vmem:[#allocation68_spill] sm:$0xff] }
 0x2a8   : > { %11612 = vst [vmem:[#allocation182_spill] sm:$0xff] %v7305_v50  ;;  %v7343_v31 = vpop.eup %5199  ;;  %v1686_v46 = vmax.f32 %v1685_v16, %v7179_v8  ;;  %5209 = vpow2.f32 %v2189_v0  ;;  %v1895_v5 = vsub.f32 %v11630_v22, %v7307_v6  ;;  %v1694_v20 = vmax.f32 %v7289_v61, %v11632_v11  ;;  %v11634_v8 = vld [vmem:[#allocation71_spill] sm:$0xff] }
 0x2a9   : > { %11614 = vst [vmem:[#allocation137_spill] sm:$0xff] %v7312_v2  ;;  %v1701_v2 = vmax.f32 %v11626_v32, %v11625_v14  ;;  %v7352_v14 = vpop.eup %5201  ;;  %v2653_v23 = vadd.f32 %v7329_v58, %v2652_v1  ;;  %v2658_v16 = vadd.f32 %v7343_v31, %v7337_v28  ;;  %v2199_v56 = vmul.f32 1.442695, %v1894_v47  ;;  %v11635_v0 = vld [vmem:[#allocation27_spill] sm:$0xff]  ;;  %v7376_v47 = vpop.f32.mrf.mxu0 }
 0x2aa   : > { %11616 = vst [vmem:[#allocation138_spill] sm:$0xff] %v7318_v41  ;;  %v2193_v41 = vmul.f32 1.442695, %v1891_v53  ;;  %v2195_v53 = vmul.f32 1.442695, %v1892_v51  ;;  %5211 = vpow2.f32 %v2191_v42  ;;  %v1896_v22 = vsub.f32 %v11635_v0, %v7307_v6  ;;  %v7368_v57 = vpop.xlane.xlu1 %1627  ;;  %v11639_v42 = vld [vmem:[#allocation140_spill] sm:$0xff] }
 0x2ab   : > { %11618 = vst [vmem:[#allocation24_spill] sm:$0xff] %v7323_v25  ;;  %v7359_v25 = vpop.eup %5203  ;;  %v7362_v32 = vmax.f32 %v1701_v2, %v11634_v8  ;;  %v2654_v61 = vadd.f32 %v7352_v14, %v2653_v23  ;;  %v1680_v51 = vmax.f32 %v1679_v27, %v7214_v4  ;;  %v1687_v2 = vmax.f32 %v1686_v46, %v7199_v45  ;;  %v11644_v45 = vld [vmem:[#allocation29_spill] sm:$0xff] }
 0x2ac   : > { %11620 = vst [vmem:[#allocation139_spill] sm:$0xff] %v7329_v58  ;;  %v7366_v15 = vpop.eup %5205  ;;  %5213 = vpow2.f32 %v2193_v41  ;;  %v2659_v1 = vadd.f32 %v7359_v25, %v2658_v16  ;;  %v1897_v0 = vsub.f32 %v11639_v42, %v7307_v6  ;;  %v2201_v8 = vmul.f32 1.442695, %v1895_v5  ;;  %v11640_v41 = vld [vmem:[#allocation141_spill] sm:$0xff] }
 0x2ad   : > { %11622 = vst [vmem:[#allocation183_spill] sm:$0xff] %v7333_v10  ;;  %v7373_v58 = vpop.eup %5207  ;;  %5215 = vpow2.f32 %v2197_v54  ;;  %v2655_v11 = vadd.f32 %v7366_v15, %v2654_v61  ;;  %v1898_v27 = vsub.f32 %v11640_v41, %v7307_v6  ;;  %v2203_v42 = vmul.f32 1.442695, %v1896_v22  ;;  %v11645_v54 = vld [vmem:[#allocation30_spill] sm:$0xff]  ;;  %v11647_v41 = vld [vmem:[#allocation72_spill] sm:$0xff] }
 0x2ae   : > { %11624 = vst [vmem:[#allocation25_spill] sm:$0xff] %v7337_v28  ;;  %5217 = vpow2.f32 %v2195_v53  ;;  %v2660_v23 = vadd.f32 %v7373_v58, %v2659_v1  ;;  %v7384_v16 = vpop.eup %5209  ;;  %v1902_v5 = vsub.f32 %v11645_v54, %v7368_v57  ;;  %v1688_v61 = vmax.f32 %v1687_v2, %v7216_v21  ;;  %v11652_v54 = vld [vmem:[#allocation31_spill] sm:$0xff] }
 0x2af   : > { %11627 = vst [vmem:[#allocation184_spill] sm:$0xff] %v7343_v31  ;;  %v1901_v31 = vsub.f32 %v11644_v45, %v7368_v57  ;;  %5219 = vpow2.f32 %v2199_v56  ;;  %2656 = vadd.xlane.f32.xlu2 %v2655_v11  ;;  %1681 = vmax.xlane.f32.xlu0 %v1680_v51  ;;  %v11649_v45 = vld [vmem:[#allocation23_spill] sm:$0xff]  ;;  %v2205_v22 = vmul.f32 1.442695, %v1897_v0  ;;  %v2207_v2 = vmul.f32 1.442695, %v1898_v27 }
 0x2b0   : > { %11628 = vst [vmem:[#allocation185_spill] sm:$0xff] %v7346_v9  ;;  %v2661_v53 = vadd.f32 %v7384_v16, %v2660_v23  ;;  %v7394_v1 = vpop.eup %5211  ;;  %v1899_v56 = vsub.f32 %v11649_v45, %v7307_v6  ;;  %5221 = vpow2.f32 %v2201_v8  ;;  %v11651_v11 = vld [vmem:[#allocation75_spill] sm:$0xff]  ;;  %v7415_v45 = vpop.f32.mrf.mxu2  ;;  %v11656_v0 = vld [vmem:[#allocation142_spill] sm:$0xff] }
 0x2b1   : > { %11629 = vst [vmem:[#allocation186_spill] sm:$0xff] %v7348_v52  ;;  %v2213_v8 = vmul.f32 1.442695, %v1901_v31  ;;  %5223 = vpow2.f32 %v2203_v42  ;;  %v11660_v28 = vld [vmem:[#allocation143_spill] sm:$0xff]  ;;  %v11661_v42 = vld [vmem:[#allocation144_spill] sm:$0xff] }
 0x2b2   : > { %11631 = vst [vmem:[#allocation26_spill] sm:$0xff] %v7352_v14  ;;  %v11642_v14 = vld [vmem:[#allocation74_spill] sm:$0xff]  ;;  %v2662_v23 = vadd.f32 %v7394_v1, %v2661_v53  ;;  %v2215_v53 = vmul.f32 1.442695, %v1902_v5  ;;  %v7421_v27 = vpop.xlane.xlu2 %1636  ;;  %5225 = vpow2.f32 %v2205_v22  ;;  %v2209_v31 = vmul.f32 1.442695, %v1899_v56 }
 0x2b3   : > { %11633 = vst [vmem:[#allocation187_spill] sm:$0xff] %v7359_v25  ;;  %v11643_v25 = vld [vmem:[#allocation73_spill] sm:$0xff]  ;;  %5227 = vpow2.f32 %v2207_v2  ;;  %v11664_v56 = vld [vmem:[#allocation34_spill] sm:$0xff] }
 0x2b4   : > { %11636 = vst [vmem:[#allocation27_spill] sm:$0xff] %v7366_v15  ;;  %v1710_v46 = vmax.f32 %v11643_v25, %v11642_v14  ;;  %v1703_v15 = vmax.f32 %v7362_v32, %v11647_v41  ;;  %v7398_v14 = vpop.f32.mrf.mxu1  ;;  %v7402_v25 = vpop.eup %5213  ;;  %v1695_v32 = vmax.f32 %v1694_v20, %v7243_v40  ;;  %v11658_v20 = vld [vmem:[#allocation32_spill] sm:$0xff]  ;;  %v1909_v22 = vsub.f32 %v11664_v56, %v7421_v27 }
 0x2b5   : > { %11637 = vst [vmem:[#allocation188_spill] sm:$0xff] %v7373_v58  ;;  %v7410_v21 = vpop.eup %5215  ;;  %v7413_v41 = vpop.f32.mrf.mxu3  ;;  %v1900_v58 = vsub.f32 %v11656_v0, %v7307_v6  ;;  %v1905_v6 = vsub.f32 %v11660_v28, %v7368_v57  ;;  %v1906_v0 = vsub.f32 %v11661_v42, %v7368_v57  ;;  %5229 = vpow2.f32 %v2213_v8  ;;  %v11665_v42 = vld [vmem:[#allocation35_spill] sm:$0xff] }
 0x2b6   : > { %11638 = vst [vmem:[#allocation189_spill] sm:$0xff] %v7376_v47  ;;  %v7405_v51 = vmax.f32 %v1710_v46, %v11651_v11  ;;  %v7419_v46 = vpop.eup %5217  ;;  %v1904_v11 = vsub.f32 %v11658_v20, %v7368_v57  ;;  %v1696_v20 = vmax.f32 %v1695_v32, %v7267_v37  ;;  %v1910_v4 = vsub.f32 %v11665_v42, %v7421_v27 }
 0x2b7   : > { %11641 = vst [vmem:[#allocation140_spill] sm:$0xff] %v7384_v16  ;;  %v1903_v16 = vsub.f32 %v11652_v54, %v7368_v57  ;;  %v2663_v54 = vadd.f32 %v7402_v25, %v2662_v23  ;;  %v7427_v40 = vpop.eup %5219  ;;  %v2211_v28 = vmul.f32 1.442695, %v1900_v58  ;;  %5231 = vpow2.f32 %v2215_v53 }
 0x2b8   : > { %11646 = vst [vmem:[#allocation141_spill] sm:$0xff] %v7394_v1  ;;  %v1689_v1 = vmax.f32 %v1688_v61, %v7279_v62  ;;  %v2667_v23 = vadd.f32 %v7427_v40, %v7410_v21  ;;  %v7439_v62 = vpop.f32.mrf.mxu0  ;;  %5233 = vpow2.f32 %v2209_v31  ;;  %v1697_v32 = vmax.f32 %v1696_v20, %v7281_v48 }
 0x2b9   : > { %11648 = vst [vmem:[#allocation29_spill] sm:$0xff] %v7398_v14  ;;  %v2664_v5 = vadd.f32 %v7419_v46, %v2663_v54  ;;  %v2217_v61 = vmul.f32 1.442695, %v1903_v16  ;;  %v2219_v16 = vmul.f32 1.442695, %v1904_v11  ;;  %v7457_v11 = vmax.f32 %v1703_v15, %v7305_v50 }
 0x2ba   : > { %11650 = vst [vmem:[#allocation30_spill] sm:$0xff] %v7402_v25  ;;  %v7436_v25 = vpop.eup %5221  ;;  %1690 = vmax.xlane.f32.xlu2 %v1689_v1  ;;  %v2221_v56 = vmul.f32 1.442695, %v1905_v6  ;;  %v2223_v8 = vmul.f32 1.442695, %v1906_v0 }
 0x2bb   : > { %11653 = vst [vmem:[#allocation23_spill] sm:$0xff] %v7410_v21  ;;  %2665 = vadd.xlane.f32.xlu1 %v2664_v5  ;;  %v2668_v2 = vadd.f32 %v7436_v25, %v2667_v23  ;;  %v7446_v54 = vpop.eup %5223  ;;  %5235 = vpow2.f32 %v2217_v61  ;;  %v11668_v5 = vld [vmem:[#allocation36_spill] sm:$0xff]  ;;  %v2229_v31 = vmul.f32 1.442695, %v1909_v22  ;;  %v11671_v23 = vld [vmem:[#allocation145_spill] sm:$0xff]  ;;  %v7465_v61 = vpop.xlane.xlu1 %1645 }
 0x2bc   : > { %11654 = vst [vmem:[#allocation31_spill] sm:$0xff] %v7413_v41  ;;  %v1911_v1 = vsub.f32 %v11668_v5, %v7421_v27  ;;  %v7454_v42 = vpop.eup %5225  ;;  %v7459_v53 = vpop.f32.mrf.mxu1  ;;  %5237 = vpow2.f32 %v2211_v28  ;;  %v2231_v20 = vmul.f32 1.442695, %v1910_v4  ;;  %v1698_v28 = vmax.f32 %v1697_v32, %v7346_v9  ;;  %v11677_v4 = vld [vmem:[#allocation146_spill] sm:$0xff] }
 0x2bd   : > { %11655 = vst [vmem:[#allocation190_spill] sm:$0xff] %v7415_v45  ;;  %v2669_v58 = vadd.f32 %v7446_v54, %v2668_v2  ;;  %v7463_v6 = vpop.eup %5227  ;;  %5239 = vpow2.f32 %v2219_v16  ;;  %v11673_v2 = vld [vmem:[#allocation37_spill] sm:$0xff]  ;;  %v7472_v50 = vpop.f32.mrf.mxu3 }
 0x2be   : > { %11657 = vst [vmem:[#allocation142_spill] sm:$0xff] %v7419_v46  ;;  %v11667_v46 = vld [vmem:[#allocation28_spill] sm:$0xff]  ;;  %v1912_v5 = vsub.f32 %v11673_v2, %v7421_v27  ;;  %v7470_v15 = vpop.eup %5229  ;;  %v7474_v22 = vpop.f32.mrf.mxu2  ;;  %5241 = vpow2.f32 %v2221_v56 }
 0x2bf   : > { %11659 = vst [vmem:[#allocation32_spill] sm:$0xff] %v7427_v40  ;;  %v1907_v37 = vsub.f32 %v11667_v46, %v7368_v57  ;;  %v1908_v46 = vsub.f32 %v11671_v23, %v7368_v57  ;;  %v2670_v0 = vadd.f32 %v7454_v42, %v2669_v58  ;;  %v1913_v23 = vsub.f32 %v11677_v4, %v7421_v27  ;;  %v7479_v48 = vpop.eup %5231  ;;  %v11679_v58 = vld [vmem:[#allocation147_spill] sm:$0xff]  ;;  %v11683_v4 = vld [vmem:[#allocation40_spill] sm:$0xff] }
 0x2c0   : > { %11662 = vst [vmem:[#allocation143_spill] sm:$0xff] %v7436_v25  ;;  %5243 = vpow2.f32 %v2223_v8  ;;  %v1914_v2 = vsub.f32 %v11679_v58, %v7421_v27  ;;  %v11681_v25 = vld [vmem:[#allocation39_spill] sm:$0xff] }
 0x2c1   : > { %11663 = vst [vmem:[#allocation144_spill] sm:$0xff] %v7439_v62  ;;  %v2225_v57 = vmul.f32 1.442695, %v1907_v37  ;;  %v2671_v16 = vadd.f32 %v7463_v6, %v2670_v0  ;;  %v1917_v40 = vsub.f32 %v11681_v25, %v7465_v61  ;;  %v2227_v32 = vmul.f32 1.442695, %v1908_v46  ;;  %v11686_v46 = vld [vmem:[#allocation33_spill] sm:$0xff] }
 0x2c2   : > { %11666 = vst [vmem:[#allocation34_spill] sm:$0xff] %v7446_v54  ;;  %v7484_v54 = vpop.eup %5233  ;;  %v2676_v37 = vadd.f32 %v7479_v48, %v7470_v15  ;;  %5245 = vpow2.f32 %v2229_v31  ;;  %v1918_v0 = vsub.f32 %v11683_v4, %v7465_v61  ;;  %v1915_v31 = vsub.f32 %v11686_v46, %v7421_v27 }
 0x2c3   : > { %11669 = vst [vmem:[#allocation35_spill] sm:$0xff] %v7454_v42  ;;  %v2233_v42 = vmul.f32 1.442695, %v1911_v1  ;;  %v7490_v56 = vpop.eup %5235  ;;  %v2672_v8 = vadd.f32 %v7484_v54, %v2671_v16  ;;  %1699 = vmax.xlane.f32.xlu1 %v1698_v28  ;;  %5247 = vpow2.f32 %v2231_v20  ;;  %v2235_v1 = vmul.f32 1.442695, %v1912_v5  ;;  %v11688_v20 = vld [vmem:[#allocation41_spill] sm:$0xff] }
 0x2c4   : > { %11670 = vst [vmem:[#allocation28_spill] sm:$0xff] %v7459_v53  ;;  %v7495_v58 = vpop.eup %5237  ;;  %5249 = vpow2.f32 %v2225_v57  ;;  %v2677_v25 = vadd.f32 %v7490_v56, %v2676_v37  ;;  %v2239_v16 = vmul.f32 1.442695, %v1914_v2  ;;  %v1919_v5 = vsub.f32 %v11688_v20, %v7465_v61  ;;  %v11690_v37 = vld [vmem:[#allocation148_spill] sm:$0xff]  ;;  %v11692_v2 = vld [vmem:[#allocation42_spill] sm:$0xff] }
 0x2c5   : > { %11672 = vst [vmem:[#allocation36_spill] sm:$0xff] %v7463_v6  ;;  %v7497_v6 = vpop.f32.mrf.mxu0  ;;  %v2673_v4 = vadd.f32 %v7495_v58, %v2672_v8  ;;  %5251 = vpow2.f32 %v2233_v42  ;;  %v1916_v46 = vsub.f32 %v11690_v37, %v7421_v27  ;;  %v1705_v8 = vmax.f32 %v7457_v11, %v7333_v10  ;;  %v444_v11 = vld [vmem:[%s7527_s21 + $0x178] sm:$0xff] }
 0x2c6   : > { %11674 = vst [vmem:[#allocation145_spill] sm:$0xff] %v7470_v15  ;;  %v7502_v15 = vpop.eup %5239  ;;  %5253 = vpow2.f32 %v2227_v32  ;;  %v2247_v42 = vmul.f32 1.442695, %v1918_v0  ;;  %v1920_v20 = vsub.f32 %v11692_v2, %v7465_v61  ;;  %v2241_v37 = vmul.f32 1.442695, %v1915_v31  ;;  %v412_v0 = vld [vmem:[%s7527_s21 + $0x78] sm:$0xff]  ;;  %3831 = vmatpush.msra.mxu2 %v444_v11 }
 0x2c7   : > { %11675 = vst [vmem:[#allocation37_spill] sm:$0xff] %v7472_v50  ;;  %v7507_v28 = vpop.eup %5241  ;;  %v2678_v57 = vadd.f32 %v7502_v15, %v2677_v25  ;;  %2674 = vadd.xlane.f32.xlu0 %v2673_v4  ;;  %5255 = vpow2.f32 %v2235_v1  ;;  %v7522_v25 = vpop.f32.mrf.mxu1  ;;  %v460_v1 = vld [vmem:[%s7527_s21 + $0x1f8] sm:$0xff]  ;;  %v11697_v2 = vld [vmem:[#allocation149_spill] sm:$0xff]  ;;  %3605 = vmatpush.msra.mxu0 %v412_v0 }
 0x2c8   : > { %11676 = vst [vmem:[#allocation191_spill] sm:$0xff] %v7474_v22  ;;  %3944 = vmatpush.msra.mxu3 %v460_v1  ;;  %v11703_v11 = vld [vmem:[#allocation77_spill] sm:$0xff]  ;;  %v2251_v9 = vmul.f32 1.442695, %v1920_v20 }
 0x2c9   : > { %11678 = vst [vmem:[#allocation146_spill] sm:$0xff] %v7479_v48  ;;  %v2237_v48 = vmul.f32 1.442695, %v1913_v23  ;;  %v7512_v23 = vpop.eup %5243  ;;  %v2679_v27 = vadd.f32 %v7507_v28, %v2678_v57  ;;  %v1921_v57 = vsub.f32 %v11697_v2, %v7465_v61  ;;  %v11704_v2 = vld [vmem:[#allocation150_spill] sm:$0xff] }
 0x2ca   : > { %11680 = vst [vmem:[#allocation147_spill] sm:$0xff] %v7484_v54  ;;  %v2245_v54 = vmul.f32 1.442695, %v1917_v40  ;;  %v11694_v40 = vld [vmem:[#allocation76_spill] sm:$0xff] }
 0x2cb   : > { %11682 = vst [vmem:[#allocation39_spill] sm:$0xff] %v7490_v56  ;;  %v1712_v32 = vmax.f32 %v7405_v51, %v11694_v40  ;;  %5257 = vpow2.f32 %v2237_v48  ;;  %v1706_v51 = vmax.f32 %v1705_v8, %v7348_v52  ;;  %v2249_v48 = vmul.f32 1.442695, %v1919_v5  ;;  %v7541_v40 = vpop.f32.mrf.mxu2  ;;  %v11702_v5 = vld [vmem:[#allocation78_spill] sm:$0xff] }
 0x2cc   : > { %11684 = vst [vmem:[#allocation40_spill] sm:$0xff] %v7495_v58  ;;  %v7518_v58 = vpop.eup %5245  ;;  %5259 = vpow2.f32 %v2239_v16  ;;  %v2680_v10 = vadd.f32 %v7512_v23, %v2679_v27  ;;  %v428_v16 = vld [vmem:[%s7527_s21 + $0xf8] sm:$0xff]  ;;  %v1719_v0 = vmax.f32 %v11703_v11, %v11702_v5  ;;  %v1922_v52 = vsub.f32 %v11704_v2, %v7465_v61  ;;  %v11753_v11 = vld [vmem:[#allocation101_spill] sm:$0xff] }
 0x2cd   : > { %11685 = vst [vmem:[#allocation192_spill] sm:$0xff] %v7497_v6  ;;  %v7532_v4 = vpop.eup %5247  ;;  %5261 = vpow2.f32 %v2245_v54  ;;  %3718 = vmatpush.msra.mxu1 %v428_v16  ;;  %v11709_v16 = vld [vmem:[#allocation79_spill] sm:$0xff]  ;;  %v7566_v5 = vpop.f32.mrf.mxu0 }
 0x2ce   : > { %11687 = vst [vmem:[#allocation33_spill] sm:$0xff] %v7502_v15  ;;  %v7537_v31 = vpop.eup %5249  ;;  %v2243_v15 = vmul.f32 1.442695, %v1916_v46  ;;  %v2685_v56 = vadd.f32 %v7532_v4, %v7518_v58  ;;  %5263 = vpow2.f32 %v2247_v42  ;;  %v1713_v46 = vmax.f32 %v1712_v32, %v7376_v47  ;;  %v11750_v47 = vld [vmem:[#allocation97_spill] sm:$0xff] }
 0x2cf   : > { %11689 = vst [vmem:[#allocation41_spill] sm:$0xff] %v7507_v28  ;;  %v7539_v28 = vpop.f32.mrf.mxu3  ;;  %v7547_v8 = vpop.eup %5251  ;;  %v2681_v27 = vadd.f32 %v7537_v31, %v2680_v10  ;;  %5265 = vpow2.f32 %v2241_v37  ;;  %v2253_v42 = vmul.f32 1.442695, %v1921_v57  ;;  %v1720_v2 = vmax.f32 %v1719_v0, %v11709_v16  ;;  %v11711_v37 = vld [vmem:[#allocation151_spill] sm:$0xff] }
 0x2d0   : > { %11691 = vst [vmem:[#allocation148_spill] sm:$0xff] %v7512_v23  ;;  %v7553_v21 = vpop.eup %5253  ;;  %v2686_v54 = vadd.f32 %v7547_v8, %v2685_v56  ;;  %v1707_v23 = vmax.f32 %v1706_v51, %v7413_v41  ;;  %5267 = vpow2.f32 %v2249_v48  ;;  %v1924_v51 = vsub.f32 %v11711_v37, %v7465_v61  ;;  %v11752_v41 = vld [vmem:[#allocation102_spill] sm:$0xff] }
 0x2d1   : > { %11693 = vst [vmem:[#allocation42_spill] sm:$0xff] %v7518_v58  ;;  %v7558_v1 = vpop.eup %5255  ;;  %v2682_v10 = vadd.f32 %v7553_v21, %v2681_v27  ;;  %5269 = vpow2.f32 %v2243_v15  ;;  %v1714_v48 = vmax.f32 %v1713_v46, %v7398_v14  ;;  %v11749_v14 = vld [vmem:[#allocation98_spill] sm:$0xff]  ;;  %v1773_v49 = vmax.f32 %v11753_v11, %v11752_v41  ;;  %v415_v41 = vld [vmem:[%s7527_s21 + $0x90] sm:$0xff]  ;;  %v11759_v11 = vld [vmem:[#allocation103_spill] sm:$0xff] }
 0x2d2   : > { %11695 = vst [vmem:[#allocation193_spill] sm:$0xff] %v7522_v25  ;;  %v7563_v20 = vpop.eup %5257  ;;  %v2687_v56 = vadd.f32 %v7558_v1, %v2686_v54  ;;  %1708 = vmax.xlane.f32.xlu0 %v1707_v23  ;;  %5271 = vpow2.f32 %v2251_v9  ;;  %v11715_v54 = vld [vmem:[#allocation80_spill] sm:$0xff] }
 0x2d3   : > { %11696 = vst [vmem:[#allocation194_spill] sm:$0xff] %v7532_v4  ;;  %v11707_v4 = vld [vmem:[#allocation38_spill] sm:$0xff]  ;;  %v7570_v32 = vpop.eup %5259  ;;  %2683 = vadd.xlane.f32.xlu2 %v2682_v10  ;;  %5273 = vpow2.f32 %v2253_v42  ;;  %v1721_v23 = vmax.f32 %v1720_v2, %v11715_v54  ;;  %v2259_v10 = vmul.f32 1.442695, %v1924_v51  ;;  %v443_v51 = vld [vmem:[%s7527_s21 + $0x170] sm:$0xff]  ;;  %v11722_v54 = vld [vmem:[#allocation83_spill] sm:$0xff] }
 0x2d4   : > { %11698 = vst [vmem:[#allocation149_spill] sm:$0xff] %v7537_v31  ;;  %v1923_v58 = vsub.f32 %v11707_v4, %v7465_v61  ;;  %v2255_v4 = vmul.f32 1.442695, %v1922_v52  ;;  %v7574_v57 = vpop.eup %5261  ;;  %v2688_v0 = vadd.f32 %v7563_v20, %v2687_v56  ;;  %v1715_v52 = vmax.f32 %v1714_v48, %v7415_v45  ;;  %v11719_v56 = vld [vmem:[#allocation81_spill] sm:$0xff]  ;;  %v7598_v48 = vpop.f32.mrf.mxu2  ;;  %3832 = vmatpush.msra.mxu2 %v443_v51  ;;  %v458_v51 = vld [vmem:[%s7527_s21 + $0x1e8] sm:$0xff]  ;;  %v401_v45 = vld [vmem:[%s7527_s21 + $0x20] sm:$0xff] }
 0x2d5   : > { %11699 = vst [vmem:[#allocation195_spill] sm:$0xff] %v7539_v28  ;;  %v7578_v31 = vpop.eup %5263  ;;  %v1722_v2 = vmax.f32 %v1721_v23, %v7439_v62 }
 0x2d6   : > { %11700 = vst [vmem:[#allocation196_spill] sm:$0xff] %v7541_v40  ;;  %v2257_v15 = vmul.f32 1.442695, %v1923_v58  ;;  %v7580_v27 = vpop.eup %5265  ;;  %v2689_v9 = vadd.f32 %v7570_v32, %v2688_v0  ;;  %v2694_v61 = vadd.f32 %v7578_v31, %v7574_v57  ;;  %5275 = vpow2.f32 %v2255_v4  ;;  %v11718_v58 = vld [vmem:[#allocation82_spill] sm:$0xff] }
 0x2d7   : > { %11701 = vst [vmem:[#allocation197_spill] sm:$0xff] %v7547_v8  ;;  %v7589_v46 = vpop.eup %5267  ;;  %v1728_v37 = vmax.f32 %v11719_v56, %v11718_v58  ;;  %v1716_v56 = vmax.f32 %v1715_v52, %v7472_v50  ;;  %v410_v52 = vld [vmem:[%s7527_s21 + $0x68] sm:$0xff]  ;;  %v433_v8 = vld [vmem:[%s7527_s21 + $0x120] sm:$0xff] }
 0x2d8   : > { %11705 = vst [vmem:[#allocation150_spill] sm:$0xff] %v7553_v21  ;;  %v7583_v21 = vpop.f32.mrf.mxu1  ;;  %v7591_v42 = vpop.eup %5269  ;;  %v2690_v0 = vadd.f32 %v7580_v27, %v2689_v9  ;;  %5277 = vpow2.f32 %v2257_v15  ;;  %v411_v9 = vld [vmem:[%s7527_s21 + $0x70] sm:$0xff]  ;;  %v450_v50 = vld [vmem:[%s7527_s21 + $0x1a8] sm:$0xff] }
 0x2d9   : > { %11706 = vst [vmem:[#allocation198_spill] sm:$0xff] %v7558_v1  ;;  %v7602_v4 = vpop.eup %5271  ;;  %v1729_v58 = vmax.f32 %v1728_v37, %v11722_v54  ;;  %5279 = vpow2.f32 %v2259_v10  ;;  %v427_v15 = vld [vmem:[%s7527_s21 + $0xf0] sm:$0xff]  ;;  %v442_v37 = vld [vmem:[%s7527_s21 + $0x168] sm:$0xff]  ;;  %3606 = vmatpush.msra.mxu0 %v411_v9  ;;  %v425_v9 = vld [vmem:[%s7527_s21 + $0xe0] sm:$0xff]  ;;  %v1764_v1 = vmax.f32 %v11750_v47, %v11749_v14 }
 0x2da   : > { %11708 = vst [vmem:[#allocation38_spill] sm:$0xff] %v7563_v20  ;;  %v7596_v20 = vpop.f32.mrf.mxu3  ;;  %v2691_v23 = vadd.f32 %v7591_v42, %v2690_v0  ;;  %v7609_v16 = vpop.eup %5273  ;;  %v426_v10 = vld [vmem:[%s7527_s21 + $0xe8] sm:$0xff]  ;;  %3719 = vmatpush.msra.mxu1 %v427_v15  ;;  %3833 = vmatpush.msra.mxu2 %v442_v37  ;;  %v408_v15 = vld [vmem:[%s7527_s21 + $0x58] sm:$0xff]  ;;  %v11757_v47 = vld [vmem:[#allocation95_spill] sm:$0xff] }
 0x2db   : > { %11710 = vst [vmem:[#allocation199_spill] sm:$0xff] %v7570_v32  ;;  %v2695_v32 = vadd.f32 %v7589_v46, %v2694_v61  ;;  %v459_v61 = vld [vmem:[%s7527_s21 + $0x1f0] sm:$0xff]  ;;  %1717 = vmax.xlane.f32.xlu2 %v1716_v56  ;;  %v441_v56 = vld [vmem:[%s7527_s21 + $0x160] sm:$0xff]  ;;  %3607 = vmatpush.msra.mxu0 %v410_v52  ;;  %v448_v14 = vld [vmem:[%s7527_s21 + $0x198] sm:$0xff] }
 0x2dc   : > { %11712 = vst [vmem:[#allocation151_spill] sm:$0xff] %v7574_v57  ;;  %2692 = vadd.xlane.f32.xlu1 %v2691_v23  ;;  %v7620_v0 = vpop.eup %5275  ;;  %3945 = vmatpush.msra.mxu3 %v459_v61  ;;  %v440_v61 = vld [vmem:[%s7527_s21 + $0x158] sm:$0xff] }
 0x2dd   : > { %11713 = vst [vmem:[#allocation200_spill] sm:$0xff] %v7578_v31  ;;  %v2696_v62 = vadd.f32 %v7602_v4, %v2695_v32  ;;  %3720 = vmatpush.msra.mxu1 %v426_v10  ;;  %3834 = vmatpush.msra.mxu2 %v441_v56  ;;  %v407_v10 = vld [vmem:[%s7527_s21 + $0x50] sm:$0xff]  ;;  %v11744_v31 = vld [vmem:[#allocation90_spill] sm:$0xff] }
 0x2de   : > { %11714 = vst [vmem:[#allocation201_spill] sm:$0xff] %v7580_v27  ;;  %v1723_v27 = vmax.f32 %v1722_v2, %v7459_v53  ;;  %v11726_v2 = vld [vmem:[#allocation84_spill] sm:$0xff]  ;;  %v7630_v53 = vpop.eup %5277  ;;  %3946 = vmatpush.msra.mxu3 %v458_v51  ;;  %v7644_v51 = vpop.f32.mrf.mxu2  ;;  %v439_v56 = vld [vmem:[%s7527_s21 + $0x150] sm:$0xff] }
 0x2df   : > { %11716 = vst [vmem:[#allocation202_spill] sm:$0xff] %v7589_v46  ;;  %v7615_v46 = vpop.f32.mrf.mxu0  ;;  %v2697_v32 = vadd.f32 %v7609_v16, %v2696_v62  ;;  %v409_v62 = vld [vmem:[%s7527_s21 + $0x60] sm:$0xff]  ;;  %v7640_v37 = vpop.eup %5279  ;;  %3721 = vmatpush.msra.mxu1 %v425_v9  ;;  %3835 = vmatpush.msra.mxu2 %v440_v61 }
 0x2e0   : > { %11717 = vst [vmem:[#allocation203_spill] sm:$0xff] %v7591_v42  ;;  %v1730_v42 = vmax.f32 %v1729_v58, %v11726_v2  ;;  %v1724_v23 = vmax.f32 %v1723_v27, %v7474_v22  ;;  %v7635_v2 = vpop.f32.mrf.mxu1  ;;  %3608 = vmatpush.msra.mxu0 %v409_v62 }
 0x2e1   : > { %11720 = vst [vmem:[#allocation204_spill] sm:$0xff] %v7596_v20  ;;  %v2698_v54 = vadd.f32 %v7620_v0, %v2697_v32  ;;  %v456_v32 = vld [vmem:[%s7527_s21 + $0x1d8] sm:$0xff]  ;;  %3836 = vmatpush.msra.mxu2 %v439_v56  ;;  %v438_v56 = vld [vmem:[%s7527_s21 + $0x148] sm:$0xff] }
 0x2e2   : > { %11721 = vst [vmem:[#allocation205_spill] sm:$0xff] %v7602_v4  ;;  %v1731_v58 = vmax.f32 %v1730_v42, %v7497_v6  ;;  %v7642_v52 = vpop.f32.mrf.mxu3  ;;  %3609 = vmatpush.msra.mxu0 %v408_v15  ;;  %v436_v6 = vld [vmem:[%s7527_s21 + $0x138] sm:$0xff] }
 0x2e3   : > { %11723 = vst [vmem:[#allocation206_spill] sm:$0xff] %v7609_v16  ;;  %v457_v16 = vld [vmem:[%s7527_s21 + $0x1e0] sm:$0xff]  ;;  %v2699_v27 = vadd.f32 %v7630_v53, %v2698_v54  ;;  %v424_v54 = vld [vmem:[%s7527_s21 + $0xd8] sm:$0xff]  ;;  %3837 = vmatpush.msra.mxu2 %v438_v56  ;;  %v435_v56 = vld [vmem:[%s7527_s21 + $0x130] sm:$0xff] }
 0x2e4   : > { %11724 = vst [vmem:[#allocation207_spill] sm:$0xff] %v7615_v46  ;;  %3947 = vmatpush.msra.mxu3 %v457_v16  ;;  %v1732_v62 = vmax.f32 %v1731_v58, %v7522_v25  ;;  %v423_v16 = vld [vmem:[%s7527_s21 + $0xd0] sm:$0xff]  ;;  %3722 = vmatpush.msra.mxu1 %v424_v54  ;;  %v406_v54 = vld [vmem:[%s7527_s21 + $0x48] sm:$0xff]  ;;  %v420_v25 = vld [vmem:[%s7527_s21 + $0xb8] sm:$0xff] }
 0x2e5   : > { %11725 = vst [vmem:[#allocation208_spill] sm:$0xff] %v7620_v0  ;;  %v2700_v42 = vadd.f32 %v7640_v37, %v2699_v27  ;;  %v1725_v0 = vmax.f32 %v1724_v23, %v7539_v28  ;;  %3610 = vmatpush.msra.mxu0 %v407_v10  ;;  %v422_v10 = vld [vmem:[%s7527_s21 + $0xc8] sm:$0xff]  ;;  %v452_v28 = vld [vmem:[%s7527_s21 + $0x1b8] sm:$0xff] }
 0x2e6   : > { %11727 = vst [vmem:[#allocation209_spill] sm:$0xff] %v7630_v53  ;;  %3948 = vmatpush.msra.mxu3 %v456_v32  ;;  %v455_v53 = vld [vmem:[%s7527_s21 + $0x1d0] sm:$0xff]  ;;  %v1733_v23 = vmax.f32 %v1732_v62, %v7541_v40  ;;  %3723 = vmatpush.msra.mxu1 %v423_v16  ;;  %v7662_v58 = vpop.f32.mrf.mxu2  ;;  %v454_v16 = vld [vmem:[%s7527_s21 + $0x1c8] sm:$0xff]  ;;  %v404_v40 = vld [vmem:[%s7527_s21 + $0x38] sm:$0xff] }
 0x2e7   : > { %11728 = vst [vmem:[#allocation210_spill] sm:$0xff] %v7635_v2  ;;  %2701 = vadd.xlane.f32.xlu0 %v2700_v42  ;;  %1726 = vmax.xlane.f32.xlu1 %v1725_v0  ;;  %v7654_v27 = vpop.f32.mrf.mxu0 }
 0x2e8   : > { %11729 = vst [vmem:[#allocation211_spill] sm:$0xff] %v7640_v37  ;;  %3949 = vmatpush.msra.mxu3 %v455_v53  ;;  %v7657_v9 = vpop.f32.mrf.mxu1  ;;  %v1734_v61 = vmax.f32 %v1733_v23, %v7596_v20  ;;  %3611 = vmatpush.msra.mxu0 %v406_v54  ;;  %v405_v23 = vld [vmem:[%s7527_s21 + $0x40] sm:$0xff]  ;;  %v403_v54 = vld [vmem:[%s7527_s21 + $0x30] sm:$0xff] }
 0x2e9   : > { %11730 = vst [vmem:[#allocation212_spill] sm:$0xff] %v7644_v51  ;;  %3724 = vmatpush.msra.mxu1 %v422_v10  ;;  %v437_v37 = vld [vmem:[%s7527_s21 + $0x140] sm:$0xff]  ;;  %v419_v10 = vld [vmem:[%s7527_s21 + $0xb0] sm:$0xff] }
 0x2ea   : > { %11731 = vst [vmem:[#allocation213_spill] sm:$0xff] %v7654_v27  ;;  %v7660_v0 = vpop.f32.mrf.mxu3  ;;  %3950 = vmatpush.msra.mxu3 %v454_v16  ;;  %v453_v20 = vld [vmem:[%s7527_s21 + $0x1c0] sm:$0xff]  ;;  %3612 = vmatpush.msra.mxu0 %v405_v23  ;;  %v451_v16 = vld [vmem:[%s7527_s21 + $0x1b0] sm:$0xff] }
 0x2eb   : > { %11732 = vst [vmem:[#allocation214_spill] sm:$0xff] %v7657_v9  ;;  %3838 = vmatpush.msra.mxu2 %v437_v37 }
 0x2ec   : > { %11733 = vst [vmem:[#allocation215_spill] sm:$0xff] %v7660_v0  ;;  %3951 = vmatpush.msra.mxu3 %v453_v20  ;;  %3613 = vmatpush.msra.mxu0 %v404_v40  ;;  %v11742_v20 = vld [vmem:[#allocation86_spill] sm:$0xff]  ;;  %v402_v40 = vld [vmem:[%s7527_s21 + $0x28] sm:$0xff] }
 0x2ed   : > { %11734 = vst [vmem:[#allocation216_spill] sm:$0xff] %v7662_v58  ;;  %3839 = vmatpush.msra.mxu2 %v436_v6  ;;  %v434_v6 = vld [vmem:[%s7527_s21 + $0x128] sm:$0xff] }
 0x2ee   : > { %v7670_v42 = vpop.f32.mrf.mxu2  ;;  %3952 = vmatpush.msra.mxu3 %v452_v28  ;;  %3614 = vmatpush.msra.mxu0 %v403_v54  ;;  %v11745_v28 = vld [vmem:[#allocation89_spill] sm:$0xff]  ;;  %v417_v54 = vld [vmem:[%s7527_s21 + $0xa0] sm:$0xff] }
 0x2ef   : > { %1735 = vmax.xlane.f32.xlu0 %v1734_v61  ;;  %v7664_v15 = vpop.f32.mrf.mxu0  ;;  %11738 = vst [vmem:[#allocation220_spill] sm:$0xff] %v7670_v42  ;;  %v421_v61 = vld [vmem:[%s7527_s21 + $0xc0] sm:$0xff]  ;;  %3840 = vmatpush.msra.mxu2 %v435_v56  ;;  %v1746_v57 = vmax.f32 %v11745_v28, %v11744_v31  ;;  %v11747_v56 = vld [vmem:[#allocation94_spill] sm:$0xff] }
 0x2f0   : > { %11735 = vst [vmem:[#allocation217_spill] sm:$0xff] %v7664_v15  ;;  %v7666_v32 = vpop.f32.mrf.mxu1  ;;  %3725 = vmatpush.msra.mxu1 %v421_v61  ;;  %v11743_v61 = vld [vmem:[#allocation85_spill] sm:$0xff]  ;;  %3953 = vmatpush.msra.mxu3 %v451_v16  ;;  %v11751_v31 = vld [vmem:[#allocation91_spill] sm:$0xff] }
 0x2f1   : > { %11736 = vst [vmem:[#allocation218_spill] sm:$0xff] %v7666_v32  ;;  %v1737_v4 = vmax.f32 %v11743_v61, %v11742_v20  ;;  %3615 = vmatpush.msra.mxu0 %v402_v40  ;;  %v11748_v61 = vld [vmem:[#allocation93_spill] sm:$0xff]  ;;  %3841 = vmatpush.msra.mxu2 %v434_v6  ;;  %v449_v40 = vld [vmem:[%s7527_s21 + $0x1a0] sm:$0xff]  ;;  %v1747_v28 = vmax.f32 %v1746_v57, %v11751_v31  ;;  %v432_v6 = vld [vmem:[%s7527_s21 + $0x118] sm:$0xff] }
 0x2f2   : > { %v7668_v53 = vpop.f32.mrf.mxu3  ;;  %3726 = vmatpush.msra.mxu1 %v420_v25  ;;  %v418_v25 = vld [vmem:[%s7527_s21 + $0xa8] sm:$0xff]  ;;  %v1755_v16 = vmax.f32 %v11748_v61, %v11747_v56  ;;  %3954 = vmatpush.msra.mxu3 %v450_v50  ;;  %v416_v50 = vld [vmem:[%s7527_s21 + $0x98] sm:$0xff]  ;;  %v11758_v61 = vld [vmem:[#allocation99_spill] sm:$0xff]  ;;  %v1774_v31 = vmax.f32 %v1773_v49, %v11759_v11 }
 0x2f3   : > { %11737 = vst [vmem:[#allocation219_spill] sm:$0xff] %v7668_v53  ;;  %3616 = vmatpush.msra.mxu0 %v401_v45  ;;  %v1765_v34 = vmax.f32 %v1764_v1, %v11758_v61  ;;  %3842 = vmatpush.msra.mxu2 %v433_v8  ;;  %v399_v57 = vld [vmem:[%s7527_s21 + $0x10] sm:$0xff] }
 0x2f4   : > { %3727 = vmatpush.msra.mxu1 %v419_v10  ;;  %v11746_v10 = vld [vmem:[#allocation87_spill] sm:$0xff]  ;;  %v1756_v56 = vmax.f32 %v1755_v16, %v11757_v47  ;;  %3955 = vmatpush.msra.mxu3 %v449_v40  ;;  %v431_v45 = vld [vmem:[%s7527_s21 + $0x110] sm:$0xff]  ;;  %v1748_v16 = vmax.f32 %v1747_v28, %v11762_v39  ;;  %v11763_v47 = vld [vmem:[#allocation110_spill] sm:$0xff] }
 0x2f5   : > { %v1738_v20 = vmax.f32 %v1737_v4, %v11746_v10  ;;  %v11754_v4 = vld [vmem:[#allocation106_spill] sm:$0xff]  ;;  %v11755_v10 = vld [vmem:[#allocation105_spill] sm:$0xff]  ;;  %3843 = vmatpush.msra.mxu2 %v432_v6  ;;  %v11768_v28 = vld [vmem:[#allocation104_spill] sm:$0xff] }
 0x2f6   : > { %v7694_v37 = vpop.f32.mrf.mxu2  ;;  %3728 = vmatpush.msra.mxu1 %v418_v25  ;;  %v400_v25 = vld [vmem:[%s7527_s21 + $0x18] sm:$0xff]  ;;  %v1782_v55 = vmax.f32 %v11755_v10, %v11754_v4  ;;  %v11760_v4 = vld [vmem:[#allocation107_spill] sm:$0xff]  ;;  %3956 = vmatpush.msra.mxu3 %v448_v14  ;;  %v11764_v1 = vld [vmem:[#allocation109_spill] sm:$0xff] }
 0x2f7   : > { %v7675_v62 = vpop.f32.mrf.mxu0  ;;  %11741 = vst [vmem:[#allocation223_spill] sm:$0xff] %v7694_v37  ;;  %3617 = vmatpush.msra.mxu0 %v400_v25  ;;  %v1791_v8 = vmax.f32 %v11764_v1, %v11763_v47  ;;  %v11767_v25 = vld [vmem:[#allocation100_spill] sm:$0xff]  ;;  %3844 = vmatpush.msra.mxu2 %v431_v45 }
 0x2f8   : > { %11739 = vst [vmem:[#allocation221_spill] sm:$0xff] %v7675_v62  ;;  %v7688_v22 = vpop.f32.mrf.mxu1  ;;  %3729 = vmatpush.msra.mxu1 %v417_v54  ;;  %v1783_v10 = vmax.f32 %v1782_v55, %v11760_v4  ;;  %v11761_v54 = vld [vmem:[#allocation88_spill] sm:$0xff]  ;;  %3957 = vmatpush.msra.mxu3 %v447_v26 }
 0x2f9   : > { %11740 = vst [vmem:[#allocation222_spill] sm:$0xff] %v7688_v22  ;;  %v1739_v13 = vmax.f32 %v1738_v20, %v11761_v54  ;;  %3618 = vmatpush.msra.mxu0 %v399_v57  ;;  %v11766_v55 = vld [vmem:[#allocation96_spill] sm:$0xff]  ;;  %v1766_v20 = vmax.f32 %v1765_v34, %v11767_v25  ;;  %v11770_v57 = vld [vmem:[#allocation111_spill] sm:$0xff] }
 0x2fa   : > { %v7692_v23 = vpop.f32.mrf.mxu3  ;;  %3730 = vmatpush.msra.mxu1 %v416_v50  ;;  %v1757_v49 = vmax.f32 %v1756_v56, %v11766_v55  ;;  %v1775_v50 = vmax.f32 %v1774_v31, %v11768_v28  ;;  %v11769_v6 = vld [vmem:[#allocation108_spill] sm:$0xff]  ;;  %v1792_v1 = vmax.f32 %v1791_v8, %v11770_v57  ;;  %v413_v8 = vld [vmem:[%s7527_s21 + $0x80] sm:$0xff]  ;;  %v11772_v57 = vld [vmem:[#allocation114_spill] sm:$0xff] }
 0x2fb   : > { %v1740_v14 = vmax.f32 %v1739_v13, %v7566_v5  ;;  %v1784_v47 = vmax.f32 %v1783_v10, %v11769_v6  ;;  %v398_v13 = vld [vmem:[%s7527_s21 + $0x8] sm:$0xff]  ;;  %v1767_v11 = vmax.f32 %v1766_v20, %v7664_v15  ;;  %v397_v10 = vld [vmem:[%s7527_s21] sm:$0xff] }
 0x2fc   : > { %3731 = vmatpush.msra.mxu1 %v415_v41  ;;  %v1749_v41 = vmax.f32 %v1748_v16, %v7615_v46  ;;  %v414_v4 = vld [vmem:[%s7527_s21 + $0x88] sm:$0xff]  ;;  %v1758_v26 = vmax.f32 %v1757_v49, %v7654_v27  ;;  %3619 = vmatpush.msra.mxu0 %v398_v13  ;;  %v11773_v16 = vld [vmem:[#allocation113_spill] sm:$0xff]  ;;  %v1776_v28 = vmax.f32 %v1775_v50, %v7675_v62  ;;  %v429_v55 = vld [vmem:[%s7527_s21 + $0x100] sm:$0xff] }
 0x2fd   : > { %v430_v45 = vld [vmem:[%s7527_s21 + $0x108] sm:$0xff]  ;;  %v1800_v6 = vmax.f32 %v11773_v16, %v11772_v57  ;;  %v445_v46 = vld [vmem:[%s7527_s21 + $0x180] sm:$0xff]  ;;  %v1741_v49 = vmax.f32 %v1740_v14, %v7583_v21  ;;  %v11777_v50 = vld [vmem:[#allocation118_spill] sm:$0xff]  ;;  %v1768_v14 = vmax.f32 %v1767_v11, %v7666_v32 }
 0x2fe   : > { %v7750_v34 = vpop.f32.mrf.mxu2  ;;  %3732 = vmatpush.msra.mxu1 %v414_v4  ;;  %v446_v31 = vld [vmem:[%s7527_s21 + $0x188] sm:$0xff]  ;;  %3845 = vmatpush.msra.mxu2 %v430_v45  ;;  %v11775_v13 = vld [vmem:[#allocation115_spill] sm:$0xff]  ;;  %v1750_v27 = vmax.f32 %v1749_v41, %v7635_v2  ;;  %v11778_v45 = vld [vmem:[#allocation117_spill] sm:$0xff]  ;;  %v1759_v16 = vmax.f32 %v1758_v26, %v7657_v9 }
 0x2ff   : > { %v7719_v63 = vpop.f32.mrf.mxu0  ;;  %11771 = vst [vmem:[#allocation92_spill] sm:$0xff] %v7750_v34  ;;  %3958 = vmatpush.msra.mxu3 %v446_v31  ;;  %3620 = vmatpush.msra.mxu0 %v397_v10  ;;  %v11774_v20 = vld [vmem:[#allocation112_spill] sm:$0xff]  ;;  %v7769_v15 = vmax.f32 %v1800_v6, %v11775_v13  ;;  %v1809_v31 = vmax.f32 %v11778_v45, %v11777_v50  ;;  %v11780_v13 = vld [vmem:[#allocation119_spill] sm:$0xff] }
 0x300   : > { %11756 = vst [vmem:[#allocation224_spill] sm:$0xff] %v7719_v63  ;;  %v7736_v40 = vpop.f32.mrf.mxu1  ;;  %v7738_v61 = vpop.xlane.xlu0 %2620  ;;  %v1785_v25 = vmax.f32 %v1784_v47, %v7719_v63  ;;  %3733 = vmatpush.msra.mxu1 %v413_v8  ;;  %v1793_v4 = vmax.f32 %v1792_v1, %v11774_v20  ;;  %3846 = vmatpush.msra.mxu2 %v429_v55 }
 0x301   : > { %11765 = vst [vmem:[#allocation88_spill] sm:$0xff] %v7736_v40  ;;  %5281 = vrcp.f32 %v7738_v61  ;;  %3959 = vmatpush.msra.mxu3 %v445_v46  ;;  %v7779_v10 = vmax.f32 %v1741_v49, %v7598_v48  ;;  %v1777_v1 = vmax.f32 %v1776_v28, %v7688_v22  ;;  %v7787_v46 = vmax.f32 %v1750_v27, %v7644_v51  ;;  %v11885_v51 = vld [vmem:[#allocation173_spill] sm:$0xff] }
 0x302   : > { %v7748_v56 = vpop.f32.mrf.mxu3  ;;  %v1786_v6 = vmax.f32 %v1785_v25, %v7736_v40  ;;  %v7794_v11 = vmax.f32 %v1759_v16, %v7662_v58  ;;  %v7797_v28 = vmax.f32 %v1768_v14, %v7670_v42  ;;  %v11779_v25 = vld [vmem:[#allocation116_spill] sm:$0xff]  ;;  %v7802_v50 = vmax.f32 %v1809_v31, %v11780_v13 }
 0x303   : > { %v2912_v16 = vand.u32 2147483648, %v7738_v61  ;;  %v11784_v14 = vld [vmem:[#allocation44_spill] sm:$0xff]  ;;  %vm2906_vm1 = vweird.f32 %v7738_v61 }
 0x304   : > { %v7814_v20 = vmax.f32 %v1786_v6, %v7750_v34 }
 0x306   : > { %v7818_v31 = vpop.f32.mrf.mxu2 }
 0x307   : > { %v7772_v57 = vpop.f32.mrf.mxu0  ;;  %v5282_v47 = vpop.eup %5281  ;;  %11782 = vst [vmem:[#allocation227_spill] sm:$0xff] %v7818_v31 }
 0x308   : > { %11776 = vst [vmem:[#allocation225_spill] sm:$0xff] %v7772_v57  ;;  %v2902_v41 = vmul.f32 %v5282_v47, %v7738_v61  ;;  %v7784_v8 = vpop.xlane.xlu2 %2629  ;;  %v1794_v55 = vmax.f32 %v1793_v4, %v7772_v57  ;;  %v7791_v26 = vpop.xlane.xlu0 %1654  ;;  %v7807_v4 = vmax.f32 %v1777_v1, %v7694_v37  ;;  %v2910_v57 = vand.u32 2147483647, %v7738_v61  ;;  %v11783_v1 = vld [vmem:[#allocation43_spill] sm:$0xff] }
 0x309   : > { %5283 = vrcp.f32 %v7784_v8  ;;  %v7804_v27 = vpop.f32.mrf.mxu1  ;;  %vm2907_vm0 = vweird.f32 %v5282_v47  ;;  %v1926_v37 = vsub.f32 %v11784_v14, %v7791_v26  ;;  %v2932_v22 = vand.u32 2147483647, %v7784_v8 }
 0x30a   : > { %11781 = vst [vmem:[#allocation226_spill] sm:$0xff] %v7804_v27  ;;  %v2903_v45 = vsub.f32 1.0, %v2902_v41  ;;  %v7816_v49 = vpop.f32.mrf.mxu3  ;;  %v1925_v41 = vsub.f32 %v11783_v1, %v7791_v26  ;;  %v1795_v63 = vmax.f32 %v1794_v55, %v7804_v27  ;;  %vm2908_vm2 = vmor %vm2906_vm1, %vm2907_vm0  ;;  %vm2911_vm3 = vcmp.eq.f32.partialorder %v2910_v57, 8.507059e+37 }
 0x30b   : > { %v2913_v55 = vor.u32 1.1754944e-38, %v2912_v16  ;;  %vm2928_vm4 = vweird.f32 %v7784_v8  ;;  %v2934_v1 = vand.u32 2147483648, %v7784_v8  ;;  %v2263_v62 = vmul.f32 1.442695, %v1926_v37 }
 0x30c   : > { %v2904_v13 = vmul.f32 %v5282_v47, %v2903_v45  ;;  %v7839_v6 = vmax.f32 %v1795_v63, %v7818_v31  ;;  %v2261_v61 = vmul.f32 1.442695, %v1925_v41  ;;  %v1927_v16 = vsub.f32 %v11546_v36, %v7791_v26 }
 0x30d   : > { %vm7850_vm5 = vcmp.eq.f32.partialorder %v2932_v22, 8.507059e+37  ;;  %v1929_v41 = vsub.f32 %v7026_v44, %v7791_v26  ;;  %v1930_v36 = vsub.f32 %v7032_v3, %v7791_v26 }
 0x30e   : > { %v2905_v45 = vadd.f32 %v5282_v47, %v2904_v13  ;;  %v2265_v3 = vmul.f32 1.442695, %v1927_v16 }
 0x30f   : > { %v5284_v40 = vpop.eup %5283  ;;  %v2269_v16 = vmul.f32 1.442695, %v1929_v41 }
 0x310   : > { %v2909_v34 = vsel %vm2908_vm2, %v5282_v47, %v2905_v45  ;;  %v2924_v13 = vmul.f32 %v5284_v40, %v7784_v8  ;;  %v7855_v47 = vpop.xlane.xlu2 %1663  ;;  %vm2929_vm6 = vweird.f32 %v5284_v40  ;;  %v2271_v8 = vmul.f32 1.442695, %v1930_v36 }
 0x311   : > { %v7843_v27 = vsel %vm2911_vm3, %v2913_v55, %v2909_v34  ;;  %v7846_v57 = vpop.xlane.xlu1 %2638  ;;  %v1928_v34 = vsub.f32 %v11551_v24, %v7791_v26  ;;  %v11787_v55 = vld [vmem:[#allocation45_spill] sm:$0xff]  ;;  %v11788_v24 = vld [vmem:[#allocation47_spill] sm:$0xff]  ;;  %vm2930_vm7 = vmor %vm2928_vm4, %vm2929_vm6 }
 0x312   : > { %v2925_v14 = vsub.f32 1.0, %v2924_v13  ;;  %5285 = vrcp.f32 %v7846_v57  ;;  %v2915_v37 = vmul.f32 %v7081_v18, %v7843_v27  ;;  %v2916_v45 = vmul.f32 %v7084_v19, %v7843_v27 }
 0x313   : > { %v2917_v13 = vmul.f32 %v11787_v55, %v7843_v27  ;;  %5287 = vpow2.f32 %v2261_v61  ;;  %v1933_v31 = vsub.f32 %v11788_v24, %v7855_v47  ;;  %v2918_v44 = vmul.f32 %v7103_v7, %v7843_v27  ;;  %v11789_v7 = vld [vmem:[#allocation48_spill] sm:$0xff] }
 0x314   : > { %v2926_v22 = vmul.f32 %v5284_v40, %v2925_v14  ;;  %3621 = vmatmul.f32.vlgmr.msra.gmra.mxu0 %v2915_v37  ;;  %4541 = vst [vmem:[%s7871_s30] sm:$0xff] %v2915_v37  ;;  %5289 = vpow2.f32 %v2263_v62  ;;  %v2935_v19 = vor.u32 1.1754944e-38, %v2934_v1  ;;  %3734 = vmatmul.f32.vlgmr.msra.gmra.mxu1 %v2916_v45  ;;  %v1931_v14 = vsub.f32 %v7034_v35, %v7791_v26 }
 0x315   : > { %4542 = vst [vmem:[%s7871_s30 + $0x8] sm:$0xff] %v2916_v45  ;;  %3847 = vmatmul.f32.vlgmr.msra.gmra.mxu2 %v2917_v13  ;;  %v2267_v61 = vmul.f32 1.442695, %v1928_v34  ;;  %v2954_v37 = vand.u32 2147483647, %v7846_v57  ;;  %v1934_v62 = vsub.f32 %v11789_v7, %v7855_v47  ;;  %3960 = vmatmul.f32.vlgmr.msra.gmra.mxu3 %v2918_v44  ;;  %v1932_v1 = vsub.f32 %v7049_v43, %v7791_v26  ;;  %v11790_v26 = vld [vmem:[#allocation156_spill] sm:$0xff] }
 0x316   : > { %v2927_v18 = vadd.f32 %v5284_v40, %v2926_v22  ;;  %4543 = vst [vmem:[%s7871_s30 + $0x10] sm:$0xff] %v2917_v13  ;;  %vm2950_vm8 = vweird.f32 %v7846_v57  ;;  %v2956_v35 = vand.u32 2147483648, %v7846_v57  ;;  %v2277_v13 = vmul.f32 1.442695, %v1933_v31 }
 0x317   : > { %4544 = vst [vmem:[%s7871_s30 + $0x18] sm:$0xff] %v2918_v44  ;;  %5291 = vpow2.f32 %v2265_v3  ;;  %v2273_v63 = vmul.f32 1.442695, %v1931_v14  ;;  %vm7906_vm9 = vcmp.eq.f32.partialorder %v2954_v37, 8.507059e+37  ;;  %v2279_v31 = vmul.f32 1.442695, %v1934_v62 }
 0x318   : > { %v5286_v22 = vpop.eup %5285  ;;  %v2931_v45 = vsel %vm2930_vm7, %v5284_v40, %v2927_v18  ;;  %5293 = vpow2.f32 %v2267_v61  ;;  %v2275_v3 = vmul.f32 1.442695, %v1932_v1  ;;  %v2957_v62 = vor.u32 1.1754944e-38, %v2956_v35  ;;  %v11794_v1 = vld [vmem:[#allocation50_spill] sm:$0xff] }
 0x319   : > { %v7893_v34 = vsel %vm7850_vm5, %v2935_v19, %v2931_v45  ;;  %v2946_v55 = vmul.f32 %v5286_v22, %v7846_v57  ;;  %v7896_v24 = vpop.eup %5287  ;;  %v11793_v19 = vld [vmem:[#allocation49_spill] sm:$0xff]  ;;  %vm2951_vm10 = vweird.f32 %v5286_v22  ;;  %v7916_v37 = vpop.xlane.xlu1 %1672  ;;  %v1938_v35 = vsub.f32 %v7046_v30, %v7855_v47  ;;  %v11796_v30 = vld [vmem:[#allocation52_spill] sm:$0xff] }
 0x31a   : > { %v7898_v43 = vpop.xlane.xlu0 %2647  ;;  %v2937_v40 = vmul.f32 %v7124_v29, %v7893_v34  ;;  %v2938_v41 = vmul.f32 %v11790_v26, %v7893_v34  ;;  %v7904_v36 = vpop.eup %5289  ;;  %v2939_v29 = vmul.f32 %v7138_v59, %v7893_v34  ;;  %v1935_v14 = vsub.f32 %v11793_v19, %v7855_v47  ;;  %vm2952_vm11 = vmor %vm2950_vm8, %vm2951_vm10 }
 0x31b   : > { %v2947_v44 = vsub.f32 1.0, %v2946_v55  ;;  %5295 = vrcp.f32 %v7898_v43  ;;  %v2940_v7 = vmul.f32 %v7143_v17, %v7893_v34  ;;  %v2703_v59 = vadd.f32 %v7904_v36, %v7896_v24 }
 0x31c   : > { %4549 = vst [vmem:[%s7871_s30 + $0x40] sm:$0xff] %v2937_v40  ;;  %5297 = vpow2.f32 %v2269_v16  ;;  %3624 = vmatmul.f32.gmra.mxu0 %v2937_v40  ;;  %3737 = vmatmul.f32.gmra.mxu1 %v2938_v41  ;;  %v1936_v16 = vsub.f32 %v11794_v1, %v7855_v47  ;;  %v1937_v17 = vsub.f32 %v7039_v33, %v7855_v47  ;;  %v11795_v40 = vld [vmem:[#allocation51_spill] sm:$0xff]  ;;  %vm2972_vm12 = vweird.f32 %v7898_v43 }
 0x31d   : > { %v2948_v61 = vmul.f32 %v5286_v22, %v2947_v44  ;;  %4550 = vst [vmem:[%s7871_s30 + $0x48] sm:$0xff] %v2938_v41  ;;  %5299 = vpow2.f32 %v2271_v8  ;;  %3850 = vmatmul.f32.gmra.mxu2 %v2939_v29  ;;  %v7926_v45 = vpop.eup %5291  ;;  %3963 = vmatmul.f32.gmra.mxu3 %v2940_v7  ;;  %v1941_v26 = vsub.f32 %v11795_v40, %v7916_v37 }
 0x31e   : > { %4551 = vst [vmem:[%s7871_s30 + $0x50] sm:$0xff] %v2939_v29  ;;  %5301 = vpow2.f32 %v2273_v63  ;;  %v7933_v8 = vpop.eup %5293  ;;  %v2704_v41 = vadd.f32 %v7926_v45, %v2703_v59  ;;  %v1939_v63 = vsub.f32 %v7054_v12, %v7855_v47  ;;  %v1940_v29 = vsub.f32 %v7091_v38, %v7855_v47 }
 0x31f   : > { %v2949_v55 = vadd.f32 %v5286_v22, %v2948_v61  ;;  %4552 = vst [vmem:[%s7871_s30 + $0x58] sm:$0xff] %v2940_v7  ;;  %5303 = vpow2.f32 %v2277_v13  ;;  %v1942_v13 = vsub.f32 %v11796_v30, %v7916_v37  ;;  %v2978_v38 = vand.u32 2147483648, %v7898_v43 }
 0x320   : > { %5305 = vpow2.f32 %v2279_v31  ;;  %v2705_v12 = vadd.f32 %v7933_v8, %v2704_v41  ;;  %v2283_v1 = vmul.f32 1.442695, %v1936_v16  ;;  %v11801_v41 = vld [vmem:[#allocation166_spill] sm:$0xff]  ;;  %v2285_v30 = vmul.f32 1.442695, %v1937_v17  ;;  %v11806_v17 = vld [vmem:[#allocation167_spill] sm:$0xff] }
 0x321   : > { %v5296_v33 = vpop.eup %5295  ;;  %v2953_v44 = vsel %vm2952_vm11, %v5286_v22, %v2949_v55  ;;  %5307 = vpow2.f32 %v2275_v3  ;;  %v2281_v22 = vmul.f32 1.442695, %v1935_v14  ;;  %v2976_v3 = vand.u32 2147483647, %v7898_v43 }
 0x322   : > { %v7947_v57 = vpop.eup %5297  ;;  %v7951_v19 = vsel %vm7906_vm9, %v2957_v62, %v2953_v44  ;;  %v2968_v61 = vmul.f32 %v5296_v33, %v7898_v43  ;;  %v7954_v7 = vpop.xlane.xlu2 %2656  ;;  %v7965_v62 = vmul.f32 1.442695, %v1941_v26  ;;  %v7970_v55 = vmul.f32 1.442695, %v1942_v13 }
 0x323   : > { %11797 = vst [vmem:[#allocation43_spill] sm:$0xff] %v7947_v57  ;;  %v7957_v31 = vpop.eup %5299  ;;  %5309 = vrcp.f32 %v7954_v7  ;;  %v2706_v59 = vadd.f32 %v7947_v57, %v2705_v12  ;;  %v2959_v40 = vmul.f32 %v7174_v60, %v7951_v19  ;;  %v2960_v44 = vmul.f32 %v11801_v41, %v7951_v19 }
 0x324   : > { %11798 = vst [vmem:[#allocation44_spill] sm:$0xff] %v7957_v31  ;;  %v7963_v47 = vpop.eup %5301  ;;  %v2969_v18 = vsub.f32 1.0, %v2968_v61  ;;  %vm2973_vm13 = vweird.f32 %v5296_v33  ;;  %5311 = vpow2.f32 %v2281_v22  ;;  %vm7981_vm14 = vcmp.eq.f32.partialorder %v2976_v3, 8.507059e+37 }
 0x325   : > { %11799 = vst [vmem:[#allocation45_spill] sm:$0xff] %v7963_v47  ;;  %v7968_v14 = vpop.eup %5303  ;;  %v2707_v61 = vadd.f32 %v7957_v31, %v2706_v59  ;;  %v2979_v60 = vor.u32 1.1754944e-38, %v2978_v38  ;;  %3627 = vmatmul.f32.gmra.mxu0 %v2959_v40  ;;  %3740 = vmatmul.f32.gmra.mxu1 %v2960_v44  ;;  %v2961_v12 = vmul.f32 %v11806_v17, %v7951_v19  ;;  %5313 = vpow2.f32 %v2283_v1  ;;  %vm7997_vm15 = vmor %vm2972_vm12, %vm2973_vm13  ;;  %v11814_v38 = vld [vmem:[#allocation176_spill] sm:$0xff] }
 0x326   : > { %11800 = vst [vmem:[#allocation47_spill] sm:$0xff] %v7968_v14  ;;  %v7976_v42 = vpop.eup %5305  ;;  %v2970_v26 = vmul.f32 %v5296_v33, %v2969_v18  ;;  %v11807_v18 = vld [vmem:[#allocation168_spill] sm:$0xff]  ;;  %v2287_v3 = vmul.f32 1.442695, %v1938_v35  ;;  %v11810_v35 = vld [vmem:[#allocation53_spill] sm:$0xff]  ;;  %5315 = vpow2.f32 %v2285_v30  ;;  %vm2994_vm0 = vweird.f32 %v7954_v7 }
 0x327   : > { %11802 = vst [vmem:[#allocation48_spill] sm:$0xff] %v7976_v42  ;;  %v7979_v16 = vpop.eup %5307  ;;  %v2962_v41 = vmul.f32 %v11807_v18, %v7951_v19  ;;  %v2708_v22 = vadd.f32 %v7963_v47, %v2707_v61  ;;  %3853 = vmatmul.f32.gmra.mxu2 %v2961_v12  ;;  %v2291_v61 = vmul.f32 1.442695, %v1940_v29  ;;  %v2712_v1 = vadd.f32 %v7976_v42, %v7968_v14  ;;  %v11813_v30 = vld [vmem:[#allocation57_spill] sm:$0xff]  ;;  %v11866_v14 = vld [vmem:[#allocation184_spill] sm:$0xff] }
 0x328   : > { %11803 = vst [vmem:[#allocation156_spill] sm:$0xff] %v7979_v16  ;;  %v2971_v57 = vadd.f32 %v5296_v33, %v2970_v26  ;;  %v2289_v26 = vmul.f32 1.442695, %v1939_v63  ;;  %v2998_v29 = vand.u32 2147483647, %v7954_v7 }
 0x329   : > { %4557 = vst [vmem:[%s7871_s30 + $0x80] sm:$0xff] %v2959_v40  ;;  %v7992_v59 = vpop.eup %5309  ;;  %v8001_v40 = vpop.xlane.xlu0 %1681  ;;  %3966 = vmatmul.f32.gmra.mxu3 %v2962_v41  ;;  %v2709_v18 = vadd.f32 %v7979_v16, %v2708_v22 }
 0x32a   : > { %4558 = vst [vmem:[%s7871_s30 + $0x88] sm:$0xff] %v2960_v44  ;;  %v1943_v44 = vsub.f32 %v11810_v35, %v7916_v37  ;;  %v2975_v43 = vsel %vm7997_vm15, %v5296_v33, %v2971_v57  ;;  %v2990_v17 = vmul.f32 %v7992_v59, %v7954_v7  ;;  %v8023_v33 = vpop.eup %5311  ;;  %v1950_v13 = vsub.f32 %v11813_v30, %v8001_v40 }
 0x32b   : > { %4559 = vst [vmem:[%s7871_s30 + $0x90] sm:$0xff] %v2961_v12  ;;  %v8018_v63 = vsel %vm7981_vm14, %v2979_v60, %v2975_v43  ;;  %v3000_v12 = vand.u32 2147483648, %v7954_v7  ;;  %2710 = vadd.xlane.f32.xlu2 %v2709_v18  ;;  %v2713_v60 = vadd.f32 %v8023_v33, %v2712_v1  ;;  %v11815_v43 = vld [vmem:[#allocation54_spill] sm:$0xff]  ;;  %vm2995_vm1 = vweird.f32 %v7992_v59  ;;  %v11818_v1 = vld [vmem:[#allocation177_spill] sm:$0xff] }
 0x32c   : > { %4560 = vst [vmem:[%s7871_s30 + $0x98] sm:$0xff] %v2962_v41  ;;  %v2991_v57 = vsub.f32 1.0, %v2990_v17  ;;  %v11812_v41 = vld [vmem:[#allocation56_spill] sm:$0xff]  ;;  %v2981_v35 = vmul.f32 %v11814_v38, %v8018_v63  ;;  %v1944_v16 = vsub.f32 %v11815_v43, %v7916_v37  ;;  %v8035_v17 = vpop.eup %5313  ;;  %v2982_v30 = vmul.f32 %v11818_v1, %v8018_v63  ;;  %v11819_v38 = vld [vmem:[#allocation133_spill] sm:$0xff]  ;;  %vm8060_vm2 = vmor %vm2994_vm0, %vm2995_vm1 }
 0x32d   : > { %11811 = vst [vmem:[#allocation49_spill] sm:$0xff] %v8023_v33  ;;  %v1949_v22 = vsub.f32 %v11812_v41, %v8001_v40  ;;  %v2714_v41 = vadd.f32 %v8035_v17, %v2713_v60  ;;  %v2983_v43 = vmul.f32 %v11819_v38, %v8018_v63  ;;  %v2297_v32 = vmul.f32 1.442695, %v1943_v44  ;;  %v8047_v58 = vpop.eup %5315  ;;  %v11822_v60 = vld [vmem:[#allocation60_spill] sm:$0xff]  ;;  %v11827_v1 = vld [vmem:[#allocation46_spill] sm:$0xff] }
 0x32e   : > { %v8014_v47 = vpop.xlane.xlu1 %2665  ;;  %11816 = vst [vmem:[#allocation50_spill] sm:$0xff] %v8035_v17  ;;  %v2992_v31 = vmul.f32 %v7992_v59, %v2991_v57  ;;  %3630 = vmatmul.f32.gmra.mxu0 %v2981_v35  ;;  %v1946_v9 = vsub.f32 %v11822_v60, %v7916_v37  ;;  %vm8064_vm3 = vcmp.eq.f32.partialorder %v2998_v29, 8.507059e+37  ;;  %3743 = vmatmul.f32.gmra.mxu1 %v2982_v30  ;;  %v11863_v33 = vld [vmem:[#allocation172_spill] sm:$0xff] }
 0x32f   : > { %5317 = vrcp.f32 %v8014_v47  ;;  %4565 = vst [vmem:[%s7871_s30 + $0xc0] sm:$0xff] %v2981_v35  ;;  %3856 = vmatmul.f32.gmra.mxu2 %v2983_v43  ;;  %v1947_v38 = vsub.f32 %v11827_v1, %v7916_v37  ;;  %v2309_v60 = vmul.f32 1.442695, %v1949_v22  ;;  %vm3016_vm4 = vweird.f32 %v8014_v47 }
 0x330   : > { %5319 = vpow2.f32 %v2287_v3  ;;  %v11817_v3 = vld [vmem:[#allocation55_spill] sm:$0xff]  ;;  %11820 = vst [vmem:[#allocation51_spill] sm:$0xff] %v8047_v58  ;;  %v2993_v57 = vadd.f32 %v7992_v59, %v2992_v31  ;;  %v3022_v31 = vand.u32 2147483648, %v8014_v47 }
 0x331   : > { %5321 = vpow2.f32 %v2289_v26  ;;  %v1945_v18 = vsub.f32 %v11817_v3, %v7916_v37  ;;  %v11821_v26 = vld [vmem:[#allocation134_spill] sm:$0xff]  ;;  %4566 = vst [vmem:[%s7871_s30 + $0xc8] sm:$0xff] %v2982_v30  ;;  %v3001_v30 = vor.u32 1.1754944e-38, %v3000_v12  ;;  %v3020_v12 = vand.u32 2147483647, %v8014_v47 }
 0x332   : > { %5323 = vpow2.f32 %v2291_v61  ;;  %v2984_v3 = vmul.f32 %v11821_v26, %v8018_v63  ;;  %v2715_v61 = vadd.f32 %v8047_v58, %v2714_v41  ;;  %v2997_v29 = vsel %vm8060_vm2, %v7992_v59, %v2993_v57  ;;  %4567 = vst [vmem:[%s7871_s30 + $0xd0] sm:$0xff] %v2983_v43  ;;  %v8087_v59 = vpop.xlane.xlu2 %1690 }
 0x333   : > { %5325 = vpow2.f32 %v7965_v62  ;;  %v2299_v41 = vmul.f32 1.442695, %v1944_v16  ;;  %v2311_v58 = vmul.f32 1.442695, %v1950_v13  ;;  %v11830_v43 = vmax.f32 %v7779_v10, %v7642_v52  ;;  %v11832_v10 = vld [vmem:[#allocation159_spill] sm:$0xff] }
 0x334   : > { %3969 = vmatmul.f32.gmra.mxu3 %v2984_v3  ;;  %5327 = vpow2.f32 %v7970_v55  ;;  %4568 = vst [vmem:[%s7871_s30 + $0xd8] sm:$0xff] %v2984_v3  ;;  %v2301_v55 = vmul.f32 1.442695, %v1945_v18  ;;  %v8094_v16 = vsel %vm8064_vm3, %v3001_v30, %v2997_v29  ;;  %v2303_v13 = vmul.f32 1.442695, %v1946_v9  ;;  %v11834_v29 = vld [vmem:[#allocation61_spill] sm:$0xff] }
 0x335   : > { %v8054_v35 = vpop.eup %5317  ;;  %1744 = vmax.xlane.f32.xlu2 %v11830_v43  ;;  %5329 = vpow2.f32 %v2297_v32  ;;  %v2305_v32 = vmul.f32 1.442695, %v1947_v38  ;;  %v11837_v38 = vld [vmem:[#allocation22_spill] sm:$0xff]  ;;  %vm8128_vm6 = vcmp.eq.f32.partialorder %v3020_v12, 8.507059e+37 }
 0x336   : > { %v8073_v7 = vpop.eup %5319  ;;  %v3012_v26 = vmul.f32 %v8054_v35, %v8014_v47  ;;  %5331 = vpow2.f32 %v2299_v41  ;;  %vm3017_vm5 = vweird.f32 %v8054_v35  ;;  %v3003_v41 = vmul.f32 %v11837_v38, %v8094_v16  ;;  %v8120_v43 = vpop.xlane.xlu1 %1699 }
 0x337   : > { %11828 = vst [vmem:[#allocation52_spill] sm:$0xff] %v8073_v7  ;;  %v2716_v1 = vadd.f32 %v8073_v7, %v2715_v61  ;;  %v8084_v62 = vpop.eup %5321  ;;  %v1948_v61 = vsub.f32 %v11832_v10, %v7916_v37  ;;  %v11836_v37 = vld [vmem:[#allocation62_spill] sm:$0xff]  ;;  %v11838_v10 = vld [vmem:[#allocation181_spill] sm:$0xff]  ;;  %vm8145_vm7 = vmor %vm3016_vm4, %vm3017_vm5 }
 0x338   : > { %11829 = vst [vmem:[#allocation166_spill] sm:$0xff] %v8084_v62  ;;  %v3013_v17 = vsub.f32 1.0, %v3012_v26  ;;  %v8098_v57 = vpop.eup %5323  ;;  %v1957_v26 = vsub.f32 %v11834_v29, %v8087_v59  ;;  %v3004_v29 = vmul.f32 %v11838_v10, %v8094_v16  ;;  %3633 = vmatmul.f32.gmra.mxu0 %v3003_v41  ;;  %v11843_v10 = vld [vmem:[#allocation138_spill] sm:$0xff] }
 0x339   : > { %v2717_v22 = vadd.f32 %v8084_v62, %v2716_v1  ;;  %11831 = vst [vmem:[#allocation167_spill] sm:$0xff] %v8098_v57  ;;  %v8105_v18 = vpop.eup %5325  ;;  %v3006_v62 = vmul.f32 %v11843_v10, %v8094_v16  ;;  %v11850_v7 = vld [vmem:[#allocation66_spill] sm:$0xff] }
 0x33a   : > { %v3014_v3 = vmul.f32 %v8054_v35, %v3013_v17  ;;  %v8101_v44 = vpop.xlane.xlu0 %2674  ;;  %11833 = vst [vmem:[#allocation168_spill] sm:$0xff] %v8105_v18  ;;  %v8112_v30 = vpop.eup %5327  ;;  %v1958_v17 = vsub.f32 %v11836_v37, %v8087_v59  ;;  %v3023_v37 = vor.u32 1.1754944e-38, %v3022_v31  ;;  %3746 = vmatmul.f32.gmra.mxu1 %v3004_v29  ;;  %v8161_v10 = vmul.f32 1.442695, %v1957_v26 }
 0x33b   : > { %v2718_v9 = vadd.f32 %v8098_v57, %v2717_v22  ;;  %5333 = vrcp.f32 %v8101_v44  ;;  %11835 = vst [vmem:[#allocation53_spill] sm:$0xff] %v8112_v30  ;;  %v2721_v22 = vadd.f32 %v8112_v30, %v8105_v18  ;;  %v8126_v57 = vpop.eup %5329  ;;  %vm3038_vm8 = vweird.f32 %v8101_v44 }
 0x33c   : > { %5335 = vpow2.f32 %v2301_v55  ;;  %v3015_v1 = vadd.f32 %v8054_v35, %v3014_v3  ;;  %11839 = vst [vmem:[#allocation56_spill] sm:$0xff] %v8126_v57  ;;  %v2307_v3 = vmul.f32 1.442695, %v1948_v61  ;;  %v8139_v12 = vpop.eup %5331  ;;  %3972 = vmatmul.f32.gmra.mxu3 %v3006_v62  ;;  %v8175_v26 = vmul.f32 1.442695, %v1958_v17  ;;  %v11859_v55 = vld [vmem:[#allocation161_spill] sm:$0xff] }
 0x33d   : > { %2719 = vadd.xlane.f32.xlu1 %v2718_v9  ;;  %5337 = vpow2.f32 %v2303_v13  ;;  %4573 = vst [vmem:[%s7871_s30 + $0x100] sm:$0xff] %v3003_v41  ;;  %v11842_v9 = vld [vmem:[#allocation136_spill] sm:$0xff]  ;;  %v2722_v38 = vadd.f32 %v8126_v57, %v2721_v22  ;;  %v11848_v41 = vld [vmem:[#allocation58_spill] sm:$0xff] }
 0x33e   : > { %5339 = vpow2.f32 %v2305_v32  ;;  %v3005_v13 = vmul.f32 %v11842_v9, %v8094_v16  ;;  %4574 = vst [vmem:[%s7871_s30 + $0x108] sm:$0xff] %v3004_v29  ;;  %v11847_v32 = vld [vmem:[#allocation65_spill] sm:$0xff]  ;;  %v1951_v22 = vsub.f32 %v11848_v41, %v8001_v40  ;;  %v3019_v47 = vsel %vm8145_vm7, %v8054_v35, %v3015_v1 }
 0x33f   : > { %5341 = vpow2.f32 %v2309_v60  ;;  %11844 = vst [vmem:[#allocation57_spill] sm:$0xff] %v8139_v12  ;;  %v1965_v31 = vsub.f32 %v11847_v32, %v8120_v43  ;;  %v11849_v60 = vld [vmem:[#allocation59_spill] sm:$0xff]  ;;  %v1966_v32 = vsub.f32 %v11850_v7, %v8120_v43  ;;  %v3042_v7 = vand.u32 2147483647, %v8101_v44 }
 0x340   : > { %3859 = vmatmul.f32.gmra.mxu2 %v3005_v13  ;;  %4575 = vst [vmem:[%s7871_s30 + $0x110] sm:$0xff] %v3005_v13  ;;  %v1952_v29 = vsub.f32 %v11849_v60, %v8001_v40  ;;  %5343 = vpow2.f32 %v2311_v58  ;;  %v2723_v13 = vadd.f32 %v8139_v12, %v2722_v38  ;;  %v11852_v60 = vld [vmem:[#allocation155_spill] sm:$0xff]  ;;  %v2313_v61 = vmul.f32 1.442695, %v1951_v22 }
 0x341   : > { %v8156_v9 = vpop.eup %5333  ;;  %4576 = vst [vmem:[%s7871_s30 + $0x118] sm:$0xff] %v3006_v62  ;;  %5345 = vpow2.f32 %v2307_v3  ;;  %v1953_v57 = vsub.f32 %v11852_v60, %v8001_v40  ;;  %v11854_v62 = vld [vmem:[#allocation158_spill] sm:$0xff]  ;;  %v8185_v18 = vmul.f32 1.442695, %v1965_v31  ;;  %v8192_v17 = vsel %vm8128_vm6, %v3023_v37, %v3019_v47 }
 0x342   : > { %v8167_v41 = vpop.eup %5335  ;;  %v3034_v58 = vmul.f32 %v8156_v9, %v8101_v44  ;;  %v1954_v12 = vsub.f32 %v11854_v62, %v8001_v40  ;;  %v2315_v22 = vmul.f32 1.442695, %v1952_v29  ;;  %v1955_v37 = vsub.f32 %v11859_v55, %v8001_v40 }
 0x343   : > { %11851 = vst [vmem:[#allocation176_spill] sm:$0xff] %v8167_v41  ;;  %v8173_v35 = vpop.eup %5337  ;;  %v2724_v1 = vadd.f32 %v8167_v41, %v2723_v13  ;;  %v8195_v13 = vmul.f32 1.442695, %v1966_v32  ;;  %v2317_v47 = vmul.f32 1.442695, %v1953_v57  ;;  %vm8208_vm9 = vcmp.eq.f32.partialorder %v3042_v7, 8.507059e+37 }
 0x344   : > { %11853 = vst [vmem:[#allocation54_spill] sm:$0xff] %v8173_v35  ;;  %v8183_v30 = vpop.eup %5339  ;;  %v3035_v3 = vsub.f32 1.0, %v3034_v58  ;;  %v11857_v58 = vmax.f32 %v7787_v46, %v7660_v0  ;;  %vm3039_vm10 = vweird.f32 %v8156_v9  ;;  %v1956_v55 = vsub.f32 %v11863_v33, %v8001_v40  ;;  %v11867_v33 = vld [vmem:[#allocation187_spill] sm:$0xff] }
 0x345   : > { %11855 = vst [vmem:[#allocation55_spill] sm:$0xff] %v8183_v30  ;;  %v8188_v60 = vpop.eup %5341  ;;  %v2725_v62 = vadd.f32 %v8173_v35, %v2724_v1  ;;  %v8204_v41 = vpop.xlane.xlu0 %1708  ;;  %v3044_v1 = vand.u32 2147483648, %v8101_v44  ;;  %v3026_v40 = vmul.f32 %v11866_v14, %v8192_v17  ;;  %vm8235_vm11 = vmor %vm3038_vm8, %vm3039_vm10 }
 0x346   : > { %v8179_v38 = vpop.xlane.xlu2 %2683  ;;  %11856 = vst [vmem:[#allocation177_spill] sm:$0xff] %v8188_v60  ;;  %1753 = vmax.xlane.f32.xlu1 %v11857_v58  ;;  %v8201_v31 = vpop.eup %5343  ;;  %v3036_v29 = vmul.f32 %v8156_v9, %v3035_v3  ;;  %v2319_v58 = vmul.f32 1.442695, %v1954_v12  ;;  %v11865_v12 = vld [vmem:[#allocation25_spill] sm:$0xff] }
 0x347   : > { %5347 = vrcp.f32 %v8179_v38  ;;  %11858 = vst [vmem:[#allocation133_spill] sm:$0xff] %v8201_v31  ;;  %v2726_v46 = vadd.f32 %v8183_v30, %v2725_v62  ;;  %v8214_v35 = vpop.eup %5345  ;;  %v2730_v62 = vadd.f32 %v8201_v31, %v8188_v60  ;;  %v3025_v30 = vmul.f32 %v11865_v12, %v8192_v17  ;;  %3749 = vmatmul.f32.gmra.mxu1 %v3026_v40 }
 0x348   : > { %5349 = vpow2.f32 %v2313_v61  ;;  %11862 = vst [vmem:[#allocation134_spill] sm:$0xff] %v8214_v35  ;;  %v3037_v3 = vadd.f32 %v8156_v9, %v3036_v29  ;;  %v11864_v61 = vld [vmem:[#allocation69_spill] sm:$0xff]  ;;  %v2321_v29 = vmul.f32 1.442695, %v1955_v37  ;;  %v11870_v37 = vld [vmem:[#allocation70_spill] sm:$0xff]  ;;  %vm3060_vm12 = vweird.f32 %v8179_v38 }
 0x349   : > { %5351 = vpow2.f32 %v2315_v22  ;;  %v2727_v57 = vadd.f32 %v8214_v35, %v2726_v46  ;;  %v1973_v7 = vsub.f32 %v11864_v61, %v8204_v41  ;;  %v3027_v22 = vmul.f32 %v11867_v33, %v8192_v17  ;;  %3636 = vmatmul.f32.gmra.mxu0 %v3025_v30  ;;  %4581 = vst [vmem:[%s7871_s30 + $0x140] sm:$0xff] %v3025_v30 }
 0x34a   : > { %5353 = vpow2.f32 %v2317_v47  ;;  %v3045_v61 = vor.u32 1.1754944e-38, %v3044_v1  ;;  %v1974_v47 = vsub.f32 %v11870_v37, %v8204_v41  ;;  %v3041_v44 = vsel %vm8235_vm11, %v8156_v9, %v3037_v3  ;;  %4582 = vst [vmem:[%s7871_s30 + $0x148] sm:$0xff] %v3026_v40  ;;  %v11874_v3 = vld [vmem:[#allocation63_spill] sm:$0xff]  ;;  %v11875_v40 = vld [vmem:[#allocation64_spill] sm:$0xff] }
 0x34b   : > { %2728 = vadd.xlane.f32.xlu0 %v2727_v57  ;;  %5355 = vpow2.f32 %v2319_v58  ;;  %v2323_v1 = vmul.f32 1.442695, %v1956_v55  ;;  %3862 = vmatmul.f32.gmra.mxu2 %v3027_v22  ;;  %v11872_v57 = vld [vmem:[#allocation188_spill] sm:$0xff]  ;;  %4583 = vst [vmem:[%s7871_s30 + $0x150] sm:$0xff] %v3027_v22  ;;  %v3064_v9 = vand.u32 2147483647, %v8179_v38  ;;  %v1959_v55 = vsub.f32 %v11874_v3, %v8087_v59 }
 0x34c   : > { %v3028_v37 = vmul.f32 %v11872_v57, %v8192_v17  ;;  %v8269_v57 = vsel %vm8208_vm9, %v3045_v61, %v3041_v44 }
 0x34d   : > { %v8227_v42 = vpop.eup %5347  ;;  %vm8338_vm15 = vcmp.eq.f32.partialorder %v3064_v9, 8.507059e+37 }
 0x34e   : > { %v3056_v12 = vmul.f32 %v8227_v42, %v8179_v38  ;;  %v8246_v33 = vpop.eup %5349  ;;  %3975 = vmatmul.f32.gmra.mxu3 %v3028_v37  ;;  %4584 = vst [vmem:[%s7871_s30 + $0x158] sm:$0xff] %v3028_v37  ;;  %v8278_v37 = vmul.f32 1.442695, %v1974_v47  ;;  %v8280_v3 = vpop.xlane.xlu2 %1717  ;;  %vm3061_vm13 = vweird.f32 %v8227_v42 }
 0x34f   : > { %v8244_v14 = vpop.xlane.xlu1 %2692  ;;  %11871 = vst [vmem:[#allocation60_spill] sm:$0xff] %v8246_v33  ;;  %v2731_v30 = vadd.f32 %v8246_v33, %v2730_v62  ;;  %v8259_v46 = vpop.eup %5351  ;;  %vm8323_vm14 = vmor %vm3060_vm12, %vm3061_vm13 }
 0x350   : > { %5357 = vrcp.f32 %v8244_v14  ;;  %v3057_v58 = vsub.f32 1.0, %v3056_v12  ;;  %11873 = vst [vmem:[#allocation46_spill] sm:$0xff] %v8259_v46  ;;  %v1960_v12 = vsub.f32 %v11875_v40, %v8087_v59  ;;  %v8274_v35 = vpop.eup %5353  ;;  %v11877_v40 = vld [vmem:[#allocation165_spill] sm:$0xff]  ;;  %v3088_v47 = vand.u32 2147483648, %v8244_v14 }
 0x351   : > { %5359 = vpow2.f32 %v8161_v10  ;;  %v3066_v10 = vand.u32 2147483648, %v8179_v38  ;;  %v2732_v22 = vadd.f32 %v8259_v46, %v2731_v30  ;;  %11876 = vst [vmem:[#allocation159_spill] sm:$0xff] %v8274_v35  ;;  %v1961_v32 = vsub.f32 %v11877_v40, %v8087_v59  ;;  %v8284_v61 = vpop.eup %5355  ;;  %v11880_v40 = vld [vmem:[#allocation23_spill] sm:$0xff] }
 0x352   : > { %5361 = vpow2.f32 %v2321_v29  ;;  %v3058_v62 = vmul.f32 %v8227_v42, %v3057_v58  ;;  %v8276_v29 = vmul.f32 1.442695, %v1973_v7  ;;  %11878 = vst [vmem:[#allocation61_spill] sm:$0xff] %v8284_v61  ;;  %v11879_v58 = vld [vmem:[#allocation169_spill] sm:$0xff]  ;;  %v2331_v46 = vmul.f32 1.442695, %v1960_v12 }
 0x353   : > { %5363 = vpow2.f32 %v2323_v1  ;;  %v2733_v44 = vadd.f32 %v8274_v35, %v2732_v22  ;;  %v1962_v30 = vsub.f32 %v11879_v58, %v8087_v59  ;;  %v2329_v1 = vmul.f32 1.442695, %v1959_v55  ;;  %v11882_v35 = vld [vmem:[#allocation73_spill] sm:$0xff] }
 0x354   : > { %5365 = vpow2.f32 %v8175_v26  ;;  %v3047_v33 = vmul.f32 %v11880_v40, %v8269_v57  ;;  %v3059_v60 = vadd.f32 %v8227_v42, %v3058_v62  ;;  %v11881_v58 = vmax.f32 %v7794_v11, %v7668_v53  ;;  %v11884_v40 = vld [vmem:[#allocation74_spill] sm:$0xff] }
 0x355   : > { %v2734_v22 = vadd.f32 %v8284_v61, %v2733_v44  ;;  %v1981_v55 = vsub.f32 %v11882_v35, %v8280_v3  ;;  %v1982_v0 = vsub.f32 %v11884_v40, %v8280_v3  ;;  %v1963_v62 = vsub.f32 %v11885_v51, %v8087_v59  ;;  %v11886_v61 = vld [vmem:[#allocation179_spill] sm:$0xff]  ;;  %v11890_v51 = vld [vmem:[#allocation32_spill] sm:$0xff] }
 0x356   : > { %v8291_v7 = vpop.eup %5357  ;;  %1762 = vmax.xlane.f32.xlu0 %v11881_v58  ;;  %5367 = vpow2.f32 %v2329_v1  ;;  %v2333_v44 = vmul.f32 1.442695, %v1961_v32  ;;  %3639 = vmatmul.f32.gmra.mxu0 %v3047_v33  ;;  %4589 = vst [vmem:[%s7871_s30 + $0x180] sm:$0xff] %v3047_v33  ;;  %v1964_v53 = vsub.f32 %v11886_v61, %v8087_v59  ;;  %v2335_v2 = vmul.f32 1.442695, %v1962_v30  ;;  %v11891_v32 = vld [vmem:[#allocation143_spill] sm:$0xff] }
 0x357   : > { %v8296_v31 = vpop.eup %5359  ;;  %v3078_v26 = vmul.f32 %v8291_v7, %v8244_v14  ;;  %5369 = vpow2.f32 %v2331_v46  ;;  %v3048_v33 = vmul.f32 %v11890_v51, %v8269_v57  ;;  %v3049_v1 = vmul.f32 %v11891_v32, %v8269_v57  ;;  %v11892_v59 = vld [vmem:[#allocation34_spill] sm:$0xff] }
 0x358   : > { %v8307_v12 = vpop.eup %5361  ;;  %v3050_v61 = vmul.f32 %v11892_v59, %v8269_v57  ;;  %v3063_v38 = vsel %vm8323_vm14, %v8227_v42, %v3059_v60  ;;  %5371 = vpow2.f32 %v2333_v44  ;;  %v2337_v59 = vmul.f32 1.442695, %v1963_v62 }
 0x359   : > { %11883 = vst [vmem:[#allocation62_spill] sm:$0xff] %v8307_v12  ;;  %v2735_v11 = vadd.f32 %v8307_v12, %v2734_v22  ;;  %v3079_v58 = vsub.f32 1.0, %v3078_v26  ;;  %v8317_v35 = vpop.eup %5363  ;;  %v3086_v26 = vand.u32 2147483647, %v8244_v14  ;;  %3752 = vmatmul.f32.gmra.mxu1 %v3048_v33  ;;  %3865 = vmatmul.f32.gmra.mxu2 %v3049_v1  ;;  %v3067_v42 = vor.u32 1.1754944e-38, %v3066_v10 }
 0x35a   : > { %11887 = vst [vmem:[#allocation22_spill] sm:$0xff] %v8317_v35  ;;  %v8333_v30 = vpop.eup %5365  ;;  %v8344_v51 = vpop.xlane.xlu0 %2701  ;;  %vm3082_vm0 = vweird.f32 %v8244_v14  ;;  %5373 = vpow2.f32 %v2335_v2  ;;  %v2339_v60 = vmul.f32 1.442695, %v1964_v53  ;;  %3978 = vmatmul.f32.gmra.mxu3 %v3050_v61  ;;  %v8354_v44 = vmul.f32 1.442695, %v1981_v55  ;;  %v11917_v2 = vld [vmem:[#allocation72_spill] sm:$0xff] }
 0x35b   : > { %v2736_v46 = vadd.f32 %v8317_v35, %v2735_v11  ;;  %v3080_v32 = vmul.f32 %v8291_v7, %v3079_v58  ;;  %v2739_v40 = vadd.f32 %v8333_v30, %v8296_v31  ;;  %4590 = vst [vmem:[%s7871_s30 + $0x188] sm:$0xff] %v3048_v33  ;;  %v3089_v11 = vor.u32 1.1754944e-38, %v3088_v47  ;;  %v11897_v47 = vld [vmem:[#allocation67_spill] sm:$0xff]  ;;  %v11898_v33 = vld [vmem:[#allocation68_spill] sm:$0xff]  ;;  %v8408_v14 = vpop.xlane.xlu1 %1726 }
 0x35c   : > { %4591 = vst [vmem:[%s7871_s30 + $0x190] sm:$0xff] %v3049_v1  ;;  %v8352_v9 = vpop.eup %5367  ;;  %v8356_v62 = vmul.f32 1.442695, %v1982_v0  ;;  %5375 = vrcp.f32 %v8344_v51  ;;  %v8362_v10 = vsel %vm8338_vm15, %v3067_v42, %v3063_v38  ;;  %vm3083_vm1 = vweird.f32 %v8291_v7 }
 0x35d   : > { %2737 = vadd.xlane.f32.xlu2 %v2736_v46  ;;  %4592 = vst [vmem:[%s7871_s30 + $0x198] sm:$0xff] %v3050_v61  ;;  %vm8365_vm2 = vcmp.eq.f32.partialorder %v3086_v26, 8.507059e+37  ;;  %v2740_v53 = vadd.f32 %v8352_v9, %v2739_v40  ;;  %v1967_v55 = vsub.f32 %v11897_v47, %v8120_v43  ;;  %v8372_v0 = vpop.eup %5369  ;;  %v3081_v58 = vadd.f32 %v8291_v7, %v3080_v32  ;;  %v11899_v61 = vld [vmem:[#allocation178_spill] sm:$0xff]  ;;  %v11900_v46 = vld [vmem:[#allocation20_spill] sm:$0xff]  ;;  %v11903_v32 = vld [vmem:[#allocation185_spill] sm:$0xff] }
 0x35e   : > { %5377 = vpow2.f32 %v2337_v59  ;;  %v1968_v1 = vsub.f32 %v11898_v33, %v8120_v43  ;;  %v1969_v38 = vsub.f32 %v11899_v61, %v8120_v43  ;;  %v1970_v26 = vsub.f32 %v11900_v46, %v8120_v43  ;;  %v11901_v40 = vld [vmem:[#allocation180_spill] sm:$0xff]  ;;  %v8384_v47 = vpop.eup %5371  ;;  %vm8395_vm3 = vmor %vm3082_vm0, %vm3083_vm1  ;;  %v11907_v46 = vld [vmem:[#allocation145_spill] sm:$0xff] }
 0x35f   : > { %5379 = vpow2.f32 %v2339_v60  ;;  %v2741_v22 = vadd.f32 %v8372_v0, %v2740_v53  ;;  %v1971_v42 = vsub.f32 %v11901_v40, %v8120_v43  ;;  %11902 = vst [vmem:[#allocation181_spill] sm:$0xff] %v8384_v47  ;;  %v1972_v59 = vsub.f32 %v11903_v32, %v8120_v43  ;;  %v11908_v40 = vld [vmem:[#allocation146_spill] sm:$0xff] }
 0x360   : > { %5381 = vpow2.f32 %v8185_v18  ;;  %v2345_v33 = vmul.f32 1.442695, %v1967_v55  ;;  %v2347_v35 = vmul.f32 1.442695, %v1968_v1  ;;  %v8389_v12 = vpop.eup %5373  ;;  %v2349_v43 = vmul.f32 1.442695, %v1969_v38 }
 0x361   : > { %11904 = vst [vmem:[#allocation136_spill] sm:$0xff] %v8389_v12  ;;  %v2742_v53 = vadd.f32 %v8384_v47, %v2741_v22  ;;  %5383 = vpow2.f32 %v8195_v13  ;;  %v3085_v55 = vsel %vm8395_vm3, %v8291_v7, %v3081_v58  ;;  %vm3104_vm4 = vweird.f32 %v8344_v51 }
 0x362   : > { %v8402_v18 = vpop.eup %5375  ;;  %v2351_v1 = vmul.f32 1.442695, %v1970_v26  ;;  %v3069_v22 = vmul.f32 %v11907_v46, %v8362_v10  ;;  %v3070_v32 = vmul.f32 %v11908_v40, %v8362_v10  ;;  %v11909_v38 = vmax.f32 %v7797_v28, %v7692_v23  ;;  %v11912_v28 = vld [vmem:[#allocation33_spill] sm:$0xff] }
 0x363   : > { %v2743_v13 = vadd.f32 %v8389_v12, %v2742_v53  ;;  %v3100_v7 = vmul.f32 %v8402_v18, %v8344_v51  ;;  %5385 = vpow2.f32 %v2345_v33  ;;  %v2353_v58 = vmul.f32 1.442695, %v1971_v42  ;;  %v11911_v53 = vld [vmem:[#allocation39_spill] sm:$0xff]  ;;  %v11914_v42 = vld [vmem:[#allocation77_spill] sm:$0xff] }
 0x364   : > { %v8420_v60 = vpop.eup %5377  ;;  %5387 = vpow2.f32 %v2347_v35  ;;  %v2355_v26 = vmul.f32 1.442695, %v1972_v59  ;;  %3642 = vmatmul.f32.gmra.mxu0 %v3069_v22  ;;  %4597 = vst [vmem:[%s7871_s30 + $0x1c0] sm:$0xff] %v3069_v22  ;;  %3755 = vmatmul.f32.gmra.mxu1 %v3070_v32  ;;  %v3071_v46 = vmul.f32 %v11911_v53, %v8362_v10  ;;  %v3072_v40 = vmul.f32 %v11912_v28, %v8362_v10 }
 0x365   : > { %1771 = vmax.xlane.f32.xlu2 %v11909_v38  ;;  %11910 = vst [vmem:[#allocation138_spill] sm:$0xff] %v8420_v60  ;;  %v8427_v38 = vpop.eup %5379  ;;  %v2744_v61 = vadd.f32 %v8420_v60, %v2743_v13  ;;  %v3101_v33 = vsub.f32 1.0, %v3100_v7  ;;  %5389 = vpow2.f32 %v2349_v43  ;;  %v8437_v59 = vsel %vm8365_vm2, %v3089_v11, %v3085_v55  ;;  %v11915_v13 = vld [vmem:[#allocation71_spill] sm:$0xff] }
 0x366   : > { %11913 = vst [vmem:[#allocation65_spill] sm:$0xff] %v8427_v38  ;;  %v8433_v35 = vpop.eup %5381  ;;  %v3110_v22 = vand.u32 2147483648, %v8344_v51  ;;  %5391 = vpow2.f32 %v2351_v1  ;;  %3868 = vmatmul.f32.gmra.mxu2 %v3071_v46  ;;  %3981 = vmatmul.f32.gmra.mxu3 %v3072_v40  ;;  %v1975_v7 = vsub.f32 %v11915_v13, %v8204_v41  ;;  %vm3105_vm5 = vweird.f32 %v8402_v18  ;;  %v11918_v1 = vld [vmem:[#allocation182_spill] sm:$0xff] }
 0x367   : > { %4598 = vst [vmem:[%s7871_s30 + $0x1c8] sm:$0xff] %v3070_v32  ;;  %v8443_v53 = vpop.eup %5383  ;;  %v2745_v43 = vadd.f32 %v8427_v38, %v2744_v61  ;;  %v3102_v32 = vmul.f32 %v8402_v18, %v3101_v33  ;;  %5393 = vpow2.f32 %v2353_v58  ;;  %v1976_v55 = vsub.f32 %v11917_v2, %v8204_v41  ;;  %v11920_v33 = vld [vmem:[#allocation183_spill] sm:$0xff]  ;;  %v11921_v58 = vld [vmem:[#allocation186_spill] sm:$0xff]  ;;  %vm8474_vm6 = vmor %vm3104_vm4, %vm3105_vm5 }
 0x368   : > { %4599 = vst [vmem:[%s7871_s30 + $0x1d0] sm:$0xff] %v3071_v46  ;;  %5395 = vpow2.f32 %v2355_v26  ;;  %v2748_v11 = vadd.f32 %v8443_v53, %v8433_v35  ;;  %v1977_v46 = vsub.f32 %v11918_v1, %v8204_v41  ;;  %v1978_v13 = vsub.f32 %v11920_v33, %v8204_v41  ;;  %v11929_v33 = vld [vmem:[#allocation42_spill] sm:$0xff] }
 0x369   : > { %11916 = vst [vmem:[#allocation58_spill] sm:$0xff] %v8443_v53  ;;  %v8455_v28 = vpop.eup %5385  ;;  %2746 = vadd.xlane.f32.xlu1 %v2745_v43  ;;  %v3103_v61 = vadd.f32 %v8402_v18, %v3102_v32  ;;  %v1979_v26 = vsub.f32 %v11921_v58, %v8204_v41  ;;  %5397 = vpow2.f32 %v8276_v29  ;;  %v2361_v1 = vmul.f32 1.442695, %v1975_v7 }
 0x36a   : > { %4600 = vst [vmem:[%s7871_s30 + $0x1d8] sm:$0xff] %v3072_v40  ;;  %v11922_v40 = vld [vmem:[#allocation31_spill] sm:$0xff]  ;;  %v8464_v38 = vpop.eup %5387  ;;  %v2749_v2 = vadd.f32 %v8455_v28, %v2748_v11  ;;  %v2363_v60 = vmul.f32 1.442695, %v1976_v55  ;;  %5399 = vpow2.f32 %v8278_v37  ;;  %v2365_v11 = vmul.f32 1.442695, %v1977_v46 }
 0x36b   : > { %11919 = vst [vmem:[#allocation59_spill] sm:$0xff] %v8455_v28  ;;  %v1980_v12 = vsub.f32 %v11922_v40, %v8204_v41  ;;  %v8468_v43 = vpop.eup %5389  ;;  %v11926_v41 = vld [vmem:[#allocation78_spill] sm:$0xff]  ;;  %v2367_v58 = vmul.f32 1.442695, %v1978_v13  ;;  %v3107_v7 = vsel %vm8474_vm6, %v8402_v18, %v3103_v61  ;;  %5401 = vpow2.f32 %v2361_v1  ;;  %v11932_v61 = vld [vmem:[#allocation197_spill] sm:$0xff] }
 0x36c   : > { %11923 = vst [vmem:[#allocation66_spill] sm:$0xff] %v8468_v43  ;;  %v8481_v29 = vpop.eup %5391  ;;  %v2750_v55 = vadd.f32 %v8464_v38, %v2749_v2  ;;  %v2369_v40 = vmul.f32 1.442695, %v1979_v26  ;;  %5403 = vpow2.f32 %v2363_v60  ;;  %v3091_v37 = vmul.f32 %v11929_v33, %v8437_v59  ;;  %v11930_v46 = vld [vmem:[#allocation194_spill] sm:$0xff]  ;;  %v11935_v33 = vld [vmem:[#allocation76_spill] sm:$0xff] }
 0x36d   : > { %11927 = vst [vmem:[#allocation155_spill] sm:$0xff] %v8481_v29  ;;  %v8487_v47 = vpop.eup %5393  ;;  %v2371_v28 = vmul.f32 1.442695, %v1980_v12  ;;  %v3092_v13 = vmul.f32 %v11930_v46, %v8437_v59  ;;  %5405 = vpow2.f32 %v2365_v11  ;;  %v3093_v2 = vmul.f32 %v11932_v61, %v8437_v59  ;;  %v11933_v26 = vld [vmem:[#allocation198_spill] sm:$0xff]  ;;  %v11934_v12 = vld [vmem:[#allocation75_spill] sm:$0xff] }
 0x36e   : > { %11928 = vst [vmem:[#allocation158_spill] sm:$0xff] %v8487_v47  ;;  %v8493_v53 = vpop.eup %5395  ;;  %v2751_v18 = vadd.f32 %v8468_v43, %v2750_v55  ;;  %v3094_v1 = vmul.f32 %v11933_v26, %v8437_v59  ;;  %v3111_v60 = vor.u32 1.1754944e-38, %v3110_v22  ;;  %5407 = vpow2.f32 %v2367_v58  ;;  %3645 = vmatmul.f32.gmra.mxu0 %v3091_v37  ;;  %v11938_v22 = vld [vmem:[#allocation189_spill] sm:$0xff] }
 0x36f   : > { %11931 = vst [vmem:[#allocation161_spill] sm:$0xff] %v8493_v53  ;;  %3758 = vmatmul.f32.gmra.mxu1 %v3092_v13  ;;  %v1983_v32 = vsub.f32 %v11934_v12, %v8280_v3  ;;  %v1984_v46 = vsub.f32 %v11935_v33, %v8280_v3  ;;  %v8505_v55 = vpop.eup %5397  ;;  %v11937_v11 = vand.u32 2147483647, %v8344_v51  ;;  %5409 = vpow2.f32 %v2369_v40  ;;  %3871 = vmatmul.f32.gmra.mxu2 %v3093_v2  ;;  %v11941_v51 = vld [vmem:[#allocation29_spill] sm:$0xff]  ;;  %v11942_v40 = vld [vmem:[#allocation190_spill] sm:$0xff] }
 0x370   : > { %4605 = vst [vmem:[%s7871_s30 + $0x200] sm:$0xff] %v3091_v37  ;;  %v2752_v61 = vadd.f32 %v8481_v29, %v2751_v18  ;;  %3984 = vmatmul.f32.gmra.mxu3 %v3094_v1  ;;  %v1985_v58 = vsub.f32 %v11938_v22, %v8280_v3  ;;  %v8513_v37 = vpop.eup %5399  ;;  %v11940_v12 = vmax.f32 %v7807_v4, %v7748_v56  ;;  %5411 = vpow2.f32 %v2371_v28 }
 0x371   : > { %11936 = vst [vmem:[#allocation172_spill] sm:$0xff] %v8505_v55  ;;  %vm3109_vm7 = vcmp.eq.f32.partialorder %v11937_v11, 8.507059e+37  ;;  %v1986_v18 = vsub.f32 %v11941_v51, %v8280_v3  ;;  %v8525_v33 = vpop.eup %5401  ;;  %5413 = vpow2.f32 %v8354_v44  ;;  %v2377_v4 = vmul.f32 1.442695, %v1983_v32 }
 0x372   : > { %4606 = vst [vmem:[%s7871_s30 + $0x208] sm:$0xff] %v3092_v13  ;;  %v8515_v26 = vsel %vm3109_vm7, %v3111_v60, %v3107_v7  ;;  %1780 = vmax.xlane.f32.xlu1 %v11940_v12  ;;  %v1987_v13 = vsub.f32 %v11942_v40, %v8280_v3  ;;  %v2753_v11 = vadd.f32 %v8487_v47, %v2752_v61  ;;  %v8532_v60 = vpop.eup %5403  ;;  %5415 = vpow2.f32 %v8356_v62 }
 0x373   : > { %11939 = vst [vmem:[#allocation69_spill] sm:$0xff] %v8513_v37  ;;  %v2757_v7 = vadd.f32 %v8513_v37, %v8505_v55  ;;  %v11945_v28 = vsub.f32 %v11914_v42, %v8408_v14  ;;  %v2379_v22 = vmul.f32 1.442695, %v1984_v46  ;;  %v2381_v12 = vmul.f32 1.442695, %v1985_v58  ;;  %v8538_v51 = vpop.eup %5405  ;;  %v11950_v46 = vld [vmem:[#allocation200_spill] sm:$0xff] }
 0x374   : > { %4607 = vst [vmem:[%s7871_s30 + $0x210] sm:$0xff] %v3093_v2  ;;  %v2754_v61 = vadd.f32 %v8493_v53, %v2753_v11  ;;  %v2383_v32 = vmul.f32 1.442695, %v1986_v18  ;;  %v8544_v47 = vpop.eup %5407  ;;  %5417 = vpow2.f32 %v2377_v4  ;;  %v2385_v42 = vmul.f32 1.442695, %v1987_v13  ;;  %v8552_v11 = vpop.xlane.xlu0 %1735  ;;  %v11952_v18 = vld [vmem:[#allocation202_spill] sm:$0xff] }
 0x375   : > { %11943 = vst [vmem:[#allocation25_spill] sm:$0xff] %v8525_v33  ;;  %v2389_v2 = vmul.f32 1.442695, %v11945_v28  ;;  %v2758_v40 = vadd.f32 %v8525_v33, %v2757_v7  ;;  %v11949_v28 = vld [vmem:[#allocation151_spill] sm:$0xff]  ;;  %v3114_v58 = vmul.f32 %v11950_v46, %v8515_v26  ;;  %v8550_v29 = vpop.eup %5409  ;;  %5419 = vpow2.f32 %v2379_v22  ;;  %v11953_v13 = vld [vmem:[#allocation205_spill] sm:$0xff] }
 0x376   : > { %4608 = vst [vmem:[%s7871_s30 + $0x218] sm:$0xff] %v3094_v1  ;;  %v11947_v1 = vld [vmem:[#allocation37_spill] sm:$0xff]  ;;  %v3113_v62 = vmul.f32 %v11949_v28, %v8515_v26  ;;  %2755 = vadd.xlane.f32.xlu0 %v2754_v61  ;;  %v3115_v7 = vmul.f32 %v11952_v18, %v8515_v26  ;;  %v3116_v4 = vmul.f32 %v11953_v13, %v8515_v26  ;;  %5421 = vpow2.f32 %v2381_v12  ;;  %v11956_v61 = vld [vmem:[#allocation79_spill] sm:$0xff] }
 0x377   : > { %11944 = vst [vmem:[#allocation184_spill] sm:$0xff] %v8532_v60  ;;  %v1988_v44 = vsub.f32 %v11947_v1, %v8280_v3  ;;  %v2759_v3 = vadd.f32 %v8532_v60, %v2758_v40  ;;  %v8559_v1 = vpop.eup %5411  ;;  %v11955_v28 = vsub.f32 %v11926_v41, %v8408_v14  ;;  %3761 = vmatmul.f32.gmra.mxu1 %v3114_v58  ;;  %v11957_v40 = vld [vmem:[#allocation80_spill] sm:$0xff]  ;;  %5423 = vpow2.f32 %v2383_v32 }
 0x378   : > { %11946 = vst [vmem:[#allocation187_spill] sm:$0xff] %v8538_v51  ;;  %3648 = vmatmul.f32.gmra.mxu0 %v3113_v62  ;;  %v1991_v22 = vsub.f32 %v11956_v61, %v8408_v14  ;;  %v1992_v18 = vsub.f32 %v11957_v40, %v8408_v14  ;;  %v8569_v53 = vpop.eup %5413  ;;  %3874 = vmatmul.f32.gmra.mxu2 %v3115_v7  ;;  %v11959_v41 = vld [vmem:[#allocation144_spill] sm:$0xff]  ;;  %5425 = vpow2.f32 %v2385_v42  ;;  %v11964_v42 = vld [vmem:[#allocation191_spill] sm:$0xff] }
 0x379   : > { %11948 = vst [vmem:[#allocation70_spill] sm:$0xff] %v8544_v47  ;;  %v2391_v46 = vmul.f32 1.442695, %v11955_v28  ;;  %v2760_v13 = vadd.f32 %v8538_v51, %v2759_v3  ;;  %3987 = vmatmul.f32.gmra.mxu3 %v3116_v4  ;;  %v1993_v12 = vsub.f32 %v11959_v41, %v8408_v14  ;;  %v11961_v28 = vld [vmem:[#allocation81_spill] sm:$0xff]  ;;  %v2387_v43 = vmul.f32 1.442695, %v1988_v44 }
 0x37a   : > { %11951 = vst [vmem:[#allocation188_spill] sm:$0xff] %v8550_v29  ;;  %v1997_v61 = vsub.f32 %v11961_v28, %v8552_v11  ;;  %v11962_v40 = vld [vmem:[#allocation28_spill] sm:$0xff]  ;;  %5427 = vpow2.f32 %v2389_v2  ;;  %v11963_v51 = vld [vmem:[#allocation82_spill] sm:$0xff]  ;;  %v1995_v44 = vsub.f32 %v11964_v42, %v8408_v14 }
 0x37b   : > { %11954 = vst [vmem:[#allocation63_spill] sm:$0xff] %v8559_v1  ;;  %v1994_v60 = vsub.f32 %v11962_v40, %v8408_v14  ;;  %v2761_v3 = vadd.f32 %v8544_v47, %v2760_v13  ;;  %v1998_v33 = vsub.f32 %v11963_v51, %v8552_v11  ;;  %5429 = vpow2.f32 %v2391_v46  ;;  %v8594_v40 = vpop.f32.mrf.mxu3  ;;  %v8596_v13 = vpop.f32.mrf.mxu0 }
 0x37c   : > { %4613 = vst [vmem:[%s7871_s30 + $0x240] sm:$0xff] %v3113_v62  ;;  %v8575_v62 = vpop.eup %5415 }
 0x37d   : > { %11958 = vst [vmem:[#allocation64_spill] sm:$0xff] %v8569_v53  ;;  %v2766_v32 = vadd.f32 %v8575_v62, %v8569_v53  ;;  %v8586_v41 = vpop.eup %5417  ;;  %v2405_v53 = vmul.f32 1.442695, %v1997_v61  ;;  %v2399_v46 = vmul.f32 1.442695, %v1994_v60  ;;  %v11973_v60 = vmax.f32 %v7769_v15, %v11779_v25  ;;  %v11975_v15 = vld [vmem:[#allocation192_spill] sm:$0xff] }
 0x37e   : > { %4614 = vst [vmem:[%s7871_s30 + $0x248] sm:$0xff] %v3114_v58  ;;  %v2393_v58 = vmul.f32 1.442695, %v1991_v22  ;;  %v8592_v28 = vpop.eup %5419  ;;  %v11966_v22 = vld [vmem:[#allocation195_spill] sm:$0xff] }
 0x37f   : > { %11960 = vst [vmem:[#allocation165_spill] sm:$0xff] %v8575_v62  ;;  %v2767_v2 = vadd.f32 %v8586_v41, %v2766_v32  ;;  %v1996_v47 = vsub.f32 %v11966_v22, %v8408_v14  ;;  %v2397_v62 = vmul.f32 1.442695, %v1993_v12  ;;  %v8602_v51 = vpop.eup %5421  ;;  %v11971_v12 = vld [vmem:[#allocation84_spill] sm:$0xff]  ;;  %v2407_v22 = vmul.f32 1.442695, %v1998_v33 }
 0x380   : > { %4615 = vst [vmem:[%s7871_s30 + $0x250] sm:$0xff] %v3115_v7  ;;  %v2395_v7 = vmul.f32 1.442695, %v1992_v18  ;;  %5431 = vpow2.f32 %v2393_v58  ;;  %v11968_v18 = vld [vmem:[#allocation83_spill] sm:$0xff]  ;;  %v8606_v37 = vpop.eup %5423  ;;  %v2000_v32 = vsub.f32 %v11971_v12, %v8552_v11  ;;  %v8621_v58 = vmax.f32 %v11973_v60, %v8596_v13  ;;  %v8630_v12 = vpop.f32.mrf.mxu1  ;;  %v11976_v60 = vld [vmem:[#allocation193_spill] sm:$0xff] }
 0x381   : > { %4616 = vst [vmem:[%s7871_s30 + $0x258] sm:$0xff] %v3116_v4  ;;  %v2762_v4 = vadd.f32 %v8550_v29, %v2761_v3  ;;  %v1999_v42 = vsub.f32 %v11968_v18, %v8552_v11  ;;  %v11970_v3 = vmax.f32 %v7814_v20, %v7816_v49  ;;  %5433 = vpow2.f32 %v2387_v43  ;;  %v8615_v61 = vpop.eup %5425 }
 0x382   : > { %11965 = vst [vmem:[#allocation169_spill] sm:$0xff] %v8596_v13  ;;  %v2768_v14 = vadd.f32 %v8592_v28, %v2767_v2  ;;  %5435 = vpow2.f32 %v2395_v7  ;;  %v8625_v20 = vpop.eup %5427  ;;  %v2401_v2 = vmul.f32 1.442695, %v1995_v44  ;;  %v2403_v18 = vmul.f32 1.442695, %v1996_v47  ;;  %v8641_v44 = vpop.f32.mrf.mxu2 }
 0x383   : > { %11967 = vst [vmem:[#allocation23_spill] sm:$0xff] %v8602_v51  ;;  %v2763_v55 = vadd.f32 %v8559_v1, %v2762_v4  ;;  %1789 = vmax.xlane.f32.xlu0 %v11970_v3  ;;  %v1797_v4 = vmax.f32 %v7839_v6, %v8594_v40  ;;  %5437 = vpow2.f32 %v2397_v62  ;;  %v8628_v3 = vpop.eup %5429  ;;  %v2001_v33 = vsub.f32 %v11975_v15, %v8552_v11  ;;  %v11978_v15 = vld [vmem:[#allocation153_spill] sm:$0xff] }
 0x384   : > { %11969 = vst [vmem:[#allocation73_spill] sm:$0xff] %v8606_v37  ;;  %v2769_v43 = vadd.f32 %v8602_v51, %v2768_v14  ;;  %5439 = vpow2.f32 %v2399_v46  ;;  %v2002_v6 = vsub.f32 %v11976_v60, %v8552_v11  ;;  %v2409_v7 = vmul.f32 1.442695, %v1999_v42  ;;  %v11977_v46 = vld [vmem:[#allocation152_spill] sm:$0xff]  ;;  %v11979_v42 = vld [vmem:[#allocation154_spill] sm:$0xff]  ;;  %v11981_v51 = vld [vmem:[#allocation157_spill] sm:$0xff] }
 0x385   : > { %11972 = vst [vmem:[#allocation74_spill] sm:$0xff] %v8615_v61  ;;  %2764 = vadd.xlane.f32.xlu2 %v2763_v55  ;;  %v2775_v55 = vadd.f32 %v8628_v3, %v8625_v20  ;;  %5441 = vpow2.f32 %v2405_v53  ;;  %v2411_v62 = vmul.f32 1.442695, %v2000_v32  ;;  %v2919_v14 = vmul.f32 %v11977_v46, %v7843_v27  ;;  %v11982_v46 = vld [vmem:[#allocation196_spill] sm:$0xff] }
 0x386   : > { %11974 = vst [vmem:[#allocation173_spill] sm:$0xff] %v8628_v3  ;;  %v2770_v1 = vadd.f32 %v8606_v37, %v2769_v43  ;;  %v8639_v47 = vpop.eup %5431  ;;  %5443 = vpow2.f32 %v2407_v22  ;;  %v2920_v60 = vmul.f32 %v11978_v15, %v7843_v27  ;;  %v2921_v43 = vmul.f32 %v11979_v42, %v7843_v27  ;;  %v11983_v42 = vld [vmem:[#allocation160_spill] sm:$0xff] }
 0x387   : > { %v8649_v37 = vpop.eup %5433  ;;  %5445 = vpow2.f32 %v2401_v2  ;;  %v2776_v32 = vadd.f32 %v8639_v47, %v2775_v55  ;;  %v2922_v22 = vmul.f32 %v11981_v51, %v7843_v27  ;;  %v2003_v13 = vsub.f32 %v11982_v46, %v8552_v11  ;;  %4545 = vst [vmem:[%s7871_s30 + $0x20] sm:$0xff] %v2919_v14  ;;  %v11985_v27 = vld [vmem:[#allocation162_spill] sm:$0xff]  ;;  %v11987_v14 = vld [vmem:[#allocation204_spill] sm:$0xff] }
 0x388   : > { %11980 = vst [vmem:[#allocation179_spill] sm:$0xff] %v8649_v37  ;;  %v2771_v53 = vadd.f32 %v8615_v61, %v2770_v1  ;;  %v8655_v29 = vpop.eup %5435  ;;  %5447 = vpow2.f32 %v2409_v7  ;;  %v2413_v15 = vmul.f32 1.442695, %v2001_v33  ;;  %v2941_v25 = vmul.f32 %v11983_v42, %v7893_v34  ;;  %v8671_v7 = vpop.f32.mrf.mxu3 }
 0x389   : > { %v8662_v3 = vpop.eup %5437  ;;  %5449 = vpow2.f32 %v2403_v18  ;;  %v2777_v2 = vadd.f32 %v8655_v29, %v2776_v32  ;;  %4546 = vst [vmem:[%s7871_s30 + $0x28] sm:$0xff] %v2920_v60  ;;  %v2942_v51 = vmul.f32 %v11985_v27, %v7893_v34  ;;  %v8673_v33 = vpop.f32.mrf.mxu0  ;;  %v2004_v46 = vsub.f32 %v11987_v14, %v8552_v11  ;;  %v11988_v18 = vld [vmem:[#allocation163_spill] sm:$0xff]  ;;  %v11989_v11 = vld [vmem:[#allocation164_spill] sm:$0xff] }
 0x38a   : > { %11984 = vst [vmem:[#allocation32_spill] sm:$0xff] %v8662_v3  ;;  %v2772_v1 = vadd.f32 %v8649_v37, %v2771_v53  ;;  %v8669_v55 = vpop.eup %5439  ;;  %5451 = vpow2.f32 %v2411_v62  ;;  %v2415_v53 = vmul.f32 1.442695, %v2002_v6  ;;  %v2943_v32 = vmul.f32 %v11988_v18, %v7893_v34  ;;  %v11990_v6 = vld [vmem:[#allocation120_spill] sm:$0xff] }
 0x38b   : > { %11986 = vst [vmem:[#allocation143_spill] sm:$0xff] %v8669_v55  ;;  %v8680_v60 = vpop.eup %5441  ;;  %v1804_v42 = vmax.f32 %v8621_v58, %v8630_v12  ;;  %v2778_v27 = vadd.f32 %v8662_v3, %v2777_v2  ;;  %v2944_v14 = vmul.f32 %v11989_v11, %v7893_v34  ;;  %5453 = vpow2.f32 %v2413_v15  ;;  %v11991_v58 = vld [vmem:[#allocation170_spill] sm:$0xff] }
 0x38c   : > { %4547 = vst [vmem:[%s7871_s30 + $0x30] sm:$0xff] %v2921_v43  ;;  %2773 = vadd.xlane.f32.xlu1 %v2772_v1  ;;  %v8688_v62 = vpop.eup %5443  ;;  %v1811_v43 = vmax.f32 %v7802_v50, %v11990_v6  ;;  %v2417_v18 = vmul.f32 1.442695, %v2003_v13  ;;  %v2963_v37 = vmul.f32 %v11991_v58, %v7951_v19  ;;  %v11993_v50 = vld [vmem:[#allocation171_spill] sm:$0xff]  ;;  %v11995_v13 = vld [vmem:[#allocation121_spill] sm:$0xff]  ;;  %v8708_v58 = vpop.f32.mrf.mxu1  ;;  %5455 = vpow2.f32 %v2415_v53 }
 0x38d   : > { %1798 = vmax.xlane.f32.xlu2 %v1797_v4  ;;  %4548 = vst [vmem:[%s7871_s30 + $0x38] sm:$0xff] %v2922_v22  ;;  %v8695_v1 = vpop.eup %5445  ;;  %v2779_v4 = vadd.f32 %v8669_v55, %v2778_v27  ;;  %v1805_v22 = vmax.f32 %v1804_v42, %v8641_v44  ;;  %v2784_v34 = vadd.f32 %v8688_v62, %v8680_v60  ;;  %v2419_v27 = vmul.f32 1.442695, %v2004_v46  ;;  %v11996_v42 = vld [vmem:[#allocation174_spill] sm:$0xff]  ;;  %v11999_v46 = vld [vmem:[#allocation123_spill] sm:$0xff]  ;;  %v8724_v6 = vpop.f32.mrf.mxu2 }
 0x38e   : > { %4553 = vst [vmem:[%s7871_s30 + $0x60] sm:$0xff] %v2941_v25  ;;  %v2964_v2 = vmul.f32 %v11993_v50, %v7951_v19  ;;  %v8704_v15 = vpop.eup %5447  ;;  %v11994_v25 = vld [vmem:[#allocation122_spill] sm:$0xff]  ;;  %v2965_v55 = vmul.f32 %v11996_v42, %v7951_v19  ;;  %5457 = vpow2.f32 %v2417_v18 }
 0x38f   : > { %11992 = vst [vmem:[#allocation34_spill] sm:$0xff] %v8695_v1  ;;  %v1818_v11 = vmax.f32 %v11995_v13, %v11994_v25  ;;  %v8713_v3 = vpop.eup %5449  ;;  %v2780_v50 = vadd.f32 %v8695_v1, %v2779_v4  ;;  %v2785_v61 = vadd.f32 %v8704_v15, %v2784_v34  ;;  %v11998_v25 = vld [vmem:[#allocation175_spill] sm:$0xff]  ;;  %v1806_v34 = vmax.f32 %v1805_v22, %v8671_v7  ;;  %v12004_v22 = vld [vmem:[#allocation137_spill] sm:$0xff] }
 0x390   : > { %4554 = vst [vmem:[%s7871_s30 + $0x68] sm:$0xff] %v2942_v51  ;;  %v1812_v51 = vmax.f32 %v1811_v43, %v8673_v33  ;;  %v2966_v13 = vmul.f32 %v11998_v25, %v7951_v19  ;;  %v8721_v53 = vpop.eup %5451  ;;  %v12000_v43 = vld [vmem:[#allocation19_spill] sm:$0xff]  ;;  %v12001_v19 = vld [vmem:[#allocation21_spill] sm:$0xff]  ;;  %5459 = vpow2.f32 %v2419_v27  ;;  %v8747_v27 = vpop.f32.mrf.mxu3 }
 0x391   : > { %4555 = vst [vmem:[%s7871_s30 + $0x70] sm:$0xff] %v2943_v32  ;;  %v1819_v32 = vmax.f32 %v1818_v11, %v11999_v46  ;;  %v2985_v42 = vmul.f32 %v12000_v43, %v8018_v63  ;;  %v2781_v4 = vadd.f32 %v8713_v3, %v2780_v50  ;;  %v2986_v25 = vmul.f32 %v12001_v19, %v8018_v63  ;;  %v8735_v11 = vpop.eup %5453  ;;  %v12006_v19 = vld [vmem:[#allocation24_spill] sm:$0xff] }
 0x392   : > { %11997 = vst [vmem:[#allocation67_spill] sm:$0xff] %v8713_v3  ;;  %v1813_v43 = vmax.f32 %v1812_v51, %v8708_v58  ;;  %v8745_v50 = vpop.eup %5455  ;;  %v3007_v51 = vmul.f32 %v12006_v19, %v8094_v16 }
 0x393   : > { %4556 = vst [vmem:[%s7871_s30 + $0x78] sm:$0xff] %v2944_v14  ;;  %v2786_v14 = vadd.f32 %v8721_v53, %v2785_v61  ;;  %2782 = vadd.xlane.f32.xlu0 %v2781_v4  ;;  %v12007_v4 = vld [vmem:[#allocation124_spill] sm:$0xff] }
 0x394   : > { %4561 = vst [vmem:[%s7871_s30 + $0xa0] sm:$0xff] %v2963_v37  ;;  %v12003_v37 = vld [vmem:[#allocation135_spill] sm:$0xff]  ;;  %1807 = vmax.xlane.f32.xlu1 %v1806_v34  ;;  %v1820_v34 = vmax.f32 %v1819_v32, %v12007_v4 }
 0x395   : > { %4562 = vst [vmem:[%s7871_s30 + $0xa8] sm:$0xff] %v2964_v2  ;;  %v2987_v18 = vmul.f32 %v12003_v37, %v8018_v63  ;;  %v2787_v61 = vadd.f32 %v8735_v11, %v2786_v14  ;;  %v2988_v2 = vmul.f32 %v12004_v22, %v8018_v63  ;;  %v12008_v63 = vld [vmem:[#allocation139_spill] sm:$0xff]  ;;  %v8760_v22 = vpop.eup %5457 }
 0x396   : > { %12002 = vst [vmem:[#allocation68_spill] sm:$0xff] %v8735_v11  ;;  %v3008_v37 = vmul.f32 %v12008_v63, %v8094_v16  ;;  %v8772_v63 = vpop.f32.mrf.mxu1 }
 0x397   : > { %4563 = vst [vmem:[%s7871_s30 + $0xb0] sm:$0xff] %v2965_v55  ;;  %v8749_v55 = vpop.f32.mrf.mxu0  ;;  %v2788_v14 = vadd.f32 %v8745_v50, %v2787_v61  ;;  %v12011_v61 = vld [vmem:[#allocation27_spill] sm:$0xff] }
 0x398   : > { %4564 = vst [vmem:[%s7871_s30 + $0xb8] sm:$0xff] %v2966_v13  ;;  %v1814_v13 = vmax.f32 %v1813_v43, %v8724_v6  ;;  %v1821_v19 = vmax.f32 %v1820_v34, %v8749_v55  ;;  %v3010_v43 = vmul.f32 %v12011_v61, %v8094_v16  ;;  %v12016_v61 = vld [vmem:[#allocation30_spill] sm:$0xff] }
 0x399   : > { %12005 = vst [vmem:[#allocation178_spill] sm:$0xff] %v8745_v50  ;;  %v2789_v32 = vadd.f32 %v8760_v22, %v2788_v14 }
 0x39a   : > { %4569 = vst [vmem:[%s7871_s30 + $0xe0] sm:$0xff] %v2985_v42  ;;  %v12010_v42 = vld [vmem:[#allocation26_spill] sm:$0xff]  ;;  %v1815_v34 = vmax.f32 %v1814_v13, %v8747_v27 }
 0x39b   : > { %4570 = vst [vmem:[%s7871_s30 + $0xe8] sm:$0xff] %v2986_v25  ;;  %v3009_v11 = vmul.f32 %v12010_v42, %v8094_v16  ;;  %v8770_v25 = vpop.eup %5459  ;;  %v8782_v16 = vpop.f32.mrf.mxu2  ;;  %v12017_v13 = vld [vmem:[#allocation142_spill] sm:$0xff] }
 0x39c   : > { %12009 = vst [vmem:[#allocation20_spill] sm:$0xff] %v8760_v22  ;;  %v2790_v42 = vadd.f32 %v8770_v25, %v2789_v32  ;;  %1816 = vmax.xlane.f32.xlu0 %v1815_v34  ;;  %v12018_v32 = vld [vmem:[#allocation35_spill] sm:$0xff] }
 0x39d   : > { %4571 = vst [vmem:[%s7871_s30 + $0xf0] sm:$0xff] %v2987_v18  ;;  %v12013_v18 = vld [vmem:[#allocation140_spill] sm:$0xff]  ;;  %v12038_v22 = vld [vmem:[#allocation127_spill] sm:$0xff] }
 0x39e   : > { %4572 = vst [vmem:[%s7871_s30 + $0xf8] sm:$0xff] %v2988_v2  ;;  %v3029_v50 = vmul.f32 %v12013_v18, %v8192_v17  ;;  %v12014_v2 = vld [vmem:[#allocation141_spill] sm:$0xff]  ;;  %v1822_v18 = vmax.f32 %v1821_v19, %v8772_v63  ;;  %2791 = vadd.xlane.f32.xlu2 %v2790_v42  ;;  %v8798_v19 = vpop.f32.mrf.mxu3 }
 0x39f   : > { %12012 = vst [vmem:[#allocation180_spill] sm:$0xff] %v8770_v25  ;;  %v3030_v14 = vmul.f32 %v12014_v2, %v8192_v17  ;;  %v3051_v2 = vmul.f32 %v12018_v32, %v8269_v57 }
 0x3a0   : > { %4577 = vst [vmem:[%s7871_s30 + $0x120] sm:$0xff] %v3007_v51  ;;  %v3031_v51 = vmul.f32 %v12016_v61, %v8192_v17  ;;  %v12019_v61 = vld [vmem:[#allocation36_spill] sm:$0xff] }
 0x3a1   : > { %4578 = vst [vmem:[%s7871_s30 + $0x128] sm:$0xff] %v3008_v37  ;;  %v3032_v37 = vmul.f32 %v12017_v13, %v8192_v17  ;;  %v3052_v25 = vmul.f32 %v12019_v61, %v8269_v57  ;;  %v12024_v13 = vld [vmem:[#allocation148_spill] sm:$0xff] }
 0x3a2   : > { %12015 = vst [vmem:[#allocation185_spill] sm:$0xff] %v8782_v16  ;;  %v3074_v32 = vmul.f32 %v12024_v13, %v8362_v10 }
 0x3a3   : > { %4579 = vst [vmem:[%s7871_s30 + $0x130] sm:$0xff] %v3009_v11  ;;  %v1823_v11 = vmax.f32 %v1822_v18, %v8782_v16 }
 0x3a4   : > { %4580 = vst [vmem:[%s7871_s30 + $0x138] sm:$0xff] %v3010_v43  ;;  %v12021_v43 = vld [vmem:[#allocation147_spill] sm:$0xff] }
 0x3a5   : > { %4585 = vst [vmem:[%s7871_s30 + $0x160] sm:$0xff] %v3029_v50  ;;  %v3053_v17 = vmul.f32 %v12021_v43, %v8269_v57  ;;  %v12022_v50 = vld [vmem:[#allocation40_spill] sm:$0xff]  ;;  %v1824_v34 = vmax.f32 %v1823_v11, %v8798_v19  ;;  %v12028_v43 = vld [vmem:[#allocation199_spill] sm:$0xff] }
 0x3a6   : > { %4586 = vst [vmem:[%s7871_s30 + $0x168] sm:$0xff] %v3030_v14  ;;  %v3054_v42 = vmul.f32 %v12022_v50, %v8269_v57  ;;  %v12023_v14 = vld [vmem:[#allocation41_spill] sm:$0xff]  ;;  %v12026_v57 = vld [vmem:[#allocation150_spill] sm:$0xff] }
 0x3a7   : > { %12020 = vst [vmem:[#allocation145_spill] sm:$0xff] %v8798_v19  ;;  %v3073_v18 = vmul.f32 %v12023_v14, %v8362_v10  ;;  %1825 = vmax.xlane.f32.xlu2 %v1824_v34  ;;  %v12029_v50 = vld [vmem:[#allocation201_spill] sm:$0xff] }
 0x3a8   : > { %4587 = vst [vmem:[%s7871_s30 + $0x170] sm:$0xff] %v3031_v51  ;;  %v12025_v51 = vld [vmem:[#allocation149_spill] sm:$0xff]  ;;  %v3097_v34 = vmul.f32 %v12029_v50, %v8437_v59 }
 0x3a9   : > { %4588 = vst [vmem:[%s7871_s30 + $0x178] sm:$0xff] %v3032_v37  ;;  %v3075_v61 = vmul.f32 %v12025_v51, %v8362_v10  ;;  %v3076_v37 = vmul.f32 %v12026_v57, %v8362_v10  ;;  %v12032_v51 = vld [vmem:[#allocation125_spill] sm:$0xff] }
 0x3aa   : > { %4593 = vst [vmem:[%s7871_s30 + $0x1a0] sm:$0xff] %v3051_v2  ;;  %v12027_v2 = vld [vmem:[#allocation38_spill] sm:$0xff]  ;;  %v12033_v57 = vld [vmem:[#allocation85_spill] sm:$0xff] }
 0x3ab   : > { %4594 = vst [vmem:[%s7871_s30 + $0x1a8] sm:$0xff] %v3052_v25  ;;  %v2711_v25 = vpop.xlane.xlu2 %2710  ;;  %v3095_v11 = vmul.f32 %v12027_v2, %v8437_v59  ;;  %v12034_v2 = vld [vmem:[#allocation206_spill] sm:$0xff]  ;;  %v12036_v50 = vld [vmem:[#allocation209_spill] sm:$0xff] }
 0x3ac   : > { %4595 = vst [vmem:[%s7871_s30 + $0x1b0] sm:$0xff] %v3053_v17  ;;  %5461 = vrcp.f32 %v2711_v25  ;;  %v3096_v17 = vmul.f32 %v12028_v43, %v8437_v59  ;;  %v3117_v43 = vmul.f32 %v12034_v2, %v8515_v26  ;;  %v3130_v1 = vand.u32 2147483647, %v2711_v25 }
 0x3ad   : > { %4596 = vst [vmem:[%s7871_s30 + $0x1b8] sm:$0xff] %v3054_v42  ;;  %v12030_v42 = vld [vmem:[#allocation203_spill] sm:$0xff]  ;;  %vm3126_vm9 = vweird.f32 %v2711_v25 }
 0x3ae   : > { %4601 = vst [vmem:[%s7871_s30 + $0x1e0] sm:$0xff] %v3073_v18  ;;  %v3098_v14 = vmul.f32 %v12030_v42, %v8437_v59  ;;  %v12035_v59 = vld [vmem:[#allocation208_spill] sm:$0xff]  ;;  %v12037_v42 = vld [vmem:[#allocation211_spill] sm:$0xff]  ;;  %vm3131_vm11 = vcmp.eq.f32.partialorder %v3130_v1, 8.507059e+37 }
 0x3af   : > { %4602 = vst [vmem:[%s7871_s30 + $0x1e8] sm:$0xff] %v3074_v32  ;;  %v12031_v32 = vld [vmem:[#allocation126_spill] sm:$0xff] }
 0x3b0   : > { %4603 = vst [vmem:[%s7871_s30 + $0x1f0] sm:$0xff] %v3075_v61  ;;  %v1827_v61 = vmax.f32 %v12032_v51, %v12031_v32  ;;  %v3132_v51 = vand.u32 2147483648, %v2711_v25 }
 0x3b1   : > { %4604 = vst [vmem:[%s7871_s30 + $0x1f8] sm:$0xff] %v3076_v37 }
 0x3b2   : > { %4609 = vst [vmem:[%s7871_s30 + $0x220] sm:$0xff] %v3095_v11  ;;  %v5462_v10 = vpop.eup %5461  ;;  %v3118_v11 = vmul.f32 %v12035_v59, %v8515_v26  ;;  %v1828_v32 = vmax.f32 %v1827_v61, %v12038_v22  ;;  %v8854_v59 = vpop.xlane.xlu1 %2719  ;;  %v12041_v61 = vld [vmem:[#allocation128_spill] sm:$0xff]  ;;  %v12043_v22 = vld [vmem:[#allocation129_spill] sm:$0xff] }
 0x3b3   : > { %4610 = vst [vmem:[%s7871_s30 + $0x228] sm:$0xff] %v3096_v17  ;;  %v3122_v18 = vmul.f32 %v5462_v10, %v2711_v25  ;;  %v8835_v13 = vpop.xlane.xlu2 %1744  ;;  %vm3127_vm8 = vweird.f32 %v5462_v10  ;;  %5463 = vrcp.f32 %v8854_v59  ;;  %v8868_v25 = vpop.f32.mrf.mxu0  ;;  %vm3148_vm12 = vweird.f32 %v8854_v59 }
 0x3b4   : > { %4611 = vst [vmem:[%s7871_s30 + $0x230] sm:$0xff] %v3097_v34  ;;  %v2005_v37 = vsub.f32 %v12033_v57, %v8835_v13  ;;  %v3119_v34 = vmul.f32 %v12036_v50, %v8515_v26  ;;  %v12039_v57 = vld [vmem:[#allocation86_spill] sm:$0xff]  ;;  %v12040_v50 = vld [vmem:[#allocation87_spill] sm:$0xff]  ;;  %vm3128_vm10 = vmor %vm3126_vm9, %vm3127_vm8 }
 0x3b5   : > { %4612 = vst [vmem:[%s7871_s30 + $0x238] sm:$0xff] %v3098_v14  ;;  %v3123_v17 = vsub.f32 1.0, %v3122_v18  ;;  %v3120_v14 = vmul.f32 %v12037_v42, %v8515_v26  ;;  %v2006_v3 = vsub.f32 %v12039_v57, %v8835_v13  ;;  %v2007_v19 = vsub.f32 %v12040_v50, %v8835_v13  ;;  %v12042_v57 = vld [vmem:[#allocation130_spill] sm:$0xff] }
 0x3b6   : > { %4617 = vst [vmem:[%s7871_s30 + $0x260] sm:$0xff] %v3117_v43  ;;  %v2421_v18 = vmul.f32 1.442695, %v2005_v37  ;;  %v1829_v42 = vmax.f32 %v1828_v32, %v12041_v61  ;;  %v3133_v43 = vor.u32 1.1754944e-38, %v3132_v51  ;;  %v1836_v37 = vmax.f32 %v12043_v22, %v12042_v57 }
 0x3b7   : > { %v3124_v2 = vmul.f32 %v5462_v10, %v3123_v17  ;;  %4618 = vst [vmem:[%s7871_s30 + $0x268] sm:$0xff] %v3118_v11  ;;  %v2423_v17 = vmul.f32 1.442695, %v2006_v3  ;;  %v2008_v11 = vsub.f32 %v11761_v54, %v8835_v13  ;;  %v2010_v32 = vsub.f32 %v7583_v21, %v8835_v13 }
 0x3b8   : > { %4619 = vst [vmem:[%s7871_s30 + $0x270] sm:$0xff] %v3119_v34  ;;  %v2009_v34 = vsub.f32 %v7566_v5, %v8835_v13  ;;  %5465 = vpow2.f32 %v2421_v18  ;;  %v2425_v3 = vmul.f32 1.442695, %v2007_v19  ;;  %v8886_v19 = vmax.f32 %v1829_v42, %v8868_v25 }
 0x3b9   : > { %v3125_v26 = vadd.f32 %v5462_v10, %v3124_v2  ;;  %4620 = vst [vmem:[%s7871_s30 + $0x278] sm:$0xff] %v3120_v14  ;;  %5467 = vpow2.f32 %v2423_v17  ;;  %v5464_v51 = vpop.eup %5463  ;;  %v12045_v2 = vld [vmem:[#allocation131_spill] sm:$0xff]  ;;  %v2011_v18 = vsub.f32 %v7598_v48, %v8835_v13  ;;  %v2431_v50 = vmul.f32 1.442695, %v2010_v32 }
 0x3ba   : > { %12044 = vst [vmem:[#allocation146_spill] sm:$0xff] %v8868_v25  ;;  %v8883_v21 = vmax.f32 %v1836_v37, %v12045_v2  ;;  %5469 = vpow2.f32 %v2425_v3  ;;  %v2012_v48 = vsub.f32 %v7642_v52, %v8835_v13  ;;  %vm3149_vm13 = vweird.f32 %v5464_v51  ;;  %v12071_v25 = vld [vmem:[#allocation94_spill] sm:$0xff] }
 0x3bb   : > { %v3129_v16 = vsel %vm3128_vm10, %v5462_v10, %v3125_v26  ;;  %v12046_v26 = vld [vmem:[#allocation89_spill] sm:$0xff]  ;;  %vm3150_vm15 = vmor %vm3148_vm12, %vm3149_vm13 }
 0x3bc   : > { %v8870_v14 = vsel %vm3131_vm11, %v3133_v43, %v3129_v16  ;;  %v2427_v16 = vmul.f32 1.442695, %v2008_v11  ;;  %v12047_v43 = vld [vmem:[#allocation90_spill] sm:$0xff]  ;;  %v12048_v11 = vld [vmem:[#allocation91_spill] sm:$0xff] }
 0x3bd   : > { %v3135_v54 = vmul.f32 %v7896_v24, %v8870_v14  ;;  %v3136_v10 = vmul.f32 %v7904_v36, %v8870_v14  ;;  %v3137_v5 = vmul.f32 %v7926_v45, %v8870_v14  ;;  %v3138_v1 = vmul.f32 %v7933_v8, %v8870_v14  ;;  %v8892_v8 = vpop.xlane.xlu1 %1753 }
 0x3be   : > { %v2429_v24 = vmul.f32 1.442695, %v2009_v34  ;;  %v3144_v36 = vmul.f32 %v5464_v51, %v8854_v59  ;;  %v3152_v45 = vand.u32 2147483647, %v8854_v59  ;;  %v2013_v42 = vsub.f32 %v12046_v26, %v8892_v8  ;;  %v8904_v34 = vpop.eup %5465 }
 0x3bf   : > { %3651 = vmatmul.f32.gmra.mxu0 %v3135_v54  ;;  %4621 = vst [vmem:[%s7871_s30 + $0x280] sm:$0xff] %v3135_v54  ;;  %3764 = vmatmul.f32.gmra.mxu1 %v3136_v10  ;;  %v2014_v17 = vsub.f32 %v12047_v43, %v8892_v8  ;;  %v2015_v37 = vsub.f32 %v12048_v11, %v8892_v8  ;;  %5471 = vpow2.f32 %v2427_v16  ;;  %v8912_v3 = vpop.eup %5467  ;;  %v2433_v11 = vmul.f32 1.442695, %v2011_v18 }
 0x3c0   : > { %4622 = vst [vmem:[%s7871_s30 + $0x288] sm:$0xff] %v3136_v10  ;;  %3877 = vmatmul.f32.gmra.mxu2 %v3137_v5  ;;  %3990 = vmatmul.f32.gmra.mxu3 %v3138_v1  ;;  %v3145_v54 = vsub.f32 1.0, %v3144_v36  ;;  %v3154_v10 = vand.u32 2147483648, %v8854_v59  ;;  %v2437_v32 = vmul.f32 1.442695, %v2013_v42  ;;  %5473 = vpow2.f32 %v2429_v24  ;;  %v8922_v24 = vpop.xlane.xlu0 %2728  ;;  %v8924_v42 = vpop.eup %5469 }
 0x3c1   : > { %4623 = vst [vmem:[%s7871_s30 + $0x290] sm:$0xff] %v3137_v5  ;;  %v2439_v26 = vmul.f32 1.442695, %v2014_v17  ;;  %v2016_v5 = vsub.f32 %v11762_v39, %v8892_v8  ;;  %5475 = vpow2.f32 %v2431_v50  ;;  %v2793_v36 = vadd.f32 %v8912_v3, %v8904_v34  ;;  %v12052_v50 = vld [vmem:[#allocation210_spill] sm:$0xff] }
 0x3c2   : > { %4624 = vst [vmem:[%s7871_s30 + $0x298] sm:$0xff] %v3138_v1  ;;  %v3146_v43 = vmul.f32 %v5464_v51, %v3145_v54  ;;  %v12049_v1 = vld [vmem:[#allocation207_spill] sm:$0xff]  ;;  %5477 = vpow2.f32 %v2437_v32  ;;  %v2441_v52 = vmul.f32 1.442695, %v2015_v37  ;;  %vm8918_vm14 = vcmp.eq.f32.partialorder %v3152_v45, 8.507059e+37  ;;  %v12054_v32 = vld [vmem:[#allocation212_spill] sm:$0xff] }
 0x3c3   : > { %v2017_v2 = vsub.f32 %v12049_v1, %v8892_v8  ;;  %v3155_v39 = vor.u32 1.1754944e-38, %v3154_v10  ;;  %5479 = vpow2.f32 %v2439_v26  ;;  %v2435_v18 = vmul.f32 1.442695, %v2012_v48  ;;  %v12056_v48 = vld [vmem:[#allocation215_spill] sm:$0xff] }
 0x3c4   : > { %v3147_v13 = vadd.f32 %v5464_v51, %v3146_v43  ;;  %5481 = vrcp.f32 %v8922_v24  ;;  %v2018_v17 = vsub.f32 %v12052_v50, %v8892_v8  ;;  %v2443_v37 = vmul.f32 1.442695, %v2016_v5 }
 0x3c5   : > { %v8931_v45 = vpop.eup %5471  ;;  %5483 = vpow2.f32 %v2433_v11  ;;  %v2794_v10 = vadd.f32 %v8924_v42, %v2793_v36  ;;  %v2019_v26 = vsub.f32 %v12054_v32, %v8892_v8  ;;  %v2020_v1 = vsub.f32 %v12056_v48, %v8892_v8  ;;  %v12059_v36 = vld [vmem:[#allocation48_spill] sm:$0xff]  ;;  %v12060_v32 = vld [vmem:[#allocation49_spill] sm:$0xff]  ;;  %v8956_v8 = vpop.f32.mrf.mxu1 }
 0x3c6   : > { %12053 = vst [vmem:[#allocation39_spill] sm:$0xff] %v8931_v45  ;;  %v3151_v54 = vsel %vm3150_vm15, %v5464_v51, %v3147_v13  ;;  %v8936_v43 = vpop.eup %5473  ;;  %5485 = vpow2.f32 %v2441_v52  ;;  %v2445_v5 = vmul.f32 1.442695, %v2017_v2  ;;  %v12058_v51 = vld [vmem:[#allocation47_spill] sm:$0xff]  ;;  %v8958_v2 = vpop.f32.mrf.mxu0  ;;  %v2447_v48 = vmul.f32 1.442695, %v2018_v17 }
 0x3c7   : > { %12055 = vst [vmem:[#allocation33_spill] sm:$0xff] %v8936_v43  ;;  %v8940_v59 = vsel %vm8918_vm14, %v3155_v39, %v3151_v54  ;;  %v8944_v50 = vpop.eup %5475  ;;  %v12061_v39 = vld [vmem:[#allocation50_spill] sm:$0xff]  ;;  %v2795_v52 = vadd.f32 %v8931_v45, %v2794_v10  ;;  %5487 = vpow2.f32 %v2443_v37  ;;  %v2449_v37 = vmul.f32 1.442695, %v2019_v26  ;;  %v8983_v26 = vpop.f32.mrf.mxu2 }
 0x3c8   : > { %12057 = vst [vmem:[#allocation77_spill] sm:$0xff] %v8944_v50  ;;  %v3157_v11 = vmul.f32 %v12058_v51, %v8940_v59  ;;  %v3158_v13 = vmul.f32 %v12059_v36, %v8940_v59  ;;  %v3159_v16 = vmul.f32 %v12060_v32, %v8940_v59  ;;  %v3160_v54 = vmul.f32 %v12061_v39, %v8940_v59  ;;  %v8954_v57 = vpop.eup %5477  ;;  %v12066_v36 = vld [vmem:[#allocation132_spill] sm:$0xff] }
 0x3c9   : > { %12062 = vst [vmem:[#allocation71_spill] sm:$0xff] %v8954_v57  ;;  %v8961_v51 = vpop.eup %5479  ;;  %v1838_v22 = vmax.f32 %v8883_v21, %v12066_v36  ;;  %5489 = vpow2.f32 %v2435_v18  ;;  %v2796_v39 = vadd.f32 %v8936_v43, %v2795_v52  ;;  %v1831_v21 = vmax.f32 %v8886_v19, %v8956_v8 }
 0x3ca   : > { %12063 = vst [vmem:[#allocation72_spill] sm:$0xff] %v8956_v8  ;;  %3654 = vmatmul.f32.gmra.mxu0 %v3157_v11  ;;  %3767 = vmatmul.f32.gmra.mxu1 %v3158_v13  ;;  %v5482_v32 = vpop.eup %5481  ;;  %5491 = vpow2.f32 %v2445_v5  ;;  %v2802_v17 = vadd.f32 %v8961_v51, %v8954_v57  ;;  %v2451_v36 = vmul.f32 1.442695, %v2020_v1  ;;  %v12070_v5 = vld [vmem:[#allocation93_spill] sm:$0xff]  ;;  %vm3170_vm1 = vweird.f32 %v8922_v24 }
 0x3cb   : > { %12064 = vst [vmem:[#allocation182_spill] sm:$0xff] %v8958_v2  ;;  %3880 = vmatmul.f32.gmra.mxu2 %v3159_v16  ;;  %3993 = vmatmul.f32.gmra.mxu3 %v3160_v54  ;;  %v8970_v10 = vpop.eup %5483  ;;  %v3166_v18 = vmul.f32 %v5482_v32, %v8922_v24  ;;  %5493 = vpow2.f32 %v2447_v48  ;;  %vm3171_vm0 = vweird.f32 %v5482_v32 }
 0x3cc   : > { %12065 = vst [vmem:[#allocation183_spill] sm:$0xff] %v8961_v51  ;;  %v8981_v52 = vpop.eup %5485  ;;  %5495 = vpow2.f32 %v2449_v37  ;;  %v9008_v37 = vpop.f32.mrf.mxu3  ;;  %vm3172_vm3 = vmor %vm3170_vm1, %vm3171_vm0 }
 0x3cd   : > { %4629 = vst [vmem:[%s7871_s30 + $0x2c0] sm:$0xff] %v3157_v11  ;;  %v8975_v11 = vmax.f32 %v1838_v22, %v8958_v2  ;;  %v2797_v22 = vadd.f32 %v8944_v50, %v2796_v39  ;;  %v3167_v19 = vsub.f32 1.0, %v3166_v18  ;;  %v3174_v2 = vand.u32 2147483647, %v8922_v24  ;;  %v8994_v8 = vpop.eup %5487  ;;  %v12074_v39 = vld [vmem:[#allocation95_spill] sm:$0xff] }
 0x3ce   : > { %4630 = vst [vmem:[%s7871_s30 + $0x2c8] sm:$0xff] %v3158_v13  ;;  %v8978_v13 = vpop.xlane.xlu0 %1762  ;;  %v2803_v1 = vadd.f32 %v8981_v52, %v2802_v17  ;;  %5497 = vpow2.f32 %v2451_v36  ;;  %v12081_v36 = vld [vmem:[#allocation213_spill] sm:$0xff] }
 0x3cf   : > { %12067 = vst [vmem:[#allocation186_spill] sm:$0xff] %v8970_v10  ;;  %v2021_v43 = vsub.f32 %v12070_v5, %v8978_v13  ;;  %v2022_v61 = vsub.f32 %v12071_v25, %v8978_v13  ;;  %v2798_v5 = vadd.f32 %v8970_v10, %v2797_v22  ;;  %v8997_v57 = vpop.eup %5489  ;;  %v3168_v25 = vmul.f32 %v5482_v32, %v3167_v19 }
 0x3d0   : > { %4631 = vst [vmem:[%s7871_s30 + $0x2d0] sm:$0xff] %v3159_v16  ;;  %v3176_v16 = vand.u32 2147483648, %v8922_v24  ;;  %v2804_v48 = vadd.f32 %v8994_v8, %v2803_v1  ;;  %v2023_v18 = vsub.f32 %v12074_v39, %v8978_v13  ;;  %v9002_v50 = vpop.eup %5491  ;;  %vm9010_vm2 = vcmp.eq.f32.partialorder %v3174_v2, 8.507059e+37  ;;  %v9014_v19 = vpop.xlane.xlu2 %2737  ;;  %v12082_v2 = vld [vmem:[#allocation214_spill] sm:$0xff] }
 0x3d1   : > { %12068 = vst [vmem:[#allocation31_spill] sm:$0xff] %v8981_v52  ;;  %v2453_v51 = vmul.f32 1.442695, %v2021_v43  ;;  %v2799_v17 = vadd.f32 %v8997_v57, %v2798_v5  ;;  %v12076_v43 = vld [vmem:[#allocation96_spill] sm:$0xff]  ;;  %v3169_v10 = vadd.f32 %v5482_v32, %v3168_v25  ;;  %v9017_v39 = vpop.eup %5493  ;;  %v2025_v5 = vsub.f32 %v12081_v36, %v8978_v13 }
 0x3d2   : > { %12069 = vst [vmem:[#allocation78_spill] sm:$0xff] %v8983_v26  ;;  %v2024_v22 = vsub.f32 %v12076_v43, %v8978_v13  ;;  %v2805_v1 = vadd.f32 %v9002_v50, %v2804_v48  ;;  %v3177_v24 = vor.u32 1.1754944e-38, %v3176_v16  ;;  %v2026_v25 = vsub.f32 %v12082_v2, %v8978_v13  ;;  %v12085_v36 = vld [vmem:[#allocation216_spill] sm:$0xff] }
 0x3d3   : > { %4632 = vst [vmem:[%s7871_s30 + $0x2d8] sm:$0xff] %v3160_v54  ;;  %v2455_v54 = vmul.f32 1.442695, %v2022_v61  ;;  %5499 = vpow2.f32 %v2453_v51  ;;  %2800 = vadd.xlane.f32.xlu1 %v2799_v17  ;;  %v3173_v43 = vsel %vm3172_vm3, %v5482_v32, %v3169_v10  ;;  %v2457_v48 = vmul.f32 1.442695, %v2023_v18  ;;  %v9026_v51 = vpop.eup %5495  ;;  %v12086_v32 = vld [vmem:[#allocation168_spill] sm:$0xff] }
 0x3d4   : > { %12072 = vst [vmem:[#allocation42_spill] sm:$0xff] %v8994_v8  ;;  %5501 = vrcp.f32 %v9014_v19  ;;  %v9032_v16 = vsel %vm9010_vm2, %v3177_v24, %v3173_v43  ;;  %v1832_v17 = vmax.f32 %v1831_v21, %v8983_v26  ;;  %v2027_v8 = vsub.f32 %v12085_v36, %v8978_v13  ;;  %v12089_v61 = vld [vmem:[#allocation57_spill] sm:$0xff]  ;;  %v9045_v43 = vpop.eup %5497  ;;  %v9047_v21 = vpop.f32.mrf.mxu2 }
 0x3d5   : > { %12073 = vst [vmem:[#allocation194_spill] sm:$0xff] %v8997_v57  ;;  %v2806_v57 = vadd.f32 %v9017_v39, %v2805_v1  ;;  %5503 = vpow2.f32 %v2455_v54  ;;  %v2459_v2 = vmul.f32 1.442695, %v2024_v22  ;;  %v3179_v10 = vmul.f32 %v12086_v32, %v9032_v16  ;;  %v12087_v54 = vld [vmem:[#allocation53_spill] sm:$0xff]  ;;  %v12088_v1 = vld [vmem:[#allocation56_spill] sm:$0xff] }
 0x3d6   : > { %12075 = vst [vmem:[#allocation197_spill] sm:$0xff] %v9002_v50  ;;  %v9028_v50 = vpop.f32.mrf.mxu1  ;;  %v3180_v18 = vmul.f32 %v12087_v54, %v9032_v16  ;;  %v3182_v24 = vmul.f32 %v12089_v61, %v9032_v16  ;;  %5505 = vpow2.f32 %v2457_v48  ;;  %v2461_v22 = vmul.f32 1.442695, %v2025_v5  ;;  %v12092_v54 = vld [vmem:[#allocation219_spill] sm:$0xff] }
 0x3d7   : > { %12077 = vst [vmem:[#allocation198_spill] sm:$0xff] %v9008_v37  ;;  %v2807_v36 = vadd.f32 %v9026_v51, %v2806_v57  ;;  %v1840_v32 = vmax.f32 %v8975_v11, %v9028_v50  ;;  %3657 = vmatmul.f32.gmra.mxu0 %v3179_v10  ;;  %v2463_v61 = vmul.f32 1.442695, %v2026_v25  ;;  %v1833_v5 = vmax.f32 %v1832_v17, %v9008_v37  ;;  %v12095_v17 = vld [vmem:[#allocation98_spill] sm:$0xff] }
 0x3d8   : > { %12080 = vst [vmem:[#allocation75_spill] sm:$0xff] %v9017_v39  ;;  %v3181_v39 = vmul.f32 %v12088_v1, %v9032_v16  ;;  %3770 = vmatmul.f32.gmra.mxu1 %v3180_v18  ;;  %v2028_v1 = vsub.f32 %v12092_v54, %v8978_v13  ;;  %3996 = vmatmul.f32.gmra.mxu3 %v3182_v24  ;;  %5507 = vpow2.f32 %v2459_v2  ;;  %v2465_v13 = vmul.f32 1.442695, %v2027_v8  ;;  %v12094_v54 = vld [vmem:[#allocation97_spill] sm:$0xff] }
 0x3d9   : > { %12083 = vst [vmem:[#allocation76_spill] sm:$0xff] %v9026_v51  ;;  %v9050_v26 = vpop.eup %5499  ;;  %v2808_v57 = vadd.f32 %v9045_v43, %v2807_v36  ;;  %v9064_v51 = vpop.xlane.xlu2 %1771  ;;  %v1841_v25 = vmax.f32 %v1840_v32, %v9047_v21  ;;  %5509 = vpow2.f32 %v2461_v22  ;;  %vm3192_vm5 = vweird.f32 %v9014_v19 }
 0x3da   : > { %12084 = vst [vmem:[#allocation189_spill] sm:$0xff] %v9028_v50  ;;  %v5502_v52 = vpop.eup %5501  ;;  %3883 = vmatmul.f32.gmra.mxu2 %v3181_v39  ;;  %v2029_v36 = vsub.f32 %v12094_v54, %v9064_v51  ;;  %v2030_v2 = vsub.f32 %v12095_v17, %v9064_v51  ;;  %5511 = vpow2.f32 %v2463_v61  ;;  %v12098_v54 = vld [vmem:[#allocation99_spill] sm:$0xff] }
 0x3db   : > { %12090 = vst [vmem:[#allocation29_spill] sm:$0xff] %v9045_v43  ;;  %v9060_v48 = vpop.eup %5503  ;;  %v3188_v11 = vmul.f32 %v5502_v52, %v9014_v19  ;;  %2809 = vadd.xlane.f32.xlu0 %v2808_v57  ;;  %1834 = vmax.xlane.f32.xlu1 %v1833_v5  ;;  %v9074_v43 = vpop.f32.mrf.mxu3  ;;  %v2031_v45 = vsub.f32 %v12098_v54, %v9064_v51  ;;  %vm3193_vm4 = vweird.f32 %v5502_v52  ;;  %5513 = vpow2.f32 %v2465_v13 }
 0x3dc   : > { %12091 = vst [vmem:[#allocation190_spill] sm:$0xff] %v9047_v21  ;;  %v2811_v8 = vadd.f32 %v9060_v48, %v9050_v26  ;;  %v9078_v32 = vpop.eup %5505  ;;  %v2469_v21 = vmul.f32 1.442695, %v2029_v36  ;;  %v2471_v37 = vmul.f32 1.442695, %v2030_v2  ;;  %v9089_v17 = vpop.xlane.xlu1 %2746  ;;  %vm3194_vm7 = vmor %vm3192_vm5, %vm3193_vm4 }
 0x3dd   : > { %4637 = vst [vmem:[%s7871_s30 + $0x300] sm:$0xff] %v3179_v10  ;;  %v3196_v10 = vand.u32 2147483647, %v9014_v19  ;;  %v3189_v50 = vsub.f32 1.0, %v3188_v11  ;;  %v2473_v11 = vmul.f32 1.442695, %v2031_v45  ;;  %vm3214_vm9 = vweird.f32 %v9089_v17 }
 0x3de   : > { %4638 = vst [vmem:[%s7871_s30 + $0x308] sm:$0xff] %v3180_v18  ;;  %v3198_v18 = vand.u32 2147483648, %v9014_v19  ;;  %v2812_v22 = vadd.f32 %v9078_v32, %v2811_v8  ;;  %v9085_v61 = vpop.eup %5507  ;;  %5515 = vpow2.f32 %v2469_v21  ;;  %v12102_v8 = vld [vmem:[#allocation217_spill] sm:$0xff] }
 0x3df   : > { %12093 = vst [vmem:[#allocation37_spill] sm:$0xff] %v9060_v48  ;;  %v3190_v5 = vmul.f32 %v5502_v52, %v3189_v50  ;;  %vm3197_vm6 = vcmp.eq.f32.partialorder %v3196_v10, 8.507059e+37  ;;  %5517 = vpow2.f32 %v2471_v37  ;;  %v9092_v50 = vpop.eup %5509  ;;  %v2033_v19 = vsub.f32 %v12102_v8, %v9064_v51  ;;  %v12104_v10 = vld [vmem:[#allocation218_spill] sm:$0xff] }
 0x3e0   : > { %4639 = vst [vmem:[%s7871_s30 + $0x310] sm:$0xff] %v3181_v39  ;;  %v2467_v39 = vmul.f32 1.442695, %v2028_v1  ;;  %v1842_v1 = vmax.f32 %v1841_v25, %v9074_v43  ;;  %v2813_v2 = vadd.f32 %v9085_v61, %v2812_v22  ;;  %v3199_v13 = vor.u32 1.1754944e-38, %v3198_v18  ;;  %v9097_v25 = vpop.eup %5511  ;;  %v12105_v18 = vld [vmem:[#allocation220_spill] sm:$0xff] }
 0x3e1   : > { %4640 = vst [vmem:[%s7871_s30 + $0x318] sm:$0xff] %v3182_v24  ;;  %v12099_v24 = vld [vmem:[#allocation100_spill] sm:$0xff]  ;;  %v3191_v36 = vadd.f32 %v5502_v52, %v3190_v5  ;;  %5519 = vrcp.f32 %v9089_v17  ;;  %v2035_v5 = vsub.f32 %v12105_v18, %v9064_v51  ;;  %v2036_v22 = vsub.f32 %v7692_v23, %v9064_v51 }
 0x3e2   : > { %12096 = vst [vmem:[#allocation151_spill] sm:$0xff] %v9074_v43  ;;  %v2032_v57 = vsub.f32 %v12099_v24, %v9064_v51  ;;  %5521 = vpow2.f32 %v2467_v39  ;;  %v2814_v21 = vadd.f32 %v9092_v50, %v2813_v2  ;;  %v2034_v24 = vsub.f32 %v12104_v10, %v9064_v51 }
 0x3e3   : > { %12097 = vst [vmem:[#allocation200_spill] sm:$0xff] %v9078_v32  ;;  %v3195_v45 = vsel %vm3194_vm7, %v5502_v52, %v3191_v36  ;;  %1843 = vmax.xlane.f32.xlu0 %v1842_v1  ;;  %5523 = vpow2.f32 %v2473_v11  ;;  %v12107_v52 = vld [vmem:[#allocation177_spill] sm:$0xff]  ;;  %v12110_v1 = vld [vmem:[#allocation46_spill] sm:$0xff]  ;;  %v2477_v51 = vmul.f32 1.442695, %v2033_v19 }
 0x3e4   : > { %12100 = vst [vmem:[#allocation202_spill] sm:$0xff] %v9085_v61  ;;  %v2475_v54 = vmul.f32 1.442695, %v2032_v57  ;;  %v9102_v37 = vsel %vm3197_vm6, %v3199_v13, %v3195_v45  ;;  %v9108_v57 = vpop.eup %5513  ;;  %v12108_v36 = vld [vmem:[#allocation133_spill] sm:$0xff]  ;;  %v12109_v13 = vld [vmem:[#allocation60_spill] sm:$0xff]  ;;  %v2815_v23 = vadd.f32 %v9097_v25, %v2814_v21 }
 0x3e5   : > { %12101 = vst [vmem:[#allocation205_spill] sm:$0xff] %v9092_v50  ;;  %v3201_v39 = vmul.f32 %v12107_v52, %v9102_v37  ;;  %v3202_v2 = vmul.f32 %v12108_v36, %v9102_v37  ;;  %v3203_v8 = vmul.f32 %v12109_v13, %v9102_v37  ;;  %v3204_v45 = vmul.f32 %v12110_v1, %v9102_v37  ;;  %v9118_v10 = vpop.eup %5515  ;;  %v9131_v1 = vpop.xlane.xlu1 %1780 }
 0x3e6   : > { %12103 = vst [vmem:[#allocation79_spill] sm:$0xff] %v9097_v25  ;;  %5525 = vpow2.f32 %v2475_v54  ;;  %v9121_v11 = vpop.eup %5517  ;;  %v2479_v18 = vmul.f32 1.442695, %v2034_v24  ;;  %v2816_v36 = vadd.f32 %v9108_v57, %v2815_v23  ;;  %v2481_v13 = vmul.f32 1.442695, %v2035_v5  ;;  %v12115_v25 = vld [vmem:[#allocation101_spill] sm:$0xff] }
 0x3e7   : > { %12106 = vst [vmem:[#allocation80_spill] sm:$0xff] %v9108_v57  ;;  %3660 = vmatmul.f32.gmra.mxu0 %v3201_v39  ;;  %3773 = vmatmul.f32.gmra.mxu1 %v3202_v2  ;;  %v5520_v52 = vpop.eup %5519  ;;  %v2820_v21 = vadd.f32 %v9121_v11, %v9118_v10  ;;  %5527 = vpow2.f32 %v2477_v51  ;;  %v2483_v24 = vmul.f32 1.442695, %v2036_v22  ;;  %v2037_v23 = vsub.f32 %v12115_v25, %v9131_v1  ;;  %v12116_v5 = vld [vmem:[#allocation102_spill] sm:$0xff]  ;;  %v12118_v25 = vld [vmem:[#allocation103_spill] sm:$0xff] }
 0x3e8   : > { %12111 = vst [vmem:[#allocation144_spill] sm:$0xff] %v9118_v10  ;;  %3886 = vmatmul.f32.gmra.mxu2 %v3203_v8  ;;  %3999 = vmatmul.f32.gmra.mxu3 %v3204_v45  ;;  %v9128_v54 = vpop.eup %5521  ;;  %v3210_v19 = vmul.f32 %v5520_v52, %v9089_v17  ;;  %v2038_v57 = vsub.f32 %v12116_v5, %v9131_v1  ;;  %v3220_v10 = vand.u32 2147483648, %v9089_v17  ;;  %5529 = vpow2.f32 %v2479_v18  ;;  %v12119_v18 = vld [vmem:[#allocation104_spill] sm:$0xff] }
 0x3e9   : > { %12112 = vst [vmem:[#allocation81_spill] sm:$0xff] %v9121_v11  ;;  %v2817_v50 = vadd.f32 %v9128_v54, %v2816_v36  ;;  %v2485_v51 = vmul.f32 1.442695, %v2037_v23  ;;  %5531 = vpow2.f32 %v2481_v13  ;;  %v2039_v61 = vsub.f32 %v12118_v25, %v9131_v1  ;;  %v9150_v36 = vpop.xlane.xlu0 %2755 }
 0x3ea   : > { %4645 = vst [vmem:[%s7871_s30 + $0x340] sm:$0xff] %v3201_v39  ;;  %v9134_v39 = vpop.eup %5523  ;;  %v3211_v11 = vsub.f32 1.0, %v3210_v19  ;;  %v2487_v43 = vmul.f32 1.442695, %v2038_v57  ;;  %vm3215_vm8 = vweird.f32 %v5520_v52  ;;  %5533 = vpow2.f32 %v2483_v24 }
 0x3eb   : > { %4646 = vst [vmem:[%s7871_s30 + $0x348] sm:$0xff] %v3202_v2  ;;  %v3218_v2 = vand.u32 2147483647, %v9089_v17  ;;  %2818 = vadd.xlane.f32.xlu2 %v2817_v50  ;;  %v2040_v19 = vsub.f32 %v12119_v18, %v9131_v1  ;;  %5535 = vpow2.f32 %v2485_v51  ;;  %v3221_v50 = vor.u32 1.1754944e-38, %v3220_v10  ;;  %vm3216_vm10 = vmor %vm3214_vm9, %vm3215_vm8  ;;  %v12124_v10 = vld [vmem:[#allocation222_spill] sm:$0xff] }
 0x3ec   : > { %12113 = vst [vmem:[#allocation28_spill] sm:$0xff] %v9128_v54  ;;  %v9145_v22 = vpop.eup %5525  ;;  %v3212_v32 = vmul.f32 %v5520_v52, %v3211_v11  ;;  %5537 = vrcp.f32 %v9150_v36  ;;  %v12121_v11 = vld [vmem:[#allocation221_spill] sm:$0xff]  ;;  %v2489_v24 = vmul.f32 1.442695, %v2039_v61  ;;  %v2042_v25 = vsub.f32 %v12124_v10, %v9131_v1  ;;  %v12130_v10 = vld [vmem:[#allocation106_spill] sm:$0xff]  ;;  %v12142_v54 = vld [vmem:[#allocation88_spill] sm:$0xff] }
 0x3ed   : > { %4647 = vst [vmem:[%s7871_s30 + $0x350] sm:$0xff] %v3203_v8  ;;  %v2821_v8 = vadd.f32 %v9134_v39, %v2820_v21  ;;  %v9154_v21 = vpop.eup %5527  ;;  %v2041_v13 = vsub.f32 %v12121_v11, %v9131_v1  ;;  %5539 = vpow2.f32 %v2487_v43  ;;  %vm3219_vm11 = vcmp.eq.f32.partialorder %v3218_v2, 8.507059e+37 }
 0x3ee   : > { %12114 = vst [vmem:[#allocation82_spill] sm:$0xff] %v9134_v39  ;;  %v3213_v23 = vadd.f32 %v5520_v52, %v3212_v32  ;;  %v9161_v5 = vpop.eup %5529  ;;  %5541 = vpow2.f32 %v2489_v24  ;;  %v12129_v24 = vld [vmem:[#allocation105_spill] sm:$0xff]  ;;  %vm3236_vm12 = vweird.f32 %v9150_v36 }
 0x3ef   : > { %4648 = vst [vmem:[%s7871_s30 + $0x358] sm:$0xff] %v3204_v45  ;;  %v2822_v45 = vadd.f32 %v9145_v22, %v2821_v8  ;;  %v9163_v51 = vpop.eup %5531  ;;  %v2493_v11 = vmul.f32 1.442695, %v2041_v13 }
 0x3f0   : > { %12117 = vst [vmem:[#allocation191_spill] sm:$0xff] %v9145_v22  ;;  %v3217_v8 = vsel %vm3216_vm10, %v5520_v52, %v3213_v23  ;;  %v9170_v18 = vpop.eup %5533 }
 0x3f1   : > { %12120 = vst [vmem:[#allocation195_spill] sm:$0xff] %v9154_v21  ;;  %v2823_v57 = vadd.f32 %v9154_v21, %v2822_v45  ;;  %v9165_v32 = vsel %vm3219_vm11, %v3221_v50, %v3217_v8  ;;  %v2491_v45 = vmul.f32 1.442695, %v2040_v19  ;;  %v9180_v23 = vpop.eup %5535  ;;  %v12127_v19 = vld [vmem:[#allocation223_spill] sm:$0xff] }
 0x3f2   : > { %12122 = vst [vmem:[#allocation83_spill] sm:$0xff] %v9161_v5  ;;  %v3223_v43 = vmul.f32 %v8296_v31, %v9165_v32  ;;  %v3224_v61 = vmul.f32 %v8333_v30, %v9165_v32  ;;  %v3225_v52 = vmul.f32 %v8352_v9, %v9165_v32  ;;  %v3226_v2 = vmul.f32 %v8372_v0, %v9165_v32  ;;  %v5538_v31 = vpop.eup %5537 }
 0x3f3   : > { %12123 = vst [vmem:[#allocation84_spill] sm:$0xff] %v9163_v51  ;;  %v2824_v17 = vadd.f32 %v9161_v5, %v2823_v57  ;;  %v2043_v57 = vsub.f32 %v12127_v19, %v9131_v1  ;;  %v2044_v30 = vsub.f32 %v7748_v56, %v9131_v1  ;;  %v9188_v9 = vpop.eup %5539  ;;  %v3232_v0 = vmul.f32 %v5538_v31, %v9150_v36 }
 0x3f4   : > { %12125 = vst [vmem:[#allocation192_spill] sm:$0xff] %v9170_v18  ;;  %3663 = vmatmul.f32.gmra.mxu0 %v3223_v43  ;;  %3776 = vmatmul.f32.gmra.mxu1 %v3224_v61  ;;  %5543 = vpow2.f32 %v2491_v45  ;;  %v2495_v56 = vmul.f32 1.442695, %v2042_v25  ;;  %v2829_v1 = vadd.f32 %v9188_v9, %v9180_v23  ;;  %vm3237_vm13 = vweird.f32 %v5538_v31 }
 0x3f5   : > { %12126 = vst [vmem:[#allocation193_spill] sm:$0xff] %v9180_v23  ;;  %v2825_v50 = vadd.f32 %v9163_v51, %v2824_v17  ;;  %3889 = vmatmul.f32.gmra.mxu2 %v3225_v52  ;;  %4002 = vmatmul.f32.gmra.mxu3 %v3226_v2  ;;  %v3233_v19 = vsub.f32 1.0, %v3232_v0  ;;  %v3242_v51 = vand.u32 2147483648, %v9150_v36  ;;  %5545 = vpow2.f32 %v2493_v11  ;;  %vm3238_vm14 = vmor %vm3236_vm12, %vm3237_vm13 }
 0x3f6   : > { %4653 = vst [vmem:[%s7871_s30 + $0x380] sm:$0xff] %v3223_v43  ;;  %v9191_v8 = vpop.xlane.xlu0 %1789  ;;  %v2497_v45 = vmul.f32 1.442695, %v2043_v57 }
 0x3f7   : > { %12128 = vst [vmem:[#allocation152_spill] sm:$0xff] %v9188_v9  ;;  %v2826_v13 = vadd.f32 %v9170_v18, %v2825_v50  ;;  %v2045_v17 = vsub.f32 %v12129_v24, %v9191_v8  ;;  %v2046_v43 = vsub.f32 %v12130_v10, %v9191_v8  ;;  %v2499_v50 = vmul.f32 1.442695, %v2044_v30  ;;  %v9208_v24 = vpop.eup %5541 }
 0x3f8   : > { %4654 = vst [vmem:[%s7871_s30 + $0x388] sm:$0xff] %v3224_v61  ;;  %v9203_v61 = vpop.xlane.xlu2 %2764  ;;  %v3234_v25 = vmul.f32 %v5538_v31, %v3233_v19 }
 0x3f9   : > { %4655 = vst [vmem:[%s7871_s30 + $0x390] sm:$0xff] %v3225_v52  ;;  %2827 = vadd.xlane.f32.xlu1 %v2826_v13  ;;  %5547 = vrcp.f32 %v9203_v61  ;;  %v3240_v52 = vand.u32 2147483647, %v9150_v36  ;;  %v2501_v0 = vmul.f32 1.442695, %v2045_v17  ;;  %v3264_v10 = vand.u32 2147483648, %v9203_v61 }
 0x3fa   : > { %4656 = vst [vmem:[%s7871_s30 + $0x398] sm:$0xff] %v3226_v2  ;;  %v2503_v18 = vmul.f32 1.442695, %v2046_v43  ;;  %5549 = vpow2.f32 %v2495_v56  ;;  %v2830_v2 = vadd.f32 %v9208_v24, %v2829_v1  ;;  %v9213_v11 = vpop.eup %5543  ;;  %v3235_v57 = vadd.f32 %v5538_v31, %v3234_v25  ;;  %v12133_v17 = vld [vmem:[#allocation107_spill] sm:$0xff]  ;;  %v12134_v43 = vld [vmem:[#allocation108_spill] sm:$0xff] }
 0x3fb   : > { %12131 = vst [vmem:[#allocation153_spill] sm:$0xff] %v9208_v24  ;;  %v3243_v13 = vor.u32 1.1754944e-38, %v3242_v51  ;;  %v3262_v5 = vand.u32 2147483647, %v9203_v61  ;;  %5551 = vpow2.f32 %v2497_v45  ;;  %v2047_v19 = vsub.f32 %v12133_v17, %v9191_v8  ;;  %v9223_v1 = vpop.eup %5545  ;;  %v476_v17 = vld [vmem:[%s7527_s21 + $0x278] sm:$0xff] }
 0x3fc   : > { %12132 = vst [vmem:[#allocation154_spill] sm:$0xff] %v9213_v11  ;;  %5553 = vpow2.f32 %v2499_v50  ;;  %v2831_v30 = vadd.f32 %v9213_v11, %v2830_v2  ;;  %v2048_v56 = vsub.f32 %v12134_v43, %v9191_v8  ;;  %v3239_v21 = vsel %vm3238_vm14, %v5538_v31, %v3235_v57  ;;  %v524_v24 = vld [vmem:[%s7527_s21 + $0x3f8] sm:$0xff]  ;;  %4057 = vmatpush.msrb.mxu0 %v476_v17 }
 0x3fd   : > { %12135 = vst [vmem:[#allocation157_spill] sm:$0xff] %v9223_v1  ;;  %vm3241_vm15 = vcmp.eq.f32.partialorder %v3240_v52, 8.507059e+37  ;;  %5555 = vpow2.f32 %v2501_v0  ;;  %v9229_v36 = vor.u32 1.1754944e-38, %v3264_v10  ;;  %vm9233_vm0 = vcmp.eq.f32.partialorder %v3262_v5, 8.507059e+37  ;;  %v12138_v52 = vld [vmem:[#allocation58_spill] sm:$0xff]  ;;  %4396 = vmatpush.msrb.mxu3 %v524_v24 }
 0x3fe   : > { %v9227_v45 = vsel %vm3241_vm15, %v3243_v13, %v3239_v21  ;;  %5557 = vpow2.f32 %v2503_v18  ;;  %v2832_v18 = vadd.f32 %v9223_v1, %v2831_v30  ;;  %vm3258_vm1 = vweird.f32 %v9203_v61  ;;  %v508_v13 = vld [vmem:[%s7527_s21 + $0x378] sm:$0xff]  ;;  %v12141_v30 = vld [vmem:[#allocation224_spill] sm:$0xff] }
 0x3ff   : > { %v9225_v51 = vpop.eup %5547  ;;  %v9237_v2 = vpop.xlane.xlu1 %2773  ;;  %v3245_v21 = vmul.f32 %v8433_v35, %v9227_v45  ;;  %v3246_v0 = vmul.f32 %v12138_v52, %v9227_v45  ;;  %v2505_v5 = vmul.f32 1.442695, %v2047_v19  ;;  %v2507_v57 = vmul.f32 1.442695, %v2048_v56  ;;  %v492_v19 = vld [vmem:[%s7527_s21 + $0x2f8] sm:$0xff]  ;;  %v12144_v56 = vld [vmem:[#allocation109_spill] sm:$0xff]  ;;  %4283 = vmatpush.msrb.mxu2 %v508_v13 }
 0x400   : > { %v3254_v50 = vmul.f32 %v9225_v51, %v9203_v61  ;;  %v9239_v31 = vpop.xlane.xlu2 %1798  ;;  %v9246_v10 = vpop.eup %5549  ;;  %5559 = vrcp.f32 %v9237_v2  ;;  %v3286_v52 = vand.u32 2147483648, %v9237_v2  ;;  %v2049_v1 = vsub.f32 %v12141_v30, %v9191_v8  ;;  %4170 = vmatpush.msrb.mxu1 %v492_v19  ;;  %v12147_v13 = vld [vmem:[#allocation92_spill] sm:$0xff] }
 0x401   : > { %12139 = vst [vmem:[#allocation196_spill] sm:$0xff] %v9246_v10  ;;  %v9252_v43 = vpop.eup %5551  ;;  %3666 = vmatmul.f32.gmra.mxu0 %v3245_v21  ;;  %3779 = vmatmul.f32.gmra.mxu1 %v3246_v0  ;;  %v2050_v11 = vsub.f32 %v12142_v54, %v9191_v8  ;;  %v2053_v23 = vsub.f32 %v12144_v56, %v9239_v31  ;;  %vm3259_vm2 = vweird.f32 %v9225_v51  ;;  %v3284_v39 = vand.u32 2147483647, %v9237_v2 }
 0x402   : > { %12140 = vst [vmem:[#allocation160_spill] sm:$0xff] %v9252_v43  ;;  %v3255_v35 = vsub.f32 1.0, %v3254_v50  ;;  %v9262_v9 = vpop.eup %5553  ;;  %v12145_v50 = vld [vmem:[#allocation59_spill] sm:$0xff]  ;;  %v2833_v56 = vadd.f32 %v9246_v10, %v2832_v18  ;;  %v2051_v17 = vsub.f32 %v12147_v13, %v9191_v8  ;;  %5561 = vpow2.f32 %v2505_v5  ;;  %vm3260_vm3 = vmor %vm3258_vm1, %vm3259_vm2 }
 0x403   : > { %4661 = vst [vmem:[%s7871_s30 + $0x3c0] sm:$0xff] %v3245_v21  ;;  %v3247_v22 = vmul.f32 %v12145_v50, %v9227_v45  ;;  %v3248_v21 = vmul.f32 %v8464_v38, %v9227_v45  ;;  %v9271_v30 = vpop.eup %5555  ;;  %v12146_v50 = vld [vmem:[#allocation110_spill] sm:$0xff]  ;;  %v2509_v18 = vmul.f32 1.442695, %v2049_v1  ;;  %vm3280_vm4 = vweird.f32 %v9237_v2 }
 0x404   : > { %12143 = vst [vmem:[#allocation162_spill] sm:$0xff] %v9262_v9  ;;  %v3256_v54 = vmul.f32 %v9225_v51, %v3255_v35  ;;  %v2054_v38 = vsub.f32 %v12146_v50, %v9239_v31  ;;  %v2052_v35 = vsub.f32 %v7816_v49, %v9191_v8  ;;  %v2834_v24 = vadd.f32 %v9252_v43, %v2833_v56  ;;  %v12152_v56 = vld [vmem:[#allocation25_spill] sm:$0xff] }
 0x405   : > { %4662 = vst [vmem:[%s7871_s30 + $0x3c8] sm:$0xff] %v3246_v0  ;;  %v9277_v0 = vpop.eup %5557  ;;  %3892 = vmatmul.f32.gmra.mxu2 %v3247_v22  ;;  %4005 = vmatmul.f32.gmra.mxu3 %v3248_v21  ;;  %v2517_v50 = vmul.f32 1.442695, %v2053_v23  ;;  %v2511_v13 = vmul.f32 1.442695, %v2050_v11  ;;  %vm9296_vm5 = vcmp.eq.f32.partialorder %v3284_v39, 8.507059e+37  ;;  %5563 = vpow2.f32 %v2507_v57 }
 0x406   : > { %4663 = vst [vmem:[%s7871_s30 + $0x3d0] sm:$0xff] %v3247_v22  ;;  %v3257_v48 = vadd.f32 %v9225_v51, %v3256_v54  ;;  %v5560_v19 = vpop.eup %5559  ;;  %v3287_v22 = vor.u32 1.1754944e-38, %v3286_v52  ;;  %v9300_v1 = vpop.xlane.xlu0 %2782  ;;  %v2835_v5 = vadd.f32 %v9262_v9, %v2834_v24  ;;  %v2519_v23 = vmul.f32 1.442695, %v2054_v38  ;;  %v12150_v57 = vld [vmem:[#allocation172_spill] sm:$0xff] }
 0x407   : > { %4664 = vst [vmem:[%s7871_s30 + $0x3d8] sm:$0xff] %v3248_v21  ;;  %v3276_v8 = vmul.f32 %v5560_v19, %v9237_v2  ;;  %5565 = vrcp.f32 %v9300_v1  ;;  %v9311_v11 = vpop.xlane.xlu1 %1807  ;;  %v2515_v52 = vmul.f32 1.442695, %v2052_v35  ;;  %vm3281_vm6 = vweird.f32 %v5560_v19  ;;  %v12153_v35 = vld [vmem:[#allocation113_spill] sm:$0xff]  ;;  %v12166_v21 = vld [vmem:[#allocation64_spill] sm:$0xff] }
 0x408   : > { %v3261_v49 = vsel %vm3260_vm3, %v9225_v51, %v3257_v48  ;;  %v2838_v48 = vadd.f32 %v9277_v0, %v9271_v30  ;;  %2836 = vadd.xlane.f32.xlu2 %v2835_v5  ;;  %5567 = vpow2.f32 %v2509_v18  ;;  %v2513_v51 = vmul.f32 1.442695, %v2051_v17  ;;  %v9319_v24 = vpop.eup %5561  ;;  %v12154_v5 = vld [vmem:[#allocation184_spill] sm:$0xff]  ;;  %vm9341_vm7 = vmor %vm3280_vm4, %vm3281_vm6 }
 0x409   : > { %v9306_v61 = vsel %vm9233_vm0, %v9229_v36, %v3261_v49  ;;  %v3277_v39 = vsub.f32 1.0, %v3276_v8  ;;  %v12151_v36 = vld [vmem:[#allocation69_spill] sm:$0xff]  ;;  %5569 = vpow2.f32 %v2511_v13  ;;  %v3306_v8 = vand.u32 2147483647, %v9300_v1 }
 0x40a   : > { %v3267_v54 = vmul.f32 %v12150_v57, %v9306_v61  ;;  %v3268_v25 = vmul.f32 %v12151_v36, %v9306_v61  ;;  %v3269_v38 = vmul.f32 %v12152_v56, %v9306_v61  ;;  %v3308_v17 = vand.u32 2147483648, %v9300_v1  ;;  %v12156_v56 = vld [vmem:[#allocation111_spill] sm:$0xff] }
 0x40b   : > { %v3278_v49 = vmul.f32 %v5560_v19, %v3277_v39  ;;  %v2061_v18 = vsub.f32 %v12153_v35, %v9311_v11  ;;  %v3270_v57 = vmul.f32 %v12154_v5, %v9306_v61  ;;  %v2839_v13 = vadd.f32 %v9319_v24, %v2838_v48  ;;  %v9329_v36 = vpop.eup %5563  ;;  %v12157_v35 = vld [vmem:[#allocation112_spill] sm:$0xff] }
 0x40c   : > { %3669 = vmatmul.f32.gmra.mxu0 %v3267_v54  ;;  %4669 = vst [vmem:[%s7871_s30 + $0x400] sm:$0xff] %v3267_v54  ;;  %3782 = vmatmul.f32.gmra.mxu1 %v3268_v25  ;;  %5571 = vpow2.f32 %v2513_v51  ;;  %v2055_v9 = vsub.f32 %v12156_v56, %v9239_v31  ;;  %v2056_v43 = vsub.f32 %v12157_v35, %v9239_v31  ;;  %vm3302_vm8 = vweird.f32 %v9300_v1  ;;  %v12173_v35 = vld [vmem:[#allocation117_spill] sm:$0xff] }
 0x40d   : > { %12155 = vst [vmem:[#allocation204_spill] sm:$0xff] %v9329_v36  ;;  %v3279_v39 = vadd.f32 %v5560_v19, %v3278_v49  ;;  %3895 = vmatmul.f32.gmra.mxu2 %v3269_v38  ;;  %v9336_v54 = vpop.eup %5565  ;;  %4008 = vmatmul.f32.gmra.mxu3 %v3270_v57  ;;  %v2840_v49 = vadd.f32 %v9329_v36, %v2839_v13  ;;  %5573 = vpow2.f32 %v2517_v50  ;;  %vm9356_vm9 = vcmp.eq.f32.partialorder %v3306_v8, 8.507059e+37  ;;  %v12165_v8 = vld [vmem:[#allocation225_spill] sm:$0xff] }
 0x40e   : > { %4670 = vst [vmem:[%s7871_s30 + $0x408] sm:$0xff] %v3268_v25  ;;  %v12160_v25 = vld [vmem:[#allocation114_spill] sm:$0xff]  ;;  %v9350_v5 = vpop.eup %5567  ;;  %v3298_v2 = vmul.f32 %v9336_v54, %v9300_v1  ;;  %5575 = vpow2.f32 %v2519_v23  ;;  %v3309_v13 = vor.u32 1.1754944e-38, %v3308_v17  ;;  %v9369_v48 = vmul.f32 1.442695, %v2061_v18  ;;  %v12167_v17 = vld [vmem:[#allocation165_spill] sm:$0xff] }
 0x40f   : > { %v2062_v51 = vsub.f32 %v12160_v25, %v9311_v11  ;;  %4671 = vst [vmem:[%s7871_s30 + $0x410] sm:$0xff] %v3269_v38  ;;  %v3283_v56 = vsel %vm9341_vm7, %v5560_v19, %v3279_v39  ;;  %v9363_v38 = vpop.eup %5569  ;;  %v2521_v39 = vmul.f32 1.442695, %v2055_v9  ;;  %v2841_v23 = vadd.f32 %v9350_v5, %v2840_v49 }
 0x410   : > { %12161 = vst [vmem:[#allocation163_spill] sm:$0xff] %v9350_v5  ;;  %v9367_v50 = vsel %vm9296_vm5, %v3287_v22, %v3283_v56  ;;  %v3299_v19 = vsub.f32 1.0, %v3298_v2  ;;  %vm3303_vm10 = vweird.f32 %v9336_v54 }
 0x411   : > { %4672 = vst [vmem:[%s7871_s30 + $0x418] sm:$0xff] %v3270_v57  ;;  %v9361_v10 = vpop.xlane.xlu2 %2791  ;;  %v2057_v57 = vsub.f32 %v12165_v8, %v9239_v31  ;;  %v9374_v25 = vmul.f32 1.442695, %v2062_v51  ;;  %v3289_v22 = vmul.f32 %v12166_v21, %v9367_v50  ;;  %v3290_v18 = vmul.f32 %v12167_v17, %v9367_v50  ;;  %v12170_v51 = vld [vmem:[#allocation227_spill] sm:$0xff]  ;;  %vm9408_vm11 = vmor %vm3302_vm8, %vm3303_vm10 }
 0x412   : > { %12164 = vst [vmem:[#allocation164_spill] sm:$0xff] %v9363_v38  ;;  %5577 = vrcp.f32 %v9361_v10  ;;  %v9381_v56 = vpop.eup %5571  ;;  %v3300_v2 = vmul.f32 %v9336_v54, %v3299_v19  ;;  %v2059_v49 = vsub.f32 %v12170_v51, %v9239_v31  ;;  %v2842_v21 = vadd.f32 %v9363_v38, %v2841_v23  ;;  %v507_v23 = vld [vmem:[%s7527_s21 + $0x370] sm:$0xff]  ;;  %v9426_v38 = vpop.xlane.xlu0 %1816 }
 0x413   : > { %5579 = vpow2.f32 %v2515_v52  ;;  %12168 = vst [vmem:[#allocation170_spill] sm:$0xff] %v9381_v56  ;;  %v12169_v52 = vld [vmem:[#allocation226_spill] sm:$0xff]  ;;  %v9389_v8 = vpop.eup %5573  ;;  %v3291_v19 = vmul.f32 %v8586_v41, %v9367_v50  ;;  %v3292_v17 = vmul.f32 %v8592_v28, %v9367_v50  ;;  %v2523_v51 = vmul.f32 1.442695, %v2056_v43  ;;  %4284 = vmatpush.msrb.mxu2 %v507_v23  ;;  %v12174_v41 = vld [vmem:[#allocation173_spill] sm:$0xff] }
 0x414   : > { %v2058_v9 = vsub.f32 %v12169_v52, %v9239_v31  ;;  %3672 = vmatmul.f32.gmra.mxu0 %v3289_v22  ;;  %4677 = vst [vmem:[%s7871_s30 + $0x440] sm:$0xff] %v3289_v22  ;;  %3785 = vmatmul.f32.gmra.mxu1 %v3290_v18  ;;  %v9397_v5 = vpop.eup %5575  ;;  %v3301_v52 = vadd.f32 %v9336_v54, %v3300_v2  ;;  %5581 = vpow2.f32 %v2521_v39  ;;  %v2525_v36 = vmul.f32 1.442695, %v2057_v57  ;;  %v475_v39 = vld [vmem:[%s7527_s21 + $0x270] sm:$0xff] }
 0x415   : > { %4678 = vst [vmem:[%s7871_s30 + $0x448] sm:$0xff] %v3290_v18  ;;  %vm3324_vm12 = vweird.f32 %v9361_v10  ;;  %v3328_v28 = vand.u32 2147483647, %v9361_v10  ;;  %v2843_v43 = vadd.f32 %v9381_v56, %v2842_v21  ;;  %3898 = vmatmul.f32.gmra.mxu2 %v3291_v19  ;;  %4011 = vmatmul.f32.gmra.mxu3 %v3292_v17  ;;  %v2060_v57 = vsub.f32 %v8594_v40, %v9239_v31  ;;  %v491_v56 = vld [vmem:[%s7527_s21 + $0x2f0] sm:$0xff] }
 0x416   : > { %4679 = vst [vmem:[%s7871_s30 + $0x450] sm:$0xff] %v3291_v19  ;;  %v3305_v18 = vsel %vm9408_vm11, %v9336_v54, %v3301_v52  ;;  %5583 = vpow2.f32 %v2523_v51  ;;  %v2527_v21 = vmul.f32 1.442695, %v2058_v9  ;;  %4058 = vmatpush.msrb.mxu0 %v475_v39  ;;  %v523_v19 = vld [vmem:[%s7527_s21 + $0x3f0] sm:$0xff]  ;;  %v3330_v31 = vand.u32 2147483648, %v9361_v10  ;;  %4171 = vmatpush.msrb.mxu1 %v491_v56 }
 0x417   : > { %4680 = vst [vmem:[%s7871_s30 + $0x458] sm:$0xff] %v3292_v17  ;;  %v9433_v40 = vsel %vm9356_vm9, %v3309_v13, %v3305_v18  ;;  %v2847_v52 = vadd.f32 %v9397_v5, %v9389_v8  ;;  %4397 = vmatpush.msrb.mxu3 %v523_v19  ;;  %5585 = vpow2.f32 %v2525_v36  ;;  %v2529_v9 = vmul.f32 1.442695, %v2059_v49  ;;  %v12175_v49 = vld [vmem:[#allocation118_spill] sm:$0xff] }
 0x418   : > { %v9402_v22 = vpop.eup %5577  ;;  %v3311_v51 = vmul.f32 %v8625_v20, %v9433_v40  ;;  %v2069_v13 = vsub.f32 %v12173_v35, %v9426_v38  ;;  %v2531_v23 = vmul.f32 1.442695, %v2060_v57  ;;  %5587 = vpow2.f32 %v2527_v21 }
 0x419   : > { %v9419_v1 = vpop.eup %5579  ;;  %v3320_v2 = vmul.f32 %v9402_v22, %v9361_v10  ;;  %vm3325_vm13 = vweird.f32 %v9402_v22  ;;  %v3313_v20 = vmul.f32 %v8639_v47, %v9433_v40  ;;  %v3314_v56 = vmul.f32 %v8655_v29, %v9433_v40  ;;  %v12177_v29 = vld [vmem:[#allocation116_spill] sm:$0xff] }
 0x41a   : > { %v2844_v54 = vadd.f32 %v9419_v1, %v2843_v43  ;;  %v3312_v43 = vmul.f32 %v12174_v41, %v9433_v40  ;;  %v9446_v39 = vpop.eup %5581  ;;  %4685 = vst [vmem:[%s7871_s30 + $0x480] sm:$0xff] %v3311_v51  ;;  %v2070_v18 = vsub.f32 %v12175_v49, %v9426_v38  ;;  %5589 = vpow2.f32 %v2529_v9  ;;  %vm3326_vm14 = vmor %vm3324_vm12, %vm3325_vm13 }
 0x41b   : > { %v3321_v17 = vsub.f32 1.0, %v3320_v2  ;;  %v2848_v57 = vadd.f32 %v9446_v39, %v2847_v52  ;;  %v12176_v2 = vld [vmem:[#allocation115_spill] sm:$0xff]  ;;  %4687 = vst [vmem:[%s7871_s30 + $0x490] sm:$0xff] %v3313_v20  ;;  %v2064_v47 = vsub.f32 %v12177_v29, %v9311_v11  ;;  %v3331_v52 = vor.u32 1.1754944e-38, %v3330_v31 }
 0x41c   : > { %2845 = vadd.xlane.f32.xlu0 %v2844_v54  ;;  %3675 = vmatmul.f32.gmra.mxu0 %v3311_v51  ;;  %4686 = vst [vmem:[%s7871_s30 + $0x488] sm:$0xff] %v3312_v43  ;;  %v2063_v19 = vsub.f32 %v12176_v2, %v9311_v11  ;;  %v9460_v21 = vpop.eup %5583  ;;  %5591 = vpow2.f32 %v2531_v23  ;;  %v2066_v9 = vsub.f32 %v8630_v12, %v9311_v11  ;;  %vm3329_vm15 = vcmp.eq.f32.partialorder %v3328_v28, 8.507059e+37 }
 0x41d   : > { %v3322_v36 = vmul.f32 %v9402_v22, %v3321_v17  ;;  %3788 = vmatmul.f32.gmra.mxu1 %v3312_v43  ;;  %v12178_v17 = vld [vmem:[#allocation169_spill] sm:$0xff]  ;;  %v2849_v51 = vadd.f32 %v9460_v21, %v2848_v57  ;;  %3901 = vmatmul.f32.gmra.mxu2 %v3313_v20  ;;  %4688 = vst [vmem:[%s7871_s30 + $0x498] sm:$0xff] %v3314_v56  ;;  %v9476_v41 = vpop.eup %5585  ;;  %5593 = vpow2.f32 %v9369_v48  ;;  %v2539_v23 = vmul.f32 1.442695, %v2064_v47 }
 0x41e   : > { %v2065_v35 = vsub.f32 %v12178_v17, %v9311_v11  ;;  %4014 = vmatmul.f32.gmra.mxu3 %v3314_v56  ;;  %5595 = vpow2.f32 %v9374_v25  ;;  %v9484_v20 = vpop.eup %5587  ;;  %v2549_v56 = vmul.f32 1.442695, %v2069_v13  ;;  %v2067_v12 = vsub.f32 %v8641_v44, %v9311_v11 }
 0x41f   : > { %v3323_v54 = vadd.f32 %v9402_v22, %v3322_v36  ;;  %v2537_v36 = vmul.f32 1.442695, %v2063_v19  ;;  %v2850_v31 = vadd.f32 %v9476_v41, %v2849_v51  ;;  %v2543_v28 = vmul.f32 1.442695, %v2066_v9  ;;  %v474_v51 = vld [vmem:[%s7527_s21 + $0x268] sm:$0xff] }
 0x420   : > { %v2541_v49 = vmul.f32 1.442695, %v2065_v35  ;;  %v9495_v2 = vpop.eup %5589  ;;  %v2068_v13 = vsub.f32 %v8671_v7, %v9311_v11  ;;  %v12180_v7 = vld [vmem:[#allocation120_spill] sm:$0xff]  ;;  %v12181_v11 = vld [vmem:[#allocation121_spill] sm:$0xff]  ;;  %v2545_v35 = vmul.f32 1.442695, %v2067_v12  ;;  %4059 = vmatpush.msrb.mxu0 %v474_v51 }
 0x421   : > { %v3327_v43 = vsel %vm3326_vm14, %v9402_v22, %v3323_v54  ;;  %5597 = vpow2.f32 %v2537_v36  ;;  %v9488_v22 = vpop.xlane.xlu2 %1825  ;;  %v2851_v48 = vadd.f32 %v9484_v20, %v2850_v31  ;;  %v12179_v54 = vld [vmem:[#allocation119_spill] sm:$0xff]  ;;  %v522_v9 = vld [vmem:[%s7527_s21 + $0x3e8] sm:$0xff]  ;;  %v2074_v31 = vsub.f32 %v8708_v58, %v9426_v38 }
 0x422   : > { %v9480_v10 = vsel %vm3329_vm15, %v3331_v52, %v3327_v43  ;;  %v2071_v29 = vsub.f32 %v12179_v54, %v9426_v38  ;;  %5599 = vpow2.f32 %v2539_v23  ;;  %v2077_v17 = vsub.f32 %v12181_v11, %v9488_v22  ;;  %v506_v52 = vld [vmem:[%s7527_s21 + $0x368] sm:$0xff]  ;;  %v521_v58 = vld [vmem:[%s7527_s21 + $0x3e0] sm:$0xff]  ;;  %4398 = vmatpush.msrb.mxu3 %v522_v9  ;;  %v504_v11 = vld [vmem:[%s7527_s21 + $0x358] sm:$0xff] }
 0x423   : > { %v3333_v57 = vmul.f32 %v8680_v60, %v9480_v10  ;;  %v3334_v25 = vmul.f32 %v8688_v62, %v9480_v10  ;;  %v3335_v44 = vmul.f32 %v8704_v15, %v9480_v10  ;;  %v3336_v19 = vmul.f32 %v8721_v53, %v9480_v10  ;;  %v9505_v60 = vpop.eup %5591  ;;  %v490_v12 = vld [vmem:[%s7527_s21 + $0x2e8] sm:$0xff]  ;;  %4285 = vmatpush.msrb.mxu2 %v506_v52 }
 0x424   : > { %v2551_v62 = vmul.f32 1.442695, %v2070_v18  ;;  %v2852_v47 = vadd.f32 %v9495_v2, %v2851_v48  ;;  %v2072_v15 = vsub.f32 %v12180_v7, %v9426_v38  ;;  %v9511_v53 = vpop.eup %5593  ;;  %5601 = vpow2.f32 %v2541_v49  ;;  %v12182_v48 = vld [vmem:[#allocation122_spill] sm:$0xff]  ;;  %4172 = vmatpush.msrb.mxu1 %v490_v12  ;;  %v489_v7 = vld [vmem:[%s7527_s21 + $0x2e0] sm:$0xff]  ;;  %4399 = vmatpush.msrb.mxu3 %v521_v58 }
 0x425   : > { %3678 = vmatmul.f32.gmra.mxu0 %v3333_v57  ;;  %4693 = vst [vmem:[%s7871_s30 + $0x4c0] sm:$0xff] %v3333_v57  ;;  %3791 = vmatmul.f32.gmra.mxu1 %v3334_v25  ;;  %v2073_v18 = vsub.f32 %v8673_v33, %v9426_v38  ;;  %v9521_v43 = vpop.eup %5595  ;;  %5603 = vpow2.f32 %v2543_v28  ;;  %v2553_v23 = vmul.f32 1.442695, %v2071_v29  ;;  %v505_v33 = vld [vmem:[%s7527_s21 + $0x360] sm:$0xff]  ;;  %v2078_v57 = vsub.f32 %v12182_v48, %v9488_v22 }
 0x426   : > { %4694 = vst [vmem:[%s7871_s30 + $0x4c8] sm:$0xff] %v3334_v25  ;;  %v2853_v36 = vadd.f32 %v9505_v60, %v2852_v47  ;;  %3904 = vmatmul.f32.gmra.mxu2 %v3335_v44  ;;  %4017 = vmatmul.f32.gmra.mxu3 %v3336_v19  ;;  %v2547_v25 = vmul.f32 1.442695, %v2068_v13  ;;  %v2856_v28 = vadd.f32 %v9521_v43, %v9511_v53  ;;  %5605 = vpow2.f32 %v2549_v56 }
 0x427   : > { %4695 = vst [vmem:[%s7871_s30 + $0x4d0] sm:$0xff] %v3335_v44  ;;  %v9529_v49 = vpop.eup %5597  ;;  %v473_v44 = vld [vmem:[%s7527_s21 + $0x260] sm:$0xff]  ;;  %v2075_v54 = vsub.f32 %v8724_v6, %v9426_v38  ;;  %v2076_v29 = vsub.f32 %v8747_v27, %v9426_v38  ;;  %5607 = vpow2.f32 %v2551_v62  ;;  %v2555_v13 = vmul.f32 1.442695, %v2072_v15  ;;  %4286 = vmatpush.msrb.mxu2 %v505_v33  ;;  %v472_v6 = vld [vmem:[%s7527_s21 + $0x258] sm:$0xff]  ;;  %4173 = vmatpush.msrb.mxu1 %v489_v7 }
 0x428   : > { %4696 = vst [vmem:[%s7871_s30 + $0x4d8] sm:$0xff] %v3336_v19  ;;  %2854 = vadd.xlane.f32.xlu1 %v2853_v36  ;;  %5609 = vpow2.f32 %v2545_v35  ;;  %v2857_v56 = vadd.f32 %v9529_v49, %v2856_v28  ;;  %v2557_v19 = vmul.f32 1.442695, %v2073_v18  ;;  %v2079_v47 = vsub.f32 %v11999_v46, %v9488_v22  ;;  %v9548_v52 = vpop.eup %5599  ;;  %4060 = vmatpush.msrb.mxu0 %v473_v44  ;;  %v520_v38 = vld [vmem:[%s7527_s21 + $0x3d8] sm:$0xff]  ;;  %v12185_v44 = vld [vmem:[#allocation45_spill] sm:$0xff] }
 0x429   : > { %5611 = vpow2.f32 %v2553_v23  ;;  %v2559_v27 = vmul.f32 1.442695, %v2074_v31  ;;  %v488_v62 = vld [vmem:[%s7527_s21 + $0x2d8] sm:$0xff]  ;;  %v2565_v35 = vmul.f32 1.442695, %v2077_v17  ;;  %4287 = vmatpush.msrb.mxu2 %v504_v11  ;;  %v2080_v31 = vsub.f32 %v12007_v4, %v9488_v22  ;;  %4400 = vmatpush.msrb.mxu3 %v520_v38  ;;  %v12184_v4 = vld [vmem:[#allocation44_spill] sm:$0xff] }
 0x42a   : > { %v9552_v15 = vpop.eup %5601  ;;  %v2567_v18 = vmul.f32 1.442695, %v2078_v57  ;;  %5613 = vpow2.f32 %v2547_v25  ;;  %v2858_v46 = vadd.f32 %v9548_v52, %v2857_v56  ;;  %v2561_v9 = vmul.f32 1.442695, %v2075_v54  ;;  %4061 = vmatpush.msrb.mxu0 %v472_v6  ;;  %4174 = vmatpush.msrb.mxu1 %v488_v62  ;;  %v12183_v57 = vld [vmem:[#allocation43_spill] sm:$0xff]  ;;  %v12188_v62 = vld [vmem:[#allocation52_spill] sm:$0xff] }
 0x42b   : > { %v9555_v51 = vpop.eup %5603  ;;  %5615 = vpow2.f32 %v2555_v13  ;;  %v2563_v36 = vmul.f32 1.442695, %v2076_v29  ;;  %v2081_v12 = vsub.f32 %v8749_v55, %v9488_v22  ;;  %v2569_v33 = vmul.f32 1.442695, %v2079_v47  ;;  %v12186_v13 = vld [vmem:[#allocation156_spill] sm:$0xff]  ;;  %v12187_v11 = vld [vmem:[#allocation51_spill] sm:$0xff] }
 0x42c   : > { %v9559_v23 = vpop.eup %5605  ;;  %v2859_v17 = vadd.f32 %v9552_v15, %v2858_v46  ;;  %5617 = vpow2.f32 %v2557_v19  ;;  %v3139_v25 = vmul.f32 %v12183_v57, %v8870_v14  ;;  %v3140_v28 = vmul.f32 %v12184_v4, %v8870_v14 }
 0x42d   : > { %v9564_v48 = vpop.eup %5607  ;;  %5619 = vpow2.f32 %v2559_v27  ;;  %v3141_v58 = vmul.f32 %v12185_v44, %v8870_v14  ;;  %v3142_v56 = vmul.f32 %v12186_v13, %v8870_v14  ;;  %v2082_v47 = vsub.f32 %v8772_v63, %v9488_v22  ;;  %v12189_v63 = vld [vmem:[#allocation185_spill] sm:$0xff] }
 0x42e   : > { %v9572_v54 = vpop.eup %5609  ;;  %v2860_v55 = vadd.f32 %v9555_v51, %v2859_v17  ;;  %v2865_v29 = vadd.f32 %v9564_v48, %v9559_v23  ;;  %5621 = vpow2.f32 %v2565_v35  ;;  %v2571_v7 = vmul.f32 1.442695, %v2080_v31  ;;  %4625 = vst [vmem:[%s7871_s30 + $0x2a0] sm:$0xff] %v3139_v25  ;;  %v12190_v17 = vld [vmem:[#allocation166_spill] sm:$0xff] }
 0x42f   : > { %v9579_v19 = vpop.eup %5611  ;;  %5623 = vpow2.f32 %v2567_v18  ;;  %v3161_v6 = vmul.f32 %v12187_v11, %v8940_v59  ;;  %4626 = vst [vmem:[%s7871_s30 + $0x2a8] sm:$0xff] %v3140_v28  ;;  %v3162_v35 = vmul.f32 %v12188_v62, %v8940_v59  ;;  %v2083_v18 = vsub.f32 %v12189_v63, %v9488_v22  ;;  %v12191_v28 = vld [vmem:[#allocation167_spill] sm:$0xff] }
 0x430   : > { %v9586_v27 = vpop.eup %5613  ;;  %v2861_v38 = vadd.f32 %v9572_v54, %v2860_v55  ;;  %5625 = vpow2.f32 %v2561_v9  ;;  %v2866_v14 = vadd.f32 %v9579_v19, %v2865_v29  ;;  %v2573_v31 = vmul.f32 1.442695, %v2081_v12  ;;  %4627 = vst [vmem:[%s7871_s30 + $0x2b0] sm:$0xff] %v3141_v58  ;;  %v12192_v12 = vld [vmem:[#allocation145_spill] sm:$0xff]  ;;  %v12193_v29 = vld [vmem:[#allocation176_spill] sm:$0xff] }
 0x431   : > { %v9593_v46 = vpop.eup %5615  ;;  %5627 = vpow2.f32 %v2569_v33  ;;  %v3163_v57 = vmul.f32 %v12190_v17, %v8940_v59  ;;  %4628 = vst [vmem:[%s7871_s30 + $0x2b8] sm:$0xff] %v3142_v56  ;;  %v3164_v44 = vmul.f32 %v12191_v28, %v8940_v59  ;;  %v2084_v33 = vsub.f32 %v12192_v12, %v9488_v22  ;;  %v12194_v59 = vld [vmem:[#allocation54_spill] sm:$0xff] }
 0x432   : > { %v9600_v9 = vpop.eup %5617  ;;  %v2862_v25 = vadd.f32 %v9586_v27, %v2861_v38  ;;  %5629 = vpow2.f32 %v2563_v36  ;;  %v2867_v4 = vadd.f32 %v9593_v46, %v2866_v14  ;;  %v2575_v58 = vmul.f32 1.442695, %v2082_v47  ;;  %4633 = vst [vmem:[%s7871_s30 + $0x2e0] sm:$0xff] %v3161_v6  ;;  %v12195_v47 = vld [vmem:[#allocation55_spill] sm:$0xff] }
 0x433   : > { %v9607_v55 = vpop.eup %5619  ;;  %5631 = vpow2.f32 %v2571_v7  ;;  %v3183_v13 = vmul.f32 %v12193_v29, %v9032_v16  ;;  %4634 = vst [vmem:[%s7871_s30 + $0x2e8] sm:$0xff] %v3162_v35  ;;  %v3184_v11 = vmul.f32 %v12194_v59, %v9032_v16  ;;  %v2577_v22 = vmul.f32 1.442695, %v2083_v18  ;;  %v12196_v35 = vld [vmem:[#allocation134_spill] sm:$0xff] }
 0x434   : > { %v9614_v36 = vpop.eup %5621  ;;  %2863 = vadd.xlane.f32.xlu2 %v2862_v25  ;;  %v2868_v56 = vadd.f32 %v9600_v9, %v2867_v4  ;;  %5633 = vpow2.f32 %v2573_v31  ;;  %4635 = vst [vmem:[%s7871_s30 + $0x2f0] sm:$0xff] %v3163_v57  ;;  %v3185_v7 = vmul.f32 %v12195_v47, %v9032_v16  ;;  %v3186_v63 = vmul.f32 %v12196_v35, %v9032_v16  ;;  %v12197_v31 = vld [vmem:[#allocation159_spill] sm:$0xff] }
 0x435   : > { %v9620_v38 = vpop.eup %5623  ;;  %4636 = vst [vmem:[%s7871_s30 + $0x2f8] sm:$0xff] %v3164_v44  ;;  %5635 = vpow2.f32 %v2575_v58  ;;  %v2579_v18 = vmul.f32 1.442695, %v2084_v33  ;;  %v3205_v57 = vmul.f32 %v12197_v31, %v9102_v37  ;;  %v12198_v44 = vld [vmem:[#allocation61_spill] sm:$0xff]  ;;  %v12199_v33 = vld [vmem:[#allocation62_spill] sm:$0xff] }
 0x436   : > { %v9625_v6 = vpop.eup %5625  ;;  %v2869_v14 = vadd.f32 %v9607_v55, %v2868_v56  ;;  %v2874_v62 = vadd.f32 %v9620_v38, %v9614_v36  ;;  %4641 = vst [vmem:[%s7871_s30 + $0x320] sm:$0xff] %v3183_v13  ;;  %v3206_v16 = vmul.f32 %v12198_v44, %v9102_v37  ;;  %5637 = vpow2.f32 %v2577_v22  ;;  %v12200_v56 = vld [vmem:[#allocation22_spill] sm:$0xff]  ;;  %v12201_v22 = vld [vmem:[#allocation181_spill] sm:$0xff] }
 0x437   : > { %v9633_v17 = vpop.eup %5627  ;;  %4642 = vst [vmem:[%s7871_s30 + $0x328] sm:$0xff] %v3184_v11  ;;  %v3207_v58 = vmul.f32 %v12199_v33, %v9102_v37  ;;  %v3208_v59 = vmul.f32 %v12200_v56, %v9102_v37  ;;  %5639 = vpow2.f32 %v2579_v18  ;;  %v3227_v47 = vmul.f32 %v12201_v22, %v9165_v32  ;;  %v12203_v37 = vld [vmem:[#allocation138_spill] sm:$0xff]  ;;  %v503_v31 = vld [vmem:[%s7527_s21 + $0x350] sm:$0xff] }
 0x438   : > { %v9638_v25 = vpop.eup %5629  ;;  %v2870_v4 = vadd.f32 %v9625_v6, %v2869_v14  ;;  %v2875_v28 = vadd.f32 %v9633_v17, %v2874_v62  ;;  %4643 = vst [vmem:[%s7871_s30 + $0x330] sm:$0xff] %v3185_v7  ;;  %v12202_v14 = vld [vmem:[#allocation136_spill] sm:$0xff]  ;;  %4288 = vmatpush.msrb.mxu2 %v503_v31  ;;  %v487_v33 = vld [vmem:[%s7527_s21 + $0x2d0] sm:$0xff]  ;;  %v12208_v22 = vld [vmem:[#allocation158_spill] sm:$0xff] }
 0x439   : > { %v9645_v12 = vpop.eup %5631  ;;  %4644 = vst [vmem:[%s7871_s30 + $0x338] sm:$0xff] %v3186_v63  ;;  %v3228_v62 = vmul.f32 %v12202_v14, %v9165_v32  ;;  %v3229_v63 = vmul.f32 %v12203_v37, %v9165_v32  ;;  %4175 = vmatpush.msrb.mxu1 %v487_v33  ;;  %v12209_v14 = vld [vmem:[#allocation161_spill] sm:$0xff]  ;;  %v12214_v33 = vld [vmem:[#allocation23_spill] sm:$0xff] }
 0x43a   : > { %v2871_v29 = vadd.f32 %v9638_v25, %v2870_v4  ;;  %v2876_v13 = vadd.f32 %v9645_v12, %v2875_v28  ;;  %v9655_v11 = vpop.eup %5633  ;;  %4649 = vst [vmem:[%s7871_s30 + $0x360] sm:$0xff] %v3205_v57  ;;  %v471_v57 = vld [vmem:[%s7527_s21 + $0x250] sm:$0xff]  ;;  %v3252_v37 = vmul.f32 %v12209_v14, %v9227_v45 }
 0x43b   : > { %4650 = vst [vmem:[%s7871_s30 + $0x368] sm:$0xff] %v3206_v16  ;;  %v9664_v35 = vpop.eup %5635  ;;  %v519_v4 = vld [vmem:[%s7527_s21 + $0x3d0] sm:$0xff]  ;;  %4062 = vmatpush.msrb.mxu0 %v471_v57 }
 0x43c   : > { %2872 = vadd.xlane.f32.xlu0 %v2871_v29  ;;  %v2877_v7 = vadd.f32 %v9655_v11, %v2876_v13  ;;  %4651 = vst [vmem:[%s7871_s30 + $0x370] sm:$0xff] %v3207_v58  ;;  %v12204_v28 = vld [vmem:[#allocation65_spill] sm:$0xff]  ;;  %v9676_v16 = vpop.eup %5637  ;;  %v12205_v58 = vld [vmem:[#allocation66_spill] sm:$0xff]  ;;  %4401 = vmatpush.msrb.mxu3 %v519_v4  ;;  %v12212_v4 = vld [vmem:[#allocation188_spill] sm:$0xff] }
 0x43d   : > { %4652 = vst [vmem:[%s7871_s30 + $0x378] sm:$0xff] %v3208_v59  ;;  %v3230_v44 = vmul.f32 %v12204_v28, %v9165_v32  ;;  %v3249_v29 = vmul.f32 %v12205_v58, %v9227_v45  ;;  %v12206_v32 = vld [vmem:[#allocation155_spill] sm:$0xff]  ;;  %v9686_v59 = vpop.eup %5639  ;;  %v3273_v28 = vmul.f32 %v12212_v4, %v9306_v61  ;;  %v3293_v58 = vmul.f32 %v12214_v33, %v9367_v50 }
 0x43e   : > { %v2878_v18 = vadd.f32 %v9664_v35, %v2877_v7  ;;  %4657 = vst [vmem:[%s7871_s30 + $0x3a0] sm:$0xff] %v3227_v47  ;;  %v3250_v56 = vmul.f32 %v12206_v32, %v9227_v45  ;;  %v3251_v47 = vmul.f32 %v12208_v22, %v9227_v45  ;;  %v12213_v45 = vld [vmem:[#allocation63_spill] sm:$0xff]  ;;  %v12216_v32 = vld [vmem:[#allocation74_spill] sm:$0xff] }
 0x43f   : > { %4658 = vst [vmem:[%s7871_s30 + $0x3a8] sm:$0xff] %v3228_v62  ;;  %v12210_v62 = vld [vmem:[#allocation187_spill] sm:$0xff] }
 0x440   : > { %v2879_v13 = vadd.f32 %v9676_v16, %v2878_v18  ;;  %12207 = vst [vmem:[#allocation171_spill] sm:$0xff] %v9686_v59  ;;  %v3271_v18 = vmul.f32 %v12210_v62, %v9306_v61  ;;  %v12217_v22 = vld [vmem:[#allocation179_spill] sm:$0xff] }
 0x441   : > { %4659 = vst [vmem:[%s7871_s30 + $0x3b0] sm:$0xff] %v3229_v63  ;;  %v12211_v63 = vld [vmem:[#allocation70_spill] sm:$0xff]  ;;  %v12221_v33 = vld [vmem:[#allocation67_spill] sm:$0xff] }
 0x442   : > { %v2880_v7 = vadd.f32 %v9686_v59, %v2879_v13  ;;  %4660 = vst [vmem:[%s7871_s30 + $0x3b8] sm:$0xff] %v3230_v44  ;;  %v3272_v31 = vmul.f32 %v12211_v63, %v9306_v61  ;;  %v3274_v44 = vmul.f32 %v12213_v45, %v9306_v61  ;;  %v12220_v45 = vld [vmem:[#allocation34_spill] sm:$0xff] }
 0x443   : > { %4665 = vst [vmem:[%s7871_s30 + $0x3e0] sm:$0xff] %v3249_v29  ;;  %v12215_v29 = vld [vmem:[#allocation73_spill] sm:$0xff] }
 0x444   : > { %2881 = vadd.xlane.f32.xlu1 %v2880_v7  ;;  %4666 = vst [vmem:[%s7871_s30 + $0x3e8] sm:$0xff] %v3250_v56  ;;  %v3294_v13 = vmul.f32 %v12215_v29, %v9367_v50  ;;  %v3295_v56 = vmul.f32 %v12216_v32, %v9367_v50 }
 0x445   : > { %4667 = vst [vmem:[%s7871_s30 + $0x3f0] sm:$0xff] %v3251_v47  ;;  %v3296_v47 = vmul.f32 %v12217_v22, %v9367_v50  ;;  %v12219_v50 = vld [vmem:[#allocation143_spill] sm:$0xff] }
 0x446   : > { %v2801_v57 = vpop.xlane.xlu1 %2800  ;;  %4668 = vst [vmem:[%s7871_s30 + $0x3f8] sm:$0xff] %v3252_v37 }
 0x447   : > { %5641 = vrcp.f32 %v2801_v57  ;;  %4673 = vst [vmem:[%s7871_s30 + $0x420] sm:$0xff] %v3271_v18  ;;  %v3352_v62 = vand.u32 2147483648, %v2801_v57  ;;  %v12218_v18 = vld [vmem:[#allocation32_spill] sm:$0xff]  ;;  %vm3346_vm1 = vweird.f32 %v2801_v57 }
 0x448   : > { %4674 = vst [vmem:[%s7871_s30 + $0x428] sm:$0xff] %v3272_v31  ;;  %v3315_v63 = vmul.f32 %v12218_v18, %v9433_v40  ;;  %v3316_v31 = vmul.f32 %v12219_v50, %v9433_v40  ;;  %v12224_v50 = vld [vmem:[#allocation39_spill] sm:$0xff] }
 0x449   : > { %4675 = vst [vmem:[%s7871_s30 + $0x430] sm:$0xff] %v3273_v28  ;;  %v3350_v28 = vand.u32 2147483647, %v2801_v57  ;;  %v3353_v32 = vor.u32 1.1754944e-38, %v3352_v62  ;;  %v9749_v62 = vpop.f32.mrf.mxu1 }
 0x44a   : > { %4676 = vst [vmem:[%s7871_s30 + $0x438] sm:$0xff] %v3274_v44  ;;  %v3317_v44 = vmul.f32 %v12220_v45, %v9433_v40  ;;  %v470_v45 = vld [vmem:[%s7527_s21 + $0x248] sm:$0xff] }
 0x44b   : > { %4681 = vst [vmem:[%s7871_s30 + $0x460] sm:$0xff] %v3293_v58  ;;  %v3318_v58 = vmul.f32 %v12221_v33, %v9433_v40  ;;  %vm3351_vm3 = vcmp.eq.f32.partialorder %v3350_v28, 8.507059e+37  ;;  %v502_v28 = vld [vmem:[%s7527_s21 + $0x348] sm:$0xff]  ;;  %v12226_v33 = vld [vmem:[#allocation178_spill] sm:$0xff]  ;;  %4063 = vmatpush.msrb.mxu0 %v470_v45 }
 0x44c   : > { %4682 = vst [vmem:[%s7871_s30 + $0x468] sm:$0xff] %v3294_v13  ;;  %4289 = vmatpush.msrb.mxu2 %v502_v28 }
 0x44d   : > { %v5642_v61 = vpop.eup %5641  ;;  %4683 = vst [vmem:[%s7871_s30 + $0x470] sm:$0xff] %v3295_v56 }
 0x44e   : > { %v3342_v7 = vmul.f32 %v5642_v61, %v2801_v57  ;;  %v9721_v14 = vpop.xlane.xlu0 %2809  ;;  %4684 = vst [vmem:[%s7871_s30 + $0x478] sm:$0xff] %v3296_v47  ;;  %vm3347_vm0 = vweird.f32 %v5642_v61 }
 0x44f   : > { %5643 = vrcp.f32 %v9721_v14  ;;  %4689 = vst [vmem:[%s7871_s30 + $0x4a0] sm:$0xff] %v3315_v63  ;;  %vm3348_vm2 = vmor %vm3346_vm1, %vm3347_vm0  ;;  %v3374_v18 = vand.u32 2147483648, %v9721_v14  ;;  %v9752_v63 = vpop.xlane.xlu1 %1834  ;;  %vm3368_vm5 = vweird.f32 %v9721_v14 }
 0x450   : > { %v3343_v37 = vsub.f32 1.0, %v3342_v7  ;;  %4690 = vst [vmem:[%s7871_s30 + $0x4a8] sm:$0xff] %v3316_v31  ;;  %v9741_v7 = vpop.f32.mrf.mxu0 }
 0x451   : > { %4691 = vst [vmem:[%s7871_s30 + $0x4b0] sm:$0xff] %v3317_v44  ;;  %v518_v44 = vld [vmem:[%s7527_s21 + $0x3c8] sm:$0xff] }
 0x452   : > { %v3344_v4 = vmul.f32 %v5642_v61, %v3343_v37  ;;  %4692 = vst [vmem:[%s7871_s30 + $0x4b8] sm:$0xff] %v3318_v58  ;;  %v3338_v58 = vmul.f32 %v12226_v33, %v9480_v10  ;;  %4402 = vmatpush.msrb.mxu3 %v518_v44  ;;  %v9784_v33 = vpop.f32.mrf.mxu2 }
 0x453   : > { %12222 = vst [vmem:[#allocation174_spill] sm:$0xff] %v9741_v7 }
 0x454   : > { %v3345_v29 = vadd.f32 %v5642_v61, %v3344_v4  ;;  %12223 = vst [vmem:[#allocation175_spill] sm:$0xff] %v9749_v62  ;;  %v12246_v62 = vld [vmem:[#allocation131_spill] sm:$0xff] }
 0x455   : > { %v5644_v13 = vpop.eup %5643  ;;  %12231 = vst [vmem:[#allocation123_spill] sm:$0xff] %v9784_v33 }
 0x456   : > { %v3349_v56 = vsel %vm3348_vm2, %v5642_v61, %v3345_v29  ;;  %v3364_v22 = vmul.f32 %v5644_v13, %v9721_v14  ;;  %vm3369_vm4 = vweird.f32 %v5644_v13  ;;  %4698 = vst [vmem:[%s7871_s30 + $0x4e8] sm:$0xff] %v3338_v58  ;;  %v9792_v44 = vpop.xlane.xlu0 %1843 }
 0x457   : > { %v9739_v47 = vsel %vm3351_vm3, %v3353_v32, %v3349_v56  ;;  %v12227_v32 = vld [vmem:[#allocation125_spill] sm:$0xff]  ;;  %vm3370_vm6 = vmor %vm3368_vm5, %vm3369_vm4  ;;  %v2095_v7 = vsub.f32 %v12246_v62, %v9792_v44 }
 0x458   : > { %v3365_v37 = vsub.f32 1.0, %v3364_v22  ;;  %v3355_v40 = vmul.f32 %v8904_v34, %v9739_v47  ;;  %v3356_v57 = vmul.f32 %v8912_v3, %v9739_v47  ;;  %v3357_v61 = vmul.f32 %v8924_v42, %v9739_v47  ;;  %v12225_v3 = vld [vmem:[#allocation68_spill] sm:$0xff] }
 0x459   : > { %v3358_v31 = vmul.f32 %v12224_v50, %v9739_v47  ;;  %v3372_v34 = vand.u32 2147483647, %v9721_v14  ;;  %v3337_v42 = vmul.f32 %v12225_v3, %v9480_v10  ;;  %v2085_v56 = vsub.f32 %v12227_v32, %v9752_v63  ;;  %v486_v22 = vld [vmem:[%s7527_s21 + $0x2c8] sm:$0xff]  ;;  %v12229_v50 = vld [vmem:[#allocation126_spill] sm:$0xff]  ;;  %v12235_v32 = vld [vmem:[#allocation31_spill] sm:$0xff] }
 0x45a   : > { %v3366_v4 = vmul.f32 %v5644_v13, %v3365_v37  ;;  %3681 = vmatmul.f32.gmra.mxu0 %v3355_v40  ;;  %4701 = vst [vmem:[%s7871_s30 + $0x500] sm:$0xff] %v3355_v40  ;;  %3794 = vmatmul.f32.gmra.mxu1 %v3356_v57  ;;  %v12228_v37 = vld [vmem:[#allocation20_spill] sm:$0xff] }
 0x45b   : > { %4702 = vst [vmem:[%s7871_s30 + $0x508] sm:$0xff] %v3356_v57  ;;  %3907 = vmatmul.f32.gmra.mxu2 %v3357_v61  ;;  %4020 = vmatmul.f32.gmra.mxu3 %v3358_v31  ;;  %v3339_v40 = vmul.f32 %v12228_v37, %v9480_v10  ;;  %v3375_v57 = vor.u32 1.1754944e-38, %v3374_v18  ;;  %vm3373_vm7 = vcmp.eq.f32.partialorder %v3372_v34, 8.507059e+37  ;;  %v9790_v18 = vpop.f32.mrf.mxu3  ;;  %v12234_v34 = vld [vmem:[#allocation183_spill] sm:$0xff]  ;;  %v12236_v37 = vld [vmem:[#allocation42_spill] sm:$0xff] }
 0x45c   : > { %v3367_v29 = vadd.f32 %v5644_v13, %v3366_v4  ;;  %4703 = vst [vmem:[%s7871_s30 + $0x510] sm:$0xff] %v3357_v61  ;;  %v2086_v4 = vsub.f32 %v12229_v50, %v9752_v63  ;;  %4176 = vmatpush.msrb.mxu1 %v486_v22  ;;  %v12230_v61 = vld [vmem:[#allocation180_spill] sm:$0xff]  ;;  %v9806_v50 = vpop.f32.mrf.mxu0 }
 0x45d   : > { %4704 = vst [vmem:[%s7871_s30 + $0x518] sm:$0xff] %v3358_v31  ;;  %v3340_v3 = vmul.f32 %v12230_v61, %v9480_v10  ;;  %v2581_v31 = vmul.f32 1.442695, %v2085_v56  ;;  %v12233_v10 = vld [vmem:[#allocation71_spill] sm:$0xff]  ;;  %v12239_v61 = vld [vmem:[#allocation128_spill] sm:$0xff] }
 0x45e   : > { %v3371_v28 = vsel %vm3370_vm6, %v5644_v13, %v3367_v29  ;;  %v9781_v45 = vpop.xlane.xlu2 %2818  ;;  %4697 = vst [vmem:[%s7871_s30 + $0x4e0] sm:$0xff] %v3337_v42  ;;  %v2583_v42 = vmul.f32 1.442695, %v2086_v4  ;;  %v12240_v4 = vld [vmem:[#allocation146_spill] sm:$0xff] }
 0x45f   : > { %v9786_v14 = vsel %vm3373_vm7, %v3375_v57, %v3371_v28  ;;  %5645 = vrcp.f32 %v9781_v45  ;;  %12232 = vst [vmem:[#allocation19_spill] sm:$0xff] %v9790_v18  ;;  %v12237_v57 = vld [vmem:[#allocation127_spill] sm:$0xff]  ;;  %v2089_v28 = vsub.f32 %v12240_v4, %v9752_v63  ;;  %vm3390_vm9 = vweird.f32 %v9781_v45 }
 0x460   : > { %v3377_v13 = vmul.f32 %v12233_v10, %v9786_v14  ;;  %v3378_v29 = vmul.f32 %v12234_v34, %v9786_v14  ;;  %4699 = vst [vmem:[%s7871_s30 + $0x4f0] sm:$0xff] %v3339_v40  ;;  %v3379_v22 = vmul.f32 %v12235_v32, %v9786_v14  ;;  %v3380_v58 = vmul.f32 %v12236_v37, %v9786_v14  ;;  %v9813_v10 = vpop.f32.mrf.mxu1  ;;  %v12242_v34 = vld [vmem:[#allocation129_spill] sm:$0xff]  ;;  %v12243_v37 = vld [vmem:[#allocation130_spill] sm:$0xff] }
 0x461   : > { %v2087_v56 = vsub.f32 %v12237_v57, %v9752_v63  ;;  %4700 = vst [vmem:[%s7871_s30 + $0x4f8] sm:$0xff] %v3340_v3  ;;  %v2088_v40 = vsub.f32 %v12239_v61, %v9752_v63  ;;  %v2093_v32 = vsub.f32 %v12242_v34, %v9792_v44  ;;  %v2094_v3 = vsub.f32 %v12243_v37, %v9792_v44  ;;  %v12245_v61 = vld [vmem:[#allocation78_spill] sm:$0xff] }
 0x462   : > { %12238 = vst [vmem:[#allocation21_spill] sm:$0xff] %v9806_v50  ;;  %3684 = vmatmul.f32.gmra.mxu0 %v3377_v13  ;;  %3797 = vmatmul.f32.gmra.mxu1 %v3378_v29  ;;  %v2091_v50 = vsub.f32 %v12245_v61, %v9752_v63  ;;  %5647 = vpow2.f32 %v2581_v31  ;;  %v2589_v34 = vmul.f32 1.442695, %v2089_v28  ;;  %v9829_v61 = vpop.f32.mrf.mxu2  ;;  %v3394_v31 = vand.u32 2147483647, %v9781_v45 }
 0x463   : > { %4709 = vst [vmem:[%s7871_s30 + $0x540] sm:$0xff] %v3377_v13  ;;  %3910 = vmatmul.f32.gmra.mxu2 %v3379_v22  ;;  %4023 = vmatmul.f32.gmra.mxu3 %v3380_v58  ;;  %v12244_v13 = vld [vmem:[#allocation72_spill] sm:$0xff]  ;;  %v2585_v4 = vmul.f32 1.442695, %v2087_v56  ;;  %v2587_v18 = vmul.f32 1.442695, %v2088_v40  ;;  %5649 = vpow2.f32 %v2583_v42  ;;  %v9837_v28 = vpop.f32.mrf.mxu3 }
 0x464   : > { %12241 = vst [vmem:[#allocation135_spill] sm:$0xff] %v9813_v10  ;;  %v2090_v57 = vsub.f32 %v12244_v13, %v9752_v63  ;;  %v2593_v59 = vmul.f32 1.442695, %v2091_v50  ;;  %v12248_v42 = vld [vmem:[#allocation198_spill] sm:$0xff]  ;;  %vm3395_vm11 = vcmp.eq.f32.partialorder %v3394_v31, 8.507059e+37 }
 0x465   : > { %4710 = vst [vmem:[%s7871_s30 + $0x548] sm:$0xff] %v3378_v29  ;;  %v5646_v10 = vpop.eup %5645  ;;  %v2597_v29 = vmul.f32 1.442695, %v2093_v32  ;;  %5651 = vpow2.f32 %v2585_v4  ;;  %v2092_v56 = vsub.f32 %v12248_v42, %v9752_v63  ;;  %v9848_v4 = vpop.f32.mrf.mxu0 }
 0x466   : > { %4711 = vst [vmem:[%s7871_s30 + $0x550] sm:$0xff] %v3379_v22  ;;  %v3386_v33 = vmul.f32 %v5646_v10, %v9781_v45  ;;  %v2591_v37 = vmul.f32 1.442695, %v2090_v57  ;;  %v2599_v22 = vmul.f32 1.442695, %v2094_v3  ;;  %5653 = vpow2.f32 %v2587_v18  ;;  %v12251_v3 = vld [vmem:[#allocation182_spill] sm:$0xff] }
 0x467   : > { %4712 = vst [vmem:[%s7871_s30 + $0x558] sm:$0xff] %v3380_v58  ;;  %v3396_v58 = vand.u32 2147483648, %v9781_v45  ;;  %5655 = vpow2.f32 %v2589_v34  ;;  %vm3391_vm8 = vweird.f32 %v5646_v10  ;;  %v2097_v63 = vsub.f32 %v12251_v3, %v9792_v44 }
 0x468   : > { %v3387_v13 = vsub.f32 1.0, %v3386_v33  ;;  %12247 = vst [vmem:[#allocation137_spill] sm:$0xff] %v9829_v61  ;;  %v9835_v40 = vpop.eup %5647  ;;  %5657 = vpow2.f32 %v2591_v37  ;;  %v12250_v33 = vld [vmem:[#allocation132_spill] sm:$0xff]  ;;  %v2601_v57 = vmul.f32 1.442695, %v2095_v7  ;;  %v9855_v42 = vpop.f32.mrf.mxu1  ;;  %vm3392_vm10 = vmor %vm3390_vm9, %vm3391_vm8  ;;  %v12256_v61 = vld [vmem:[#allocation189_spill] sm:$0xff] }
 0x469   : > { %12249 = vst [vmem:[#allocation24_spill] sm:$0xff] %v9837_v28  ;;  %v2096_v18 = vsub.f32 %v12250_v33, %v9792_v44  ;;  %v9843_v50 = vpop.eup %5649  ;;  %v3397_v33 = vor.u32 1.1754944e-38, %v3396_v58  ;;  %v2595_v28 = vmul.f32 1.442695, %v2092_v56  ;;  %v2605_v31 = vmul.f32 1.442695, %v2097_v63 }
 0x46a   : > { %v3388_v32 = vmul.f32 %v5646_v10, %v3387_v13  ;;  %12252 = vst [vmem:[#allocation124_spill] sm:$0xff] %v9848_v4  ;;  %v2883_v37 = vadd.f32 %v9843_v50, %v9835_v40  ;;  %v12261_v63 = vld [vmem:[#allocation190_spill] sm:$0xff] }
 0x46b   : > { %v9853_v13 = vpop.eup %5651  ;;  %12254 = vst [vmem:[#allocation26_spill] sm:$0xff] %v9855_v42  ;;  %v2098_v42 = vsub.f32 %v12256_v61, %v9792_v44  ;;  %v12260_v61 = vld [vmem:[#allocation202_spill] sm:$0xff] }
 0x46c   : > { %v9839_v62 = vpop.xlane.xlu1 %2827  ;;  %v3389_v34 = vadd.f32 %v5646_v10, %v3388_v32  ;;  %12253 = vst [vmem:[#allocation139_spill] sm:$0xff] %v9853_v13  ;;  %v9858_v7 = vpop.eup %5653  ;;  %v2884_v32 = vadd.f32 %v9853_v13, %v2883_v37 }
 0x46d   : > { %5659 = vrcp.f32 %v9839_v62  ;;  %12255 = vst [vmem:[#allocation27_spill] sm:$0xff] %v9858_v7  ;;  %v9861_v45 = vpop.eup %5655  ;;  %v9894_v13 = vpop.f32.mrf.mxu3  ;;  %vm3412_vm13 = vweird.f32 %v9839_v62 }
 0x46e   : > { %5661 = vpow2.f32 %v2593_v59  ;;  %v3393_v3 = vsel %vm3392_vm10, %v5646_v10, %v3389_v34  ;;  %v2603_v59 = vmul.f32 1.442695, %v2096_v18  ;;  %v9867_v58 = vpop.eup %5657  ;;  %v12259_v18 = vld [vmem:[#allocation200_spill] sm:$0xff]  ;;  %12265 = vst [vmem:[#allocation142_spill] sm:$0xff] %v9894_v13 }
 0x46f   : > { %5663 = vpow2.f32 %v2597_v29  ;;  %v9863_v4 = vsel %vm3395_vm11, %v3397_v33, %v3393_v3  ;;  %12257 = vst [vmem:[#allocation140_spill] sm:$0xff] %v9867_v58  ;;  %v2885_v29 = vadd.f32 %v9858_v7, %v2884_v32  ;;  %v2099_v33 = vsub.f32 %v12261_v63, %v9792_v44 }
 0x470   : > { %5665 = vpow2.f32 %v2599_v22  ;;  %v3399_v10 = vmul.f32 %v9050_v26, %v9863_v4  ;;  %v12258_v22 = vld [vmem:[#allocation37_spill] sm:$0xff]  ;;  %v3401_v34 = vmul.f32 %v12259_v18, %v9863_v4  ;;  %v12264_v18 = vld [vmem:[#allocation151_spill] sm:$0xff]  ;;  %v2607_v63 = vmul.f32 1.442695, %v2098_v42  ;;  %v9904_v42 = vpop.f32.mrf.mxu0 }
 0x471   : > { %5667 = vpow2.f32 %v2601_v57  ;;  %v3400_v56 = vmul.f32 %v12258_v22, %v9863_v4  ;;  %v3402_v57 = vmul.f32 %v12260_v61, %v9863_v4  ;;  %v2886_v26 = vadd.f32 %v9861_v45, %v2885_v29  ;;  %12266 = vst [vmem:[#allocation35_spill] sm:$0xff] %v9904_v42 }
 0x472   : > { %5669 = vpow2.f32 %v2595_v28  ;;  %3687 = vmatmul.f32.gmra.mxu0 %v3399_v10  ;;  %4717 = vst [vmem:[%s7871_s30 + $0x580] sm:$0xff] %v3399_v10  ;;  %v9887_v28 = vpop.f32.mrf.mxu2  ;;  %3913 = vmatmul.f32.gmra.mxu2 %v3401_v34  ;;  %v2100_v61 = vsub.f32 %v12264_v18, %v9792_v44 }
 0x473   : > { %v5660_v37 = vpop.eup %5659  ;;  %5671 = vpow2.f32 %v2603_v59  ;;  %12263 = vst [vmem:[#allocation30_spill] sm:$0xff] %v9887_v28  ;;  %3800 = vmatmul.f32.gmra.mxu1 %v3400_v56  ;;  %v2887_v10 = vadd.f32 %v9867_v58, %v2886_v26  ;;  %4026 = vmatmul.f32.gmra.mxu3 %v3402_v57  ;;  %v3418_v28 = vand.u32 2147483648, %v9839_v62 }
 0x474   : > { %v9880_v3 = vpop.eup %5661  ;;  %v3408_v32 = vmul.f32 %v5660_v37, %v9839_v62  ;;  %4718 = vst [vmem:[%s7871_s30 + $0x588] sm:$0xff] %v3400_v56  ;;  %5673 = vpow2.f32 %v2605_v31  ;;  %v2609_v56 = vmul.f32 1.442695, %v2099_v33  ;;  %vm3413_vm12 = vweird.f32 %v5660_v37  ;;  %v9910_v31 = vpop.f32.mrf.mxu1 }
 0x475   : > { %12262 = vst [vmem:[#allocation141_spill] sm:$0xff] %v9880_v3  ;;  %v9885_v22 = vpop.eup %5663  ;;  %v2888_v26 = vadd.f32 %v9880_v3, %v2887_v10  ;;  %5675 = vpow2.f32 %v2607_v63  ;;  %v2611_v13 = vmul.f32 1.442695, %v2100_v61  ;;  %vm3414_vm14 = vmor %vm3412_vm13, %vm3413_vm12  ;;  %v3419_v42 = vor.u32 1.1754944e-38, %v3418_v28 }
 0x476   : > { %v9892_v7 = vpop.eup %5665  ;;  %v3409_v29 = vsub.f32 1.0, %v3408_v32  ;;  %4719 = vst [vmem:[%s7871_s30 + $0x590] sm:$0xff] %v3401_v34  ;;  %v3416_v32 = vand.u32 2147483647, %v9839_v62  ;;  %5677 = vpow2.f32 %v2609_v56  ;;  %v9927_v56 = vpop.f32.mrf.mxu3 }
 0x477   : > { %v9898_v59 = vpop.eup %5667  ;;  %4720 = vst [vmem:[%s7871_s30 + $0x598] sm:$0xff] %v3402_v57  ;;  %v2892_v44 = vadd.f32 %v9892_v7, %v9885_v22  ;;  %5679 = vpow2.f32 %v2611_v13 }
 0x478   : > { %v3410_v18 = vmul.f32 %v5660_v37, %v3409_v29  ;;  %v9908_v34 = vpop.eup %5669  ;;  %12268 = vst [vmem:[#allocation147_spill] sm:$0xff] %v9910_v31  ;;  %vm3417_vm15 = vcmp.eq.f32.partialorder %v3416_v32, 8.507059e+37  ;;  %v517_v32 = vld [vmem:[%s7527_s21 + $0x3c0] sm:$0xff] }
 0x479   : > { %12267 = vst [vmem:[#allocation36_spill] sm:$0xff] %v9908_v34  ;;  %v2893_v57 = vadd.f32 %v9898_v59, %v2892_v44  ;;  %v9913_v33 = vpop.eup %5671  ;;  %v2889_v29 = vadd.f32 %v9908_v34, %v2888_v26  ;;  %v501_v26 = vld [vmem:[%s7527_s21 + $0x340] sm:$0xff]  ;;  %4403 = vmatpush.msrb.mxu3 %v517_v32 }
 0x47a   : > { %v3411_v58 = vadd.f32 %v5660_v37, %v3410_v18  ;;  %v9918_v31 = vpop.eup %5673  ;;  %v9925_v28 = vpop.f32.mrf.mxu2  ;;  %12272 = vst [vmem:[#allocation149_spill] sm:$0xff] %v9927_v56  ;;  %4290 = vmatpush.msrb.mxu2 %v501_v26  ;;  %v12277_v56 = vld [vmem:[#allocation191_spill] sm:$0xff] }
 0x47b   : > { %v2894_v10 = vadd.f32 %v9913_v33, %v2893_v57  ;;  %12269 = vst [vmem:[#allocation40_spill] sm:$0xff] %v9918_v31  ;;  %2890 = vadd.xlane.f32.xlu2 %v2889_v29  ;;  %v2837_v44 = vpop.xlane.xlu2 %2836  ;;  %v9923_v18 = vpop.eup %5675  ;;  %v12274_v57 = vld [vmem:[#allocation81_spill] sm:$0xff] }
 0x47c   : > { %v3415_v61 = vsel %vm3414_vm14, %v5660_v37, %v3411_v58  ;;  %12270 = vst [vmem:[#allocation41_spill] sm:$0xff] %v9923_v18  ;;  %5681 = vrcp.f32 %v2837_v44  ;;  %v469_v37 = vld [vmem:[%s7527_s21 + $0x240] sm:$0xff]  ;;  %vm3434_vm1 = vweird.f32 %v2837_v44 }
 0x47d   : > { %v9920_v63 = vsel %vm3417_vm15, %v3419_v42, %v3415_v61  ;;  %v2895_v62 = vadd.f32 %v9918_v31, %v2894_v10  ;;  %12271 = vst [vmem:[#allocation148_spill] sm:$0xff] %v9925_v28  ;;  %v12273_v42 = vld [vmem:[#allocation144_spill] sm:$0xff]  ;;  %v12275_v10 = vld [vmem:[#allocation82_spill] sm:$0xff]  ;;  %v9939_v28 = vpop.eup %5677  ;;  %4064 = vmatpush.msrb.mxu0 %v469_v37  ;;  %v9944_v31 = vpop.f32.mrf.mxu0 }
 0x47e   : > { %v3421_v13 = vmul.f32 %v12273_v42, %v9920_v63  ;;  %v3422_v29 = vmul.f32 %v12274_v57, %v9920_v63  ;;  %v3423_v61 = vmul.f32 %v12275_v10, %v9920_v63  ;;  %12276 = vst [vmem:[#allocation150_spill] sm:$0xff] %v9939_v28  ;;  %v9948_v57 = vpop.eup %5679  ;;  %v9950_v10 = vpop.f32.mrf.mxu1 }
 0x47f   : > { %v2896_v58 = vadd.f32 %v9923_v18, %v2895_v62  ;;  %v3424_v62 = vmul.f32 %v12277_v56, %v9920_v63  ;;  %v485_v18 = vld [vmem:[%s7527_s21 + $0x2c0] sm:$0xff]  ;;  %12278 = vst [vmem:[#allocation38_spill] sm:$0xff] %v9944_v31  ;;  %v9958_v31 = vpop.f32.mrf.mxu3 }
 0x480   : > { %3690 = vmatmul.f32.gmra.mxu0 %v3421_v13  ;;  %4725 = vst [vmem:[%s7871_s30 + $0x5c0] sm:$0xff] %v3421_v13  ;;  %3803 = vmatmul.f32.gmra.mxu1 %v3422_v29  ;;  %v3440_v13 = vand.u32 2147483648, %v2837_v44 }
 0x481   : > { %v2897_v42 = vadd.f32 %v9939_v28, %v2896_v58  ;;  %12279 = vst [vmem:[#allocation199_spill] sm:$0xff] %v9948_v57  ;;  %3916 = vmatmul.f32.gmra.mxu2 %v3423_v61  ;;  %4029 = vmatmul.f32.gmra.mxu3 %v3424_v62 }
 0x482   : > { %12280 = vst [vmem:[#allocation201_spill] sm:$0xff] %v9950_v10  ;;  %4177 = vmatpush.msrb.mxu1 %v485_v18  ;;  %v5682_v56 = vpop.eup %5681  ;;  %v9956_v32 = vpop.f32.mrf.mxu2  ;;  %v3438_v10 = vand.u32 2147483647, %v2837_v44  ;;  %v3441_v18 = vor.u32 1.1754944e-38, %v3440_v13 }
 0x483   : > { %4726 = vst [vmem:[%s7871_s30 + $0x5c8] sm:$0xff] %v3422_v29  ;;  %v2898_v26 = vadd.f32 %v9948_v57, %v2897_v42  ;;  %v3430_v37 = vmul.f32 %v5682_v56, %v2837_v44  ;;  %vm3435_vm0 = vweird.f32 %v5682_v56  ;;  %v12287_v44 = vld [vmem:[#allocation153_spill] sm:$0xff] }
 0x484   : > { %4727 = vst [vmem:[%s7871_s30 + $0x5d0] sm:$0xff] %v3423_v61  ;;  %vm3436_vm2 = vmor %vm3434_vm1, %vm3435_vm0  ;;  %vm3439_vm3 = vcmp.eq.f32.partialorder %v3438_v10, 8.507059e+37 }
 0x485   : > { %4728 = vst [vmem:[%s7871_s30 + $0x5d8] sm:$0xff] %v3424_v62  ;;  %2899 = vadd.xlane.f32.xlu0 %v2898_v26  ;;  %v3431_v58 = vsub.f32 1.0, %v3430_v37  ;;  %v9960_v29 = vpop.f32.mrf.mxu0  ;;  %v12285_v37 = vld [vmem:[#allocation193_spill] sm:$0xff] }
 0x486   : > { %12281 = vst [vmem:[#allocation203_spill] sm:$0xff] %v9956_v32  ;;  %v9962_v61 = vpop.f32.mrf.mxu1  ;;  %v484_v32 = vld [vmem:[%s7527_s21 + $0x2b8] sm:$0xff] }
 0x487   : > { %12282 = vst [vmem:[#allocation85_spill] sm:$0xff] %v9958_v31  ;;  %v3432_v28 = vmul.f32 %v5682_v56, %v3431_v58  ;;  %v12288_v31 = vld [vmem:[#allocation154_spill] sm:$0xff]  ;;  %v9977_v10 = vpop.f32.mrf.mxu3  ;;  %4178 = vmatpush.msrb.mxu1 %v484_v32 }
 0x488   : > { %12283 = vst [vmem:[#allocation206_spill] sm:$0xff] %v9960_v29 }
 0x489   : > { %v3433_v34 = vadd.f32 %v5682_v56, %v3432_v28  ;;  %12284 = vst [vmem:[#allocation208_spill] sm:$0xff] %v9962_v61  ;;  %v12286_v28 = vld [vmem:[#allocation152_spill] sm:$0xff] }
 0x48a   : > { %12290 = vst [vmem:[#allocation211_spill] sm:$0xff] %v9977_v10  ;;  %v500_v10 = vld [vmem:[%s7527_s21 + $0x338] sm:$0xff] }
 0x48b   : > { %v3437_v62 = vsel %vm3436_vm2, %v5682_v56, %v3433_v34  ;;  %v9974_v34 = vpop.f32.mrf.mxu2  ;;  %4291 = vmatpush.msrb.mxu2 %v500_v10 }
 0x48c   : > { %v9964_v42 = vsel %vm3439_vm3, %v3441_v18, %v3437_v62  ;;  %12289 = vst [vmem:[#allocation209_spill] sm:$0xff] %v9974_v34  ;;  %v468_v34 = vld [vmem:[%s7527_s21 + $0x238] sm:$0xff] }
 0x48d   : > { %v3443_v58 = vmul.f32 %v12285_v37, %v9964_v42  ;;  %v3444_v29 = vmul.f32 %v12286_v28, %v9964_v42  ;;  %v3445_v61 = vmul.f32 %v12287_v44, %v9964_v42  ;;  %v3446_v13 = vmul.f32 %v12288_v31, %v9964_v42  ;;  %v9981_v18 = vpop.f32.mrf.mxu0  ;;  %4065 = vmatpush.msrb.mxu0 %v468_v34 }
 0x48e   : > { %12291 = vst [vmem:[#allocation86_spill] sm:$0xff] %v9981_v18  ;;  %v9984_v31 = vpop.f32.mrf.mxu1 }
 0x48f   : > { %v2846_v26 = vpop.xlane.xlu0 %2845  ;;  %3693 = vmatmul.f32.gmra.mxu0 %v3443_v58  ;;  %4733 = vst [vmem:[%s7871_s30 + $0x600] sm:$0xff] %v3443_v58  ;;  %3806 = vmatmul.f32.gmra.mxu1 %v3444_v29 }
 0x490   : > { %5683 = vrcp.f32 %v2846_v26  ;;  %4734 = vst [vmem:[%s7871_s30 + $0x608] sm:$0xff] %v3444_v29  ;;  %3919 = vmatmul.f32.gmra.mxu2 %v3445_v61  ;;  %4032 = vmatmul.f32.gmra.mxu3 %v3446_v13  ;;  %v3462_v58 = vand.u32 2147483648, %v2846_v26  ;;  %v3460_v44 = vand.u32 2147483647, %v2846_v26  ;;  %v516_v29 = vld [vmem:[%s7527_s21 + $0x3b8] sm:$0xff]  ;;  %vm3456_vm5 = vweird.f32 %v2846_v26 }
 0x491   : > { %4735 = vst [vmem:[%s7871_s30 + $0x610] sm:$0xff] %v3445_v61  ;;  %4404 = vmatpush.msrb.mxu3 %v516_v29 }
 0x492   : > { %4736 = vst [vmem:[%s7871_s30 + $0x618] sm:$0xff] %v3446_v13  ;;  %v9992_v13 = vpop.f32.mrf.mxu3  ;;  %vm3461_vm7 = vcmp.eq.f32.partialorder %v3460_v44, 8.507059e+37 }
 0x493   : > { %12292 = vst [vmem:[#allocation87_spill] sm:$0xff] %v9984_v31  ;;  %v9990_v61 = vpop.f32.mrf.mxu2  ;;  %v466_v31 = vld [vmem:[%s7527_s21 + $0x228] sm:$0xff] }
 0x494   : > { %12293 = vst [vmem:[#allocation89_spill] sm:$0xff] %v9990_v61  ;;  %v498_v61 = vld [vmem:[%s7527_s21 + $0x328] sm:$0xff] }
 0x495   : > { %12294 = vst [vmem:[#allocation90_spill] sm:$0xff] %v9992_v13  ;;  %v9995_v34 = vpop.f32.mrf.mxu0  ;;  %v483_v13 = vld [vmem:[%s7527_s21 + $0x2b0] sm:$0xff] }
 0x496   : > { %v5684_v56 = vpop.eup %5683  ;;  %12295 = vst [vmem:[#allocation91_spill] sm:$0xff] %v9995_v34  ;;  %4179 = vmatpush.msrb.mxu1 %v483_v13 }
 0x497   : > { %v3452_v62 = vmul.f32 %v5684_v56, %v2846_v26  ;;  %vm3457_vm4 = vweird.f32 %v5684_v56  ;;  %v9999_v26 = vpop.f32.mrf.mxu1 }
 0x498   : > { %vm3458_vm6 = vmor %vm3456_vm5, %vm3457_vm4  ;;  %12296 = vst [vmem:[#allocation207_spill] sm:$0xff] %v9999_v26 }
 0x499   : > { %v3453_v37 = vsub.f32 1.0, %v3452_v62  ;;  %v3463_v62 = vor.u32 1.1754944e-38, %v3462_v58 }
 0x49b   : > { %v3454_v28 = vmul.f32 %v5684_v56, %v3453_v37  ;;  %v2855_v18 = vpop.xlane.xlu1 %2854 }
 0x49c   : > { %5685 = vrcp.f32 %v2855_v18  ;;  %vm3478_vm9 = vweird.f32 %v2855_v18 }
 0x49d   : > { %v3455_v57 = vadd.f32 %v5684_v56, %v3454_v28  ;;  %v10025_v34 = vpop.f32.mrf.mxu0 }
 0x49e   : > { %12304 = vst [vmem:[#allocation215_spill] sm:$0xff] %v10025_v34 }
 0x49f   : > { %v3459_v37 = vsel %vm3458_vm6, %v5684_v56, %v3455_v57  ;;  %v12297_v57 = vld [vmem:[#allocation204_spill] sm:$0xff] }
 0x4a0   : > { %v9997_v10 = vsel %vm3461_vm7, %v3463_v62, %v3459_v37  ;;  %v10015_v62 = vpop.f32.mrf.mxu3  ;;  %v12300_v37 = vld [vmem:[#allocation33_spill] sm:$0xff] }
 0x4a1   : > { %v3465_v32 = vmul.f32 %v9271_v30, %v9997_v10  ;;  %v3466_v28 = vmul.f32 %v9277_v0, %v9997_v10  ;;  %v3467_v58 = vmul.f32 %v9319_v24, %v9997_v10  ;;  %v3468_v56 = vmul.f32 %v12297_v57, %v9997_v10  ;;  %v10013_v30 = vpop.f32.mrf.mxu2  ;;  %12299 = vst [vmem:[#allocation212_spill] sm:$0xff] %v10015_v62 }
 0x4a2   : > { %v5686_v44 = vpop.eup %5685  ;;  %12298 = vst [vmem:[#allocation210_spill] sm:$0xff] %v10013_v30  ;;  %v3484_v24 = vand.u32 2147483648, %v2855_v18  ;;  %v12303_v30 = vld [vmem:[#allocation194_spill] sm:$0xff] }
 0x4a3   : > { %3696 = vmatmul.f32.gmra.mxu0 %v3465_v32  ;;  %4741 = vst [vmem:[%s7871_s30 + $0x640] sm:$0xff] %v3465_v32  ;;  %3809 = vmatmul.f32.gmra.mxu1 %v3466_v28  ;;  %v3474_v29 = vmul.f32 %v5686_v44, %v2855_v18  ;;  %vm3479_vm8 = vweird.f32 %v5686_v44  ;;  %v3359_v32 = vmul.f32 %v12300_v37, %v9739_v47 }
 0x4a4   : > { %4742 = vst [vmem:[%s7871_s30 + $0x648] sm:$0xff] %v3466_v28  ;;  %3922 = vmatmul.f32.gmra.mxu2 %v3467_v58  ;;  %4035 = vmatmul.f32.gmra.mxu3 %v3468_v56  ;;  %v12301_v28 = vld [vmem:[#allocation77_spill] sm:$0xff]  ;;  %v3362_v62 = vmul.f32 %v12303_v30, %v9739_v47  ;;  %vm10027_vm10 = vmor %vm3478_vm9, %vm3479_vm8  ;;  %v3485_v34 = vor.u32 1.1754944e-38, %v3484_v24 }
 0x4a5   : > { %4743 = vst [vmem:[%s7871_s30 + $0x650] sm:$0xff] %v3467_v58  ;;  %v3475_v0 = vsub.f32 1.0, %v3474_v29  ;;  %v3360_v57 = vmul.f32 %v12301_v28, %v9739_v47  ;;  %v12302_v58 = vld [vmem:[#allocation186_spill] sm:$0xff]  ;;  %v3482_v29 = vand.u32 2147483647, %v2855_v18  ;;  %v499_v18 = vld [vmem:[%s7527_s21 + $0x330] sm:$0xff] }
 0x4a6   : > { %4744 = vst [vmem:[%s7871_s30 + $0x658] sm:$0xff] %v3468_v56  ;;  %v3361_v56 = vmul.f32 %v12302_v58, %v9739_v47  ;;  %v10034_v58 = vpop.f32.mrf.mxu1  ;;  %v467_v47 = vld [vmem:[%s7527_s21 + $0x230] sm:$0xff]  ;;  %4292 = vmatpush.msrb.mxu2 %v499_v18  ;;  %v481_v18 = vld [vmem:[%s7527_s21 + $0x2a0] sm:$0xff] }
 0x4a7   : > { %v3476_v26 = vmul.f32 %v5686_v44, %v3475_v0  ;;  %v10031_v28 = vpop.xlane.xlu2 %2863  ;;  %4705 = vst [vmem:[%s7871_s30 + $0x520] sm:$0xff] %v3359_v32  ;;  %v515_v30 = vld [vmem:[%s7527_s21 + $0x3b0] sm:$0xff]  ;;  %4066 = vmatpush.msrb.mxu0 %v467_v47  ;;  %vm3483_vm11 = vcmp.eq.f32.partialorder %v3482_v29, 8.507059e+37  ;;  %v496_v47 = vld [vmem:[%s7527_s21 + $0x318] sm:$0xff] }
 0x4a8   : > { %12307 = vst [vmem:[#allocation47_spill] sm:$0xff] %v10034_v58  ;;  %5687 = vrcp.f32 %v10031_v28  ;;  %4405 = vmatpush.msrb.mxu3 %v515_v30  ;;  %4293 = vmatpush.msrb.mxu2 %v498_v61  ;;  %v12311_v30 = vld [vmem:[#allocation75_spill] sm:$0xff]  ;;  %v3506_v3 = vand.u32 2147483648, %v10031_v28  ;;  %vm3500_vm13 = vweird.f32 %v10031_v28 }
 0x4a9   : > { %v3477_v0 = vadd.f32 %v5686_v44, %v3476_v26  ;;  %4706 = vst [vmem:[%s7871_s30 + $0x528] sm:$0xff] %v3360_v57  ;;  %v514_v26 = vld [vmem:[%s7527_s21 + $0x3a8] sm:$0xff]  ;;  %4067 = vmatpush.msrb.mxu0 %v466_v31  ;;  %v10061_v61 = vpop.f32.mrf.mxu2  ;;  %v465_v31 = vld [vmem:[%s7527_s21 + $0x220] sm:$0xff] }
 0x4aa   : > { %4707 = vst [vmem:[%s7871_s30 + $0x530] sm:$0xff] %v3361_v56  ;;  %4406 = vmatpush.msrb.mxu3 %v514_v26  ;;  %v464_v26 = vld [vmem:[%s7527_s21 + $0x218] sm:$0xff] }
 0x4ab   : > { %v3481_v32 = vsel %vm10027_vm10, %v5686_v44, %v3477_v0  ;;  %4708 = vst [vmem:[%s7871_s30 + $0x538] sm:$0xff] %v3362_v62  ;;  %v513_v0 = vld [vmem:[%s7527_s21 + $0x3a0] sm:$0xff]  ;;  %4068 = vmatpush.msrb.mxu0 %v465_v31  ;;  %v3504_v31 = vand.u32 2147483647, %v10031_v28 }
 0x4ac   : > { %v10049_v57 = vsel %vm3483_vm11, %v3485_v34, %v3481_v32  ;;  %12308 = vst [vmem:[#allocation48_spill] sm:$0xff] %v10061_v61  ;;  %v10083_v32 = vmul.f32 %v12311_v30, %v9786_v14  ;;  %4407 = vmatpush.msrb.mxu3 %v513_v0  ;;  %v480_v30 = vld [vmem:[%s7527_s21 + $0x298] sm:$0xff] }
 0x4ad   : > { %v3487_v24 = vmul.f32 %v9389_v8, %v10049_v57  ;;  %v3488_v56 = vmul.f32 %v9397_v5, %v10049_v57  ;;  %v3489_v44 = vmul.f32 %v9446_v39, %v10049_v57  ;;  %v3490_v13 = vmul.f32 %v9460_v21, %v10049_v57  ;;  %v482_v5 = vld [vmem:[%s7527_s21 + $0x2a8] sm:$0xff]  ;;  %v497_v8 = vld [vmem:[%s7527_s21 + $0x320] sm:$0xff]  ;;  %v12309_v39 = vld [vmem:[#allocation197_spill] sm:$0xff]  ;;  %v10071_v21 = vpop.f32.mrf.mxu3  ;;  %4069 = vmatpush.msrb.mxu0 %v464_v26 }
 0x4ae   : > { %v10059_v62 = vpop.eup %5687  ;;  %v10069_v34 = vmul.f32 %v12309_v39, %v9786_v14  ;;  %12310 = vst [vmem:[#allocation49_spill] sm:$0xff] %v10071_v21  ;;  %4180 = vmatpush.msrb.mxu1 %v482_v5  ;;  %4294 = vmatpush.msrb.mxu2 %v497_v8  ;;  %v10093_v21 = vpop.f32.mrf.mxu0  ;;  %v12313_v5 = vld [vmem:[#allocation29_spill] sm:$0xff]  ;;  %vm3505_vm15 = vcmp.eq.f32.partialorder %v3504_v31, 8.507059e+37 }
 0x4af   : > { %3699 = vmatmul.f32.gmra.mxu0 %v3487_v24  ;;  %4749 = vst [vmem:[%s7871_s30 + $0x680] sm:$0xff] %v3487_v24  ;;  %3812 = vmatmul.f32.gmra.mxu1 %v3488_v56  ;;  %v3496_v29 = vmul.f32 %v10059_v62, %v10031_v28  ;;  %v10075_v37 = vpop.xlane.xlu0 %2872  ;;  %v512_v24 = vld [vmem:[%s7527_s21 + $0x398] sm:$0xff]  ;;  %v10100_v8 = vmul.f32 %v12313_v5, %v9786_v14  ;;  %v10102_v58 = vpop.f32.mrf.mxu1  ;;  %vm3501_vm12 = vweird.f32 %v10059_v62  ;;  %v12317_v5 = vld [vmem:[#allocation28_spill] sm:$0xff] }
 0x4b0   : > { %4750 = vst [vmem:[%s7871_s30 + $0x688] sm:$0xff] %v3488_v56  ;;  %3925 = vmatmul.f32.gmra.mxu2 %v3489_v44  ;;  %4038 = vmatmul.f32.gmra.mxu3 %v3490_v13  ;;  %5689 = vrcp.f32 %v10075_v37  ;;  %v12312_v56 = vld [vmem:[#allocation76_spill] sm:$0xff]  ;;  %vm3502_vm14 = vmor %vm3500_vm13, %vm3501_vm12  ;;  %vm3522_vm1 = vweird.f32 %v10075_v37 }
 0x4b1   : > { %4751 = vst [vmem:[%s7871_s30 + $0x690] sm:$0xff] %v3489_v44  ;;  %v10091_v39 = vmul.f32 %v12312_v56, %v9786_v14  ;;  %v3497_v61 = vsub.f32 1.0, %v3496_v29  ;;  %v495_v44 = vld [vmem:[%s7527_s21 + $0x310] sm:$0xff]  ;;  %4181 = vmatpush.msrb.mxu1 %v481_v18  ;;  %4295 = vmatpush.msrb.mxu2 %v496_v47  ;;  %v12315_v47 = vld [vmem:[#allocation79_spill] sm:$0xff] }
 0x4b2   : > { %4752 = vst [vmem:[%s7871_s30 + $0x698] sm:$0xff] %v3490_v13  ;;  %v463_v56 = vld [vmem:[%s7527_s21 + $0x210] sm:$0xff]  ;;  %4408 = vmatpush.msrb.mxu3 %v512_v24  ;;  %v10127_v26 = vmul.f32 %v12315_v47, %v9863_v4  ;;  %v3507_v24 = vor.u32 1.1754944e-38, %v3506_v3  ;;  %v10145_v3 = vpop.f32.mrf.mxu2 }
 0x4b3   : > { %v511_v29 = vld [vmem:[%s7527_s21 + $0x390] sm:$0xff]  ;;  %4713 = vst [vmem:[%s7871_s30 + $0x560] sm:$0xff] %v10069_v34  ;;  %v3498_v13 = vmul.f32 %v10059_v62, %v3497_v61  ;;  %4182 = vmatpush.msrb.mxu1 %v480_v30  ;;  %4296 = vmatpush.msrb.mxu2 %v495_v44  ;;  %v12316_v30 = vld [vmem:[#allocation80_spill] sm:$0xff] }
 0x4b4   : > { %v479_v14 = vld [vmem:[%s7527_s21 + $0x290] sm:$0xff]  ;;  %4714 = vst [vmem:[%s7871_s30 + $0x568] sm:$0xff] %v10083_v32  ;;  %4070 = vmatpush.msrb.mxu0 %v463_v56  ;;  %4409 = vmatpush.msrb.mxu3 %v511_v29  ;;  %v10133_v44 = vmul.f32 %v12316_v30, %v9863_v4  ;;  %v10137_v56 = vmul.f32 %v12317_v5, %v9863_v4  ;;  %v3528_v30 = vand.u32 2147483648, %v10075_v37 }
 0x4b5   : > { %4715 = vst [vmem:[%s7871_s30 + $0x570] sm:$0xff] %v10091_v39  ;;  %v3499_v0 = vadd.f32 %v10059_v62, %v3498_v13  ;;  %v12314_v61 = vld [vmem:[#allocation205_spill] sm:$0xff]  ;;  %4183 = vmatpush.msrb.mxu1 %v479_v14 }
 0x4b6   : > { %4716 = vst [vmem:[%s7871_s30 + $0x578] sm:$0xff] %v10100_v8  ;;  %v10123_v18 = vmul.f32 %v12314_v61, %v9863_v4  ;;  %v5690_v28 = vpop.eup %5689  ;;  %v10152_v4 = vpop.f32.mrf.mxu3 }
 0x4b7   : > { %v3503_v29 = vsel %vm3502_vm14, %v10059_v62, %v3499_v0  ;;  %v3518_v13 = vmul.f32 %v5690_v28, %v10075_v37  ;;  %v10141_v61 = vpop.xlane.xlu1 %2881  ;;  %4722 = vst [vmem:[%s7871_s30 + $0x5a8] sm:$0xff] %v10127_v26  ;;  %v10154_v62 = vpop.f32.mrf.mxu0  ;;  %vm3523_vm0 = vweird.f32 %v5690_v28 }
 0x4b8   : > { %4721 = vst [vmem:[%s7871_s30 + $0x5a0] sm:$0xff] %v10123_v18  ;;  %v10147_v14 = vsel %vm3505_vm15, %v3507_v24, %v3503_v29  ;;  %5691 = vrcp.f32 %v10141_v61  ;;  %v10162_v24 = vpop.f32.mrf.mxu1  ;;  %vm3524_vm2 = vmor %vm3522_vm1, %vm3523_vm0  ;;  %vm3544_vm5 = vweird.f32 %v10141_v61 }
 0x4b9   : > { %12318 = vst [vmem:[#allocation50_spill] sm:$0xff] %v10152_v4  ;;  %v3519_v31 = vsub.f32 1.0, %v3518_v13  ;;  %v3509_v0 = vmul.f32 %v9511_v53, %v10147_v14  ;;  %v3510_v47 = vmul.f32 %v9521_v43, %v10147_v14  ;;  %v3511_v5 = vmul.f32 %v9529_v49, %v10147_v14  ;;  %v12321_v49 = vld [vmem:[#allocation195_spill] sm:$0xff] }
 0x4ba   : > { %12319 = vst [vmem:[#allocation93_spill] sm:$0xff] %v10154_v62  ;;  %v3512_v29 = vmul.f32 %v9548_v52, %v10147_v14  ;;  %v3526_v53 = vand.u32 2147483647, %v10075_v37  ;;  %v10178_v52 = vmul.f32 %v12321_v49, %v9920_v63  ;;  %v10197_v4 = vpop.f32.mrf.mxu2 }
 0x4bb   : > { %4723 = vst [vmem:[%s7871_s30 + $0x5b0] sm:$0xff] %v10133_v44  ;;  %v3520_v13 = vmul.f32 %v5690_v28, %v3519_v31  ;;  %3702 = vmatmul.f32.gmra.mxu0 %v3509_v0  ;;  %3815 = vmatmul.f32.gmra.mxu1 %v3510_v47  ;;  %v12322_v31 = vld [vmem:[#allocation83_spill] sm:$0xff] }
 0x4bc   : > { %12320 = vst [vmem:[#allocation94_spill] sm:$0xff] %v10162_v24  ;;  %3928 = vmatmul.f32.gmra.mxu2 %v3511_v5  ;;  %4041 = vmatmul.f32.gmra.mxu3 %v3512_v29  ;;  %v10182_v24 = vmul.f32 %v12322_v31, %v9920_v63  ;;  %vm3527_vm3 = vcmp.eq.f32.partialorder %v3526_v53, 8.507059e+37 }
 0x4bd   : > { %4724 = vst [vmem:[%s7871_s30 + $0x5b8] sm:$0xff] %v10137_v56  ;;  %v3521_v43 = vadd.f32 %v5690_v28, %v3520_v13 }
 0x4be   : > { %4757 = vst [vmem:[%s7871_s30 + $0x6c0] sm:$0xff] %v3509_v0  ;;  %v12323_v0 = vld [vmem:[#allocation84_spill] sm:$0xff]  ;;  %v5692_v37 = vpop.eup %5691 }
 0x4bf   : > { %4758 = vst [vmem:[%s7871_s30 + $0x6c8] sm:$0xff] %v3510_v47  ;;  %v10186_v62 = vmul.f32 %v12323_v0, %v9920_v63  ;;  %v3529_v47 = vor.u32 1.1754944e-38, %v3528_v30  ;;  %v3525_v49 = vsel %vm3524_vm2, %v5690_v28, %v3521_v43  ;;  %v3540_v31 = vmul.f32 %v5692_v37, %v10141_v61  ;;  %v10203_v30 = vpop.f32.mrf.mxu3 }
 0x4c0   : > { %4759 = vst [vmem:[%s7871_s30 + $0x6d0] sm:$0xff] %v3511_v5  ;;  %v12324_v5 = vld [vmem:[#allocation192_spill] sm:$0xff]  ;;  %v3550_v43 = vand.u32 2147483648, %v10141_v61  ;;  %vm3545_vm4 = vweird.f32 %v5692_v37 }
 0x4c1   : > { %4760 = vst [vmem:[%s7871_s30 + $0x6d8] sm:$0xff] %v3512_v29  ;;  %v10192_v13 = vmul.f32 %v12324_v5, %v9920_v63  ;;  %v10199_v0 = vsel %vm3527_vm3, %v3529_v47, %v3525_v49  ;;  %v3541_v29 = vsub.f32 1.0, %v3540_v31  ;;  %v10218_v5 = vpop.f32.mrf.mxu0  ;;  %v3548_v49 = vand.u32 2147483647, %v10141_v61  ;;  %vm3546_vm6 = vmor %vm3544_vm5, %vm3545_vm4 }
 0x4c2   : > { %4729 = vst [vmem:[%s7871_s30 + $0x5e0] sm:$0xff] %v10178_v52  ;;  %v3531_v63 = vmul.f32 %v9559_v23, %v10199_v0  ;;  %v3532_v28 = vmul.f32 %v9564_v48, %v10199_v0  ;;  %v3533_v53 = vmul.f32 %v9579_v19, %v10199_v0  ;;  %v3534_v47 = vmul.f32 %v9593_v46, %v10199_v0  ;;  %v10222_v48 = vpop.f32.mrf.mxu1  ;;  %v12327_v46 = vld [vmem:[#allocation157_spill] sm:$0xff] }
 0x4c3   : > { %4730 = vst [vmem:[%s7871_s30 + $0x5e8] sm:$0xff] %v10182_v24  ;;  %v3542_v23 = vmul.f32 %v5692_v37, %v3541_v29  ;;  %v10229_v31 = vmul.f32 %v12327_v46, %v9964_v42  ;;  %v12328_v29 = vld [vmem:[#allocation196_spill] sm:$0xff]  ;;  %v3551_v61 = vor.u32 1.1754944e-38, %v3550_v43  ;;  %vm3549_vm7 = vcmp.eq.f32.partialorder %v3548_v49, 8.507059e+37 }
 0x4c4   : > { %4731 = vst [vmem:[%s7871_s30 + $0x5f0] sm:$0xff] %v10186_v62  ;;  %3705 = vmatmul.f32.gmra.mxu0 %v3531_v63  ;;  %3818 = vmatmul.f32.gmra.mxu1 %v3532_v28 }
 0x4c5   : > { %4732 = vst [vmem:[%s7871_s30 + $0x5f8] sm:$0xff] %v10192_v13  ;;  %3931 = vmatmul.f32.gmra.mxu2 %v3533_v53  ;;  %4044 = vmatmul.f32.gmra.mxu3 %v3534_v47  ;;  %v3543_v19 = vadd.f32 %v5692_v37, %v3542_v23 }
 0x4c6   : > { %12325 = vst [vmem:[#allocation95_spill] sm:$0xff] %v10218_v5 }
 0x4c7   : > { %4765 = vst [vmem:[%s7871_s30 + $0x700] sm:$0xff] %v3531_v63  ;;  %v10233_v63 = vmul.f32 %v12328_v29, %v9964_v42  ;;  %v3547_v23 = vsel %vm3546_vm6, %v5692_v37, %v3543_v19  ;;  %v10265_v49 = vpop.f32.mrf.mxu3  ;;  %v12333_v29 = vld [vmem:[#allocation170_spill] sm:$0xff] }
 0x4c8   : > { %12326 = vst [vmem:[#allocation96_spill] sm:$0xff] %v10222_v48  ;;  %v12329_v48 = vld [vmem:[#allocation160_spill] sm:$0xff]  ;;  %v10247_v46 = vsel %vm3549_vm7, %v3551_v61, %v3547_v23  ;;  %v10282_v61 = vmul.f32 %v12333_v29, %v9997_v10  ;;  %v10289_v23 = vmul.f32 %v9419_v1, %v9997_v10  ;;  %v10305_v1 = vmul.f32 %v9476_v41, %v10049_v57 }
 0x4c9   : > { %4766 = vst [vmem:[%s7871_s30 + $0x708] sm:$0xff] %v3532_v28  ;;  %v10237_v5 = vmul.f32 %v12329_v48, %v9964_v42  ;;  %v12330_v28 = vld [vmem:[#allocation162_spill] sm:$0xff]  ;;  %v3553_v48 = vmul.f32 %v9614_v36, %v10247_v46  ;;  %v3554_v43 = vmul.f32 %v9620_v38, %v10247_v46  ;;  %v3556_v37 = vmul.f32 %v9645_v12, %v10247_v46  ;;  %v10269_v36 = vpop.f32.mrf.mxu0  ;;  %v12331_v38 = vld [vmem:[#allocation163_spill] sm:$0xff]  ;;  %v12332_v12 = vld [vmem:[#allocation164_spill] sm:$0xff] }
 0x4ca   : > { %4767 = vst [vmem:[%s7871_s30 + $0x710] sm:$0xff] %v3533_v53  ;;  %v10243_v53 = vmul.f32 %v12330_v28, %v9964_v42  ;;  %v3555_v42 = vmul.f32 %v9633_v17, %v10247_v46  ;;  %v10274_v17 = vmul.f32 %v12331_v38, %v9997_v10  ;;  %v10278_v19 = vmul.f32 %v12332_v12, %v9997_v10  ;;  %v10284_v28 = vpop.f32.mrf.mxu1  ;;  %v494_v41 = vld [vmem:[%s7527_s21 + $0x308] sm:$0xff] }
 0x4cb   : > { %4768 = vst [vmem:[%s7871_s30 + $0x718] sm:$0xff] %v3534_v47  ;;  %v10261_v47 = vpop.f32.mrf.mxu2  ;;  %v10309_v10 = vmul.f32 %v9484_v20, %v10049_v57  ;;  %v462_v20 = vld [vmem:[%s7527_s21 + $0x208] sm:$0xff]  ;;  %v10344_v29 = vmul.f32 %v9572_v54, %v10147_v14  ;;  %4297 = vmatpush.msrb.mxu2 %v494_v41  ;;  %v10381_v41 = vmul.f32 %v9638_v25, %v10199_v0 }
 0x4cc   : > { %4737 = vst [vmem:[%s7871_s30 + $0x620] sm:$0xff] %v10229_v31  ;;  %3708 = vmatmul.f32.gmra.mxu0 %v3553_v48  ;;  %3821 = vmatmul.f32.gmra.mxu1 %v3554_v43 }
 0x4cd   : > { %4738 = vst [vmem:[%s7871_s30 + $0x628] sm:$0xff] %v10233_v63  ;;  %3934 = vmatmul.f32.gmra.mxu2 %v3555_v42  ;;  %4047 = vmatmul.f32.gmra.mxu3 %v3556_v37 }
 0x4ce   : > { %4739 = vst [vmem:[%s7871_s30 + $0x630] sm:$0xff] %v10237_v5  ;;  %4071 = vmatpush.msrb.mxu0 %v462_v20  ;;  %v493_v20 = vld [vmem:[%s7527_s21 + $0x300] sm:$0xff] }
 0x4cf   : > { %4740 = vst [vmem:[%s7871_s30 + $0x638] sm:$0xff] %v10243_v53  ;;  %4298 = vmatpush.msrb.mxu2 %v493_v20 }
 0x4d0   : > { %4773 = vst [vmem:[%s7871_s30 + $0x740] sm:$0xff] %v3553_v48 }
 0x4d1   : > { %4774 = vst [vmem:[%s7871_s30 + $0x748] sm:$0xff] %v3554_v43  ;;  %v10301_v43 = vpop.f32.mrf.mxu3  ;;  %v10319_v38 = vpop.f32.mrf.mxu0 }
 0x4d2   : > { %4775 = vst [vmem:[%s7871_s30 + $0x750] sm:$0xff] %v3555_v42  ;;  %v10313_v42 = vmul.f32 %v9495_v2, %v10049_v57  ;;  %v10323_v12 = vpop.f32.mrf.mxu1  ;;  %v510_v2 = vld [vmem:[%s7527_s21 + $0x388] sm:$0xff] }
 0x4d3   : > { %4776 = vst [vmem:[%s7871_s30 + $0x758] sm:$0xff] %v3556_v37  ;;  %v10299_v48 = vpop.f32.mrf.mxu2  ;;  %v10317_v37 = vmul.f32 %v9505_v60, %v10049_v57  ;;  %v10336_v60 = vmul.f32 %v9552_v15, %v10147_v14  ;;  %v10340_v57 = vmul.f32 %v9555_v51, %v10147_v14  ;;  %v10351_v15 = vmul.f32 %v9586_v27, %v10147_v14 }
 0x4d4   : > { %4745 = vst [vmem:[%s7871_s30 + $0x660] sm:$0xff] %v10274_v17  ;;  %4410 = vmatpush.msrb.mxu3 %v510_v2  ;;  %v10369_v27 = vmul.f32 %v9600_v9, %v10199_v0  ;;  %v10373_v14 = vmul.f32 %v9607_v55, %v10199_v0  ;;  %v461_v2 = vld [vmem:[%s7527_s21 + $0x200] sm:$0xff] }
 0x4d5   : > { %4746 = vst [vmem:[%s7871_s30 + $0x668] sm:$0xff] %v10278_v19  ;;  %4072 = vmatpush.msrb.mxu0 %v461_v2  ;;  %v477_v55 = vld [vmem:[%s7527_s21 + $0x280] sm:$0xff]  ;;  %v10405_v2 = vmul.f32 %v9655_v11, %v10247_v46 }
 0x4d6   : > { %4747 = vst [vmem:[%s7871_s30 + $0x670] sm:$0xff] %v10282_v61 }
 0x4d7   : > { %4748 = vst [vmem:[%s7871_s30 + $0x678] sm:$0xff] %v10289_v23 }
 0x4d8   : > { %12334 = vst [vmem:[#allocation213_spill] sm:$0xff] %v10301_v43 }
 0x4d9   : > { %12335 = vst [vmem:[#allocation214_spill] sm:$0xff] %v10319_v38  ;;  %v478_v38 = vld [vmem:[%s7527_s21 + $0x288] sm:$0xff]  ;;  %v10353_v43 = vpop.f32.mrf.mxu3  ;;  %v10359_v51 = vpop.f32.mrf.mxu0 }
 0x4da   : > { %4753 = vst [vmem:[%s7871_s30 + $0x6a0] sm:$0xff] %v10305_v1  ;;  %4184 = vmatpush.msrb.mxu1 %v478_v38  ;;  %v10363_v54 = vpop.f32.mrf.mxu1  ;;  %v10377_v38 = vmul.f32 %v9625_v6, %v10199_v0 }
 0x4db   : > { %12336 = vst [vmem:[#allocation216_spill] sm:$0xff] %v10323_v12  ;;  %v10346_v12 = vpop.f32.mrf.mxu2 }
 0x4dc   : > { %4754 = vst [vmem:[%s7871_s30 + $0x6a8] sm:$0xff] %v10309_v10  ;;  %4185 = vmatpush.msrb.mxu1 %v477_v55  ;;  %v12348_v55 = vld [vmem:[#allocation171_spill] sm:$0xff] }
 0x4dd   : > { %4755 = vst [vmem:[%s7871_s30 + $0x6b0] sm:$0xff] %v10313_v42 }
 0x4de   : > { %4756 = vst [vmem:[%s7871_s30 + $0x6b8] sm:$0xff] %v10317_v37 }
 0x4df   : > { %12337 = vst [vmem:[#allocation168_spill] sm:$0xff] %v10353_v43 }
 0x4e0   : > { %4761 = vst [vmem:[%s7871_s30 + $0x6e0] sm:$0xff] %v10336_v60 }
 0x4e1   : > { %4762 = vst [vmem:[%s7871_s30 + $0x6e8] sm:$0xff] %v10340_v57  ;;  %v10393_v6 = vpop.f32.mrf.mxu3  ;;  %v10399_v25 = vpop.f32.mrf.mxu0 }
 0x4e2   : > { %12338 = vst [vmem:[#allocation53_spill] sm:$0xff] %v10359_v51  ;;  %v10401_v0 = vpop.f32.mrf.mxu1 }
 0x4e3   : > { %4763 = vst [vmem:[%s7871_s30 + $0x6f0] sm:$0xff] %v10344_v29  ;;  %v10388_v9 = vpop.f32.mrf.mxu2 }
 0x4e4   : > { %12339 = vst [vmem:[#allocation56_spill] sm:$0xff] %v10363_v54  ;;  %v509_v54 = vld [vmem:[%s7527_s21 + $0x380] sm:$0xff] }
 0x4e5   : > { %4764 = vst [vmem:[%s7871_s30 + $0x6f8] sm:$0xff] %v10351_v15  ;;  %4411 = vmatpush.msrb.mxu3 %v509_v54  ;;  %v10413_v54 = vmul.f32 %v9676_v16, %v10247_v46 }
 0x4e6   : > { %12340 = vst [vmem:[#allocation57_spill] sm:$0xff] %v10381_v41 }
 0x4e7   : > { %4769 = vst [vmem:[%s7871_s30 + $0x720] sm:$0xff] %v10369_v27 }
 0x4e8   : > { %12341 = vst [vmem:[#allocation219_spill] sm:$0xff] %v10388_v9  ;;  %v10417_v9 = vmul.f32 %v12348_v55, %v10247_v46 }
 0x4e9   : > { %4770 = vst [vmem:[%s7871_s30 + $0x728] sm:$0xff] %v10373_v14  ;;  %v10431_v16 = vpop.f32.mrf.mxu0 }
 0x4ea   : > { %12342 = vst [vmem:[#allocation97_spill] sm:$0xff] %v10393_v6  ;;  %v10409_v6 = vmul.f32 %v9664_v35, %v10247_v46  ;;  %v10433_v51 = vpop.f32.mrf.mxu1 }
 0x4eb   : > { %4771 = vst [vmem:[%s7871_s30 + $0x730] sm:$0xff] %v10377_v38 }
 0x4ec   : > { %4772 = vst [vmem:[%s7871_s30 + $0x738] sm:$0xff] %v10381_v41 }
 0x4ed   : > { %12343 = vst [vmem:[#allocation98_spill] sm:$0xff] %v10399_v25  ;;  %v10427_v25 = vpop.f32.mrf.mxu3 }
 0x4ee   : > { %12344 = vst [vmem:[#allocation99_spill] sm:$0xff] %v10401_v0  ;;  %v2891_v20 = vpop.xlane.xlu2 %2890  ;;  %v10423_v0 = vpop.f32.mrf.mxu2 }
 0x4ef   : > { %5693 = vrcp.f32 %v2891_v20  ;;  %12345 = vst [vmem:[#allocation100_spill] sm:$0xff] %v10405_v2  ;;  %v3572_v43 = vand.u32 2147483648, %v2891_v20  ;;  %vm3566_vm9 = vweird.f32 %v2891_v20 }
 0x4f0   : > { %12346 = vst [vmem:[#allocation217_spill] sm:$0xff] %v10409_v6 }
 0x4f1   : > { %12347 = vst [vmem:[#allocation218_spill] sm:$0xff] %v10413_v54 }
 0x4f2   : > { %12349 = vst [vmem:[#allocation220_spill] sm:$0xff] %v10417_v9 }
 0x4f3   : > { %4777 = vst [vmem:[%s7871_s30 + $0x760] sm:$0xff] %v10405_v2 }
 0x4f4   : > { %4778 = vst [vmem:[%s7871_s30 + $0x768] sm:$0xff] %v10409_v6  ;;  %v3570_v6 = vand.u32 2147483647, %v2891_v20 }
 0x4f5   : > { %12350 = vst [vmem:[#allocation177_spill] sm:$0xff] %v10423_v0  ;;  %v5694_v11 = vpop.eup %5693  ;;  %v10437_v41 = vpop.f32.mrf.mxu3 }
 0x4f6   : > { %4779 = vst [vmem:[%s7871_s30 + $0x770] sm:$0xff] %v10413_v54  ;;  %v3562_v35 = vmul.f32 %v5694_v11, %v2891_v20  ;;  %vm3567_vm8 = vweird.f32 %v5694_v11  ;;  %v3573_v54 = vor.u32 1.1754944e-38, %v3572_v43  ;;  %vm3571_vm11 = vcmp.eq.f32.partialorder %v3570_v6, 8.507059e+37  ;;  %v12357_v20 = vld [vmem:[#allocation139_spill] sm:$0xff] }
 0x4f7   : > { %12351 = vst [vmem:[#allocation133_spill] sm:$0xff] %v10427_v25  ;;  %vm3568_vm10 = vmor %vm3566_vm9, %vm3567_vm8  ;;  %v10435_v25 = vpop.f32.mrf.mxu2 }
 0x4f8   : > { %4780 = vst [vmem:[%s7871_s30 + $0x778] sm:$0xff] %v10417_v9  ;;  %v3563_v46 = vsub.f32 1.0, %v3562_v35  ;;  %v2900_v55 = vpop.xlane.xlu0 %2899 }
 0x4f9   : > { %12352 = vst [vmem:[#allocation60_spill] sm:$0xff] %v10431_v16  ;;  %5695 = vrcp.f32 %v2900_v55  ;;  %vm3588_vm13 = vweird.f32 %v2900_v55 }
 0x4fa   : > { %12353 = vst [vmem:[#allocation46_spill] sm:$0xff] %v10433_v51  ;;  %v3564_v2 = vmul.f32 %v5694_v11, %v3563_v46 }
 0x4fb   : > { %12354 = vst [vmem:[#allocation101_spill] sm:$0xff] %v10435_v25  ;;  %v5757_v25 = vld [vmem:[%s7871_s30 + $0x3e0] sm:$0xff] }
 0x4fc   : > { %v3565_v0 = vadd.f32 %v5694_v11, %v3564_v2  ;;  %12355 = vst [vmem:[#allocation102_spill] sm:$0xff] %v10437_v41  ;;  %v10443_v2 = vpop.f32.mrf.mxu0  ;;  %v10451_v41 = vpop.f32.mrf.mxu1 }
 0x4fd   : > { %12356 = vst [vmem:[#allocation103_spill] sm:$0xff] %v10443_v2  ;;  %v3592_v2 = vand.u32 2147483647, %v2900_v55 }
 0x4fe   : > { %v3569_v9 = vsel %vm3568_vm10, %v5694_v11, %v3565_v0  ;;  %v12358_v0 = vld [vmem:[#allocation27_spill] sm:$0xff]  ;;  %12359 = vst [vmem:[#allocation104_spill] sm:$0xff] %v10451_v41 }
 0x4ff   : > { %v5696_v16 = vpop.eup %5695  ;;  %v10439_v35 = vsel %vm3571_vm11, %v3573_v54, %v3569_v9  ;;  %v3594_v54 = vand.u32 2147483648, %v2900_v55  ;;  %vm3593_vm15 = vcmp.eq.f32.partialorder %v3592_v2, 8.507059e+37 }
 0x500   : > { %v3584_v51 = vmul.f32 %v5696_v16, %v2900_v55  ;;  %v3575_v46 = vmul.f32 %v9835_v40, %v10439_v35  ;;  %v3576_v43 = vmul.f32 %v9843_v50, %v10439_v35  ;;  %v3577_v6 = vmul.f32 %v12357_v20, %v10439_v35 }
 0x501   : > { %v3578_v11 = vmul.f32 %v12358_v0, %v10439_v35  ;;  %vm3589_vm12 = vweird.f32 %v5696_v16  ;;  %v3595_v20 = vor.u32 1.1754944e-38, %v3594_v54  ;;  %v10457_v0 = vpop.f32.mrf.mxu2 }
 0x502   : > { %v3585_v9 = vsub.f32 1.0, %v3584_v51  ;;  %3711 = vmatmul.f32.gmra.mxu0 %v3575_v46  ;;  %4781 = vst [vmem:[%s7871_s30 + $0x780] sm:$0xff] %v3575_v46  ;;  %3824 = vmatmul.f32.gmra.mxu1 %v3576_v43  ;;  %vm3590_vm14 = vmor %vm3588_vm13, %vm3589_vm12  ;;  %v10459_v46 = vpop.f32.mrf.mxu3 }
 0x503   : > { %4782 = vst [vmem:[%s7871_s30 + $0x788] sm:$0xff] %v3576_v43  ;;  %3937 = vmatmul.f32.gmra.mxu2 %v3577_v6  ;;  %4050 = vmatmul.f32.gmra.mxu3 %v3578_v11 }
 0x504   : > { %v3586_v40 = vmul.f32 %v5696_v16, %v3585_v9  ;;  %4783 = vst [vmem:[%s7871_s30 + $0x790] sm:$0xff] %v3577_v6  ;;  %v10471_v2 = vpop.f32.mrf.mxu0  ;;  %v10473_v9 = vpop.f32.mrf.mxu1 }
 0x505   : > { %4784 = vst [vmem:[%s7871_s30 + $0x798] sm:$0xff] %v3578_v11 }
 0x506   : > { %v3587_v50 = vadd.f32 %v5696_v16, %v3586_v40  ;;  %12360 = vst [vmem:[#allocation221_spill] sm:$0xff] %v10457_v0  ;;  %v5699_v40 = vld [vmem:[%s7871_s30 + $0x30] sm:$0xff] }
 0x507   : > { %12361 = vst [vmem:[#allocation222_spill] sm:$0xff] %v10459_v46  ;;  %v5755_v46 = vld [vmem:[%s7871_s30 + $0x3b0] sm:$0xff] }
 0x508   : > { %v3591_v51 = vsel %vm3590_vm14, %v5696_v16, %v3587_v50  ;;  %12362 = vst [vmem:[#allocation223_spill] sm:$0xff] %v10471_v2  ;;  %v5700_v50 = vld [vmem:[%s7871_s30 + $0x38] sm:$0xff] }
 0x509   : > { %v10461_v43 = vsel %vm3593_vm15, %v3595_v20, %v3591_v51  ;;  %12363 = vst [vmem:[#allocation105_spill] sm:$0xff] %v10473_v9  ;;  %v5729_v9 = vld [vmem:[%s7871_s30 + $0x220] sm:$0xff] }
 0x50a   : > { %v3597_v6 = vmul.f32 %v9885_v22, %v10461_v43  ;;  %v3598_v55 = vmul.f32 %v9892_v7, %v10461_v43  ;;  %v3599_v11 = vmul.f32 %v9898_v59, %v10461_v43  ;;  %v3600_v16 = vmul.f32 %v9913_v33, %v10461_v43  ;;  %v10479_v7 = vpop.f32.mrf.mxu2  ;;  %v10481_v22 = vpop.f32.mrf.mxu3  ;;  %v5697_v59 = vld [vmem:[%s7871_s30 + $0x20] sm:$0xff]  ;;  %v5698_v33 = vld [vmem:[%s7871_s30 + $0x28] sm:$0xff] }
 0x50b   : > { %12364 = vst [vmem:[#allocation106_spill] sm:$0xff] %v10479_v7 }
 0x50c   : > { %3714 = vmatmul.f32.gmra.mxu0 %v3597_v6  ;;  %4789 = vst [vmem:[%s7871_s30 + $0x7c0] sm:$0xff] %v3597_v6  ;;  %3827 = vmatmul.f32.gmra.mxu1 %v3598_v55  ;;  %v10485_v54 = vpop.f32.mrf.mxu0  ;;  %v10489_v20 = vpop.f32.mrf.mxu1  ;;  %v5701_v6 = vld [vmem:[%s7871_s30 + $0x60] sm:$0xff] }
 0x50d   : > { %4790 = vst [vmem:[%s7871_s30 + $0x7c8] sm:$0xff] %v3598_v55  ;;  %3940 = vmatmul.f32.gmra.mxu2 %v3599_v11  ;;  %4053 = vmatmul.f32.gmra.mxu3 %v3600_v16  ;;  %v5702_v55 = vld [vmem:[%s7871_s30 + $0x68] sm:$0xff] }
 0x50e   : > { %4791 = vst [vmem:[%s7871_s30 + $0x7d0] sm:$0xff] %v3599_v11 }
 0x50f   : > { %4792 = vst [vmem:[%s7871_s30 + $0x7d8] sm:$0xff] %v3600_v16 }
 0x510   : > { %12365 = vst [vmem:[#allocation107_spill] sm:$0xff] %v10481_v22 }
 0x511   : > { %12366 = vst [vmem:[#allocation108_spill] sm:$0xff] %v10485_v54  ;;  %v5724_v54 = vld [vmem:[%s7871_s30 + $0x1b8] sm:$0xff] }
 0x512   : > { %12367 = vst [vmem:[#allocation58_spill] sm:$0xff] %v10489_v20  ;;  %v10491_v51 = vpop.f32.mrf.mxu2  ;;  %v10495_v11 = vpop.f32.mrf.mxu3 }
 0x513   : > { %12368 = vst [vmem:[#allocation224_spill] sm:$0xff] %v10491_v51 }
 0x514   : > { %4073 = vmatmul.f32.vlgmr.msrb.gmra.mxu0 %v5697_v59  ;;  %4186 = vmatmul.f32.vlgmr.msrb.gmra.mxu1 %v5698_v33  ;;  %12369 = vst [vmem:[#allocation88_spill] sm:$0xff] %v10495_v11  ;;  %v10497_v16 = vpop.f32.mrf.mxu0  ;;  %v5703_v59 = vld [vmem:[%s7871_s30 + $0x70] sm:$0xff]  ;;  %v5704_v33 = vld [vmem:[%s7871_s30 + $0x78] sm:$0xff] }
 0x515   : > { %4299 = vmatmul.f32.vlgmr.msrb.gmra.mxu2 %v5699_v40  ;;  %4412 = vmatmul.f32.vlgmr.msrb.gmra.mxu3 %v5700_v50  ;;  %12370 = vst [vmem:[#allocation109_spill] sm:$0xff] %v10497_v16  ;;  %v10501_v40 = vpop.f32.mrf.mxu1  ;;  %v5707_v11 = vld [vmem:[%s7871_s30 + $0xb0] sm:$0xff]  ;;  %v5708_v16 = vld [vmem:[%s7871_s30 + $0xb8] sm:$0xff] }
 0x516   : > { %12371 = vst [vmem:[#allocation59_spill] sm:$0xff] %v10501_v40  ;;  %v5709_v40 = vld [vmem:[%s7871_s30 + $0xe0] sm:$0xff] }
 0x51a   : > { %v10503_v50 = vpop.f32.mrf.mxu2  ;;  %v10507_v51 = vpop.f32.mrf.mxu3 }
 0x51b   : > { %12372 = vst [vmem:[#allocation110_spill] sm:$0xff] %v10503_v50  ;;  %v5710_v50 = vld [vmem:[%s7871_s30 + $0xe8] sm:$0xff] }
 0x51c   : > { %4076 = vmatmul.f32.gmra.mxu0 %v5701_v6  ;;  %4189 = vmatmul.f32.gmra.mxu1 %v5702_v55  ;;  %v5705_v6 = vld [vmem:[%s7871_s30 + $0xa0] sm:$0xff]  ;;  %v5706_v55 = vld [vmem:[%s7871_s30 + $0xa8] sm:$0xff]  ;;  %12373 = vst [vmem:[#allocation92_spill] sm:$0xff] %v10507_v51 }
 0x51d   : > { %4302 = vmatmul.f32.gmra.mxu2 %v5703_v59  ;;  %4415 = vmatmul.f32.gmra.mxu3 %v5704_v33  ;;  %v10511_v59 = vpop.f32.mrf.mxu0  ;;  %v10513_v33 = vpop.f32.mrf.mxu1 }
 0x51e   : > { %12374 = vst [vmem:[#allocation172_spill] sm:$0xff] %v10511_v59 }
 0x51f   : > { %12375 = vst [vmem:[#allocation69_spill] sm:$0xff] %v10513_v33  ;;  %v5713_v33 = vld [vmem:[%s7871_s30 + $0x120] sm:$0xff] }
 0x522   : > { %v10519_v51 = vpop.f32.mrf.mxu2 }
 0x523   : > { %12376 = vst [vmem:[#allocation25_spill] sm:$0xff] %v10519_v51 }
 0x524   : > { %4079 = vmatmul.f32.gmra.mxu0 %v5705_v6  ;;  %4192 = vmatmul.f32.gmra.mxu1 %v5706_v55  ;;  %v5711_v6 = vld [vmem:[%s7871_s30 + $0xf0] sm:$0xff]  ;;  %v5712_v55 = vld [vmem:[%s7871_s30 + $0xf8] sm:$0xff] }
 0x525   : > { %4305 = vmatmul.f32.gmra.mxu2 %v5707_v11  ;;  %4418 = vmatmul.f32.gmra.mxu3 %v5708_v16  ;;  %v10521_v11 = vpop.f32.mrf.mxu3  ;;  %v10523_v16 = vpop.f32.mrf.mxu0 }
 0x526   : > { %12377 = vst [vmem:[#allocation113_spill] sm:$0xff] %v10521_v11  ;;  %v10525_v59 = vpop.f32.mrf.mxu1  ;;  %v5720_v11 = vld [vmem:[%s7871_s30 + $0x178] sm:$0xff] }
 0x527   : > { %12378 = vst [vmem:[#allocation184_spill] sm:$0xff] %v10523_v16 }
 0x528   : > { %12379 = vst [vmem:[#allocation111_spill] sm:$0xff] %v10525_v59 }
 0x52c   : > { %4082 = vmatmul.f32.gmra.mxu0 %v5709_v40  ;;  %4195 = vmatmul.f32.gmra.mxu1 %v5710_v50  ;;  %v5714_v40 = vld [vmem:[%s7871_s30 + $0x128] sm:$0xff]  ;;  %v5715_v50 = vld [vmem:[%s7871_s30 + $0x130] sm:$0xff] }
 0x52d   : > { %4308 = vmatmul.f32.gmra.mxu2 %v5711_v6  ;;  %4421 = vmatmul.f32.gmra.mxu3 %v5712_v55  ;;  %v5716_v6 = vld [vmem:[%s7871_s30 + $0x138] sm:$0xff]  ;;  %v10531_v55 = vpop.f32.mrf.mxu2  ;;  %v10533_v51 = vpop.f32.mrf.mxu3 }
 0x52e   : > { %12380 = vst [vmem:[#allocation112_spill] sm:$0xff] %v10531_v55  ;;  %v10535_v16 = vpop.f32.mrf.mxu0  ;;  %v10537_v59 = vpop.f32.mrf.mxu1 }
 0x52f   : > { %12381 = vst [vmem:[#allocation114_spill] sm:$0xff] %v10533_v51 }
 0x530   : > { %12382 = vst [vmem:[#allocation225_spill] sm:$0xff] %v10535_v16  ;;  %v12386_v16 = vld [vmem:[#allocation141_spill] sm:$0xff] }
 0x531   : > { %12383 = vst [vmem:[#allocation64_spill] sm:$0xff] %v10537_v59  ;;  %v10551_v55 = vmul.f32 %v12386_v16, %v10439_v35  ;;  %v5719_v59 = vld [vmem:[%s7871_s30 + $0x170] sm:$0xff]  ;;  %v12392_v16 = vld [vmem:[#allocation40_spill] sm:$0xff] }
 0x533   : > { %12387 = vst [vmem:[#allocation226_spill] sm:$0xff] %v10551_v55 }
 0x534   : > { %4085 = vmatmul.f32.gmra.mxu0 %v5713_v33  ;;  %4198 = vmatmul.f32.gmra.mxu1 %v5714_v40  ;;  %v5717_v33 = vld [vmem:[%s7871_s30 + $0x160] sm:$0xff]  ;;  %v5718_v40 = vld [vmem:[%s7871_s30 + $0x168] sm:$0xff]  ;;  %4787 = vst [vmem:[%s7871_s30 + $0x7b0] sm:$0xff] %v10551_v55  ;;  %v5780_v55 = vld [vmem:[%s7871_s30 + $0x538] sm:$0xff] }
 0x535   : > { %4311 = vmatmul.f32.gmra.mxu2 %v5715_v50  ;;  %4424 = vmatmul.f32.gmra.mxu3 %v5716_v6  ;;  %v10543_v50 = vmul.f32 %v9861_v45, %v10439_v35  ;;  %v12384_v6 = vld [vmem:[#allocation140_spill] sm:$0xff]  ;;  %v10567_v45 = vpop.f32.mrf.mxu2 }
 0x536   : > { %v10547_v51 = vmul.f32 %v12384_v6, %v10439_v35  ;;  %12390 = vst [vmem:[#allocation117_spill] sm:$0xff] %v10567_v45  ;;  %v10575_v6 = vmul.f32 %v12392_v16, %v10461_v43  ;;  %v10581_v45 = vpop.f32.mrf.mxu0  ;;  %v12399_v16 = vld [vmem:[#allocation199_spill] sm:$0xff]  ;;  %v10593_v7 = vpop.f32.mrf.mxu1 }
 0x537   : > { %4785 = vst [vmem:[%s7871_s30 + $0x7a0] sm:$0xff] %v10543_v50  ;;  %v10591_v22 = vmul.f32 %v12399_v16, %v10461_v43  ;;  %v5728_v16 = vld [vmem:[%s7871_s30 + $0x1f8] sm:$0xff] }
 0x538   : > { %12385 = vst [vmem:[#allocation165_spill] sm:$0xff] %v10547_v51 }
 0x539   : > { %4786 = vst [vmem:[%s7871_s30 + $0x7a8] sm:$0xff] %v10547_v51 }
 0x53a   : > { %12393 = vst [vmem:[#allocation118_spill] sm:$0xff] %v10575_v6 }
 0x53b   : > { %12396 = vst [vmem:[#allocation116_spill] sm:$0xff] %v10581_v45 }
 0x53c   : > { %4088 = vmatmul.f32.gmra.mxu0 %v5717_v33  ;;  %4201 = vmatmul.f32.gmra.mxu1 %v5718_v40  ;;  %v12388_v33 = vld [vmem:[#allocation36_spill] sm:$0xff]  ;;  %12400 = vst [vmem:[#allocation119_spill] sm:$0xff] %v10591_v22 }
 0x53d   : > { %4314 = vmatmul.f32.gmra.mxu2 %v5719_v59  ;;  %4427 = vmatmul.f32.gmra.mxu3 %v5720_v11  ;;  %v10557_v40 = vmul.f32 %v12388_v33, %v10439_v35  ;;  %v10569_v59 = vpop.f32.mrf.mxu3  ;;  %v5721_v11 = vld [vmem:[%s7871_s30 + $0x1a0] sm:$0xff]  ;;  %v5722_v35 = vld [vmem:[%s7871_s30 + $0x1a8] sm:$0xff]  ;;  %v12394_v33 = vld [vmem:[#allocation41_spill] sm:$0xff]  ;;  %12401 = vst [vmem:[#allocation120_spill] sm:$0xff] %v10593_v7 }
 0x53e   : > { %12391 = vst [vmem:[#allocation173_spill] sm:$0xff] %v10569_v59  ;;  %v10579_v20 = vmul.f32 %v12394_v33, %v10461_v43  ;;  %v5723_v59 = vld [vmem:[%s7871_s30 + $0x1b0] sm:$0xff]  ;;  %v10611_v7 = vpop.f32.mrf.mxu0  ;;  %v10613_v45 = vpop.f32.mrf.mxu1 }
 0x53f   : > { %12389 = vst [vmem:[#allocation227_spill] sm:$0xff] %v10557_v40 }
 0x540   : > { %4788 = vst [vmem:[%s7871_s30 + $0x7b8] sm:$0xff] %v10557_v40 }
 0x541   : > { %12395 = vst [vmem:[#allocation115_spill] sm:$0xff] %v10579_v20 }
 0x542   : > { %4793 = vst [vmem:[%s7871_s30 + $0x7e0] sm:$0xff] %v10575_v6 }
 0x543   : > { %4794 = vst [vmem:[%s7871_s30 + $0x7e8] sm:$0xff] %v10579_v20  ;;  %v12429_v20 = vld [vmem:[#allocation21_spill] sm:$0xff] }
 0x544   : > { %4091 = vmatmul.f32.gmra.mxu0 %v5721_v11  ;;  %4204 = vmatmul.f32.gmra.mxu1 %v5722_v35  ;;  %v12397_v11 = vld [vmem:[#allocation150_spill] sm:$0xff]  ;;  %4796 = vst [vmem:[%s7871_s30 + $0x7f8] sm:$0xff] %v10591_v22 }
 0x545   : > { %4317 = vmatmul.f32.gmra.mxu2 %v5723_v59  ;;  %4430 = vmatmul.f32.gmra.mxu3 %v5724_v54  ;;  %v10587_v35 = vmul.f32 %v12397_v11, %v10461_v43  ;;  %v10603_v54 = vpop.f32.mrf.mxu2  ;;  %v5725_v59 = vld [vmem:[%s7871_s30 + $0x1e0] sm:$0xff]  ;;  %v5726_v43 = vld [vmem:[%s7871_s30 + $0x1e8] sm:$0xff]  ;;  %v10607_v33 = vpop.f32.mrf.mxu3  ;;  %v5727_v11 = vld [vmem:[%s7871_s30 + $0x1f0] sm:$0xff]  ;;  %12404 = vst [vmem:[#allocation43_spill] sm:$0xff] %v10611_v7 }
 0x546   : > { %12402 = vst [vmem:[#allocation121_spill] sm:$0xff] %v10603_v54  ;;  %v5730_v54 = vld [vmem:[%s7871_s30 + $0x228] sm:$0xff]  ;;  %v10625_v7 = vpop.f32.mrf.mxu1  ;;  %v12425_v22 = vld [vmem:[#allocation174_spill] sm:$0xff] }
 0x547   : > { %12398 = vst [vmem:[#allocation169_spill] sm:$0xff] %v10587_v35 }
 0x548   : > { %4795 = vst [vmem:[%s7871_s30 + $0x7f0] sm:$0xff] %v10587_v35  ;;  %v12426_v35 = vld [vmem:[#allocation175_spill] sm:$0xff] }
 0x549   : > { %12403 = vst [vmem:[#allocation122_spill] sm:$0xff] %v10607_v33 }
 0x54a   : > { %12405 = vst [vmem:[#allocation44_spill] sm:$0xff] %v10613_v45  ;;  %v5733_v45 = vld [vmem:[%s7871_s30 + $0x260] sm:$0xff] }
 0x54b   : > { %12409 = vst [vmem:[#allocation52_spill] sm:$0xff] %v10625_v7  ;;  %v5737_v7 = vld [vmem:[%s7871_s30 + $0x2a0] sm:$0xff] }
 0x54c   : > { %4094 = vmatmul.f32.gmra.mxu0 %v5725_v59  ;;  %4207 = vmatmul.f32.gmra.mxu1 %v5726_v43  ;;  %v5731_v59 = vld [vmem:[%s7871_s30 + $0x230] sm:$0xff]  ;;  %v5732_v43 = vld [vmem:[%s7871_s30 + $0x238] sm:$0xff] }
 0x54d   : > { %4320 = vmatmul.f32.gmra.mxu2 %v5727_v11  ;;  %4433 = vmatmul.f32.gmra.mxu3 %v5728_v16  ;;  %v10619_v33 = vpop.f32.mrf.mxu2  ;;  %v10621_v11 = vpop.f32.mrf.mxu3 }
 0x54e   : > { %12406 = vst [vmem:[#allocation45_spill] sm:$0xff] %v10619_v33  ;;  %v10623_v16 = vpop.f32.mrf.mxu0  ;;  %v10637_v33 = vpop.f32.mrf.mxu1 }
 0x54f   : > { %12407 = vst [vmem:[#allocation156_spill] sm:$0xff] %v10621_v11 }
 0x550   : > { %12408 = vst [vmem:[#allocation51_spill] sm:$0xff] %v10623_v16 }
 0x551   : > { %12413 = vst [vmem:[#allocation145_spill] sm:$0xff] %v10637_v33  ;;  %v5742_v33 = vld [vmem:[%s7871_s30 + $0x2e8] sm:$0xff] }
 0x554   : > { %4097 = vmatmul.f32.gmra.mxu0 %v5729_v9  ;;  %4210 = vmatmul.f32.gmra.mxu1 %v5730_v54  ;;  %v5734_v9 = vld [vmem:[%s7871_s30 + $0x268] sm:$0xff]  ;;  %v5735_v54 = vld [vmem:[%s7871_s30 + $0x270] sm:$0xff] }
 0x555   : > { %4323 = vmatmul.f32.gmra.mxu2 %v5731_v59  ;;  %4436 = vmatmul.f32.gmra.mxu3 %v5732_v43  ;;  %v5736_v59 = vld [vmem:[%s7871_s30 + $0x278] sm:$0xff]  ;;  %v10631_v43 = vpop.f32.mrf.mxu2  ;;  %v10633_v11 = vpop.f32.mrf.mxu3 }
 0x556   : > { %12410 = vst [vmem:[#allocation185_spill] sm:$0xff] %v10631_v43  ;;  %v10635_v16 = vpop.f32.mrf.mxu0 }
 0x557   : > { %12411 = vst [vmem:[#allocation166_spill] sm:$0xff] %v10633_v11  ;;  %v5741_v11 = vld [vmem:[%s7871_s30 + $0x2e0] sm:$0xff] }
 0x558   : > { %12412 = vst [vmem:[#allocation167_spill] sm:$0xff] %v10635_v16  ;;  %v5743_v16 = vld [vmem:[%s7871_s30 + $0x2f0] sm:$0xff] }
 0x55c   : > { %4100 = vmatmul.f32.gmra.mxu0 %v5733_v45  ;;  %4213 = vmatmul.f32.gmra.mxu1 %v5734_v9  ;;  %v5738_v45 = vld [vmem:[%s7871_s30 + $0x2a8] sm:$0xff]  ;;  %v5739_v9 = vld [vmem:[%s7871_s30 + $0x2b0] sm:$0xff] }
 0x55d   : > { %4326 = vmatmul.f32.gmra.mxu2 %v5735_v54  ;;  %4439 = vmatmul.f32.gmra.mxu3 %v5736_v59  ;;  %v5740_v54 = vld [vmem:[%s7871_s30 + $0x2b8] sm:$0xff]  ;;  %v10643_v59 = vpop.f32.mrf.mxu2  ;;  %v10645_v43 = vpop.f32.mrf.mxu3 }
 0x55e   : > { %12414 = vst [vmem:[#allocation176_spill] sm:$0xff] %v10643_v59 }
 0x55f   : > { %12415 = vst [vmem:[#allocation54_spill] sm:$0xff] %v10645_v43  ;;  %v5745_v43 = vld [vmem:[%s7871_s30 + $0x320] sm:$0xff] }
 0x564   : > { %4103 = vmatmul.f32.gmra.mxu0 %v5737_v7  ;;  %4216 = vmatmul.f32.gmra.mxu1 %v5738_v45  ;;  %v10649_v7 = vpop.f32.mrf.mxu0  ;;  %v5744_v45 = vld [vmem:[%s7871_s30 + $0x2f8] sm:$0xff] }
 0x565   : > { %4329 = vmatmul.f32.gmra.mxu2 %v5739_v9  ;;  %4442 = vmatmul.f32.gmra.mxu3 %v5740_v54  ;;  %12416 = vst [vmem:[#allocation55_spill] sm:$0xff] %v10649_v7  ;;  %v10653_v9 = vpop.f32.mrf.mxu1  ;;  %v10655_v54 = vpop.f32.mrf.mxu2  ;;  %v5748_v7 = vld [vmem:[%s7871_s30 + $0x338] sm:$0xff] }
 0x566   : > { %12417 = vst [vmem:[#allocation134_spill] sm:$0xff] %v10653_v9  ;;  %v10659_v59 = vpop.f32.mrf.mxu3  ;;  %v5749_v9 = vld [vmem:[%s7871_s30 + $0x360] sm:$0xff] }
 0x567   : > { %12418 = vst [vmem:[#allocation159_spill] sm:$0xff] %v10655_v54  ;;  %v5750_v54 = vld [vmem:[%s7871_s30 + $0x368] sm:$0xff] }
 0x568   : > { %12419 = vst [vmem:[#allocation61_spill] sm:$0xff] %v10659_v59 }
 0x56c   : > { %4106 = vmatmul.f32.gmra.mxu0 %v5741_v11  ;;  %4219 = vmatmul.f32.gmra.mxu1 %v5742_v33  ;;  %v5746_v11 = vld [vmem:[%s7871_s30 + $0x328] sm:$0xff]  ;;  %v5747_v33 = vld [vmem:[%s7871_s30 + $0x330] sm:$0xff] }
 0x56d   : > { %4332 = vmatmul.f32.gmra.mxu2 %v5743_v16  ;;  %4445 = vmatmul.f32.gmra.mxu3 %v5744_v45  ;;  %v10663_v16 = vpop.f32.mrf.mxu0  ;;  %v10665_v45 = vpop.f32.mrf.mxu1 }
 0x56e   : > { %12420 = vst [vmem:[#allocation62_spill] sm:$0xff] %v10663_v16  ;;  %v10671_v59 = vpop.f32.mrf.mxu2  ;;  %v5753_v16 = vld [vmem:[%s7871_s30 + $0x3a0] sm:$0xff] }
 0x56f   : > { %12421 = vst [vmem:[#allocation22_spill] sm:$0xff] %v10665_v45  ;;  %v5754_v45 = vld [vmem:[%s7871_s30 + $0x3a8] sm:$0xff] }
 0x570   : > { %12422 = vst [vmem:[#allocation181_spill] sm:$0xff] %v10671_v59 }
 0x574   : > { %4109 = vmatmul.f32.gmra.mxu0 %v5745_v43  ;;  %4222 = vmatmul.f32.gmra.mxu1 %v5746_v11  ;;  %v5751_v43 = vld [vmem:[%s7871_s30 + $0x370] sm:$0xff]  ;;  %v5752_v11 = vld [vmem:[%s7871_s30 + $0x378] sm:$0xff] }
 0x575   : > { %4335 = vmatmul.f32.gmra.mxu2 %v5747_v33  ;;  %4448 = vmatmul.f32.gmra.mxu3 %v5748_v7  ;;  %v10673_v33 = vpop.f32.mrf.mxu3 }
 0x576   : > { %12423 = vst [vmem:[#allocation136_spill] sm:$0xff] %v10673_v33 }
 0x57c   : > { %4112 = vmatmul.f32.gmra.mxu0 %v5749_v9  ;;  %4225 = vmatmul.f32.gmra.mxu1 %v5750_v54  ;;  %v5756_v54 = vld [vmem:[%s7871_s30 + $0x3b8] sm:$0xff] }
 0x57d   : > { %4338 = vmatmul.f32.gmra.mxu2 %v5751_v43  ;;  %4451 = vmatmul.f32.gmra.mxu3 %v5752_v11 }
 0x57f   : > { %v3712_v7 = vpop.f32.mrf.mxu0  ;;  %v3825_v2 = vpop.f32.mrf.mxu1 }
 0x580   : > { %v3826_v9 = vadd.f32 %v3825_v2, %v3712_v7  ;;  %v12427_v2 = vld [vmem:[#allocation123_spill] sm:$0xff]  ;;  %v5759_v7 = vld [vmem:[%s7871_s30 + $0x3f0] sm:$0xff] }
 0x584   : > { %4115 = vmatmul.f32.gmra.mxu0 %v5753_v16  ;;  %4228 = vmatmul.f32.gmra.mxu1 %v5754_v45  ;;  %v3736_v16 = vadd.f32 %v12426_v35, %v12425_v22  ;;  %v5758_v45 = vld [vmem:[%s7871_s30 + $0x3e8] sm:$0xff] }
 0x585   : > { %4341 = vmatmul.f32.gmra.mxu2 %v5755_v46  ;;  %4454 = vmatmul.f32.gmra.mxu3 %v5756_v54  ;;  %v5760_v54 = vld [vmem:[%s7871_s30 + $0x3f8] sm:$0xff] }
 0x586   : > { %v3938_v43 = vpop.f32.mrf.mxu2  ;;  %v4051_v59 = vpop.f32.mrf.mxu3  ;;  %v3849_v46 = vadd.f32 %v12427_v2, %v3736_v16  ;;  %v5761_v2 = vld [vmem:[%s7871_s30 + $0x420] sm:$0xff] }
 0x587   : > { %v3939_v11 = vadd.f32 %v3938_v43, %v3826_v9 }
 0x589   : > { %v10679_v0 = vadd.f32 %v4051_v59, %v3939_v11  ;;  %v3715_v33 = vpop.f32.mrf.mxu0  ;;  %v3828_v41 = vpop.f32.mrf.mxu1  ;;  %v12428_v11 = vld [vmem:[#allocation19_spill] sm:$0xff] }
 0x58a   : > { %v3829_v59 = vadd.f32 %v3828_v41, %v3715_v33  ;;  %v5763_v33 = vld [vmem:[%s7871_s30 + $0x430] sm:$0xff] }
 0x58b   : > { %12424 = vst [vmem:[#allocation138_spill] sm:$0xff] %v10679_v0  ;;  %v3962_v0 = vadd.f32 %v12428_v11, %v3849_v46  ;;  %v5764_v46 = vld [vmem:[%s7871_s30 + $0x438] sm:$0xff] }
 0x58c   : > { %4118 = vmatmul.f32.gmra.mxu0 %v5757_v25  ;;  %4231 = vmatmul.f32.gmra.mxu1 %v5758_v45  ;;  %v12430_v45 = vld [vmem:[#allocation135_spill] sm:$0xff] }
 0x58d   : > { %4344 = vmatmul.f32.gmra.mxu2 %v5759_v7  ;;  %4457 = vmatmul.f32.gmra.mxu3 %v5760_v54  ;;  %v3739_v6 = vadd.f32 %v12430_v45, %v12429_v20  ;;  %v5762_v7 = vld [vmem:[%s7871_s30 + $0x428] sm:$0xff]  ;;  %v12432_v54 = vld [vmem:[#allocation137_spill] sm:$0xff] }
 0x58e   : > { %v12434_v45 = vld [vmem:[#allocation124_spill] sm:$0xff] }
 0x58f   : > { %v3852_v41 = vadd.f32 %v12432_v54, %v3739_v6 }
 0x590   : > { %v3941_v9 = vpop.f32.mrf.mxu2  ;;  %v4054_v43 = vpop.f32.mrf.mxu3 }
 0x591   : > { %v3942_v22 = vadd.f32 %v3941_v9, %v3829_v59  ;;  %v4074_v35 = vpop.f32.mrf.mxu0  ;;  %v4187_v25 = vpop.f32.mrf.mxu1 }
 0x592   : > { %v4075_v16 = vadd.f32 %v4074_v35, %v3962_v0 }
 0x593   : > { %v10691_v40 = vadd.f32 %v4054_v43, %v3942_v22  ;;  %v12433_v43 = vld [vmem:[#allocation24_spill] sm:$0xff] }
 0x594   : > { %4121 = vmatmul.f32.gmra.mxu0 %v5761_v2  ;;  %4234 = vmatmul.f32.gmra.mxu1 %v5762_v7  ;;  %v4188_v59 = vadd.f32 %v4187_v25, %v4075_v16  ;;  %v3965_v11 = vadd.f32 %v12433_v43, %v3852_v41  ;;  %v12435_v2 = vld [vmem:[#allocation26_spill] sm:$0xff]  ;;  %v5767_v16 = vld [vmem:[%s7871_s30 + $0x470] sm:$0xff] }
 0x595   : > { %12431 = vst [vmem:[#allocation65_spill] sm:$0xff] %v10691_v40  ;;  %4347 = vmatmul.f32.gmra.mxu2 %v5763_v33  ;;  %4460 = vmatmul.f32.gmra.mxu3 %v5764_v46  ;;  %v3742_v7 = vadd.f32 %v12435_v2, %v12434_v45  ;;  %v5765_v40 = vld [vmem:[%s7871_s30 + $0x460] sm:$0xff]  ;;  %v5766_v33 = vld [vmem:[%s7871_s30 + $0x468] sm:$0xff]  ;;  %v12436_v46 = vld [vmem:[#allocation30_spill] sm:$0xff] }
 0x596   : > { %v5768_v41 = vld [vmem:[%s7871_s30 + $0x478] sm:$0xff]  ;;  %v12438_v45 = vld [vmem:[#allocation35_spill] sm:$0xff] }
 0x597   : > { %v3855_v25 = vadd.f32 %v12436_v46, %v3742_v7  ;;  %v12439_v2 = vld [vmem:[#allocation147_spill] sm:$0xff] }
 0x598   : > { %v4300_v9 = vpop.f32.mrf.mxu2  ;;  %v4413_v20 = vpop.f32.mrf.mxu3  ;;  %v3745_v7 = vadd.f32 %v12439_v2, %v12438_v45  ;;  %v5769_v46 = vld [vmem:[%s7871_s30 + $0x4a0] sm:$0xff]  ;;  %v12442_v2 = vld [vmem:[#allocation38_spill] sm:$0xff] }
 0x599   : > { %v4301_v0 = vadd.f32 %v4300_v9, %v4188_v59  ;;  %v4077_v22 = vpop.f32.mrf.mxu0  ;;  %v4190_v35 = vpop.f32.mrf.mxu1 }
 0x59a   : > { %v4078_v54 = vadd.f32 %v4077_v22, %v3965_v11 }
 0x59b   : > { %v4414_v6 = vadd.f32 %v4413_v20, %v4301_v0  ;;  %v12437_v20 = vld [vmem:[#allocation142_spill] sm:$0xff] }
 0x59c   : > { %4124 = vmatmul.f32.gmra.mxu0 %v5765_v40  ;;  %4237 = vmatmul.f32.gmra.mxu1 %v5766_v33  ;;  %v4191_v59 = vadd.f32 %v4190_v35, %v4078_v54  ;;  %v3968_v43 = vadd.f32 %v12437_v20, %v3855_v25  ;;  %v5771_v54 = vld [vmem:[%s7871_s30 + $0x4b0] sm:$0xff]  ;;  %v5772_v25 = vld [vmem:[%s7871_s30 + $0x4b8] sm:$0xff] }
 0x59d   : > { %4509 = vst [vmem:[%s10706_s5] sm:$0xff] %v4414_v6  ;;  %4350 = vmatmul.f32.gmra.mxu2 %v5767_v16  ;;  %4463 = vmatmul.f32.gmra.mxu3 %v5768_v41  ;;  %v5770_v16 = vld [vmem:[%s7871_s30 + $0x4a8] sm:$0xff] }
 0x59e   : > { %v12440_v41 = vld [vmem:[#allocation148_spill] sm:$0xff] }
 0x59f   : > { %v3858_v35 = vadd.f32 %v12440_v41, %v3745_v7  ;;  %v12443_v7 = vld [vmem:[#allocation201_spill] sm:$0xff]  ;;  %v5773_v41 = vld [vmem:[%s7871_s30 + $0x4e0] sm:$0xff] }
 0x5a0   : > { %v4303_v9 = vpop.f32.mrf.mxu2  ;;  %v4416_v40 = vpop.f32.mrf.mxu3 }
 0x5a1   : > { %v4304_v11 = vadd.f32 %v4303_v9, %v4191_v59  ;;  %v4080_v0 = vpop.f32.mrf.mxu0  ;;  %v4193_v22 = vpop.f32.mrf.mxu1 }
 0x5a2   : > { %v4081_v33 = vadd.f32 %v4080_v0, %v3968_v43 }
 0x5a3   : > { %v4417_v6 = vadd.f32 %v4416_v40, %v4304_v11  ;;  %v12441_v40 = vld [vmem:[#allocation149_spill] sm:$0xff] }
 0x5a4   : > { %4127 = vmatmul.f32.gmra.mxu0 %v5769_v46  ;;  %4240 = vmatmul.f32.gmra.mxu1 %v5770_v16  ;;  %v4194_v59 = vadd.f32 %v4193_v22, %v4081_v33  ;;  %v3971_v43 = vadd.f32 %v12441_v40, %v3858_v35  ;;  %v3748_v46 = vadd.f32 %v12443_v7, %v12442_v2  ;;  %v5775_v33 = vld [vmem:[%s7871_s30 + $0x4f0] sm:$0xff]  ;;  %v5776_v35 = vld [vmem:[%s7871_s30 + $0x4f8] sm:$0xff] }
 0x5a5   : > { %4510 = vst [vmem:[%s10706_s5 + $0x8] sm:$0xff] %v4417_v6  ;;  %4353 = vmatmul.f32.gmra.mxu2 %v5771_v54  ;;  %4466 = vmatmul.f32.gmra.mxu3 %v5772_v25  ;;  %v5774_v54 = vld [vmem:[%s7871_s30 + $0x4e8] sm:$0xff]  ;;  %v12444_v25 = vld [vmem:[#allocation203_spill] sm:$0xff]  ;;  %v12446_v7 = vld [vmem:[#allocation206_spill] sm:$0xff] }
 0x5a6   : > { %v3861_v22 = vadd.f32 %v12444_v25, %v3748_v46  ;;  %v12447_v46 = vld [vmem:[#allocation208_spill] sm:$0xff]  ;;  %v5777_v25 = vld [vmem:[%s7871_s30 + $0x520] sm:$0xff] }
 0x5a8   : > { %v4306_v9 = vpop.f32.mrf.mxu2  ;;  %v4419_v20 = vpop.f32.mrf.mxu3 }
 0x5a9   : > { %v4307_v11 = vadd.f32 %v4306_v9, %v4194_v59  ;;  %v4083_v0 = vpop.f32.mrf.mxu0  ;;  %v4196_v45 = vpop.f32.mrf.mxu1 }
 0x5aa   : > { %v4084_v16 = vadd.f32 %v4083_v0, %v3971_v43 }
 0x5ab   : > { %v4420_v6 = vadd.f32 %v4419_v20, %v4307_v11  ;;  %v12445_v20 = vld [vmem:[#allocation85_spill] sm:$0xff] }
 0x5ac   : > { %4130 = vmatmul.f32.gmra.mxu0 %v5773_v41  ;;  %4243 = vmatmul.f32.gmra.mxu1 %v5774_v54  ;;  %v4197_v59 = vadd.f32 %v4196_v45, %v4084_v16  ;;  %v3974_v43 = vadd.f32 %v12445_v20, %v3861_v22  ;;  %v3751_v41 = vadd.f32 %v12447_v46, %v12446_v7  ;;  %v5779_v16 = vld [vmem:[%s7871_s30 + $0x530] sm:$0xff]  ;;  %v12449_v20 = vld [vmem:[#allocation211_spill] sm:$0xff] }
 0x5ad   : > { %4511 = vst [vmem:[%s10706_s5 + $0x10] sm:$0xff] %v4420_v6  ;;  %4356 = vmatmul.f32.gmra.mxu2 %v5775_v33  ;;  %4469 = vmatmul.f32.gmra.mxu3 %v5776_v35  ;;  %v5778_v33 = vld [vmem:[%s7871_s30 + $0x528] sm:$0xff]  ;;  %v12448_v35 = vld [vmem:[#allocation209_spill] sm:$0xff] }
 0x5ae   : > { %v3864_v45 = vadd.f32 %v12448_v35, %v3751_v41  ;;  %v12452_v41 = vld [vmem:[#allocation89_spill] sm:$0xff]  ;;  %v12453_v35 = vld [vmem:[#allocation90_spill] sm:$0xff] }
 0x5b0   : > { %v4309_v9 = vpop.f32.mrf.mxu2  ;;  %v4422_v40 = vpop.f32.mrf.mxu3  ;;  %v3977_v51 = vadd.f32 %v12449_v20, %v3864_v45 }
 0x5b1   : > { %v4310_v11 = vadd.f32 %v4309_v9, %v4197_v59  ;;  %v4086_v0 = vpop.f32.mrf.mxu0  ;;  %v4199_v2 = vpop.f32.mrf.mxu1 }
 0x5b2   : > { %v4087_v54 = vadd.f32 %v4086_v0, %v3974_v43  ;;  %v12451_v0 = vld [vmem:[#allocation87_spill] sm:$0xff] }
 0x5b3   : > { %v4423_v6 = vadd.f32 %v4422_v40, %v4310_v11  ;;  %v12450_v11 = vld [vmem:[#allocation86_spill] sm:$0xff] }
 0x5b4   : > { %4133 = vmatmul.f32.gmra.mxu0 %v5777_v25  ;;  %4246 = vmatmul.f32.gmra.mxu1 %v5778_v33  ;;  %v4200_v22 = vadd.f32 %v4199_v2, %v4087_v54  ;;  %v3754_v46 = vadd.f32 %v12451_v0, %v12450_v11  ;;  %v12457_v11 = vld [vmem:[#allocation212_spill] sm:$0xff] }
 0x5b5   : > { %4512 = vst [vmem:[%s10706_s5 + $0x18] sm:$0xff] %v4423_v6  ;;  %4359 = vmatmul.f32.gmra.mxu2 %v5779_v16  ;;  %4472 = vmatmul.f32.gmra.mxu3 %v5780_v55 }
 0x5b6   : > { %v3867_v6 = vadd.f32 %v12452_v41, %v3754_v46  ;;  %v12458_v41 = vld [vmem:[#allocation215_spill] sm:$0xff] }
 0x5b8   : > { %v4312_v59 = vpop.f32.mrf.mxu2  ;;  %v4425_v9 = vpop.f32.mrf.mxu3  ;;  %v3980_v45 = vadd.f32 %v12453_v35, %v3867_v6 }
 0x5b9   : > { %v4313_v7 = vadd.f32 %v4312_v59, %v4200_v22  ;;  %v4089_v40 = vpop.f32.mrf.mxu0  ;;  %v4202_v43 = vpop.f32.mrf.mxu1  ;;  %v12454_v59 = vld [vmem:[#allocation91_spill] sm:$0xff] }
 0x5ba   : > { %v4090_v33 = vadd.f32 %v4089_v40, %v3977_v51 }
 0x5bb   : > { %v4426_v25 = vadd.f32 %v4425_v9, %v4313_v7 }
 0x5bc   : > { %4136 = vmatmul.f32.gmra.mxu0 %v10069_v34  ;;  %4249 = vmatmul.f32.gmra.mxu1 %v10083_v32  ;;  %v4203_v55 = vadd.f32 %v4202_v43, %v4090_v33  ;;  %v12455_v34 = vld [vmem:[#allocation207_spill] sm:$0xff] }
 0x5bd   : > { %4513 = vst [vmem:[%s10706_s5 + $0x20] sm:$0xff] %v4426_v25  ;;  %4362 = vmatmul.f32.gmra.mxu2 %v10091_v39  ;;  %4475 = vmatmul.f32.gmra.mxu3 %v10100_v8  ;;  %v3757_v9 = vadd.f32 %v12455_v34, %v12454_v59  ;;  %v12456_v39 = vld [vmem:[#allocation210_spill] sm:$0xff] }
 0x5bf   : > { %v3870_v7 = vadd.f32 %v12456_v39, %v3757_v9 }
 0x5c0   : > { %v4315_v2 = vpop.f32.mrf.mxu2  ;;  %v4428_v54 = vpop.f32.mrf.mxu3 }
 0x5c1   : > { %v4316_v16 = vadd.f32 %v4315_v2, %v4203_v55  ;;  %v4092_v22 = vpop.f32.mrf.mxu0  ;;  %v4205_v51 = vpop.f32.mrf.mxu1  ;;  %v3983_v0 = vadd.f32 %v12457_v11, %v3870_v7 }
 0x5c2   : > { %v4093_v20 = vadd.f32 %v4092_v22, %v3980_v45  ;;  %v12461_v45 = vld [vmem:[#allocation49_spill] sm:$0xff] }
 0x5c3   : > { %v4429_v32 = vadd.f32 %v4428_v54, %v4316_v16 }
 0x5c4   : > { %4139 = vmatmul.f32.gmra.mxu0 %v10123_v18  ;;  %4252 = vmatmul.f32.gmra.mxu1 %v10127_v26  ;;  %v4206_v8 = vadd.f32 %v4205_v51, %v4093_v20  ;;  %v12459_v18 = vld [vmem:[#allocation47_spill] sm:$0xff]  ;;  %v12462_v20 = vld [vmem:[#allocation50_spill] sm:$0xff] }
 0x5c5   : > { %4514 = vst [vmem:[%s10706_s5 + $0x28] sm:$0xff] %v4429_v32  ;;  %4365 = vmatmul.f32.gmra.mxu2 %v10133_v44  ;;  %4478 = vmatmul.f32.gmra.mxu3 %v10137_v56  ;;  %v3760_v6 = vadd.f32 %v12459_v18, %v12458_v41  ;;  %v12460_v44 = vld [vmem:[#allocation48_spill] sm:$0xff]  ;;  %v12465_v41 = vld [vmem:[#allocation95_spill] sm:$0xff] }
 0x5c7   : > { %v3873_v2 = vadd.f32 %v12460_v44, %v3760_v6 }
 0x5c8   : > { %v4318_v40 = vpop.f32.mrf.mxu2  ;;  %v4431_v43 = vpop.f32.mrf.mxu3 }
 0x5c9   : > { %v4319_v46 = vadd.f32 %v4318_v40, %v4206_v8  ;;  %v4095_v25 = vpop.f32.mrf.mxu0  ;;  %v4208_v33 = vpop.f32.mrf.mxu1  ;;  %v3986_v16 = vadd.f32 %v12461_v45, %v3873_v2  ;;  %v12463_v8 = vld [vmem:[#allocation93_spill] sm:$0xff] }
 0x5ca   : > { %v4096_v55 = vadd.f32 %v4095_v25, %v3983_v0 }
 0x5cb   : > { %v4432_v26 = vadd.f32 %v4431_v43, %v4319_v46 }
 0x5cc   : > { %4142 = vmatmul.f32.gmra.mxu0 %v10178_v52  ;;  %4255 = vmatmul.f32.gmra.mxu1 %v10182_v24  ;;  %v4209_v56 = vadd.f32 %v4208_v33, %v4096_v55  ;;  %v3763_v52 = vadd.f32 %v10102_v58, %v10093_v21 }
 0x5cd   : > { %4515 = vst [vmem:[%s10706_s5 + $0x30] sm:$0xff] %v4432_v26  ;;  %4368 = vmatmul.f32.gmra.mxu2 %v10186_v62  ;;  %4481 = vmatmul.f32.gmra.mxu3 %v10192_v13 }
 0x5ce   : > { %v3876_v62 = vadd.f32 %v10145_v3, %v3763_v52 }
 0x5d0   : > { %v4321_v54 = vpop.f32.mrf.mxu2  ;;  %v4434_v35 = vpop.f32.mrf.mxu3  ;;  %v3989_v39 = vadd.f32 %v12462_v20, %v3876_v62 }
 0x5d1   : > { %v4322_v22 = vadd.f32 %v4321_v54, %v4209_v56  ;;  %v4098_v51 = vpop.f32.mrf.mxu0  ;;  %v4211_v59 = vpop.f32.mrf.mxu1  ;;  %v12467_v54 = vld [vmem:[#allocation213_spill] sm:$0xff] }
 0x5d2   : > { %v4099_v34 = vadd.f32 %v4098_v51, %v3986_v16  ;;  %v12468_v16 = vld [vmem:[#allocation214_spill] sm:$0xff] }
 0x5d3   : > { %v4435_v24 = vadd.f32 %v4434_v35, %v4322_v22 }
 0x5d4   : > { %4145 = vmatmul.f32.gmra.mxu0 %v10229_v31  ;;  %4258 = vmatmul.f32.gmra.mxu1 %v10233_v63  ;;  %v4212_v13 = vadd.f32 %v4211_v59, %v4099_v34  ;;  %v12464_v31 = vld [vmem:[#allocation94_spill] sm:$0xff] }
 0x5d5   : > { %4516 = vst [vmem:[%s10706_s5 + $0x38] sm:$0xff] %v4435_v24  ;;  %4371 = vmatmul.f32.gmra.mxu2 %v10237_v5  ;;  %4484 = vmatmul.f32.gmra.mxu3 %v10243_v53  ;;  %v3766_v40 = vadd.f32 %v12464_v31, %v12463_v8  ;;  %v12471_v24 = vld [vmem:[#allocation168_spill] sm:$0xff] }
 0x5d6   : > { %v12478_v8 = vld [vmem:[#allocation220_spill] sm:$0xff] }
 0x5d7   : > { %v3879_v3 = vadd.f32 %v10197_v4, %v3766_v40 }
 0x5d8   : > { %v4324_v9 = vpop.f32.mrf.mxu2  ;;  %v4437_v32 = vpop.f32.mrf.mxu3 }
 0x5d9   : > { %v4325_v58 = vadd.f32 %v4324_v9, %v4212_v13  ;;  %v4101_v21 = vpop.f32.mrf.mxu0  ;;  %v4214_v7 = vpop.f32.mrf.mxu1  ;;  %v3992_v0 = vadd.f32 %v10203_v30, %v3879_v3 }
 0x5da   : > { %v4102_v43 = vadd.f32 %v4101_v21, %v3989_v39 }
 0x5db   : > { %v4438_v63 = vadd.f32 %v4437_v32, %v4325_v58  ;;  %v12472_v32 = vld [vmem:[#allocation53_spill] sm:$0xff] }
 0x5dc   : > { %4148 = vmatmul.f32.gmra.mxu0 %v10274_v17  ;;  %4261 = vmatmul.f32.gmra.mxu1 %v10278_v19  ;;  %v4215_v5 = vadd.f32 %v4214_v7, %v4102_v43  ;;  %v12466_v17 = vld [vmem:[#allocation96_spill] sm:$0xff]  ;;  %v12475_v58 = vld [vmem:[#allocation217_spill] sm:$0xff]  ;;  %v12477_v7 = vld [vmem:[#allocation218_spill] sm:$0xff] }
 0x5dd   : > { %4517 = vst [vmem:[%s10706_s5 + $0x40] sm:$0xff] %v4438_v63  ;;  %4374 = vmatmul.f32.gmra.mxu2 %v10282_v61  ;;  %4487 = vmatmul.f32.gmra.mxu3 %v10289_v23  ;;  %v3769_v18 = vadd.f32 %v12466_v17, %v12465_v41  ;;  %v12479_v43 = vld [vmem:[#allocation97_spill] sm:$0xff] }
 0x5de   : > { %v12482_v17 = vld [vmem:[#allocation165_spill] sm:$0xff] }
 0x5df   : > { %v3882_v4 = vadd.f32 %v10261_v47, %v3769_v18  ;;  %v12483_v18 = vld [vmem:[#allocation177_spill] sm:$0xff] }
 0x5e0   : > { %v4327_v53 = vpop.f32.mrf.mxu2  ;;  %v4440_v11 = vpop.f32.mrf.mxu3 }
 0x5e1   : > { %v4328_v46 = vadd.f32 %v4327_v53, %v4215_v5  ;;  %v4104_v25 = vpop.f32.mrf.mxu0  ;;  %v4217_v33 = vpop.f32.mrf.mxu1  ;;  %v3995_v26 = vadd.f32 %v10265_v49, %v3882_v4  ;;  %v12485_v4 = vld [vmem:[#allocation227_spill] sm:$0xff] }
 0x5e2   : > { %v4105_v6 = vadd.f32 %v4104_v25, %v3992_v0  ;;  %v12480_v0 = vld [vmem:[#allocation98_spill] sm:$0xff] }
 0x5e3   : > { %v4441_v19 = vadd.f32 %v4440_v11, %v4328_v46  ;;  %v12481_v46 = vld [vmem:[#allocation99_spill] sm:$0xff] }
 0x5e4   : > { %4151 = vmatmul.f32.gmra.mxu0 %v10305_v1  ;;  %4264 = vmatmul.f32.gmra.mxu1 %v10309_v10  ;;  %v4218_v30 = vadd.f32 %v4217_v33, %v4105_v6  ;;  %v3772_v1 = vadd.f32 %v10284_v28, %v10269_v36  ;;  %v3781_v25 = vadd.f32 %v12481_v46, %v12480_v0  ;;  %v12484_v6 = vld [vmem:[#allocation226_spill] sm:$0xff] }
 0x5e5   : > { %4518 = vst [vmem:[%s10706_s5 + $0x48] sm:$0xff] %v4441_v19  ;;  %4377 = vmatmul.f32.gmra.mxu2 %v10313_v42  ;;  %4490 = vmatmul.f32.gmra.mxu3 %v10317_v37 }
 0x5e6   : > { %v3885_v47 = vadd.f32 %v10299_v48, %v3772_v1  ;;  %v3894_v19 = vadd.f32 %v12483_v18, %v3781_v25 }
 0x5e8   : > { %v4330_v61 = vpop.f32.mrf.mxu2  ;;  %v4443_v23 = vpop.f32.mrf.mxu3  ;;  %v3998_v35 = vadd.f32 %v12467_v54, %v3885_v47  ;;  %v12491_v54 = vld [vmem:[#allocation101_spill] sm:$0xff] }
 0x5e9   : > { %v4331_v55 = vadd.f32 %v4330_v61, %v4218_v30  ;;  %v4107_v44 = vpop.f32.mrf.mxu0  ;;  %v4220_v2 = vpop.f32.mrf.mxu1 }
 0x5ea   : > { %v4108_v56 = vadd.f32 %v4107_v44, %v3995_v26  ;;  %v12486_v26 = vld [vmem:[#allocation133_spill] sm:$0xff] }
 0x5eb   : > { %v4444_v10 = vadd.f32 %v4443_v23, %v4331_v55  ;;  %v4007_v55 = vadd.f32 %v12486_v26, %v3894_v19 }
 0x5ec   : > { %4154 = vmatmul.f32.gmra.mxu0 %v10336_v60  ;;  %4267 = vmatmul.f32.gmra.mxu1 %v10340_v57  ;;  %v4221_v49 = vadd.f32 %v4220_v2, %v4108_v56  ;;  %v12469_v60 = vld [vmem:[#allocation216_spill] sm:$0xff] }
 0x5ed   : > { %4519 = vst [vmem:[%s10706_s5 + $0x50] sm:$0xff] %v4444_v10  ;;  %4380 = vmatmul.f32.gmra.mxu2 %v10344_v29  ;;  %4493 = vmatmul.f32.gmra.mxu3 %v10351_v15  ;;  %v3775_v22 = vadd.f32 %v12469_v60, %v12468_v16  ;;  %v12470_v29 = vld [vmem:[#allocation57_spill] sm:$0xff]  ;;  %v12487_v10 = vld [vmem:[#allocation60_spill] sm:$0xff] }
 0x5ef   : > { %v3888_v48 = vadd.f32 %v10346_v12, %v3775_v22  ;;  %v12474_v12 = vld [vmem:[#allocation100_spill] sm:$0xff]  ;;  %v12494_v22 = vld [vmem:[#allocation102_spill] sm:$0xff] }
 0x5f0   : > { %v4333_v42 = vpop.f32.mrf.mxu2  ;;  %v4446_v37 = vpop.f32.mrf.mxu3 }
 0x5f1   : > { %v4334_v36 = vadd.f32 %v4333_v42, %v4221_v49  ;;  %v4110_v28 = vpop.f32.mrf.mxu0  ;;  %v4223_v45 = vpop.f32.mrf.mxu1  ;;  %v4001_v34 = vadd.f32 %v12471_v24, %v3888_v48  ;;  %v12489_v42 = vld [vmem:[#allocation118_spill] sm:$0xff] }
 0x5f2   : > { %v4111_v51 = vadd.f32 %v4110_v28, %v3998_v35  ;;  %v12493_v28 = vld [vmem:[#allocation119_spill] sm:$0xff] }
 0x5f3   : > { %v4447_v57 = vadd.f32 %v4446_v37, %v4334_v36  ;;  %v12490_v37 = vld [vmem:[#allocation115_spill] sm:$0xff]  ;;  %v12492_v36 = vld [vmem:[#allocation169_spill] sm:$0xff] }
 0x5f4   : > { %4157 = vmatmul.f32.gmra.mxu0 %v10369_v27  ;;  %4270 = vmatmul.f32.gmra.mxu1 %v10373_v14  ;;  %v4224_v15 = vadd.f32 %v4223_v45, %v4111_v51  ;;  %v12473_v27 = vld [vmem:[#allocation56_spill] sm:$0xff] }
 0x5f5   : > { %4520 = vst [vmem:[%s10706_s5 + $0x58] sm:$0xff] %v4447_v57  ;;  %4383 = vmatmul.f32.gmra.mxu2 %v10377_v38  ;;  %4496 = vmatmul.f32.gmra.mxu3 %v12470_v29  ;;  %v3778_v20 = vadd.f32 %v12473_v27, %v12472_v32  ;;  %v12476_v38 = vld [vmem:[#allocation219_spill] sm:$0xff] }
 0x5f7   : > { %v3891_v21 = vadd.f32 %v12476_v38, %v3778_v20  ;;  %v12498_v20 = vld [vmem:[#allocation222_spill] sm:$0xff]  ;;  %v12499_v38 = vld [vmem:[#allocation223_spill] sm:$0xff] }
 0x5f8   : > { %v4336_v59 = vpop.f32.mrf.mxu2  ;;  %v4449_v52 = vpop.f32.mrf.mxu3 }
 0x5f9   : > { %v4337_v62 = vadd.f32 %v4336_v59, %v4224_v15  ;;  %v4113_v13 = vpop.f32.mrf.mxu0  ;;  %v4226_v9 = vpop.f32.mrf.mxu1  ;;  %v4004_v3 = vadd.f32 %v12479_v43, %v3891_v21  ;;  %v12495_v15 = vld [vmem:[#allocation103_spill] sm:$0xff]  ;;  %v12496_v59 = vld [vmem:[#allocation104_spill] sm:$0xff]  ;;  %v12500_v21 = vld [vmem:[#allocation105_spill] sm:$0xff] }
 0x5fa   : > { %v4114_v39 = vadd.f32 %v4113_v13, %v4001_v34 }
 0x5fb   : > { %v4450_v14 = vadd.f32 %v4449_v52, %v4337_v62  ;;  %v3787_v52 = vadd.f32 %v12496_v59, %v12495_v15  ;;  %v12497_v62 = vld [vmem:[#allocation221_spill] sm:$0xff] }
 0x5fc   : > { %4160 = vmatmul.f32.gmra.mxu0 %v12474_v12  ;;  %4273 = vmatmul.f32.gmra.mxu1 %v12475_v58  ;;  %v4227_v31 = vadd.f32 %v4226_v9, %v4114_v39 }
 0x5fd   : > { %4521 = vst [vmem:[%s10706_s5 + $0x60] sm:$0xff] %v4450_v14  ;;  %4386 = vmatmul.f32.gmra.mxu2 %v12477_v7  ;;  %4499 = vmatmul.f32.gmra.mxu3 %v12478_v8  ;;  %v3900_v13 = vadd.f32 %v12497_v62, %v3787_v52  ;;  %v3790_v7 = vadd.f32 %v12500_v21, %v12499_v38 }
 0x5ff   : > { %v4013_v14 = vadd.f32 %v12498_v20, %v3900_v13 }
 0x600   : > { %v4339_v40 = vpop.f32.mrf.mxu2  ;;  %v4452_v63 = vpop.f32.mrf.mxu3 }
 0x601   : > { %v4340_v5 = vadd.f32 %v4339_v40, %v4227_v31  ;;  %v4116_v53 = vpop.f32.mrf.mxu0  ;;  %v4229_v11 = vpop.f32.mrf.mxu1  ;;  %v12501_v40 = vld [vmem:[#allocation106_spill] sm:$0xff] }
 0x602   : > { %v4117_v41 = vadd.f32 %v4116_v53, %v4004_v3 }
 0x603   : > { %v4453_v33 = vadd.f32 %v4452_v63, %v4340_v5  ;;  %v3903_v63 = vadd.f32 %v12501_v40, %v3790_v7 }
 0x604   : > { %4163 = vmatmul.f32.gmra.mxu0 %v10543_v50  ;;  %4276 = vmatmul.f32.gmra.mxu1 %v12482_v17  ;;  %v4230_v30 = vadd.f32 %v4229_v11, %v4117_v41  ;;  %v12488_v50 = vld [vmem:[#allocation46_spill] sm:$0xff] }
 0x605   : > { %4522 = vst [vmem:[%s10706_s5 + $0x68] sm:$0xff] %v4453_v33  ;;  %4389 = vmatmul.f32.gmra.mxu2 %v12484_v6  ;;  %4502 = vmatmul.f32.gmra.mxu3 %v12485_v4  ;;  %v3784_v56 = vadd.f32 %v12488_v50, %v12487_v10 }
 0x607   : > { %v3897_v35 = vadd.f32 %v12491_v54, %v3784_v56 }
 0x608   : > { %v4342_v61 = vpop.f32.mrf.mxu2  ;;  %v4455_v23 = vpop.f32.mrf.mxu3 }
 0x609   : > { %v4343_v44 = vadd.f32 %v4342_v61, %v4230_v30  ;;  %v4119_v2 = vpop.f32.mrf.mxu0  ;;  %v4232_v1 = vpop.f32.mrf.mxu1  ;;  %v4010_v57 = vadd.f32 %v12494_v22, %v3897_v35 }
 0x60a   : > { %v4120_v49 = vadd.f32 %v4119_v2, %v4007_v55 }
 0x60b   : > { %v4456_v47 = vadd.f32 %v4455_v23, %v4343_v44 }
 0x60c   : > { %4166 = vmatmul.f32.gmra.mxu0 %v12489_v42  ;;  %4279 = vmatmul.f32.gmra.mxu1 %v12490_v37  ;;  %v4233_v45 = vadd.f32 %v4232_v1, %v4120_v49 }
 0x60d   : > { %4523 = vst [vmem:[%s10706_s5 + $0x70] sm:$0xff] %v4456_v47  ;;  %4392 = vmatmul.f32.gmra.mxu2 %v12492_v36  ;;  %4505 = vmatmul.f32.gmra.mxu3 %v12493_v28 }
 0x610   : > { %v4345_v16 = vpop.f32.mrf.mxu2  ;;  %v4458_v60 = vpop.f32.mrf.mxu3 }
 0x611   : > { %v4346_v51 = vadd.f32 %v4345_v16, %v4233_v45  ;;  %v4122_v48 = vpop.f32.mrf.mxu0  ;;  %v4235_v29 = vpop.f32.mrf.mxu1 }
 0x612   : > { %v4123_v34 = vadd.f32 %v4122_v48, %v4010_v57 }
 0x613   : > { %v4459_v24 = vadd.f32 %v4458_v60, %v4346_v51 }
 0x614   : > { %v4236_v9 = vadd.f32 %v4235_v29, %v4123_v34 }
 0x615   : > { %4524 = vst [vmem:[%s10706_s5 + $0x78] sm:$0xff] %v4459_v24 }
 0x618   : > { %v4348_v32 = vpop.f32.mrf.mxu2  ;;  %v4461_v27 = vpop.f32.mrf.mxu3 }
 0x619   : > { %v4349_v39 = vadd.f32 %v4348_v32, %v4236_v9  ;;  %v4125_v12 = vpop.f32.mrf.mxu0  ;;  %v4238_v58 = vpop.f32.mrf.mxu1 }
 0x61a   : > { %v4126_v31 = vadd.f32 %v4125_v12, %v4013_v14 }
 0x61b   : > { %v4462_v8 = vadd.f32 %v4461_v27, %v4349_v39 }
 0x61d   : > { %4525 = vst [vmem:[%s10706_s5 + $0x80] sm:$0xff] %v4462_v8 }
 0x61e   : > { %5898 = shalt.err (!%p5895_p10)
}
 0x61f   : > { %s5993_s23 = smov 1024   ;;  %s5994_s28 = smov 64   ;;  %v4239_v43 = vadd.f32 %v4238_v58, %v4126_v31  ;;  %v12502_v53 = vld [vmem:[#allocation107_spill] sm:$0xff]  ;;  %v12503_v33 = vld [vmem:[#allocation108_spill] sm:$0xff]  ;;  %v12504_v41 = vld [vmem:[#allocation58_spill] sm:$0xff] }
 0x620   : > { %5045 = dma.vmem_to_hbm [thread:$0]  (%p6073_p9), %s4838_s11, 32768, %s4840_s6, %s4803_s24, %s5993_s23, %s5993_s23, %s5994_s28   ;;  %v4351_v3 = vpop.f32.mrf.mxu2  ;;  %v4464_v5 = vpop.f32.mrf.mxu3  ;;  %v4016_v11 = vadd.f32 %v12502_v53, %v3903_v63  ;;  %v3793_v17 = vadd.f32 %v12504_v41, %v12503_v33  ;;  %v12505_v6 = vld [vmem:[#allocation224_spill] sm:$0xff]  ;;  %v12507_v10 = vld [vmem:[#allocation109_spill] sm:$0xff]  ;;  %v12508_v50 = vld [vmem:[#allocation59_spill] sm:$0xff] }
 0x621   : > { %v4352_v0 = vadd.f32 %v4351_v3, %v4239_v43  ;;  %v4128_v46 = vpop.f32.mrf.mxu0  ;;  %v4241_v25 = vpop.f32.mrf.mxu1  ;;  %v12506_v26 = vld [vmem:[#allocation88_spill] sm:$0xff]  ;;  %v3796_v56 = vadd.f32 %v12508_v50, %v12507_v10  ;;  %v12509_v42 = vld [vmem:[#allocation110_spill] sm:$0xff]  ;;  %v12512_v51 = vld [vmem:[#allocation69_spill] sm:$0xff]  ;;  %s5036_s21 = sshll.u32 %s5981_s18, 8  ;;  %s4817_s11 = sshll.u32 %s10706_s5, 4  ;;  %s4818_s11 = int_to_ptr.vmem [resolvable:$true] %s4817_s11 }
 0x622   : > { %v4129_v19 = vadd.f32 %v4128_v46, %v4016_v11  ;;  %v3906_v4 = vadd.f32 %v12505_v6, %v3793_v17  ;;  %v12510_v28 = vld [vmem:[#allocation92_spill] sm:$0xff]  ;;  %v12513_v59 = vld [vmem:[#allocation25_spill] sm:$0xff]  ;;  %v12516_v39 = vld [vmem:[#allocation111_spill] sm:$0xff]  ;;  %s4816_s9 = scalar_lea.hbm %s10966_s3, %s5036_s21  ;;  %s4798_s18 = scalar_lea.sflag [#allocation4], %s6116_s29 }
 0x623   : > { %v4465_v18 = vadd.f32 %v4464_v5, %v4352_v0  ;;  %v3909_v37 = vadd.f32 %v12509_v42, %v3796_v56  ;;  %v12511_v57 = vld [vmem:[#allocation172_spill] sm:$0xff]  ;;  %v12514_v13 = vld [vmem:[#allocation113_spill] sm:$0xff]  ;;  %v12518_v63 = vld [vmem:[#allocation114_spill] sm:$0xff]  ;;  %s4819_s13 = sshll.u32 %s4816_s9, 4  ;;  %s5919_s10 = scalar_lea.hbm %s10966_s3, 1024  ;;  %s4820_s13 = int_to_ptr.hbm [resolvable:$true] %s4819_s13 }
 0x624   : > { %v4242_v30 = vadd.f32 %v4241_v25, %v4129_v19  ;;  %v4019_v55 = vadd.f32 %v12506_v26, %v3906_v4  ;;  %v3799_v48 = vadd.f32 %v12512_v51, %v12511_v57  ;;  %v12515_v14 = vld [vmem:[#allocation184_spill] sm:$0xff]  ;;  %v12519_v11 = vld [vmem:[#allocation225_spill] sm:$0xff]  ;;  %s5913_s22 = sshra.s32 %s4820_s13, 4  ;;  %s5914_s22 = int_to_ptr.hbm [resolvable:$true] %s5913_s22 }
 0x625   : > { %4526 = vst [vmem:[%s10706_s5 + $0x88] sm:$0xff] %v4465_v18  ;;  %v4022_v45 = vadd.f32 %v12510_v28, %v3909_v37  ;;  %v3802_v12 = vadd.f32 %v12516_v39, %v12515_v14  ;;  %v12517_v21 = vld [vmem:[#allocation112_spill] sm:$0xff]  ;;  %v12521_v41 = vld [vmem:[#allocation117_spill] sm:$0xff]  ;;  %v12526_v37 = vld [vmem:[#allocation122_spill] sm:$0xff]  ;;  %s5915_s8 = scalar_lea.hbm %s5914_s22, 256  ;;  %p5920_p1 = scmp.lt.s32.totalorder %s5914_s22, %s10966_s3 }
 0x626   : > { %v3912_v52 = vadd.f32 %v12513_v59, %v3799_v48  ;;  %v12520_v0 = vld [vmem:[#allocation64_spill] sm:$0xff]  ;;  %v12522_v4 = vld [vmem:[#allocation173_spill] sm:$0xff]  ;;  %p5916_p12 = scmp.ne.s32.totalorder %s5914_s22, %s5915_s8  ;;  %p5921_p2 = scmp.lt.s32.totalorder %s5919_s10, %s5915_s8 }
 0x627   : > { %v3915_v7 = vadd.f32 %v12517_v21, %v3802_v12  ;;  %v3805_v46 = vadd.f32 %v12520_v0, %v12519_v11  ;;  %v12525_v50 = vld [vmem:[#allocation121_spill] sm:$0xff]  ;;  %v12537_v0 = vld [vmem:[#allocation176_spill] sm:$0xff] }
 0x628   : > { %v4354_v61 = vpop.f32.mrf.mxu2  ;;  %v4467_v23 = vpop.f32.mrf.mxu3  ;;  %v4025_v9 = vadd.f32 %v12514_v13, %v3912_v52  ;;  %v12529_v51 = vld [vmem:[#allocation45_spill] sm:$0xff]  ;;  %v12530_v52 = vld [vmem:[#allocation156_spill] sm:$0xff]  ;;  %p5917_p13 = pnand %p5916_p12, %p6073_p9  ;;  %p5922_p3 = por %p5921_p2, %p5920_p1 }
 0x629   : > { %v4355_v44 = vadd.f32 %v4354_v61, %v4242_v30  ;;  %v4131_v2 = vpop.f32.mrf.mxu0  ;;  %v4244_v1 = vpop.f32.mrf.mxu1  ;;  %v4028_v43 = vadd.f32 %v12518_v63, %v3915_v7  ;;  %v3918_v17 = vadd.f32 %v12521_v41, %v3805_v46  ;;  %v12533_v39 = vld [vmem:[#allocation185_spill] sm:$0xff]  ;;  %v12534_v7 = vld [vmem:[#allocation166_spill] sm:$0xff] }
 0x62a   : > { %v4132_v49 = vadd.f32 %v4131_v2, %v4019_v55  ;;  %v12523_v55 = vld [vmem:[#allocation116_spill] sm:$0xff]  ;;  %p5918_p0 = pneg %p5917_p13 }
 0x62b   : > { %v4468_v47 = vadd.f32 %v4467_v23, %v4355_v44  ;;  %v4031_v30 = vadd.f32 %v12522_v4, %v3918_v17  ;;  %v12524_v44 = vld [vmem:[#allocation120_spill] sm:$0xff]  ;;  %v12538_v17 = vld [vmem:[#allocation54_spill] sm:$0xff] }
 0x62c   : > { %v4245_v54 = vadd.f32 %v4244_v1, %v4132_v49  ;;  %v3808_v2 = vadd.f32 %v12524_v44, %v12523_v55  ;;  %v12541_v44 = vld [vmem:[#allocation159_spill] sm:$0xff]  ;;  %p5923_p4 = pnand %p5922_p3, %p5918_p0 }
 0x62d   : > { %4527 = vst [vmem:[%s10706_s5 + $0x90] sm:$0xff] %v4468_v47 }
 0x62e   : > { %v3921_v56 = vadd.f32 %v12525_v50, %v3808_v2 }
 0x630   : > { %v4357_v35 = vpop.f32.mrf.mxu2  ;;  %v4470_v36 = vpop.f32.mrf.mxu3 }
 0x631   : > { %v4358_v16 = vadd.f32 %v4357_v35, %v4245_v54  ;;  %v4134_v60 = vpop.f32.mrf.mxu0  ;;  %v4247_v22 = vpop.f32.mrf.mxu1  ;;  %v4034_v54 = vadd.f32 %v12526_v37, %v3921_v56  ;;  %v12542_v56 = vld [vmem:[#allocation61_spill] sm:$0xff] }
 0x632   : > { %v4135_v15 = vadd.f32 %v4134_v60, %v4022_v45  ;;  %v12527_v45 = vld [vmem:[#allocation43_spill] sm:$0xff] }
 0x633   : > { %v4471_v29 = vadd.f32 %v4470_v36, %v4358_v16  ;;  %v12528_v16 = vld [vmem:[#allocation44_spill] sm:$0xff] }
 0x634   : > { %v4248_v24 = vadd.f32 %v4247_v22, %v4135_v15  ;;  %v3811_v60 = vadd.f32 %v12528_v16, %v12527_v45  ;;  %v12545_v16 = vld [vmem:[#allocation181_spill] sm:$0xff] }
 0x635   : > { %4528 = vst [vmem:[%s10706_s5 + $0x98] sm:$0xff] %v4471_v29 }
 0x636   : > { %v3924_v48 = vadd.f32 %v12529_v51, %v3811_v60 }
 0x638   : > { %v4360_v34 = vpop.f32.mrf.mxu2  ;;  %v4473_v62 = vpop.f32.mrf.mxu3 }
 0x639   : > { %v4361_v32 = vadd.f32 %v4360_v34, %v4248_v24  ;;  %v4137_v27 = vpop.f32.mrf.mxu0  ;;  %v4250_v20 = vpop.f32.mrf.mxu1  ;;  %v4037_v24 = vadd.f32 %v12530_v52, %v3924_v48  ;;  %v12546_v48 = vld [vmem:[#allocation136_spill] sm:$0xff] }
 0x63a   : > { %v4138_v38 = vadd.f32 %v4137_v27, %v4025_v9  ;;  %v12531_v9 = vld [vmem:[#allocation51_spill] sm:$0xff] }
 0x63b   : > { %v4474_v58 = vadd.f32 %v4473_v62, %v4361_v32  ;;  %v12532_v32 = vld [vmem:[#allocation52_spill] sm:$0xff] }
 0x63c   : > { %v4251_v8 = vadd.f32 %v4250_v20, %v4138_v38  ;;  %v3814_v27 = vadd.f32 %v12532_v32, %v12531_v9 }
 0x63d   : > { %4529 = vst [vmem:[%s10706_s5 + $0xa0] sm:$0xff] %v4474_v58 }
 0x63e   : > { %v3927_v12 = vadd.f32 %v12533_v39, %v3814_v27 }
 0x640   : > { %v4363_v31 = vpop.f32.mrf.mxu2  ;;  %v4476_v40 = vpop.f32.mrf.mxu3 }
 0x641   : > { %v4364_v3 = vadd.f32 %v4363_v31, %v4251_v8  ;;  %v4140_v5 = vpop.f32.mrf.mxu0  ;;  %v4253_v53 = vpop.f32.mrf.mxu1  ;;  %v4040_v8 = vadd.f32 %v12534_v7, %v3927_v12 }
 0x642   : > { %v4141_v33 = vadd.f32 %v4140_v5, %v4028_v43  ;;  %v12535_v43 = vld [vmem:[#allocation167_spill] sm:$0xff] }
 0x643   : > { %v4477_v25 = vadd.f32 %v4476_v40, %v4364_v3  ;;  %v12536_v3 = vld [vmem:[#allocation145_spill] sm:$0xff] }
 0x644   : > { %v4254_v18 = vadd.f32 %v4253_v53, %v4141_v33  ;;  %v3817_v5 = vadd.f32 %v12536_v3, %v12535_v43 }
 0x645   : > { %4530 = vst [vmem:[%s10706_s5 + $0xa8] sm:$0xff] %v4477_v25 }
 0x646   : > { %v3930_v46 = vadd.f32 %v12537_v0, %v3817_v5 }
 0x648   : > { %v4366_v19 = vpop.f32.mrf.mxu2  ;;  %v4479_v6 = vpop.f32.mrf.mxu3 }
 0x649   : > { %v4367_v61 = vadd.f32 %v4366_v19, %v4254_v18  ;;  %v4143_v23 = vpop.f32.mrf.mxu0  ;;  %v4256_v26 = vpop.f32.mrf.mxu1  ;;  %v4043_v18 = vadd.f32 %v12538_v17, %v3930_v46 }
 0x64a   : > { %v4144_v10 = vadd.f32 %v4143_v23, %v4031_v30  ;;  %v12539_v30 = vld [vmem:[#allocation55_spill] sm:$0xff] }
 0x64b   : > { %v4480_v1 = vadd.f32 %v4479_v6, %v4367_v61  ;;  %v12540_v61 = vld [vmem:[#allocation134_spill] sm:$0xff] }
 0x64c   : > { %v4257_v47 = vadd.f32 %v4256_v26, %v4144_v10  ;;  %v3820_v23 = vadd.f32 %v12540_v61, %v12539_v30 }
 0x64d   : > { %4531 = vst [vmem:[%s10706_s5 + $0xb0] sm:$0xff] %v4480_v1 }
 0x64e   : > { %v3933_v2 = vadd.f32 %v12541_v44, %v3820_v23 }
 0x650   : > { %v4369_v49 = vpop.f32.mrf.mxu2  ;;  %v4482_v42 = vpop.f32.mrf.mxu3 }
 0x651   : > { %v4370_v35 = vadd.f32 %v4369_v49, %v4257_v47  ;;  %v4146_v36 = vpop.f32.mrf.mxu0  ;;  %v4259_v28 = vpop.f32.mrf.mxu1  ;;  %v4046_v47 = vadd.f32 %v12542_v56, %v3933_v2 }
 0x652   : > { %v4147_v57 = vadd.f32 %v4146_v36, %v4034_v54  ;;  %v12543_v54 = vld [vmem:[#allocation62_spill] sm:$0xff] }
 0x653   : > { %v4483_v22 = vadd.f32 %v4482_v42, %v4370_v35  ;;  %v12544_v35 = vld [vmem:[#allocation22_spill] sm:$0xff] }
 0x654   : > { %v4260_v29 = vadd.f32 %v4259_v28, %v4147_v57  ;;  %v3823_v36 = vadd.f32 %v12544_v35, %v12543_v54 }
 0x655   : > { %4532 = vst [vmem:[%s10706_s5 + $0xb8] sm:$0xff] %v4483_v22 }
 0x656   : > { %v3936_v60 = vadd.f32 %v12545_v16, %v3823_v36 }
 0x658   : > { %v4372_v15 = vpop.f32.mrf.mxu2  ;;  %v4485_v59 = vpop.f32.mrf.mxu3 }
 0x659   : > { %v4373_v34 = vadd.f32 %v4372_v15, %v4260_v29  ;;  %v4149_v62 = vpop.f32.mrf.mxu0  ;;  %v4262_v13 = vpop.f32.mrf.mxu1  ;;  %v4049_v29 = vadd.f32 %v12546_v48, %v3936_v60 }
 0x65a   : > { %v4150_v14 = vadd.f32 %v4149_v62, %v4037_v24 }
 0x65b   : > { %v4486_v20 = vadd.f32 %v4485_v59, %v4373_v34 }
 0x65c   : > { %v4263_v58 = vadd.f32 %v4262_v13, %v4150_v14  ;;  %v12547_v14 = vld [vmem:[#allocation138_spill] sm:$0xff] }
 0x65d   : > { %4533 = vst [vmem:[%s10706_s5 + $0xc0] sm:$0xff] %v4486_v20 }
 0x660   : > { %v4375_v38 = vpop.f32.mrf.mxu2  ;;  %v4488_v21 = vpop.f32.mrf.mxu3 }
 0x661   : > { %v4376_v31 = vadd.f32 %v4375_v38, %v4263_v58  ;;  %v4152_v40 = vpop.f32.mrf.mxu0  ;;  %v4265_v63 = vpop.f32.mrf.mxu1 }
 0x662   : > { %v4153_v11 = vadd.f32 %v4152_v40, %v4040_v8  ;;  %v12548_v40 = vld [vmem:[#allocation65_spill] sm:$0xff] }
 0x663   : > { %v4489_v53 = vadd.f32 %v4488_v21, %v4376_v31 }
 0x664   : > { %v4266_v25 = vadd.f32 %v4265_v63, %v4153_v11 }
 0x665   : > { %4534 = vst [vmem:[%s10706_s5 + $0xc8] sm:$0xff] %v4489_v53 }
 0x668   : > { %v4378_v33 = vpop.f32.mrf.mxu2  ;;  %v4491_v41 = vpop.f32.mrf.mxu3 }
 0x669   : > { %v4379_v19 = vadd.f32 %v4378_v33, %v4266_v25  ;;  %v4155_v6 = vpop.f32.mrf.mxu0  ;;  %v4268_v4 = vpop.f32.mrf.mxu1 }
 0x66a   : > { %v4156_v55 = vadd.f32 %v4155_v6, %v4043_v18 }
 0x66b   : > { %v4492_v26 = vadd.f32 %v4491_v41, %v4379_v19 }
 0x66c   : > { %v4269_v1 = vadd.f32 %v4268_v4, %v4156_v55 }
 0x66d   : > { %4535 = vst [vmem:[%s10706_s5 + $0xd0] sm:$0xff] %v4492_v26 }
 0x670   : > { %v4381_v10 = vpop.f32.mrf.mxu2  ;;  %v4494_v50 = vpop.f32.mrf.mxu3 }
 0x671   : > { %v4382_v49 = vadd.f32 %v4381_v10, %v4269_v1  ;;  %v4158_v42 = vpop.f32.mrf.mxu0  ;;  %v4271_v37 = vpop.f32.mrf.mxu1 }
 0x672   : > { %v4159_v45 = vadd.f32 %v4158_v42, %v4046_v47 }
 0x673   : > { %v4495_v28 = vadd.f32 %v4494_v50, %v4382_v49 }
 0x674   : > { %v4272_v22 = vadd.f32 %v4271_v37, %v4159_v45 }
 0x675   : > { %4536 = vst [vmem:[%s10706_s5 + $0xd8] sm:$0xff] %v4495_v28 }
 0x678   : > { %v4384_v57 = vpop.f32.mrf.mxu2  ;;  %v4497_v51 = vpop.f32.mrf.mxu3 }
 0x679   : > { %v4385_v15 = vadd.f32 %v4384_v57, %v4272_v22  ;;  %v4161_v59 = vpop.f32.mrf.mxu0  ;;  %v4274_v52 = vpop.f32.mrf.mxu1 }
 0x67a   : > { %v4162_v34 = vadd.f32 %v4161_v59, %v4049_v29 }
 0x67b   : > { %v4498_v24 = vadd.f32 %v4497_v51, %v4385_v15 }
 0x67c   : > { %v4275_v62 = vadd.f32 %v4274_v52, %v4162_v34 }
 0x67d   : > { %4537 = vst [vmem:[%s10706_s5 + $0xe0] sm:$0xff] %v4498_v24 }
 0x680   : > { %v4387_v13 = vpop.f32.mrf.mxu2  ;;  %v4500_v9 = vpop.f32.mrf.mxu3 }
 0x681   : > { %v4388_v32 = vadd.f32 %v4387_v13, %v4275_v62  ;;  %v4164_v27 = vpop.f32.mrf.mxu0  ;;  %v4277_v12 = vpop.f32.mrf.mxu1 }
 0x682   : > { %v4165_v39 = vadd.f32 %v4164_v27, %v12547_v14 }
 0x683   : > { %v4501_v20 = vadd.f32 %v4500_v9, %v4388_v32 }
 0x684   : > { %v4278_v58 = vadd.f32 %v4277_v12, %v4165_v39 }
 0x685   : > { %4538 = vst [vmem:[%s10706_s5 + $0xe8] sm:$0xff] %v4501_v20 }
 0x688   : > { %v4390_v38 = vpop.f32.mrf.mxu2  ;;  %v4503_v21 = vpop.f32.mrf.mxu3 }
 0x689   : > { %v4391_v7 = vadd.f32 %v4390_v38, %v4278_v58  ;;  %v4167_v8 = vpop.f32.mrf.mxu0  ;;  %v4280_v43 = vpop.f32.mrf.mxu1 }
 0x68a   : > { %v4168_v63 = vadd.f32 %v4167_v8, %v12548_v40 }
 0x68b   : > { %v4504_v31 = vadd.f32 %v4503_v21, %v4391_v7 }
 0x68c   : > { %v4281_v3 = vadd.f32 %v4280_v43, %v4168_v63 }
 0x68d   : > { %4539 = vst [vmem:[%s10706_s5 + $0xf0] sm:$0xff] %v4504_v31 }
 0x690   : > { %v4393_v5 = vpop.f32.mrf.mxu2  ;;  %v4506_v11 = vpop.f32.mrf.mxu3 }
 0x691   : > { %v4394_v53 = vadd.f32 %v4393_v5, %v4281_v3 }
 0x693   : > { %v4507_v0 = vadd.f32 %v4506_v11, %v4394_v53 }
 0x695   : > { %4540 = vst [vmem:[%s10706_s5 + $0xf8] sm:$0xff] %v4507_v0 }
 0x696   : > { %5926 = shalt.err (!%p5923_p4)
}
 0x697   : > { %s5995_s29 = smov 128   ;;  %s5996_s5 = smov 8  }
 0x698   : > { %5044 = dma.vmem_to_hbm [thread:$0]  (%p6073_p9), %s4818_s11, 4096, %s4820_s13, %s4798_s18, %s5995_s29, %s5995_s29, %s5996_s5  }
 0x699 PF: > { %p5066_p5 = scmp.ge.s32.totalorder %s5989_s20, 2  ;;  %s4854_s12 = sand.u32 1, %s5969_s15  }
 0x69a   : > { %s4855_s1 = scalar_lea.sflag [#allocation4], %s4854_s12 }
 0x69b   : > { %p5059_p6 = pnand %p5066_p5, %p6080_p11 }
 0x69d   : > { %p5060_p7 = pneg %p5059_p6 }
 0x69f   : > { %5960 = dma.done.wait (%p5060_p7), %s4855_s1, 4096  }
 0x6a0   : > { %5962 = vsyncadd (%p5060_p7), %s4855_s1, 4294963200  ;;  %s4865_s17 = scalar_lea.sflag [#allocation10], %s4854_s12 }
 0x6a1   : > { %5964 = dma.done.wait (%p5060_p7), %s4865_s17, 32768  }
 0x6a2   : > { %5966 = vsyncadd (%p5060_p7), %s4865_s17, 4294934528  ;;  %s27_s20 = sadd.s32 1, %s5989_s20   ;;  %s12550_s27 = sld [smem:[#allocation15_spill]] }
 0x6a3   : > { %p24_p8 = scmp.ge.s32.totalorder %s27_s20, 6   ;;  %s12551_s17 = sld [smem:[#allocation17_spill]] }
 0x6a4   : > { %s12552_s23 = sld [smem:[#allocation16_spill]]  ;;  %s12553_s15 = smov %s5973_s16 }
 0x6a5   : > { %s12555_s18 = smov %s5985_s19 }
 0x6a6   :  { %26 = sbr.rel (!%p24_p8) target bundleno = 12 (0xc), region = 118 }
 0x6a8   : > { %s12554_s16 = smov %s12550_s27 }
 0x6aa   : > { %s12556_s19 = smov %s12552_s23 }
 0x6ab   :  { %4871 = vsyncpa [#allocation3], 1 }
 0x6ac   :  { %4873 = vsyncpa [#allocation3 + $0x1], 1 }
 0x6ad   :  { %4874 = vsyncpa [#allocation6], 1 }
 0x6ae   :  { %4876 = vsyncpa [#allocation6 + $0x1], 1 }
 0x6af   :  { %4877 = vsyncpa [#allocation4], 1 }
 0x6b0   :  { %4879 = vsyncpa [#allocation4 + $0x1], 1 }
 0x6b1   :  { %4880 = vsyncpa [#allocation10], 1 }
 0x6b2   :  { %4882 = vsyncpa [#allocation10 + $0x1], 1 }

</bundles_post_ra>
